<compile_context>
chip_gen: v7x
topology: tpu7x:2x2x1
jax: 0.10.0
libtpu: 0.0.40
codegen_flags: <defaults>
</compile_context>

<pallas_src>
import functools
import math

import jax
import jax.numpy as jnp
from jax import lax
from jax.experimental import pallas as pl
from jax.experimental.pallas import tpu as pltpu

_BN_EPS = 1e-5


# ----------------------------------------------------------------------------
# Fused Pallas kernel: whole residual block for one batch-block
# ----------------------------------------------------------------------------
def _block_kernel(*refs, H, W, Cin, Cout, Ho, Wo, stride, has_proj, bblk):
    if has_proj:
        (x_ref, s1_ref, b1_ref, w1_ref, s2_ref, b2_ref, w2_ref, wsc_ref,
         out_ref, pad1_ref, pad2_ref, col1_ref, col2_ref) = refs
    else:
        (x_ref, s1_ref, b1_ref, w1_ref, s2_ref, b2_ref, w2_ref,
         out_ref, pad1_ref, pad2_ref, col1_ref, col2_ref) = refs
        wsc_ref = None

    bf16 = jnp.bfloat16
    M = bblk * Ho * Wo
    s1 = s1_ref[...]            # (1, Cin) f32
    b1 = b1_ref[...]

    # ---- bn1 (inference affine) + relu1, written bf16 into zero-bordered pad scratch ----
    if stride == 1:
        # x_ref: (bblk, H, W, Cin); pad1_ref: (bblk, H+2, W+2, Cin)
        zr = jnp.zeros((bblk, 1, W + 2, Cin), bf16)
        zc = jnp.zeros((bblk, H, 1, Cin), bf16)
        pad1_ref[:, 0:1, :, :] = zr                      # border only (interior fully
        pad1_ref[:, H + 1:H + 2, :, :] = zr              # overwritten below each step)
        pad1_ref[:, 1:H + 1, 0:1, :] = zc
        pad1_ref[:, 1:H + 1, W + 1:W + 2, :] = zc
        a1 = jnp.maximum(x_ref[...] * s1 + b1, 0.0)      # f32 elementwise
        pad1_ref[:, 1:H + 1, 1:W + 1, :] = a1.astype(bf16)
    else:
        # x_ref: (bblk, 4, Ho, Wo, Cin) -- 2x2 padded-parity phases (see wrapper).
        # pad1_ref: (bblk, 4, Ho+1, Wo+1, Cin); phase (py,px) plane (i,j) holds the
        # zero-padded activation at padded coordinate (2i+py, 2j+px).
        zr = jnp.zeros((bblk, 1, Wo + 1, Cin), bf16)
        zc = jnp.zeros((bblk, Ho, 1, Cin), bf16)
        for ph in range(4):
            py, px = ph // 2, ph % 2
            oy, ox = 1 - py, 1 - px                      # interior offset in this plane
            rz = Ho if py == 1 else 0                    # the single unwritten (pad) row
            cz = Wo if px == 1 else 0                    # the single unwritten (pad) col
            pad1_ref[:, ph, rz:rz + 1, :, :] = zr
            pad1_ref[:, ph, oy:oy + Ho, cz:cz + 1, :] = zc
            a1p = jnp.maximum(x_ref[:, ph, :, :, :] * s1 + b1, 0.0)
            pad1_ref[:, ph, oy:oy + Ho, ox:ox + Wo, :] = a1p.astype(bf16)

    # ---- conv1: 3x3 (stride handled by phase layout), ONE fused-K MXU matmul ----
    for t in range(9):                                   # static tap -> im2col slab copies
        dy, dx = t // 3, t % 3
        if stride == 1:
            patch = pad1_ref[:, dy:dy + Ho, dx:dx + Wo, :]
        else:
            ph = (dy % 2) * 2 + (dx % 2)
            patch = pad1_ref[:, ph, dy // 2:dy // 2 + Ho, dx // 2:dx // 2 + Wo, :]
        col1_ref[:, t * Cin:(t + 1) * Cin] = patch.reshape(M, Cin)
    y1 = jnp.dot(col1_ref[...], w1_ref[...], preferred_element_type=jnp.float32)  # (M, Cout)

    # ---- bn2 + relu2 (dropout = identity in eval / p=0) ----
    a2 = jnp.maximum(y1 * s2_ref[...] + b2_ref[...], 0.0)

    # ---- conv2: 3x3 stride 1, padding 1, ONE fused-K MXU matmul ----
    zr2 = jnp.zeros((bblk, 1, Wo + 2, Cout), bf16)
    zc2 = jnp.zeros((bblk, Ho, 1, Cout), bf16)
    pad2_ref[:, 0:1, :, :] = zr2
    pad2_ref[:, Ho + 1:Ho + 2, :, :] = zr2
    pad2_ref[:, 1:Ho + 1, 0:1, :] = zc2
    pad2_ref[:, 1:Ho + 1, Wo + 1:Wo + 2, :] = zc2
    pad2_ref[:, 1:Ho + 1, 1:Wo + 1, :] = a2.reshape(bblk, Ho, Wo, Cout).astype(bf16)
    for t in range(9):
        dy, dx = t // 3, t % 3
        patch = pad2_ref[:, dy:dy + Ho, dx:dx + Wo, :]
        col2_ref[:, t * Cout:(t + 1) * Cout] = patch.reshape(M, Cout)
    y2 = jnp.dot(col2_ref[...], w2_ref[...], preferred_element_type=jnp.float32)  # (M, Cout)

    # ---- shortcut: identity, or 1x1 (strided) projection in bf16 on the MXU ----
    if stride == 1:
        x_flat = x_ref[...].reshape(M, Cin)
    else:
        # phase (py=1, px=1) plane == x[:, 0::2, 0::2, :], exactly the stride-2 sampling grid
        x_flat = x_ref[:, 3, :, :, :].reshape(M, Cin)
    if has_proj:
        sc = jnp.dot(x_flat.astype(bf16), wsc_ref[...], preferred_element_type=jnp.float32)
    else:
        sc = x_flat                                       # identity (stride 1, Cin == Cout)

    out_ref[...] = (y2 + sc).reshape(bblk, Ho, Wo, Cout)


# ----------------------------------------------------------------------------
# Wrapper
# ----------------------------------------------------------------------------
def _largest_divisor_leq(n, cap):
    cap = max(1, min(n, cap))
    for d in range(cap, 0, -1):
        if n % d == 0:
            return d
    return 1


def basic_block_forward(x_nchw, params, *, stride, has_proj, bblk=None):
    assert stride in (1, 2), "kernel supports stride 1 or 2"
    x = jnp.transpose(x_nchw, (0, 2, 3, 1)).astype(jnp.float32)   # NCHW -> NHWC (lanes = C)
    B, H, W, Cin = x.shape
    Cout = params["w1"].shape[-1]
    if stride == 2:
        assert H % 2 == 0 and W % 2 == 0, "stride-2 phase path assumes even H, W"
    Ho = (H - 1) // stride + 1
    Wo = (W - 1) // stride + 1

    if bblk is None:
        # >= 2 grid steps when possible (megacore / pipeline) with a bounded matmul M.
        cap = B // 2 if B > 1 else 1
        while cap > 1 and cap * Ho * Wo > 4096:
            cap //= 2
        bblk = _largest_divisor_leq(B, max(1, cap))
    assert B % bblk == 0
    M = bblk * Ho * Wo

    if stride == 2:
        # 2x2 phase decomposition by PADDED-coordinate parity (cheap XLA slices); makes
        # every conv1 tap and the strided shortcut a static contiguous in-kernel slice.
        x_in = jnp.stack(
            [x[:, 1::2, 1::2, :],    # phase (py=0, px=0)
             x[:, 1::2, 0::2, :],    # phase (0, 1)
             x[:, 0::2, 1::2, :],    # phase (1, 0)
             x[:, 0::2, 0::2, :]],   # phase (1, 1)  == shortcut sampling grid
            axis=1)                  # (B, 4, Ho, Wo, Cin)
    else:
        x_in = x

    order = ["s1", "b1", "w1", "s2", "b2", "w2"] + (["wsc"] if has_proj else [])
    inputs = [x_in] + [params[k] for k in order]

    def _const_spec(shape):
        nd = len(shape)
        return pl.BlockSpec(shape, lambda g, _nd=nd: (0,) * _nd)

    x_block = (bblk,) + x_in.shape[1:]
    in_specs = [pl.BlockSpec(x_block, lambda g, _nd=len(x_block): (g,) + (0,) * (_nd - 1))]
    in_specs += [_const_spec(tuple(params[k].shape)) for k in order]
    out_specs = pl.BlockSpec((bblk, Ho, Wo, Cout), lambda g: (g, 0, 0, 0))

    if stride == 1:
        pad1_shape = (bblk, H + 2, W + 2, Cin)
    else:
        pad1_shape = (bblk, 4, Ho + 1, Wo + 1, Cin)
    pad2_shape = (bblk, Ho + 2, Wo + 2, Cout)
    scratch = [
        pltpu.VMEM(pad1_shape, jnp.bfloat16),
        pltpu.VMEM(pad2_shape, jnp.bfloat16),
        pltpu.VMEM((M, 9 * Cin), jnp.bfloat16),
        pltpu.VMEM((M, 9 * Cout), jnp.bfloat16),
    ]

    # Explicit VMEM budget (v5e default scoped limit is 16 MiB; v7x physical is 64 MiB).
    param_bytes = sum(int(params[k].size) * params[k].dtype.itemsize for k in order)
    io_bytes = math.prod(x_block) * 4 + M * Cout * 4
    scratch_bytes = 2 * (math.prod(pad1_shape) + math.prod(pad2_shape)
                         + M * 9 * Cin + M * 9 * Cout)
    est = 2 * (io_bytes + param_bytes) + scratch_bytes
    vmem_limit = int(min(max(2 * est + (8 << 20), 32 << 20), 64 << 20))

    kernel = functools.partial(
        _block_kernel, H=H, W=W, Cin=Cin, Cout=Cout, Ho=Ho, Wo=Wo,
        stride=stride, has_proj=has_proj, bblk=bblk)

    out_nhwc = pl.pallas_call(
        kernel,
        out_shape=jax.ShapeDtypeStruct((B, Ho, Wo, Cout), jnp.float32),
        grid=(B // bblk,),
        in_specs=in_specs,
        out_specs=out_specs,
        scratch_shapes=scratch,
        compiler_params=pltpu.CompilerParams(
            dimension_semantics=("parallel",),
            vmem_limit_bytes=vmem_limit),
    )(*inputs)
    return jnp.transpose(out_nhwc, (0, 3, 1, 2))                  # back to NCHW


# ----------------------------------------------------------------------------
# Parameter construction (PyTorch-shaped raw params -> kernel layout)
# ----------------------------------------------------------------------------
def make_raw_params(key, in_planes, out_planes, stride):
    ks = jax.random.split(key, 12)

    def conv_w(k, cout, cin, ksz):
        std = math.sqrt(2.0 / (cin * ksz * ksz))
        return std * jax.random.normal(k, (cout, cin, ksz, ksz), jnp.float32)

    raw = {
        "bn1_g": 0.8 + 0.4 * jax.random.uniform(ks[0], (in_planes,), jnp.float32),
        "bn1_b": 0.1 * jax.random.normal(ks[1], (in_planes,), jnp.float32),
        "bn1_rm": 0.1 * jax.random.normal(ks[2], (in_planes,), jnp.float32),
        "bn1_rv": 0.5 + jax.random.uniform(ks[3], (in_planes,), jnp.float32),
        "conv1_w": conv_w(ks[4], out_planes, in_planes, 3),
        "bn2_g": 0.8 + 0.4 * jax.random.uniform(ks[5], (out_planes,), jnp.float32),
        "bn2_b": 0.1 * jax.random.normal(ks[6], (out_planes,), jnp.float32),
        "bn2_rm": 0.1 * jax.random.normal(ks[7], (out_planes,), jnp.float32),
        "bn2_rv": 0.5 + jax.random.uniform(ks[8], (out_planes,), jnp.float32),
        "conv2_w": conv_w(ks[9], out_planes, out_planes, 3),
    }
    if stride != 1 or in_planes != out_planes:
        raw["sc_w"] = conv_w(ks[10], out_planes, in_planes, 1)
    return raw


def prepare_kernel_params(raw):
    def fold_bn(g, b, rm, rv):
        scale = g * lax.rsqrt(rv + _BN_EPS)
        shift = b - rm * scale
        return scale.reshape(1, -1), shift.reshape(1, -1)

    def conv3_to_mat(w):   # (Cout, Cin, 3, 3) -> (9*Cin, Cout) bf16, tap-major rows
        cout, cin = w.shape[0], w.shape[1]
        return jnp.transpose(w, (2, 3, 1, 0)).reshape(9 * cin, cout).astype(jnp.bfloat16)

    s1, b1 = fold_bn(raw["bn1_g"], raw["bn1_b"], raw["bn1_rm"], raw["bn1_rv"])
    s2, b2 = fold_bn(raw["bn2_g"], raw["bn2_b"], raw["bn2_rm"], raw["bn2_rv"])
    p = {"s1": s1, "b1": b1, "w1": conv3_to_mat(raw["conv1_w"]),
         "s2": s2, "b2": b2, "w2": conv3_to_mat(raw["conv2_w"])}
    if "sc_w" in raw:
        p["wsc"] = jnp.transpose(raw["sc_w"][:, :, 0, 0], (1, 0)).astype(jnp.bfloat16)
    return p


# ----------------------------------------------------------------------------
# Pure-JAX reference (mirrors the PyTorch forward, eval mode)
# ----------------------------------------------------------------------------
def reference_block(x_nchw, raw, stride):
    def bn(v, g, b, rm, rv):
        s = (1, -1, 1, 1)
        return (v - rm.reshape(s)) * lax.rsqrt(rv.reshape(s) + _BN_EPS) * g.reshape(s) + b.reshape(s)

    dn = ("NCHW", "OIHW", "NCHW")
    a1 = jnp.maximum(bn(x_nchw, raw["bn1_g"], raw["bn1_b"], raw["bn1_rm"], raw["bn1_rv"]), 0.0)
    y1 = lax.conv_general_dilated(a1, raw["conv1_w"], (stride, stride), ((1, 1), (1, 1)),
                                  dimension_numbers=dn)
    a2 = jnp.maximum(bn(y1, raw["bn2_g"], raw["bn2_b"], raw["bn2_rm"], raw["bn2_rv"]), 0.0)
    y2 = lax.conv_general_dilated(a2, raw["conv2_w"], (1, 1), ((1, 1), (1, 1)),
                                  dimension_numbers=dn)
    if "sc_w" in raw:
        sc = lax.conv_general_dilated(x_nchw, raw["sc_w"], (stride, stride), ((0, 0), (0, 0)),
                                      dimension_numbers=dn)
    else:
        sc = x_nchw
    return y2 + sc


# ----------------------------------------------------------------------------
if __name__ == "__main__":
    key = jax.random.PRNGKey(0)

    def run_case(case_key, B, in_planes, out_planes, H, W, stride):
        kx, kw = jax.random.split(case_key)
        x = jax.random.normal(kx, (B, in_planes, H, W), jnp.float32)
        raw = make_raw_params(kw, in_planes, out_planes, stride)
        has_proj = (stride != 1) or (in_planes != out_planes)
        params = prepare_kernel_params(raw)

        out = basic_block_forward(x, params, stride=stride, has_proj=has_proj)
        out = jax.block_until_ready(out)

        ref = reference_block(x, raw, stride)
        assert out.shape == ref.shape, (out.shape, ref.shape)
        err = float(jnp.max(jnp.abs(out - ref)))
        denom = max(float(jnp.max(jnp.abs(ref))), 1e-6)
        rel = err / denom
        assert rel < 4e-2, f"relative max error {rel:.4g} (abs {err:.4g}, ref max {denom:.4g})"

    # downsampling block: stride 2, 64 -> 128 channels, 1x1 projection shortcut
    run_case(jax.random.fold_in(key, 1), B=4, in_planes=64, out_planes=128, H=16, W=16, stride=2)
    # identity-shortcut block: stride 1, 64 -> 64 channels
    run_case(jax.random.fold_in(key, 2), B=2, in_planes=64, out_planes=64, H=8, W=8, stride=1)
    # stride-1 projection block: 32 -> 64 channels
    run_case(jax.random.fold_in(key, 3), B=2, in_planes=32, out_planes=64, H=8, W=8, stride=1)

    print("KERNEL_OK")
</pallas_src>

<mosaic_0001>
module attributes {stable_mosaic.version = 11 : i64} {
  func.func @_block_kernel(%arg0: i32, %arg1: memref<2x4x8x8x64xf32, #tpu.memory_space<vmem>>, %arg2: memref<1x64xf32, #tpu.memory_space<vmem>>, %arg3: memref<1x64xf32, #tpu.memory_space<vmem>>, %arg4: memref<576x128xbf16, #tpu.memory_space<vmem>>, %arg5: memref<1x128xf32, #tpu.memory_space<vmem>>, %arg6: memref<1x128xf32, #tpu.memory_space<vmem>>, %arg7: memref<1152x128xbf16, #tpu.memory_space<vmem>>, %arg8: memref<64x128xbf16, #tpu.memory_space<vmem>>, %arg9: memref<2x8x8x128xf32, #tpu.memory_space<vmem>>, %arg10: memref<2x4x9x9x64xbf16, #tpu.memory_space<vmem>>, %arg11: memref<2x10x10x128xbf16, #tpu.memory_space<vmem>>, %arg12: memref<128x576xbf16, #tpu.memory_space<vmem>>, %arg13: memref<128x1152xbf16, #tpu.memory_space<vmem>>) attributes {dimension_semantics = [#tpu.dimension_semantics<parallel>], iteration_bounds = array<i64: 2>, scalar_prefetch = 0 : i64, scratch_operands = 4 : i64, tpu.core_type = #tpu.core_type<tc>, window_params = [{transform_indices = @transform_0, window_bounds = array<i64: 2, 4, 8, 8, 64>}, {pipeline_mode = #tpu.pipeline_mode<synchronous>, transform_indices = @transform_1, window_bounds = array<i64: 1, 64>}, {pipeline_mode = #tpu.pipeline_mode<synchronous>, transform_indices = @transform_2, window_bounds = array<i64: 1, 64>}, {pipeline_mode = #tpu.pipeline_mode<synchronous>, transform_indices = @transform_3, window_bounds = array<i64: 576, 128>}, {pipeline_mode = #tpu.pipeline_mode<synchronous>, transform_indices = @transform_4, window_bounds = array<i64: 1, 128>}, {pipeline_mode = #tpu.pipeline_mode<synchronous>, transform_indices = @transform_5, window_bounds = array<i64: 1, 128>}, {pipeline_mode = #tpu.pipeline_mode<synchronous>, transform_indices = @transform_6, window_bounds = array<i64: 1152, 128>}, {pipeline_mode = #tpu.pipeline_mode<synchronous>, transform_indices = @transform_7, window_bounds = array<i64: 64, 128>}, {transform_indices = @transform_8, window_bounds = array<i64: 2, 8, 8, 128>}]} {
    %c0 = arith.constant 0 : index
    %c0_0 = arith.constant 0 : index
    %0 = vector.load %arg2[%c0, %c0_0] : memref<1x64xf32, #tpu.memory_space<vmem>>, vector<1x64xf32>
    %c0_1 = arith.constant 0 : index
    %c0_2 = arith.constant 0 : index
    %1 = vector.load %arg3[%c0_1, %c0_2] : memref<1x64xf32, #tpu.memory_space<vmem>>, vector<1x64xf32>
    %cst = arith.constant 0.000000e+00 : bf16
    %2 = vector.broadcast %cst : bf16 to vector<2x1x9x64xbf16>
    %cst_3 = arith.constant 0.000000e+00 : bf16
    %3 = vector.broadcast %cst_3 : bf16 to vector<2x8x1x64xbf16>
    %c0_4 = arith.constant 0 : index
    %c0_5 = arith.constant 0 : index
    %c0_6 = arith.constant 0 : index
    %c0_7 = arith.constant 0 : index
    %c0_8 = arith.constant 0 : index
    %4 = vector.load %arg10[%c0_4, %c0_5, %c0_6, %c0_7, %c0_8] : memref<2x4x9x9x64xbf16, #tpu.memory_space<vmem>>, vector<2x1x1x9x64xbf16>
    %5 = vector.shape_cast %4 : vector<2x1x1x9x64xbf16> to vector<2x1x9x64xbf16>
    %6 = vector.shape_cast %2 : vector<2x1x9x64xbf16> to vector<2x1x1x9x64xbf16>
    tpu.vector_store %arg10[%c0_4, %c0_5, %c0_6, %c0_7, %c0_8], %6 {strides = array<i32>} : memref<2x4x9x9x64xbf16, #tpu.memory_space<vmem>>, vector<2x1x1x9x64xbf16>,
    %c0_9 = arith.constant 0 : index
    %c0_10 = arith.constant 0 : index
    %c1 = arith.constant 1 : index
    %c0_11 = arith.constant 0 : index
    %c0_12 = arith.constant 0 : index
    %7 = vector.load %arg10[%c0_9, %c0_10, %c1, %c0_11, %c0_12] : memref<2x4x9x9x64xbf16, #tpu.memory_space<vmem>>, vector<2x1x8x1x64xbf16>
    %8 = vector.shape_cast %7 : vector<2x1x8x1x64xbf16> to vector<2x8x1x64xbf16>
    %9 = vector.shape_cast %3 : vector<2x8x1x64xbf16> to vector<2x1x8x1x64xbf16>
    tpu.vector_store %arg10[%c0_9, %c0_10, %c1, %c0_11, %c0_12], %9 {strides = array<i32>} : memref<2x4x9x9x64xbf16, #tpu.memory_space<vmem>>, vector<2x1x8x1x64xbf16>,
    %c0_13 = arith.constant 0 : index
    %c0_14 = arith.constant 0 : index
    %c0_15 = arith.constant 0 : index
    %c0_16 = arith.constant 0 : index
    %c0_17 = arith.constant 0 : index
    %10 = vector.load %arg1[%c0_13, %c0_14, %c0_15, %c0_16, %c0_17] : memref<2x4x8x8x64xf32, #tpu.memory_space<vmem>>, vector<2x1x8x8x64xf32>
    %11 = vector.shape_cast %10 : vector<2x1x8x8x64xf32> to vector<2x8x8x64xf32>
    %12 = vector.shape_cast %0 : vector<1x64xf32> to vector<1x1x1x64xf32>
    %13 = vector.broadcast %12 : vector<1x1x1x64xf32> to vector<2x8x8x64xf32>
    %14 = arith.mulf %11, %13 : vector<2x8x8x64xf32>
    %15 = vector.shape_cast %1 : vector<1x64xf32> to vector<1x1x1x64xf32>
    %16 = vector.broadcast %15 : vector<1x1x1x64xf32> to vector<2x8x8x64xf32>
    %17 = arith.addf %14, %16 : vector<2x8x8x64xf32>
    %cst_18 = arith.constant 0.000000e+00 : f32
    %18 = vector.broadcast %cst_18 : f32 to vector<2x8x8x64xf32>
    %19 = arith.maximumf %17, %18 : vector<2x8x8x64xf32>
    %20 = arith.truncf %19 : vector<2x8x8x64xf32> to vector<2x8x8x64xbf16>
    %c0_19 = arith.constant 0 : index
    %c0_20 = arith.constant 0 : index
    %c1_21 = arith.constant 1 : index
    %c1_22 = arith.constant 1 : index
    %c0_23 = arith.constant 0 : index
    %21 = vector.load %arg10[%c0_19, %c0_20, %c1_21, %c1_22, %c0_23] : memref<2x4x9x9x64xbf16, #tpu.memory_space<vmem>>, vector<2x1x8x8x64xbf16>
    %22 = vector.shape_cast %21 : vector<2x1x8x8x64xbf16> to vector<2x8x8x64xbf16>
    %23 = vector.shape_cast %20 : vector<2x8x8x64xbf16> to vector<2x1x8x8x64xbf16>
    tpu.vector_store %arg10[%c0_19, %c0_20, %c1_21, %c1_22, %c0_23], %23 {strides = array<i32>} : memref<2x4x9x9x64xbf16, #tpu.memory_space<vmem>>, vector<2x1x8x8x64xbf16>,
    %c0_24 = arith.constant 0 : index
    %c1_25 = arith.constant 1 : index
    %c0_26 = arith.constant 0 : index
    %c0_27 = arith.constant 0 : index
    %c0_28 = arith.constant 0 : index
    %24 = vector.load %arg10[%c0_24, %c1_25, %c0_26, %c0_27, %c0_28] : memref<2x4x9x9x64xbf16, #tpu.memory_space<vmem>>, vector<2x1x1x9x64xbf16>
    %25 = vector.shape_cast %24 : vector<2x1x1x9x64xbf16> to vector<2x1x9x64xbf16>
    %26 = vector.shape_cast %2 : vector<2x1x9x64xbf16> to vector<2x1x1x9x64xbf16>
    tpu.vector_store %arg10[%c0_24, %c1_25, %c0_26, %c0_27, %c0_28], %26 {strides = array<i32>} : memref<2x4x9x9x64xbf16, #tpu.memory_space<vmem>>, vector<2x1x1x9x64xbf16>,
    %c0_29 = arith.constant 0 : index
    %c1_30 = arith.constant 1 : index
    %c1_31 = arith.constant 1 : index
    %c8 = arith.constant 8 : index
    %c0_32 = arith.constant 0 : index
    %27 = vector.load %arg10[%c0_29, %c1_30, %c1_31, %c8, %c0_32] : memref<2x4x9x9x64xbf16, #tpu.memory_space<vmem>>, vector<2x1x8x1x64xbf16>
    %28 = vector.shape_cast %27 : vector<2x1x8x1x64xbf16> to vector<2x8x1x64xbf16>
    %29 = vector.shape_cast %3 : vector<2x8x1x64xbf16> to vector<2x1x8x1x64xbf16>
    tpu.vector_store %arg10[%c0_29, %c1_30, %c1_31, %c8, %c0_32], %29 {strides = array<i32>} : memref<2x4x9x9x64xbf16, #tpu.memory_space<vmem>>, vector<2x1x8x1x64xbf16>,
    %c0_33 = arith.constant 0 : index
    %c1_34 = arith.constant 1 : index
    %c0_35 = arith.constant 0 : index
    %c0_36 = arith.constant 0 : index
    %c0_37 = arith.constant 0 : index
    %30 = vector.load %arg1[%c0_33, %c1_34, %c0_35, %c0_36, %c0_37] : memref<2x4x8x8x64xf32, #tpu.memory_space<vmem>>, vector<2x1x8x8x64xf32>
    %31 = vector.shape_cast %30 : vector<2x1x8x8x64xf32> to vector<2x8x8x64xf32>
    %32 = vector.shape_cast %0 : vector<1x64xf32> to vector<1x1x1x64xf32>
    %33 = vector.broadcast %32 : vector<1x1x1x64xf32> to vector<2x8x8x64xf32>
    %34 = arith.mulf %31, %33 : vector<2x8x8x64xf32>
    %35 = vector.shape_cast %1 : vector<1x64xf32> to vector<1x1x1x64xf32>
    %36 = vector.broadcast %35 : vector<1x1x1x64xf32> to vector<2x8x8x64xf32>
    %37 = arith.addf %34, %36 : vector<2x8x8x64xf32>
    %cst_38 = arith.constant 0.000000e+00 : f32
    %38 = vector.broadcast %cst_38 : f32 to vector<2x8x8x64xf32>
    %39 = arith.maximumf %37, %38 : vector<2x8x8x64xf32>
    %40 = arith.truncf %39 : vector<2x8x8x64xf32> to vector<2x8x8x64xbf16>
    %c0_39 = arith.constant 0 : index
    %c1_40 = arith.constant 1 : index
    %c1_41 = arith.constant 1 : index
    %c0_42 = arith.constant 0 : index
    %c0_43 = arith.constant 0 : index
    %41 = vector.load %arg10[%c0_39, %c1_40, %c1_41, %c0_42, %c0_43] : memref<2x4x9x9x64xbf16, #tpu.memory_space<vmem>>, vector<2x1x8x8x64xbf16>
    %42 = vector.shape_cast %41 : vector<2x1x8x8x64xbf16> to vector<2x8x8x64xbf16>
    %43 = vector.shape_cast %40 : vector<2x8x8x64xbf16> to vector<2x1x8x8x64xbf16>
    tpu.vector_store %arg10[%c0_39, %c1_40, %c1_41, %c0_42, %c0_43], %43 {strides = array<i32>} : memref<2x4x9x9x64xbf16, #tpu.memory_space<vmem>>, vector<2x1x8x8x64xbf16>,
    %c0_44 = arith.constant 0 : index
    %c2 = arith.constant 2 : index
    %c8_45 = arith.constant 8 : index
    %c0_46 = arith.constant 0 : index
    %c0_47 = arith.constant 0 : index
    %44 = vector.load %arg10[%c0_44, %c2, %c8_45, %c0_46, %c0_47] : memref<2x4x9x9x64xbf16, #tpu.memory_space<vmem>>, vector<2x1x1x9x64xbf16>
    %45 = vector.shape_cast %44 : vector<2x1x1x9x64xbf16> to vector<2x1x9x64xbf16>
    %46 = vector.shape_cast %2 : vector<2x1x9x64xbf16> to vector<2x1x1x9x64xbf16>
    tpu.vector_store %arg10[%c0_44, %c2, %c8_45, %c0_46, %c0_47], %46 {strides = array<i32>} : memref<2x4x9x9x64xbf16, #tpu.memory_space<vmem>>, vector<2x1x1x9x64xbf16>,
    %c0_48 = arith.constant 0 : index
    %c2_49 = arith.constant 2 : index
    %c0_50 = arith.constant 0 : index
    %c0_51 = arith.constant 0 : index
    %c0_52 = arith.constant 0 : index
    %47 = vector.load %arg10[%c0_48, %c2_49, %c0_50, %c0_51, %c0_52] : memref<2x4x9x9x64xbf16, #tpu.memory_space<vmem>>, vector<2x1x8x1x64xbf16>
    %48 = vector.shape_cast %47 : vector<2x1x8x1x64xbf16> to vector<2x8x1x64xbf16>
    %49 = vector.shape_cast %3 : vector<2x8x1x64xbf16> to vector<2x1x8x1x64xbf16>
    tpu.vector_store %arg10[%c0_48, %c2_49, %c0_50, %c0_51, %c0_52], %49 {strides = array<i32>} : memref<2x4x9x9x64xbf16, #tpu.memory_space<vmem>>, vector<2x1x8x1x64xbf16>,
    %c0_53 = arith.constant 0 : index
    %c2_54 = arith.constant 2 : index
    %c0_55 = arith.constant 0 : index
    %c0_56 = arith.constant 0 : index
    %c0_57 = arith.constant 0 : index
    %50 = vector.load %arg1[%c0_53, %c2_54, %c0_55, %c0_56, %c0_57] : memref<2x4x8x8x64xf32, #tpu.memory_space<vmem>>, vector<2x1x8x8x64xf32>
    %51 = vector.shape_cast %50 : vector<2x1x8x8x64xf32> to vector<2x8x8x64xf32>
    %52 = vector.shape_cast %0 : vector<1x64xf32> to vector<1x1x1x64xf32>
    %53 = vector.broadcast %52 : vector<1x1x1x64xf32> to vector<2x8x8x64xf32>
    %54 = arith.mulf %51, %53 : vector<2x8x8x64xf32>
    %55 = vector.shape_cast %1 : vector<1x64xf32> to vector<1x1x1x64xf32>
    %56 = vector.broadcast %55 : vector<1x1x1x64xf32> to vector<2x8x8x64xf32>
    %57 = arith.addf %54, %56 : vector<2x8x8x64xf32>
    %cst_58 = arith.constant 0.000000e+00 : f32
    %58 = vector.broadcast %cst_58 : f32 to vector<2x8x8x64xf32>
    %59 = arith.maximumf %57, %58 : vector<2x8x8x64xf32>
    %60 = arith.truncf %59 : vector<2x8x8x64xf32> to vector<2x8x8x64xbf16>
    %c0_59 = arith.constant 0 : index
    %c2_60 = arith.constant 2 : index
    %c0_61 = arith.constant 0 : index
    %c1_62 = arith.constant 1 : index
    %c0_63 = arith.constant 0 : index
    %61 = vector.load %arg10[%c0_59, %c2_60, %c0_61, %c1_62, %c0_63] : memref<2x4x9x9x64xbf16, #tpu.memory_space<vmem>>, vector<2x1x8x8x64xbf16>
    %62 = vector.shape_cast %61 : vector<2x1x8x8x64xbf16> to vector<2x8x8x64xbf16>
    %63 = vector.shape_cast %60 : vector<2x8x8x64xbf16> to vector<2x1x8x8x64xbf16>
    tpu.vector_store %arg10[%c0_59, %c2_60, %c0_61, %c1_62, %c0_63], %63 {strides = array<i32>} : memref<2x4x9x9x64xbf16, #tpu.memory_space<vmem>>, vector<2x1x8x8x64xbf16>,
    %c0_64 = arith.constant 0 : index
    %c3 = arith.constant 3 : index
    %c8_65 = arith.constant 8 : index
    %c0_66 = arith.constant 0 : index
    %c0_67 = arith.constant 0 : index
    %64 = vector.load %arg10[%c0_64, %c3, %c8_65, %c0_66, %c0_67] : memref<2x4x9x9x64xbf16, #tpu.memory_space<vmem>>, vector<2x1x1x9x64xbf16>
    %65 = vector.shape_cast %64 : vector<2x1x1x9x64xbf16> to vector<2x1x9x64xbf16>
    %66 = vector.shape_cast %2 : vector<2x1x9x64xbf16> to vector<2x1x1x9x64xbf16>
    tpu.vector_store %arg10[%c0_64, %c3, %c8_65, %c0_66, %c0_67], %66 {strides = array<i32>} : memref<2x4x9x9x64xbf16, #tpu.memory_space<vmem>>, vector<2x1x1x9x64xbf16>,
    %c0_68 = arith.constant 0 : index
    %c3_69 = arith.constant 3 : index
    %c0_70 = arith.constant 0 : index
    %c8_71 = arith.constant 8 : index
    %c0_72 = arith.constant 0 : index
    %67 = vector.load %arg10[%c0_68, %c3_69, %c0_70, %c8_71, %c0_72] : memref<2x4x9x9x64xbf16, #tpu.memory_space<vmem>>, vector<2x1x8x1x64xbf16>
    %68 = vector.shape_cast %67 : vector<2x1x8x1x64xbf16> to vector<2x8x1x64xbf16>
    %69 = vector.shape_cast %3 : vector<2x8x1x64xbf16> to vector<2x1x8x1x64xbf16>
    tpu.vector_store %arg10[%c0_68, %c3_69, %c0_70, %c8_71, %c0_72], %69 {strides = array<i32>} : memref<2x4x9x9x64xbf16, #tpu.memory_space<vmem>>, vector<2x1x8x1x64xbf16>,
    %c0_73 = arith.constant 0 : index
    %c3_74 = arith.constant 3 : index
    %c0_75 = arith.constant 0 : index
    %c0_76 = arith.constant 0 : index
    %c0_77 = arith.constant 0 : index
    %70 = vector.load %arg1[%c0_73, %c3_74, %c0_75, %c0_76, %c0_77] : memref<2x4x8x8x64xf32, #tpu.memory_space<vmem>>, vector<2x1x8x8x64xf32>
    %71 = vector.shape_cast %70 : vector<2x1x8x8x64xf32> to vector<2x8x8x64xf32>
    %72 = vector.shape_cast %0 : vector<1x64xf32> to vector<1x1x1x64xf32>
    %73 = vector.broadcast %72 : vector<1x1x1x64xf32> to vector<2x8x8x64xf32>
    %74 = arith.mulf %71, %73 : vector<2x8x8x64xf32>
    %75 = vector.shape_cast %1 : vector<1x64xf32> to vector<1x1x1x64xf32>
    %76 = vector.broadcast %75 : vector<1x1x1x64xf32> to vector<2x8x8x64xf32>
    %77 = arith.addf %74, %76 : vector<2x8x8x64xf32>
    %cst_78 = arith.constant 0.000000e+00 : f32
    %78 = vector.broadcast %cst_78 : f32 to vector<2x8x8x64xf32>
    %79 = arith.maximumf %77, %78 : vector<2x8x8x64xf32>
    %80 = arith.truncf %79 : vector<2x8x8x64xf32> to vector<2x8x8x64xbf16>
    %c0_79 = arith.constant 0 : index
    %c3_80 = arith.constant 3 : index
    %c0_81 = arith.constant 0 : index
    %c0_82 = arith.constant 0 : index
    %c0_83 = arith.constant 0 : index
    %81 = vector.load %arg10[%c0_79, %c3_80, %c0_81, %c0_82, %c0_83] : memref<2x4x9x9x64xbf16, #tpu.memory_space<vmem>>, vector<2x1x8x8x64xbf16>
    %82 = vector.shape_cast %81 : vector<2x1x8x8x64xbf16> to vector<2x8x8x64xbf16>
    %83 = vector.shape_cast %80 : vector<2x8x8x64xbf16> to vector<2x1x8x8x64xbf16>
    tpu.vector_store %arg10[%c0_79, %c3_80, %c0_81, %c0_82, %c0_83], %83 {strides = array<i32>} : memref<2x4x9x9x64xbf16, #tpu.memory_space<vmem>>, vector<2x1x8x8x64xbf16>,
    %c0_84 = arith.constant 0 : index
    %c0_85 = arith.constant 0 : index
    %c0_86 = arith.constant 0 : index
    %c0_87 = arith.constant 0 : index
    %c0_88 = arith.constant 0 : index
    %84 = vector.load %arg10[%c0_84, %c0_85, %c0_86, %c0_87, %c0_88] : memref<2x4x9x9x64xbf16, #tpu.memory_space<vmem>>, vector<2x1x8x8x64xbf16>
    %85 = vector.shape_cast %84 : vector<2x1x8x8x64xbf16> to vector<2x8x8x64xbf16>
    %86 = vector.shape_cast %85 : vector<2x8x8x64xbf16> to vector<128x64xbf16>
    %c0_89 = arith.constant 0 : index
    %c0_90 = arith.constant 0 : index
    %87 = vector.load %arg12[%c0_89, %c0_90] : memref<128x576xbf16, #tpu.memory_space<vmem>>, vector<128x64xbf16>
    tpu.vector_store %arg12[%c0_89, %c0_90], %86 {strides = array<i32>} : memref<128x576xbf16, #tpu.memory_space<vmem>>, vector<128x64xbf16>,
    %c0_91 = arith.constant 0 : index
    %c1_92 = arith.constant 1 : index
    %c0_93 = arith.constant 0 : index
    %c0_94 = arith.constant 0 : index
    %c0_95 = arith.constant 0 : index
    %88 = vector.load %arg10[%c0_91, %c1_92, %c0_93, %c0_94, %c0_95] : memref<2x4x9x9x64xbf16, #tpu.memory_space<vmem>>, vector<2x1x8x8x64xbf16>
    %89 = vector.shape_cast %88 : vector<2x1x8x8x64xbf16> to vector<2x8x8x64xbf16>
    %90 = vector.shape_cast %89 : vector<2x8x8x64xbf16> to vector<128x64xbf16>
    %c0_96 = arith.constant 0 : index
    %c64 = arith.constant 64 : index
    %91 = vector.load %arg12[%c0_96, %c64] : memref<128x576xbf16, #tpu.memory_space<vmem>>, vector<128x64xbf16>
    tpu.vector_store %arg12[%c0_96, %c64], %90 {strides = array<i32>} : memref<128x576xbf16, #tpu.memory_space<vmem>>, vector<128x64xbf16>,
    %c0_97 = arith.constant 0 : index
    %c0_98 = arith.constant 0 : index
    %c0_99 = arith.constant 0 : index
    %c1_100 = arith.constant 1 : index
    %c0_101 = arith.constant 0 : index
    %92 = vector.load %arg10[%c0_97, %c0_98, %c0_99, %c1_100, %c0_101] : memref<2x4x9x9x64xbf16, #tpu.memory_space<vmem>>, vector<2x1x8x8x64xbf16>
    %93 = vector.shape_cast %92 : vector<2x1x8x8x64xbf16> to vector<2x8x8x64xbf16>
    %94 = vector.shape_cast %93 : vector<2x8x8x64xbf16> to vector<128x64xbf16>
    %c0_102 = arith.constant 0 : index
    %c128 = arith.constant 128 : index
    %95 = vector.load %arg12[%c0_102, %c128] : memref<128x576xbf16, #tpu.memory_space<vmem>>, vector<128x64xbf16>
    tpu.vector_store %arg12[%c0_102, %c128], %94 {strides = array<i32>} : memref<128x576xbf16, #tpu.memory_space<vmem>>, vector<128x64xbf16>,
    %c0_103 = arith.constant 0 : index
    %c2_104 = arith.constant 2 : index
    %c0_105 = arith.constant 0 : index
    %c0_106 = arith.constant 0 : index
    %c0_107 = arith.constant 0 : index
    %96 = vector.load %arg10[%c0_103, %c2_104, %c0_105, %c0_106, %c0_107] : memref<2x4x9x9x64xbf16, #tpu.memory_space<vmem>>, vector<2x1x8x8x64xbf16>
    %97 = vector.shape_cast %96 : vector<2x1x8x8x64xbf16> to vector<2x8x8x64xbf16>
    %98 = vector.shape_cast %97 : vector<2x8x8x64xbf16> to vector<128x64xbf16>
    %c0_108 = arith.constant 0 : index
    %c192 = arith.constant 192 : index
    %99 = vector.load %arg12[%c0_108, %c192] : memref<128x576xbf16, #tpu.memory_space<vmem>>, vector<128x64xbf16>
    tpu.vector_store %arg12[%c0_108, %c192], %98 {strides = array<i32>} : memref<128x576xbf16, #tpu.memory_space<vmem>>, vector<128x64xbf16>,
    %c0_109 = arith.constant 0 : index
    %c3_110 = arith.constant 3 : index
    %c0_111 = arith.constant 0 : index
    %c0_112 = arith.constant 0 : index
    %c0_113 = arith.constant 0 : index
    %100 = vector.load %arg10[%c0_109, %c3_110, %c0_111, %c0_112, %c0_113] : memref<2x4x9x9x64xbf16, #tpu.memory_space<vmem>>, vector<2x1x8x8x64xbf16>
    %101 = vector.shape_cast %100 : vector<2x1x8x8x64xbf16> to vector<2x8x8x64xbf16>
    %102 = vector.shape_cast %101 : vector<2x8x8x64xbf16> to vector<128x64xbf16>
    %c0_114 = arith.constant 0 : index
    %c256 = arith.constant 256 : index
    %103 = vector.load %arg12[%c0_114, %c256] : memref<128x576xbf16, #tpu.memory_space<vmem>>, vector<128x64xbf16>
    tpu.vector_store %arg12[%c0_114, %c256], %102 {strides = array<i32>} : memref<128x576xbf16, #tpu.memory_space<vmem>>, vector<128x64xbf16>,
    %c0_115 = arith.constant 0 : index
    %c2_116 = arith.constant 2 : index
    %c0_117 = arith.constant 0 : index
    %c1_118 = arith.constant 1 : index
    %c0_119 = arith.constant 0 : index
    %104 = vector.load %arg10[%c0_115, %c2_116, %c0_117, %c1_118, %c0_119] : memref<2x4x9x9x64xbf16, #tpu.memory_space<vmem>>, vector<2x1x8x8x64xbf16>
    %105 = vector.shape_cast %104 : vector<2x1x8x8x64xbf16> to vector<2x8x8x64xbf16>
    %106 = vector.shape_cast %105 : vector<2x8x8x64xbf16> to vector<128x64xbf16>
    %c0_120 = arith.constant 0 : index
    %c320 = arith.constant 320 : index
    %107 = vector.load %arg12[%c0_120, %c320] : memref<128x576xbf16, #tpu.memory_space<vmem>>, vector<128x64xbf16>
    tpu.vector_store %arg12[%c0_120, %c320], %106 {strides = array<i32>} : memref<128x576xbf16, #tpu.memory_space<vmem>>, vector<128x64xbf16>,
    %c0_121 = arith.constant 0 : index
    %c0_122 = arith.constant 0 : index
    %c1_123 = arith.constant 1 : index
    %c0_124 = arith.constant 0 : index
    %c0_125 = arith.constant 0 : index
    %108 = vector.load %arg10[%c0_121, %c0_122, %c1_123, %c0_124, %c0_125] : memref<2x4x9x9x64xbf16, #tpu.memory_space<vmem>>, vector<2x1x8x8x64xbf16>
    %109 = vector.shape_cast %108 : vector<2x1x8x8x64xbf16> to vector<2x8x8x64xbf16>
    %110 = vector.shape_cast %109 : vector<2x8x8x64xbf16> to vector<128x64xbf16>
    %c0_126 = arith.constant 0 : index
    %c384 = arith.constant 384 : index
    %111 = vector.load %arg12[%c0_126, %c384] : memref<128x576xbf16, #tpu.memory_space<vmem>>, vector<128x64xbf16>
    tpu.vector_store %arg12[%c0_126, %c384], %110 {strides = array<i32>} : memref<128x576xbf16, #tpu.memory_space<vmem>>, vector<128x64xbf16>,
    %c0_127 = arith.constant 0 : index
    %c1_128 = arith.constant 1 : index
    %c1_129 = arith.constant 1 : index
    %c0_130 = arith.constant 0 : index
    %c0_131 = arith.constant 0 : index
    %112 = vector.load %arg10[%c0_127, %c1_128, %c1_129, %c0_130, %c0_131] : memref<2x4x9x9x64xbf16, #tpu.memory_space<vmem>>, vector<2x1x8x8x64xbf16>
    %113 = vector.shape_cast %112 : vector<2x1x8x8x64xbf16> to vector<2x8x8x64xbf16>
    %114 = vector.shape_cast %113 : vector<2x8x8x64xbf16> to vector<128x64xbf16>
    %c0_132 = arith.constant 0 : index
    %c448 = arith.constant 448 : index
    %115 = vector.load %arg12[%c0_132, %c448] : memref<128x576xbf16, #tpu.memory_space<vmem>>, vector<128x64xbf16>
    tpu.vector_store %arg12[%c0_132, %c448], %114 {strides = array<i32>} : memref<128x576xbf16, #tpu.memory_space<vmem>>, vector<128x64xbf16>,
    %c0_133 = arith.constant 0 : index
    %c0_134 = arith.constant 0 : index
    %c1_135 = arith.constant 1 : index
    %c1_136 = arith.constant 1 : index
    %c0_137 = arith.constant 0 : index
    %116 = vector.load %arg10[%c0_133, %c0_134, %c1_135, %c1_136, %c0_137] : memref<2x4x9x9x64xbf16, #tpu.memory_space<vmem>>, vector<2x1x8x8x64xbf16>
    %117 = vector.shape_cast %116 : vector<2x1x8x8x64xbf16> to vector<2x8x8x64xbf16>
    %118 = vector.shape_cast %117 : vector<2x8x8x64xbf16> to vector<128x64xbf16>
    %c0_138 = arith.constant 0 : index
    %c512 = arith.constant 512 : index
    %119 = vector.load %arg12[%c0_138, %c512] : memref<128x576xbf16, #tpu.memory_space<vmem>>, vector<128x64xbf16>
    tpu.vector_store %arg12[%c0_138, %c512], %118 {strides = array<i32>} : memref<128x576xbf16, #tpu.memory_space<vmem>>, vector<128x64xbf16>,
    %c0_139 = arith.constant 0 : index
    %c0_140 = arith.constant 0 : index
    %120 = vector.load %arg12[%c0_139, %c0_140] : memref<128x576xbf16, #tpu.memory_space<vmem>>, vector<128x576xbf16>
    %c0_141 = arith.constant 0 : index
    %c0_142 = arith.constant 0 : index
    %121 = vector.load %arg4[%c0_141, %c0_142] : memref<576x128xbf16, #tpu.memory_space<vmem>>, vector<576x128xbf16>
    %cst_143 = arith.constant dense<0.000000e+00> : vector<128x128xf32>
    %122 = tpu.matmul %120, %121, %cst_143 {dimension_numbers = #tpu.dot_dimension_numbers<[1], [0], [0], [1], [0, 0, 1, 1], [], []>} : vector<128x576xbf16>, vector<576x128xbf16>, vector<128x128xf32> -> vector<128x128xf32>
    %c0_144 = arith.constant 0 : index
    %c0_145 = arith.constant 0 : index
    %123 = vector.load %arg5[%c0_144, %c0_145] : memref<1x128xf32, #tpu.memory_space<vmem>>, vector<1x128xf32>
    %124 = vector.broadcast %123 : vector<1x128xf32> to vector<128x128xf32>
    %125 = arith.mulf %122, %124 : vector<128x128xf32>
    %c0_146 = arith.constant 0 : index
    %c0_147 = arith.constant 0 : index
    %126 = vector.load %arg6[%c0_146, %c0_147] : memref<1x128xf32, #tpu.memory_space<vmem>>, vector<1x128xf32>
    %127 = vector.broadcast %126 : vector<1x128xf32> to vector<128x128xf32>
    %128 = arith.addf %125, %127 : vector<128x128xf32>
    %cst_148 = arith.constant 0.000000e+00 : f32
    %129 = vector.broadcast %cst_148 : f32 to vector<128x128xf32>
    %130 = arith.maximumf %128, %129 : vector<128x128xf32>
    %cst_149 = arith.constant 0.000000e+00 : bf16
    %131 = vector.broadcast %cst_149 : bf16 to vector<2x1x10x128xbf16>
    %cst_150 = arith.constant 0.000000e+00 : bf16
    %132 = vector.broadcast %cst_150 : bf16 to vector<2x8x1x128xbf16>
    %c0_151 = arith.constant 0 : index
    %c0_152 = arith.constant 0 : index
    %c0_153 = arith.constant 0 : index
    %c0_154 = arith.constant 0 : index
    %133 = vector.load %arg11[%c0_151, %c0_152, %c0_153, %c0_154] : memref<2x10x10x128xbf16, #tpu.memory_space<vmem>>, vector<2x1x10x128xbf16>
    tpu.vector_store %arg11[%c0_151, %c0_152, %c0_153, %c0_154], %131 {strides = array<i32>} : memref<2x10x10x128xbf16, #tpu.memory_space<vmem>>, vector<2x1x10x128xbf16>,
    %c0_155 = arith.constant 0 : index
    %c9 = arith.constant 9 : index
    %c0_156 = arith.constant 0 : index
    %c0_157 = arith.constant 0 : index
    %134 = vector.load %arg11[%c0_155, %c9, %c0_156, %c0_157] : memref<2x10x10x128xbf16, #tpu.memory_space<vmem>>, vector<2x1x10x128xbf16>
    tpu.vector_store %arg11[%c0_155, %c9, %c0_156, %c0_157], %131 {strides = array<i32>} : memref<2x10x10x128xbf16, #tpu.memory_space<vmem>>, vector<2x1x10x128xbf16>,
    %c0_158 = arith.constant 0 : index
    %c1_159 = arith.constant 1 : index
    %c0_160 = arith.constant 0 : index
    %c0_161 = arith.constant 0 : index
    %135 = vector.load %arg11[%c0_158, %c1_159, %c0_160, %c0_161] : memref<2x10x10x128xbf16, #tpu.memory_space<vmem>>, vector<2x8x1x128xbf16>
    tpu.vector_store %arg11[%c0_158, %c1_159, %c0_160, %c0_161], %132 {strides = array<i32>} : memref<2x10x10x128xbf16, #tpu.memory_space<vmem>>, vector<2x8x1x128xbf16>,
    %c0_162 = arith.constant 0 : index
    %c1_163 = arith.constant 1 : index
    %c9_164 = arith.constant 9 : index
    %c0_165 = arith.constant 0 : index
    %136 = vector.load %arg11[%c0_162, %c1_163, %c9_164, %c0_165] : memref<2x10x10x128xbf16, #tpu.memory_space<vmem>>, vector<2x8x1x128xbf16>
    tpu.vector_store %arg11[%c0_162, %c1_163, %c9_164, %c0_165], %132 {strides = array<i32>} : memref<2x10x10x128xbf16, #tpu.memory_space<vmem>>, vector<2x8x1x128xbf16>,
    %137 = vector.shape_cast %130 : vector<128x128xf32> to vector<2x8x8x128xf32>
    %138 = arith.truncf %137 : vector<2x8x8x128xf32> to vector<2x8x8x128xbf16>
    %c0_166 = arith.constant 0 : index
    %c1_167 = arith.constant 1 : index
    %c1_168 = arith.constant 1 : index
    %c0_169 = arith.constant 0 : index
    %139 = vector.load %arg11[%c0_166, %c1_167, %c1_168, %c0_169] : memref<2x10x10x128xbf16, #tpu.memory_space<vmem>>, vector<2x8x8x128xbf16>
    tpu.vector_store %arg11[%c0_166, %c1_167, %c1_168, %c0_169], %138 {strides = array<i32>} : memref<2x10x10x128xbf16, #tpu.memory_space<vmem>>, vector<2x8x8x128xbf16>,
    %c0_170 = arith.constant 0 : index
    %c0_171 = arith.constant 0 : index
    %c0_172 = arith.constant 0 : index
    %c0_173 = arith.constant 0 : index
    %140 = vector.load %arg11[%c0_170, %c0_171, %c0_172, %c0_173] : memref<2x10x10x128xbf16, #tpu.memory_space<vmem>>, vector<2x8x8x128xbf16>
    %141 = vector.shape_cast %140 : vector<2x8x8x128xbf16> to vector<128x128xbf16>
    %c0_174 = arith.constant 0 : index
    %c0_175 = arith.constant 0 : index
    %142 = vector.load %arg13[%c0_174, %c0_175] : memref<128x1152xbf16, #tpu.memory_space<vmem>>, vector<128x128xbf16>
    tpu.vector_store %arg13[%c0_174, %c0_175], %141 {strides = array<i32>} : memref<128x1152xbf16, #tpu.memory_space<vmem>>, vector<128x128xbf16>,
    %c0_176 = arith.constant 0 : index
    %c0_177 = arith.constant 0 : index
    %c1_178 = arith.constant 1 : index
    %c0_179 = arith.constant 0 : index
    %143 = vector.load %arg11[%c0_176, %c0_177, %c1_178, %c0_179] : memref<2x10x10x128xbf16, #tpu.memory_space<vmem>>, vector<2x8x8x128xbf16>
    %144 = vector.shape_cast %143 : vector<2x8x8x128xbf16> to vector<128x128xbf16>
    %c0_180 = arith.constant 0 : index
    %c128_181 = arith.constant 128 : index
    %145 = vector.load %arg13[%c0_180, %c128_181] : memref<128x1152xbf16, #tpu.memory_space<vmem>>, vector<128x128xbf16>
    tpu.vector_store %arg13[%c0_180, %c128_181], %144 {strides = array<i32>} : memref<128x1152xbf16, #tpu.memory_space<vmem>>, vector<128x128xbf16>,
    %c0_182 = arith.constant 0 : index
    %c0_183 = arith.constant 0 : index
    %c2_184 = arith.constant 2 : index
    %c0_185 = arith.constant 0 : index
    %146 = vector.load %arg11[%c0_182, %c0_183, %c2_184, %c0_185] : memref<2x10x10x128xbf16, #tpu.memory_space<vmem>>, vector<2x8x8x128xbf16>
    %147 = vector.shape_cast %146 : vector<2x8x8x128xbf16> to vector<128x128xbf16>
    %c0_186 = arith.constant 0 : index
    %c256_187 = arith.constant 256 : index
    %148 = vector.load %arg13[%c0_186, %c256_187] : memref<128x1152xbf16, #tpu.memory_space<vmem>>, vector<128x128xbf16>
    tpu.vector_store %arg13[%c0_186, %c256_187], %147 {strides = array<i32>} : memref<128x1152xbf16, #tpu.memory_space<vmem>>, vector<128x128xbf16>,
    %c0_188 = arith.constant 0 : index
    %c1_189 = arith.constant 1 : index
    %c0_190 = arith.constant 0 : index
    %c0_191 = arith.constant 0 : index
    %149 = vector.load %arg11[%c0_188, %c1_189, %c0_190, %c0_191] : memref<2x10x10x128xbf16, #tpu.memory_space<vmem>>, vector<2x8x8x128xbf16>
    %150 = vector.shape_cast %149 : vector<2x8x8x128xbf16> to vector<128x128xbf16>
    %c0_192 = arith.constant 0 : index
    %c384_193 = arith.constant 384 : index
    %151 = vector.load %arg13[%c0_192, %c384_193] : memref<128x1152xbf16, #tpu.memory_space<vmem>>, vector<128x128xbf16>
    tpu.vector_store %arg13[%c0_192, %c384_193], %150 {strides = array<i32>} : memref<128x1152xbf16, #tpu.memory_space<vmem>>, vector<128x128xbf16>,
    %c0_194 = arith.constant 0 : index
    %c1_195 = arith.constant 1 : index
    %c1_196 = arith.constant 1 : index
    %c0_197 = arith.constant 0 : index
    %152 = vector.load %arg11[%c0_194, %c1_195, %c1_196, %c0_197] : memref<2x10x10x128xbf16, #tpu.memory_space<vmem>>, vector<2x8x8x128xbf16>
    %153 = vector.shape_cast %152 : vector<2x8x8x128xbf16> to vector<128x128xbf16>
    %c0_198 = arith.constant 0 : index
    %c512_199 = arith.constant 512 : index
    %154 = vector.load %arg13[%c0_198, %c512_199] : memref<128x1152xbf16, #tpu.memory_space<vmem>>, vector<128x128xbf16>
    tpu.vector_store %arg13[%c0_198, %c512_199], %153 {strides = array<i32>} : memref<128x1152xbf16, #tpu.memory_space<vmem>>, vector<128x128xbf16>,
    %c0_200 = arith.constant 0 : index
    %c1_201 = arith.constant 1 : index
    %c2_202 = arith.constant 2 : index
    %c0_203 = arith.constant 0 : index
    %155 = vector.load %arg11[%c0_200, %c1_201, %c2_202, %c0_203] : memref<2x10x10x128xbf16, #tpu.memory_space<vmem>>, vector<2x8x8x128xbf16>
    %156 = vector.shape_cast %155 : vector<2x8x8x128xbf16> to vector<128x128xbf16>
    %c0_204 = arith.constant 0 : index
    %c640 = arith.constant 640 : index
    %157 = vector.load %arg13[%c0_204, %c640] : memref<128x1152xbf16, #tpu.memory_space<vmem>>, vector<128x128xbf16>
    tpu.vector_store %arg13[%c0_204, %c640], %156 {strides = array<i32>} : memref<128x1152xbf16, #tpu.memory_space<vmem>>, vector<128x128xbf16>,
    %c0_205 = arith.constant 0 : index
    %c2_206 = arith.constant 2 : index
    %c0_207 = arith.constant 0 : index
    %c0_208 = arith.constant 0 : index
    %158 = vector.load %arg11[%c0_205, %c2_206, %c0_207, %c0_208] : memref<2x10x10x128xbf16, #tpu.memory_space<vmem>>, vector<2x8x8x128xbf16>
    %159 = vector.shape_cast %158 : vector<2x8x8x128xbf16> to vector<128x128xbf16>
    %c0_209 = arith.constant 0 : index
    %c768 = arith.constant 768 : index
    %160 = vector.load %arg13[%c0_209, %c768] : memref<128x1152xbf16, #tpu.memory_space<vmem>>, vector<128x128xbf16>
    tpu.vector_store %arg13[%c0_209, %c768], %159 {strides = array<i32>} : memref<128x1152xbf16, #tpu.memory_space<vmem>>, vector<128x128xbf16>,
    %c0_210 = arith.constant 0 : index
    %c2_211 = arith.constant 2 : index
    %c1_212 = arith.constant 1 : index
    %c0_213 = arith.constant 0 : index
    %161 = vector.load %arg11[%c0_210, %c2_211, %c1_212, %c0_213] : memref<2x10x10x128xbf16, #tpu.memory_space<vmem>>, vector<2x8x8x128xbf16>
    %162 = vector.shape_cast %161 : vector<2x8x8x128xbf16> to vector<128x128xbf16>
    %c0_214 = arith.constant 0 : index
    %c896 = arith.constant 896 : index
    %163 = vector.load %arg13[%c0_214, %c896] : memref<128x1152xbf16, #tpu.memory_space<vmem>>, vector<128x128xbf16>
    tpu.vector_store %arg13[%c0_214, %c896], %162 {strides = array<i32>} : memref<128x1152xbf16, #tpu.memory_space<vmem>>, vector<128x128xbf16>,
    %c0_215 = arith.constant 0 : index
    %c2_216 = arith.constant 2 : index
    %c2_217 = arith.constant 2 : index
    %c0_218 = arith.constant 0 : index
    %164 = vector.load %arg11[%c0_215, %c2_216, %c2_217, %c0_218] : memref<2x10x10x128xbf16, #tpu.memory_space<vmem>>, vector<2x8x8x128xbf16>
    %165 = vector.shape_cast %164 : vector<2x8x8x128xbf16> to vector<128x128xbf16>
    %c0_219 = arith.constant 0 : index
    %c1024 = arith.constant 1024 : index
    %166 = vector.load %arg13[%c0_219, %c1024] : memref<128x1152xbf16, #tpu.memory_space<vmem>>, vector<128x128xbf16>
    tpu.vector_store %arg13[%c0_219, %c1024], %165 {strides = array<i32>} : memref<128x1152xbf16, #tpu.memory_space<vmem>>, vector<128x128xbf16>,
    %c0_220 = arith.constant 0 : index
    %c0_221 = arith.constant 0 : index
    %167 = vector.load %arg13[%c0_220, %c0_221] : memref<128x1152xbf16, #tpu.memory_space<vmem>>, vector<128x1152xbf16>
    %c0_222 = arith.constant 0 : index
    %c0_223 = arith.constant 0 : index
    %168 = vector.load %arg7[%c0_222, %c0_223] : memref<1152x128xbf16, #tpu.memory_space<vmem>>, vector<1152x128xbf16>
    %cst_224 = arith.constant dense<0.000000e+00> : vector<128x128xf32>
    %169 = tpu.matmul %167, %168, %cst_224 {dimension_numbers = #tpu.dot_dimension_numbers<[1], [0], [0], [1], [0, 0, 1, 1], [], []>} : vector<128x1152xbf16>, vector<1152x128xbf16>, vector<128x128xf32> -> vector<128x128xf32>
    %c0_225 = arith.constant 0 : index
    %c3_226 = arith.constant 3 : index
    %c0_227 = arith.constant 0 : index
    %c0_228 = arith.constant 0 : index
    %c0_229 = arith.constant 0 : index
    %170 = vector.load %arg1[%c0_225, %c3_226, %c0_227, %c0_228, %c0_229] : memref<2x4x8x8x64xf32, #tpu.memory_space<vmem>>, vector<2x1x8x8x64xf32>
    %171 = vector.shape_cast %170 : vector<2x1x8x8x64xf32> to vector<2x8x8x64xf32>
    %172 = vector.shape_cast %171 : vector<2x8x8x64xf32> to vector<128x64xf32>
    %173 = arith.truncf %172 : vector<128x64xf32> to vector<128x64xbf16>
    %c0_230 = arith.constant 0 : index
    %c0_231 = arith.constant 0 : index
    %174 = vector.load %arg8[%c0_230, %c0_231] : memref<64x128xbf16, #tpu.memory_space<vmem>>, vector<64x128xbf16>
    %cst_232 = arith.constant dense<0.000000e+00> : vector<128x128xf32>
    %175 = tpu.matmul %173, %174, %cst_232 {dimension_numbers = #tpu.dot_dimension_numbers<[1], [0], [0], [1], [0, 0, 1, 1], [], []>} : vector<128x64xbf16>, vector<64x128xbf16>, vector<128x128xf32> -> vector<128x128xf32>
    %176 = arith.addf %169, %175 : vector<128x128xf32>
    %177 = vector.shape_cast %176 : vector<128x128xf32> to vector<2x8x8x128xf32>
    %c0_233 = arith.constant 0 : index
    %c0_234 = arith.constant 0 : index
    %c0_235 = arith.constant 0 : index
    %c0_236 = arith.constant 0 : index
    %178 = vector.load %arg9[%c0_233, %c0_234, %c0_235, %c0_236] : memref<2x8x8x128xf32, #tpu.memory_space<vmem>>, vector<2x8x8x128xf32>
    tpu.vector_store %arg9[%c0_233, %c0_234, %c0_235, %c0_236], %177 {strides = array<i32>} : memref<2x8x8x128xf32, #tpu.memory_space<vmem>>, vector<2x8x8x128xf32>,
    return
  }
  func.func @transform_0(%arg0: i32) -> (i32, i32, i32, i32, i32) {
    %c0_i32 = arith.constant 0 : i32
    %c0_i32_0 = arith.constant 0 : i32
    %c0_i32_1 = arith.constant 0 : i32
    %c0_i32_2 = arith.constant 0 : i32
    %c0_i32_3 = arith.constant 0 : i32
    return %arg0, %c0_i32, %c0_i32_0, %c0_i32_1, %c0_i32_2 : i32, i32, i32, i32, i32
  }
  func.func @transform_1(%arg0: i32) -> (i32, i32) {
    %c0_i32 = arith.constant 0 : i32
    %c0_i32_0 = arith.constant 0 : i32
    %c0_i32_1 = arith.constant 0 : i32
    return %c0_i32, %c0_i32_0 : i32, i32
  }
  func.func @transform_2(%arg0: i32) -> (i32, i32) {
    %c0_i32 = arith.constant 0 : i32
    %c0_i32_0 = arith.constant 0 : i32
    %c0_i32_1 = arith.constant 0 : i32
    return %c0_i32, %c0_i32_0 : i32, i32
  }
  func.func @transform_3(%arg0: i32) -> (i32, i32) {
    %c0_i32 = arith.constant 0 : i32
    %c0_i32_0 = arith.constant 0 : i32
    %c0_i32_1 = arith.constant 0 : i32
    return %c0_i32, %c0_i32_0 : i32, i32
  }
  func.func @transform_4(%arg0: i32) -> (i32, i32) {
    %c0_i32 = arith.constant 0 : i32
    %c0_i32_0 = arith.constant 0 : i32
    %c0_i32_1 = arith.constant 0 : i32
    return %c0_i32, %c0_i32_0 : i32, i32
  }
  func.func @transform_5(%arg0: i32) -> (i32, i32) {
    %c0_i32 = arith.constant 0 : i32
    %c0_i32_0 = arith.constant 0 : i32
    %c0_i32_1 = arith.constant 0 : i32
    return %c0_i32, %c0_i32_0 : i32, i32
  }
  func.func @transform_6(%arg0: i32) -> (i32, i32) {
    %c0_i32 = arith.constant 0 : i32
    %c0_i32_0 = arith.constant 0 : i32
    %c0_i32_1 = arith.constant 0 : i32
    return %c0_i32, %c0_i32_0 : i32, i32
  }
  func.func @transform_7(%arg0: i32) -> (i32, i32) {
    %c0_i32 = arith.constant 0 : i32
    %c0_i32_0 = arith.constant 0 : i32
    %c0_i32_1 = arith.constant 0 : i32
    return %c0_i32, %c0_i32_0 : i32, i32
  }
  func.func @transform_8(%arg0: i32) -> (i32, i32, i32, i32) {
    %c0_i32 = arith.constant 0 : i32
    %c0_i32_0 = arith.constant 0 : i32
    %c0_i32_1 = arith.constant 0 : i32
    %c0_i32_2 = arith.constant 0 : i32
    return %arg0, %c0_i32, %c0_i32_0, %c0_i32_1 : i32, i32, i32, i32
  }
}

</mosaic_0001>

<bundles_post_ra>
// kernel: tpu_custom_call.1
= control target key start
LH: loop header
LB: loop body
LE: loop exit
PB: predicated region body
PF: predicated region fallthrough
CT: control target
= control target key end

     0   :  { %13 = vsyncpa [#allocation7], 0  ;;  %s10770_s0 = inlined_call_operand.hbm [shape: f32[4,4,8,8,64], index: 0, kind: input, shape index: {}]   ;;  %s10771_s1 = inlined_call_operand.vmem [shape: f32[1,64], index: 1, kind: input, shape index: {}]   ;;  %s10772_s2 = inlined_call_operand.vmem [shape: f32[1,64], index: 2, kind: input, shape index: {}]   ;;  %s10773_s3 = inlined_call_operand.hbm [shape: bf16[576,128], index: 3, kind: input, shape index: {}]   ;;  %s10774_s4 = inlined_call_operand.vmem [shape: f32[1,128], index: 4, kind: input, shape index: {}]   ;;  %s10775_s5 = inlined_call_operand.vmem [shape: f32[1,128], index: 5, kind: input, shape index: {}]   ;;  %s10776_s6 = inlined_call_operand.hbm [shape: bf16[1152,128], index: 6, kind: input, shape index: {}]   ;;  %s10777_s7 = inlined_call_operand.hbm [shape: bf16[64,128], index: 7, kind: input, shape index: {}]   ;;  %s10778_s8 = inlined_call_operand.hbm [shape: f32[4,8,8,128], index: 8, kind: output, shape index: {}]  }
   0x1   :  { %15 = vsyncpa [#allocation7 + $0x1], 0 }
   0x2   :  { %16 = vsyncpa [#allocation10], 0 }
   0x3   :  { %17 = vsyncpa [#allocation13], 0 }
   0x4   :  { %18 = vsyncpa [#allocation8], 0 }
   0x5   :  { %20 = vsyncpa [#allocation8 + $0x1], 0  ;;  %s8799_s27 = smov 0   ;;  %s8801_s28 = smov 0  }
   0x6   :  { %s8803_s29 = smov 0   ;;  %s8805_s30 = smov 0  }
   0x7 LB: > { %10784 = sst [smem:[#allocation19_spill]] %s8727_s27  ;;  %s8820_s9 = sadd.s32 4294967295, %s8739_s30   ;;  %s8739_s30 = sphi %s8805_s30, %s10821_s30   ;;  %s8735_s29 = sphi %s8803_s29, %s10820_s29   ;;  %s8731_s28 = sphi %s8801_s28, %s10819_s28   ;;  %s8727_s27 = sphi %s8799_s27, %s10818_s27  }
   0x8   : > { %s7167_s10 = sadd.s32 4294967294, %s8739_s30   ;;  %p46_p0 = scmp.ne.s32.totalorder %s8731_s28, %s8727_s27 }
   0x9   : > { %p10779_p1 = scmp.eq.s32.totalorder %s8820_s9, 0  ;;  %p223_p3 = scmp.eq.s32.totalorder %s7167_s10, 1 }
   0xa   : > { %p7168_p5 = scmp.ge.s32.totalorder %s8739_s30, 1  ;;  %p230_p7 = scmp.lt.s32.totalorder %s8739_s30, 3 }
   0xb   : > { %p8829_p4 = por %p10779_p1, %p46_p0  ;;  %p8834_p6 = por %p223_p3, %p46_p0 }
   0xc   : > { %p8839_p8 = pnand %p7168_p5, %p230_p7  ;;  %s8741_s14 = smov [#allocation9]  }
   0xd   : > { %s10785_s11 = scalar_select %p8829_p4, 1, 0 }
   0xe   : > { %s10786_s12 = scalar_select %p8834_p6, 1, 0 }
   0xf   : > { %s10788_s13 = scalar_select %p8839_p8, 1, 0 }
  0x10   : > { %10787 = sst [smem:[#allocation20_spill]] %s10786_s12  ;;  %s248_s15 = sshll.u32 %s8741_s14, 4  ;;  %s8843_s15 = int_to_ptr.vmem [resolvable:$true] %s248_s15 }
  0x11   : > { %p8293_p9 = pneg %p8839_p8  ;;  %s8742_s17 = smov [#allocation11]  }
  0x12   : > { %s267_s18 = sshll.u32 %s8742_s17, 4  ;;  %s8743_s19 = smov [#allocation12]   ;;  %s8854_s18 = int_to_ptr.vmem [resolvable:$true] %s267_s18 }
  0x13   : > { %p8850_p11 = pnand %p8293_p9, %p10779_p1  ;;  %s8856_s20 = sshll.u32 %s8743_s19, 4  ;;  %s281_s20 = int_to_ptr.vmem [resolvable:$true] %s8856_s20 }
  0x14   : > { %s8551_s23 = scalar_lea.hbm %s10773_s3, 4608 }
  0x15   : > { %p8552_p12 = scmp.ne.s32.totalorder %s10773_s3, %s8551_s23  ;;  %p8866_p13 = pneg %p8850_p11 }
  0x16   : > { %p8558_p5 = scmp.lt.u32.totalorder %s8551_s23, %s10773_s3 }
  0x17   : > { %p8554_p0 = pnand %p8866_p13, %p8552_p12 }
  0x19   : > { %p8555_p3 = pneg %p8554_p0 }
  0x1b   : > { %p8560_p7 = pnand %p8558_p5, %p8555_p3 }
  0x1d   : > { %8563 = shalt.err (!%p8560_p7)
}
  0x1e   : > { %s8564_s17 = scalar_lea.vmem %s8843_s15, 4608  ;;  %p8572_p2 = scmp.lt.s32.totalorder %s8843_s15, %s8843_s15 }
  0x1f   : > { %p8565_p9 = scmp.ne.s32.totalorder %s8843_s15, %s8564_s17  ;;  %p8573_p6 = scmp.lt.s32.totalorder %s8564_s17, %s8564_s17 }
  0x21   : > { %p8567_p10 = pnand %p8565_p9, %p8866_p13  ;;  %p8574_p12 = por %p8573_p6, %p8572_p2 }
  0x23   : > { %p8568_p1 = pneg %p8567_p10 }
  0x25   : > { %p8575_p0 = pnand %p8574_p12, %p8568_p1 }
  0x27   : > { %8578 = shalt.err (!%p8575_p0)
}
  0x28   : > { %s8744_s19 = smov 64   ;;  %s8745_s21 = smov 4  }
  0x29   : > { %8296 = dma.hbm_to_vmem [thread:$0]  (!%p8850_p11), %s10773_s3, 4608, %s8843_s15, [#allocation10], %s8744_s19, %s8744_s19, %s8745_s21  }
  0x2a   : > { %s8579_s10 = scalar_lea.hbm %s10776_s6, 9216 }
  0x2b   : > { %p8580_p1 = scmp.ne.s32.totalorder %s10776_s6, %s8579_s10  ;;  %p8586_p10 = scmp.lt.u32.totalorder %s8579_s10, %s10776_s6 }
  0x2d   : > { %p8582_p2 = pnand %p8580_p1, %p8866_p13 }
  0x2f   : > { %p8583_p6 = pneg %p8582_p2 }
  0x31   : > { %p8588_p3 = pnand %p8586_p10, %p8583_p6 }
  0x33   : > { %8591 = shalt.err (!%p8588_p3)
}
  0x34   : > { %s8592_s15 = scalar_lea.vmem %s8854_s18, 9216  ;;  %p8600_p12 = scmp.lt.s32.totalorder %s8854_s18, %s8854_s18 }
  0x35   : > { %p8593_p5 = scmp.ne.s32.totalorder %s8854_s18, %s8592_s15  ;;  %p8601_p0 = scmp.lt.s32.totalorder %s8592_s15, %s8592_s15 }
  0x37   : > { %p8595_p7 = pnand %p8593_p5, %p8866_p13  ;;  %p8602_p1 = por %p8601_p0, %p8600_p12 }
  0x39   : > { %p8596_p9 = pneg %p8595_p7 }
  0x3b   : > { %p8603_p2 = pnand %p8602_p1, %p8596_p9 }
  0x3d   : > { %8606 = shalt.err (!%p8603_p2)
}
  0x3e   : > { %8299 = dma.hbm_to_vmem [thread:$0]  (!%p8850_p11), %s10776_s6, 9216, %s8854_s18, [#allocation10], %s8744_s19, %s8744_s19, %s8745_s21  }
  0x3f   : > { %s8607_s24 = scalar_lea.hbm %s10777_s7, 512 }
  0x40   : > { %p8608_p6 = scmp.ne.s32.totalorder %s10777_s7, %s8607_s24  ;;  %p8614_p5 = scmp.lt.u32.totalorder %s8607_s24, %s10777_s7 }
  0x42   : > { %p8610_p10 = pnand %p8608_p6, %p8866_p13 }
  0x44   : > { %p8611_p3 = pneg %p8610_p10 }
  0x46   : > { %p8616_p7 = pnand %p8614_p5, %p8611_p3 }
  0x48   : > { %8619 = shalt.err (!%p8616_p7)
}
  0x49   : > { %s8620_s15 = scalar_lea.vmem %s281_s20, 512  ;;  %p8628_p1 = scmp.lt.s32.totalorder %s281_s20, %s281_s20 }
  0x4a   : > { %p8621_p9 = scmp.ne.s32.totalorder %s281_s20, %s8620_s15  ;;  %p8629_p2 = scmp.lt.s32.totalorder %s8620_s15, %s8620_s15 }
  0x4c   : > { %p8623_p12 = pnand %p8621_p9, %p8866_p13  ;;  %p8630_p4 = por %p8629_p2, %p8628_p1 }
  0x4e   : > { %p8624_p0 = pneg %p8623_p12 }
  0x50   : > { %p8631_p8 = pnand %p8630_p4, %p8624_p0 }
  0x52   : > { %8634 = shalt.err (!%p8631_p8)
}
  0x53   : > { %8302 = dma.hbm_to_vmem [thread:$0]  (!%p8850_p11), %s10777_s7, 512, %s281_s20, [#allocation13], %s8744_s19, %s8744_s19, %s8745_s21  }
  0x54   : > { %s8939_s26 = sadd.s32 1, %s8739_s30   ;;  %s33_s12 = sadd.s32 1, %s8735_s29 }
  0x55   : > { %s30_s16 = ssub.s32 %s8739_s30, %s8939_s26  ;;  %p40_p8 = scmp.ne.s32.totalorder %s8735_s29, %s8731_s28 }
  0x56   : > { %p31_p4 = scmp.eq.s32.totalorder %s30_s16, 0  ;;  %p41_p13 = scmp.eq.s32.totalorder %s8739_s30, 0 }
  0x57   : > { %p8314_p6 = scmp.lt.s32.totalorder %s8739_s30, 2  ;;  %p10791_p3 = scmp.eq.s32.totalorder %s8820_s9, 1 }
  0x58   : > { %s8949_s22 = scalar_select %p31_p4, %s8735_s29, %s33_s12  }
  0x59   : > { %p42_p10 = por %p41_p13, %p40_p8  ;;  %p8953_p5 = por %p10791_p3, %p40_p8 }
  0x5a   : > { %s294_s24 = sand.u32 1, %s8735_s29   ;;  %s7626_s25 = sshll.u32 %s8739_s30, 13 }
  0x5b   : > { %s7173_s20 = sshll.u32 %s294_s24, 9  ;;  %s8962_s10 = scalar_lea.hbm %s10770_s0, %s7626_s25 }
  0x5c   : > { %s298_s14 = scalar_lea.vmem [#allocation6], %s7173_s20  ;;  %p8964_p11 = pnand %p8314_p6, %p42_p10 }
  0x5d   : > { %s306_s17 = sshll.u32 %s298_s14, 4  ;;  %s8970_s18 = scalar_lea.sflag [#allocation7], %s294_s24  ;;  %s8968_s17 = int_to_ptr.vmem [resolvable:$true] %s306_s17 }
  0x5e   : > { %s8635_s27 = scalar_lea.hbm %s8962_s10, 8192  ;;  %p8637_p9 = pneg %p8964_p11 }
  0x5f   : > { %p8636_p7 = scmp.ne.s32.totalorder %s8962_s10, %s8635_s27  ;;  %s8640_s25 = scalar_lea.hbm %s10770_s0, 16384 }
  0x60   : > { %p8641_p1 = scmp.lt.u32.totalorder %s8962_s10, %s10770_s0  ;;  %p8642_p2 = scmp.lt.u32.totalorder %s8640_s25, %s8635_s27 }
  0x61   : > { %p8638_p12 = pnand %p8637_p9, %p8636_p7  ;;  %p8644_p8 = scmp.lt.u32.totalorder %s8635_s27, %s8962_s10 }
  0x62   : > { %p8643_p4 = por %p8642_p2, %p8641_p1 }
  0x63   : > { %p8639_p0 = pneg %p8638_p12 }
  0x64   : > { %p8645_p13 = por %p8644_p8, %p8643_p4 }
  0x66   : > { %p8646_p6 = pnand %p8645_p13, %p8639_p0 }
  0x68   : > { %8649 = shalt.err (!%p8646_p6)
}
  0x69   : > { %s8650_s24 = scalar_lea.vmem %s8968_s17, 8192  ;;  %s8746_s21 = smov [#allocation6]  }
  0x6a   : > { %p8651_p10 = scmp.ne.s32.totalorder %s8968_s17, %s8650_s24  ;;  %s8655_s14 = sshll.u32 %s8746_s21, 4  ;;  %s8656_s14 = int_to_ptr.vmem [resolvable:$false] %s8655_s14 }
  0x6b   : > { %s8657_s16 = scalar_lea.vmem %s8656_s14, 16384  ;;  %p8658_p12 = scmp.lt.s32.totalorder %s8968_s17, %s8656_s14 }
  0x6c   : > { %p8653_p3 = pnand %p8651_p10, %p8637_p9  ;;  %p8659_p1 = scmp.lt.s32.totalorder %s8657_s16, %s8650_s24 }
  0x6e   : > { %p8654_p7 = pneg %p8653_p3  ;;  %p8660_p2 = por %p8659_p1, %p8658_p12 }
  0x70   : > { %p8661_p4 = pnand %p8660_p2, %p8654_p7 }
  0x72   : > { %8664 = shalt.err (!%p8661_p4)
}
  0x73   : > { %s8747_s27 = smov 128   ;;  %s8748_s12 = smov 8  }
  0x74   : > { %8306 = dma.hbm_to_vmem [thread:$0]  (!%p8964_p11), %s8962_s10, 8192, %s8968_s17, %s8970_s18, %s8747_s27, %s8747_s27, %s8748_s12  }
  0x75   : > { %p10794_p9 = scmp.ne.s32.totalorder %s10788_s13, 0 }
  0x76   : > { %s9001_s25 = sand.u32 (!%p10794_p9), 1, %s8731_s28   ;;  %p10795_p0 = scmp.ne.s32.totalorder (!%p10794_p9), %s10785_s11, 0 }
  0x77   : > { %318 = sbr.rel (%p10794_p9) target bundleno = 1092 (0x444), region = 52  ;;  %s7178_s20 = sshll.u32 (!%p10794_p9), %s9001_s25, 9 }
  0x78   : > { %s321_s19 = scalar_lea.sflag (!%p10794_p9), [#allocation7], %s9001_s25  ;;  %s9005_s24 = scalar_lea.vmem (!%p10794_p9), [#allocation6], %s7178_s20 }
  0x7e   : > { %8710 = dma.done.wait (%p10795_p0), %s321_s19, 8192  }
  0x7f   : > { %8712 = vsyncadd (%p10795_p0), %s321_s19, 4294959104  ;;  %p10796_p11 = scmp.eq.s32.totalorder %s8820_s9, 0 }
  0x81   : > { %8714 = dma.done.wait (%p10796_p11), [#allocation10], 13824   ;;  %p10797_p8 = pmov %p10796_p11 }
  0x83   : > { %8716 = vsyncadd (%p10797_p8), [#allocation10], 4294953472  ;;  %p10798_p13 = pmov %p10797_p8 }
  0x84   : > { %p10799_p6 = pmov %p10797_p8 }
  0x85   : > { %8718 = dma.done.wait (%p10798_p13), [#allocation13], 512  }
  0x86   : > { %8720 = vsyncadd (%p10799_p6), [#allocation13], 4294966784  ;;  %vm374_vm0 = vcmask 519168   ;;  %v8749_v0 = vmov 0   ;;  %vm376_vm1 = vcmask 516096   ;;  %s8750_s15 = smov 64  }
  0x87   : > { %835 = vst.msk [vmem:[#allocation2 + $0x48] sm:$0xf] %vm374_vm0, %v8749_v0  ;;  %375 = vst.msk [vmem:[#allocation2] sm:$0xf] %vm374_vm0, %v8749_v0  ;;  %vm377_vm2 = vsmask.f32 256 }
  0x88   : > { %382 = vst.msk [vmem:[#allocation2 + $0x120] sm:$0xf] %vm374_vm0, %v8749_v0  ;;  %839 = vst.msk [vmem:[#allocation2 + $0x168] sm:$0xf] %vm374_vm0, %v8749_v0  ;;  %v836_v2 = vld [vmem:[#allocation2 + $0x4c] sm:$0x1] }
  0x89   : > { %3681 = vst [vmem:[#allocation3] sm:$0xf] %v8749_v0  ;;  %3682 = vst [vmem:[#allocation3 + $0x4] sm:$0x1] %v8749_v0  ;;  %v840_v3 = vld [vmem:[#allocation2 + $0x16c] sm:$0x1] }
  0x8a   : > { %3683 = vst [vmem:[#allocation3 + $0x50] sm:$0xf] %v8749_v0  ;;  %3684 = vst [vmem:[#allocation3 + $0x54] sm:$0x1] %v8749_v0  ;;  %v844_v4 = vld [vmem:[#allocation2 + $0x54] sm:$0x1] }
  0x8b   : > { %3686 = vst [vmem:[#allocation3 + $0x48] sm:$0xf] %v8749_v0  ;;  %3687 = vst [vmem:[#allocation3 + $0x4c] sm:$0x1] %v8749_v0  ;;  %v847_v8 = vld [vmem:[#allocation2 + $0x5c] sm:$0x1] }
  0x8c   : > { %3688 = vst [vmem:[#allocation3 + $0x98] sm:$0xf] %v8749_v0  ;;  %3689 = vst [vmem:[#allocation3 + $0x9c] sm:$0x1] %v8749_v0  ;;  %v850_v10 = vld [vmem:[#allocation2 + $0x64] sm:$0x1] }
  0x8d   : > { %vm9024_vm3 = vmand %vm376_vm1, %vm377_vm2  ;;  %v853_v11 = vld [vmem:[#allocation2 + $0x6c] sm:$0x1]  ;;  %v856_v14 = vld [vmem:[#allocation2 + $0x74] sm:$0x1]  ;;  %vm736_vm4 = vsmask.f32 7938 }
  0x8e   : > { %v837_v5 = vsel %vm9024_vm3, 0, %v836_v2  ;;  %v841_v6 = vsel %vm9024_vm3, 0, %v840_v3  ;;  %v845_v7 = vsel %vm9024_vm3, 0, %v844_v4  ;;  %v848_v9 = vsel %vm9024_vm3, 0, %v847_v8  ;;  %v859_v15 = vld [vmem:[#allocation2 + $0x7c] sm:$0x1]  ;;  %vm9158_vm5 = vmand %vm374_vm0, %vm736_vm4 }
  0x8f   : > { %838 = vst [vmem:[#allocation2 + $0x4c] sm:$0x1] %v837_v5  ;;  %842 = vst [vmem:[#allocation2 + $0x16c] sm:$0x1] %v841_v6  ;;  %v851_v12 = vsel %vm9024_vm3, 0, %v850_v10  ;;  %v854_v13 = vsel %vm9024_vm3, 0, %v853_v11 }
  0x90   : > { %846 = vst [vmem:[#allocation2 + $0x54] sm:$0x1] %v845_v7  ;;  %849 = vst [vmem:[#allocation2 + $0x5c] sm:$0x1] %v848_v9  ;;  %v857_v16 = vsel %vm9024_vm3, 0, %v856_v14  ;;  %v860_v17 = vsel %vm9024_vm3, 0, %v859_v15 }
  0x91   : > { %852 = vst [vmem:[#allocation2 + $0x64] sm:$0x1] %v851_v12  ;;  %855 = vst [vmem:[#allocation2 + $0x6c] sm:$0x1] %v854_v13  ;;  %v862_v18 = vld [vmem:[#allocation2 + $0x84] sm:$0x1] }
  0x92   : > { %v865_v19 = vld [vmem:[#allocation2 + $0x8c] sm:$0x1]  ;;  %858 = vst [vmem:[#allocation2 + $0x74] sm:$0x1] %v857_v16  ;;  %861 = vst [vmem:[#allocation2 + $0x7c] sm:$0x1] %v860_v17 }
  0x93   : > { %v863_v20 = vsel %vm9024_vm3, 0, %v862_v18  ;;  %v866_v21 = vsel %vm9024_vm3, 0, %v865_v19  ;;  %v868_v22 = vld [vmem:[#allocation2 + $0x174] sm:$0x1]  ;;  %v871_v23 = vld [vmem:[#allocation2 + $0x17c] sm:$0x1] }
  0x94   : > { %864 = vst [vmem:[#allocation2 + $0x84] sm:$0x1] %v863_v20  ;;  %867 = vst [vmem:[#allocation2 + $0x8c] sm:$0x1] %v866_v21  ;;  %v869_v24 = vsel %vm9024_vm3, 0, %v868_v22  ;;  %v872_v25 = vsel %vm9024_vm3, 0, %v871_v23 }
  0x95   : > { %v874_v26 = vld [vmem:[#allocation2 + $0x184] sm:$0x1]  ;;  %v877_v27 = vld [vmem:[#allocation2 + $0x18c] sm:$0x1]  ;;  %870 = vst [vmem:[#allocation2 + $0x174] sm:$0x1] %v869_v24 }
  0x96   : > { %873 = vst [vmem:[#allocation2 + $0x17c] sm:$0x1] %v872_v25  ;;  %v875_v28 = vsel %vm9024_vm3, 0, %v874_v26  ;;  %v878_v29 = vsel %vm9024_vm3, 0, %v877_v27  ;;  %v880_v30 = vld [vmem:[#allocation2 + $0x194] sm:$0x1] }
  0x97   : > { %v883_v31 = vld [vmem:[#allocation2 + $0x19c] sm:$0x1]  ;;  %876 = vst [vmem:[#allocation2 + $0x184] sm:$0x1] %v875_v28  ;;  %879 = vst [vmem:[#allocation2 + $0x18c] sm:$0x1] %v878_v29 }
  0x98   : > { %v881_v32 = vsel %vm9024_vm3, 0, %v880_v30  ;;  %v884_v33 = vsel %vm9024_vm3, 0, %v883_v31  ;;  %v886_v34 = vld [vmem:[#allocation2 + $0x1a4] sm:$0x1]  ;;  %v889_v35 = vld [vmem:[#allocation2 + $0x1ac] sm:$0x1] }
  0x99   : > { %882 = vst [vmem:[#allocation2 + $0x194] sm:$0x1] %v881_v32  ;;  %885 = vst [vmem:[#allocation2 + $0x19c] sm:$0x1] %v884_v33  ;;  %v887_v36 = vsel %vm9024_vm3, 0, %v886_v34  ;;  %v890_v37 = vsel %vm9024_vm3, 0, %v889_v35 }
  0x9a   : > { %v991_v38 = vld [vmem:[#allocation2 + $0xd4] sm:$0x1]  ;;  %888 = vst [vmem:[#allocation2 + $0x1a4] sm:$0x1] %v887_v36  ;;  %891 = vst [vmem:[#allocation2 + $0x1ac] sm:$0x1] %v890_v37 }
  0x9b   : > { %v995_v39 = vld [vmem:[#allocation2 + $0x1f4] sm:$0x1]  ;;  %v992_v40 = vsel %vm9024_vm3, 0, %v991_v38  ;;  %v1434_v42 = vld [vmem:[#allocation2 + $0x11c] sm:$0x1]  ;;  %v7217_v0 = vld [vmem:[%s9005_s24 + $0x80] sm:$0xff] }
  0x9c   : > { %v996_v41 = vsel %vm9024_vm3, 0, %v995_v39  ;;  %v1438_v43 = vld [vmem:[#allocation2 + $0x23c] sm:$0x1]  ;;  %993 = vst [vmem:[#allocation2 + $0xd4] sm:$0x1] %v992_v40  ;;  %v1435_v44 = vsel %vm9024_vm3, 0, %v1434_v42 }
  0x9d   : > { %997 = vst [vmem:[#allocation2 + $0x1f4] sm:$0x1] %v996_v41  ;;  %v1439_v45 = vsel %vm9024_vm3, 0, %v1438_v43  ;;  %v1442_v46 = vld [vmem:[#allocation2 + $0xdc] sm:$0x1]  ;;  %v7218_v2 = vld [vmem:[%s9005_s24 + $0x88] sm:$0xff] }
  0x9e   : > { %v1445_v47 = vld [vmem:[#allocation2 + $0xe4] sm:$0x1]  ;;  %1436 = vst [vmem:[#allocation2 + $0x11c] sm:$0x1] %v1435_v44  ;;  %1440 = vst [vmem:[#allocation2 + $0x23c] sm:$0x1] %v1439_v45 }
  0x9f   : > { %v1443_v48 = vsel %vm9024_vm3, 0, %v1442_v46  ;;  %v1446_v49 = vsel %vm9024_vm3, 0, %v1445_v47  ;;  %v1448_v50 = vld [vmem:[#allocation2 + $0xec] sm:$0x1]  ;;  %v1451_v51 = vld [vmem:[#allocation2 + $0xf4] sm:$0x1] }
  0xa0   : > { %1444 = vst [vmem:[#allocation2 + $0xdc] sm:$0x1] %v1443_v48  ;;  %1447 = vst [vmem:[#allocation2 + $0xe4] sm:$0x1] %v1446_v49  ;;  %v1449_v52 = vsel %vm9024_vm3, 0, %v1448_v50  ;;  %v1452_v53 = vsel %vm9024_vm3, 0, %v1451_v51 }
  0xa1   : > { %v1454_v54 = vld [vmem:[#allocation2 + $0xfc] sm:$0x1]  ;;  %v1457_v55 = vld [vmem:[#allocation2 + $0x104] sm:$0x1]  ;;  %1450 = vst [vmem:[#allocation2 + $0xec] sm:$0x1] %v1449_v52 }
  0xa2   : > { %1453 = vst [vmem:[#allocation2 + $0xf4] sm:$0x1] %v1452_v53  ;;  %v1455_v56 = vsel %vm9024_vm3, 0, %v1454_v54  ;;  %v1458_v57 = vsel %vm9024_vm3, 0, %v1457_v55  ;;  %v1460_v58 = vld [vmem:[#allocation2 + $0x10c] sm:$0x1] }
  0xa3   : > { %v1463_v59 = vld [vmem:[#allocation2 + $0x114] sm:$0x1]  ;;  %1456 = vst [vmem:[#allocation2 + $0xfc] sm:$0x1] %v1455_v56  ;;  %1459 = vst [vmem:[#allocation2 + $0x104] sm:$0x1] %v1458_v57 }
  0xa4   : > { %v1461_v60 = vsel %vm9024_vm3, 0, %v1460_v58  ;;  %v1464_v61 = vsel %vm9024_vm3, 0, %v1463_v59  ;;  %v1466_v62 = vld [vmem:[#allocation2 + $0x1fc] sm:$0x1]  ;;  %v1469_v63 = vld [vmem:[#allocation2 + $0x204] sm:$0x1] }
  0xa5   : > { %1462 = vst [vmem:[#allocation2 + $0x10c] sm:$0x1] %v1461_v60  ;;  %1465 = vst [vmem:[#allocation2 + $0x114] sm:$0x1] %v1464_v61  ;;  %v1467_v3 = vsel %vm9024_vm3, 0, %v1466_v62  ;;  %v1470_v4 = vsel %vm9024_vm3, 0, %v1469_v63 }
  0xa6   : > { %v1472_v5 = vld [vmem:[#allocation2 + $0x20c] sm:$0x1]  ;;  %v1475_v6 = vld [vmem:[#allocation2 + $0x214] sm:$0x1]  ;;  %1468 = vst [vmem:[#allocation2 + $0x1fc] sm:$0x1] %v1467_v3 }
  0xa7   : > { %1471 = vst [vmem:[#allocation2 + $0x204] sm:$0x1] %v1470_v4  ;;  %v1473_v7 = vsel %vm9024_vm3, 0, %v1472_v5  ;;  %v1476_v8 = vsel %vm9024_vm3, 0, %v1475_v6  ;;  %v1478_v9 = vld [vmem:[#allocation2 + $0x21c] sm:$0x1] }
  0xa8   : > { %v1481_v10 = vld [vmem:[#allocation2 + $0x224] sm:$0x1]  ;;  %1474 = vst [vmem:[#allocation2 + $0x20c] sm:$0x1] %v1473_v7  ;;  %1477 = vst [vmem:[#allocation2 + $0x214] sm:$0x1] %v1476_v8 }
  0xa9   : > { %v1479_v11 = vsel %vm9024_vm3, 0, %v1478_v9  ;;  %v1482_v12 = vsel %vm9024_vm3, 0, %v1481_v10  ;;  %v1484_v13 = vld [vmem:[#allocation2 + $0x22c] sm:$0x1]  ;;  %v1487_v14 = vld [vmem:[#allocation2 + $0x234] sm:$0x1] }
  0xaa   : > { %1480 = vst [vmem:[#allocation2 + $0x21c] sm:$0x1] %v1479_v11  ;;  %1483 = vst [vmem:[#allocation2 + $0x224] sm:$0x1] %v1482_v12  ;;  %v1485_v15 = vsel %vm9024_vm3, 0, %v1484_v13  ;;  %v1488_v16 = vsel %vm9024_vm3, 0, %v1487_v14 }
  0xab   : > { %v9109_v17 = vld [vmem:[%s10771_s1] ss:$0 sm:$0xff]  ;;  %1486 = vst [vmem:[#allocation2 + $0x22c] sm:$0x1] %v1485_v15  ;;  %1489 = vst [vmem:[#allocation2 + $0x234] sm:$0x1] %v1488_v16 }
  0xac   : > { %v9114_v18 = vld [vmem:[%s10772_s2] ss:$0 sm:$0xff]  ;;  %v999_v19 = vld [vmem:[#allocation2 + $0x90] sm:$0x1]  ;;  %v1002_v20 = vld [vmem:[#allocation2 + $0x98] sm:$0x1]  ;;  %v1064_v21 = vmul.f32 %v7217_v0, %v9109_v17  ;;  %v1065_v22 = vmul.f32 %v7218_v2, %v9109_v17 }
  0xad   : > { %v1005_v23 = vld [vmem:[#allocation2 + $0xa0] sm:$0x1]  ;;  %v1000_v24 = vsel %vm9024_vm3, 0, %v999_v19  ;;  %v1003_v25 = vsel %vm9024_vm3, 0, %v1002_v20  ;;  %v1008_v27 = vld [vmem:[#allocation2 + $0xa8] sm:$0x1] }
  0xae   : > { %v1006_v26 = vsel %vm9024_vm3, 0, %v1005_v23  ;;  %v7219_v28 = vld [vmem:[%s9005_s24 + $0x90] sm:$0xff]  ;;  %1001 = vst [vmem:[#allocation2 + $0x90] sm:$0x1] %v1000_v24  ;;  %1004 = vst [vmem:[#allocation2 + $0x98] sm:$0x1] %v1003_v25  ;;  %v1080_v29 = vadd.f32 %v9114_v18, %v1064_v21  ;;  %v1081_v30 = vadd.f32 %v9114_v18, %v1065_v22 }
  0xaf   : > { %1007 = vst [vmem:[#allocation2 + $0xa0] sm:$0x1] %v1006_v26  ;;  %v1009_v31 = vsel %vm9024_vm3, 0, %v1008_v27  ;;  %v7220_v32 = vld [vmem:[%s9005_s24 + $0x98] sm:$0xff]  ;;  %v1066_v33 = vmul.f32 %v7219_v28, %v9109_v17  ;;  %v7201_v34 = vld [vmem:[%s9005_s24 + $0x40] sm:$0xff]  ;;  %v7202_v37 = vld [vmem:[%s9005_s24 + $0x48] sm:$0xff] }
  0xb0   : > { %1010 = vst [vmem:[#allocation2 + $0xa8] sm:$0x1] %v1009_v31  ;;  %v1067_v35 = vmul.f32 %v7220_v32, %v9109_v17  ;;  %v909_v36 = vmul.f32 %v7201_v34, %v9109_v17  ;;  %v7203_v38 = vld [vmem:[%s9005_s24 + $0x50] sm:$0xff]  ;;  %v1096_v40 = vmax.f32 %v1080_v29, 0.0  ;;  %v1097_v41 = vmax.f32 %v1081_v30, 0.0  ;;  %v7221_v53 = vld [vmem:[%s9005_s24 + $0xa0] sm:$0xff] }
  0xb1   : > { %v1011_v39 = vld [vmem:[#allocation2 + $0xb0] sm:$0x1]  ;;  %v1082_v42 = vadd.f32 %v9114_v18, %v1066_v33  ;;  %v910_v43 = vmul.f32 %v7202_v37, %v9109_v17  ;;  %v1014_v44 = vld [vmem:[#allocation2 + $0xb8] sm:$0x1]  ;;  %v911_v47 = vmul.f32 %v7203_v38, %v9109_v17  ;;  %v7222_v2 = vld [vmem:[%s9005_s24 + $0xa8] sm:$0xff]  ;;  %v1068_v3 = vmul.f32 %v7221_v53, %v9109_v17  ;;  %s7182_s18 = sshll.u32 %s9001_s25, 7 }
  0xb2   : > { %v1083_v45 = vadd.f32 %v9114_v18, %v1067_v35  ;;  %v925_v46 = vadd.f32 %v9114_v18, %v909_v36  ;;  %v1012_v48 = vsel %vm9024_vm3, 0, %v1011_v39  ;;  %v7643_v49 = vpack.c.bf16 %v1096_v40, %v1096_v40  ;;  %v7204_v4 = vld [vmem:[%s9005_s24 + $0x58] sm:$0xff]  ;;  %v7205_v5 = vld [vmem:[%s9005_s24 + $0x60] sm:$0xff]  ;;  %v1020_v28 = vld [vmem:[#allocation2 + $0xc8] sm:$0x1]  ;;  %s10691_s21 = scalar_lea.vmem [#allocation14], %s7182_s18 }
  0xb3   : > { %v7644_v50 = vpack.c.bf16 %v1097_v41, %v1097_v41  ;;  %v1098_v51 = vmax.f32 %v1082_v42, 0.0  ;;  %v926_v52 = vadd.f32 %v9114_v18, %v910_v43  ;;  %1013 = vst [vmem:[#allocation2 + $0xb0] sm:$0x1] %v1012_v48  ;;  %v927_v56 = vadd.f32 %v9114_v18, %v911_v47  ;;  %v1017_v27 = vld [vmem:[#allocation2 + $0xc0] sm:$0x1]  ;;  %v7223_v39 = vld [vmem:[%s9005_s24 + $0xb0] sm:$0xff] }
  0xb4   : > { %v1099_v54 = vmax.f32 %v1083_v45, 0.0  ;;  %v941_v55 = vmax.f32 %v925_v46, 0.0  ;;  %v1015_v57 = vsel %vm9024_vm3, 0, %v1014_v44  ;;  %v1177_v58 = vshrl.u32 %v7643_v49, 16  ;;  %v7224_v40 = vld [vmem:[%s9005_s24 + $0xb8] sm:$0xff]  ;;  %v7206_v45 = vld [vmem:[%s9005_s24 + $0x68] sm:$0xff] }
  0xb5   : > { %v1180_v59 = vshll.u32 %v7643_v49, 16  ;;  %v1185_v60 = vshrl.u32 %v7644_v50, 16  ;;  %v1188_v61 = vshll.u32 %v7644_v50, 16  ;;  %1016 = vst [vmem:[#allocation2 + $0xb8] sm:$0x1] %v1015_v57  ;;  %v7645_v62 = vpack.c.bf16 %v1098_v51, %v1098_v51  ;;  %v7207_v50 = vld [vmem:[%s9005_s24 + $0x70] sm:$0xff] }
  0xb6   : > { %v7646_v63 = vpack.c.bf16 %v1099_v54, %v1099_v54  ;;  %v957_v0 = vpack.c.bf16 %v941_v55, %v941_v55  ;;  %v9152_v6 = vrot.slane %v1177_v58, 7  ;;  %v1336_v8 = vld [vmem:[#allocation2 + $0x90] sm:$0xf]  ;;  %v942_v9 = vmax.f32 %v926_v52, 0.0  ;;  %v1342_v12 = vld [vmem:[#allocation2 + $0x98] sm:$0xf] }
  0xb7   : > { %v9154_v7 = vrot.slane %v1185_v60, 7  ;;  %v943_v10 = vmax.f32 %v927_v56, 0.0  ;;  %v1193_v13 = vshrl.u32 %v7645_v62, 16  ;;  %v1196_v14 = vshll.u32 %v7645_v62, 16  ;;  %v1348_v31 = vld [vmem:[#allocation2 + $0xa0] sm:$0xf] }
  0xb8   : > { %v1201_v15 = vshrl.u32 %v7646_v63, 16  ;;  %v1204_v16 = vshll.u32 %v7646_v63, 16  ;;  %973 = vst.msk [vmem:[#allocation2 + $0x50] sm:$0xf] %vm374_vm0, %v957_v0  ;;  %v1182_v19 = vor.u32 %v1180_v59, %v9152_v6  ;;  %v958_v21 = vpack.c.bf16 %v942_v9, %v942_v9  ;;  %v1354_v32 = vld [vmem:[#allocation2 + $0xa8] sm:$0xf] }
  0xb9   : > { %v1190_v20 = vor.u32 %v1188_v61, %v9154_v7  ;;  %v959_v22 = vpack.c.bf16 %v943_v10, %v943_v10  ;;  %v9165_v23 = vrot.slane %v1193_v13, 7  ;;  %v1069_v25 = vmul.f32 %v7222_v2, %v9109_v17  ;;  %v7225_v51 = vld [vmem:[%s9005_s24 + $0x180] sm:$0xff]  ;;  %v7226_v56 = vld [vmem:[%s9005_s24 + $0x188] sm:$0xff]  ;;  %v7227_v62 = vld [vmem:[%s9005_s24 + $0x190] sm:$0xff]  ;;  %s7676_s14 = sshll.u32 %s8820_s9, 11  ;;  %s7065_s16 = sshll.u32 %s10691_s21, 4  ;;  %s10723_s16 = int_to_ptr.vmem [resolvable:$true] %s7065_s16 }
  0xba   : > { %v9167_v24 = vrot.slane %v1201_v15, 7  ;;  %v1084_v26 = vadd.f32 %v9114_v18, %v1068_v3  ;;  %v1337_v29 = vsel %vm9158_vm5, %v1182_v19, %v1336_v8  ;;  %974 = vst.msk [vmem:[#allocation2 + $0x58] sm:$0xf] %vm374_vm0, %v958_v21  ;;  %v912_v33 = vmul.f32 %v7204_v4, %v9109_v17  ;;  %v7209_v57 = vld [vmem:[%s9005_s24 + $0x140] sm:$0xff]  ;;  %v7228_v63 = vld [vmem:[%s9005_s24 + $0x198] sm:$0xff]  ;;  %v7210_v0 = vld [vmem:[%s9005_s24 + $0x148] sm:$0xff]  ;;  %s10721_s20 = scalar_lea.hbm %s10778_s8, %s7676_s14 }
  0xbb   : > { %v1343_v30 = vsel %vm9158_vm5, %v1190_v20, %v1342_v12  ;;  %975 = vst.msk [vmem:[#allocation2 + $0x60] sm:$0xf] %vm374_vm0, %v959_v22  ;;  %v913_v34 = vmul.f32 %v7205_v5, %v9109_v17  ;;  %1338 = vst [vmem:[#allocation2 + $0x90] sm:$0xf] %v1337_v29  ;;  %v1198_v35 = vor.u32 %v1196_v14, %v9165_v23  ;;  %v1018_v43 = vsel %vm9024_vm3, 0, %v1017_v27  ;;  %s7051_s9 = scalar_lea.sflag [#allocation8], %s9001_s25 }
  0xbc   : > { %1344 = vst [vmem:[#allocation2 + $0x98] sm:$0xf] %v1343_v30  ;;  %v1206_v36 = vor.u32 %v1204_v16, %v9167_v24  ;;  %v1085_v37 = vadd.f32 %v9114_v18, %v1069_v25  ;;  %v1100_v38 = vmax.f32 %v1084_v26, 0.0  ;;  %v928_v41 = vadd.f32 %v9114_v18, %v912_v33  ;;  %1019 = vst [vmem:[#allocation2 + $0xc0] sm:$0x1] %v1018_v43  ;;  %v7211_v33 = vld [vmem:[%s9005_s24 + $0x150] sm:$0xff] }
  0xbd   : > { %v929_v42 = vadd.f32 %v9114_v18, %v913_v34  ;;  %v1021_v44 = vsel %vm9024_vm3, 0, %v1020_v28  ;;  %v1349_v46 = vsel %vm9158_vm5, %v1198_v35, %v1348_v31  ;;  %v1070_v54 = vmul.f32 %v7223_v39, %v9109_v17  ;;  %v1023_v14 = vld [vmem:[#allocation2 + $0x1b0] sm:$0x1]  ;;  %s8665_s19 = scalar_lea.vmem %s10723_s16, 2048  ;;  %s8751_s11 = smov [#allocation14]  }
  0xbe   : > { %v1355_v47 = vsel %vm9158_vm5, %v1206_v36, %v1354_v32  ;;  %v1101_v48 = vmax.f32 %v1085_v37, 0.0  ;;  %v7647_v49 = vpack.c.bf16 %v1100_v38, %v1100_v38  ;;  %1022 = vst [vmem:[#allocation2 + $0xc8] sm:$0x1] %v1021_v44  ;;  %1350 = vst [vmem:[#allocation2 + $0xa0] sm:$0xf] %v1349_v46  ;;  %v944_v52 = vmax.f32 %v928_v41, 0.0  ;;  %p8666_p10 = scmp.ne.s32.totalorder %s10723_s16, %s8665_s19 }
  0xbf   : > { %1356 = vst [vmem:[#allocation2 + $0xa8] sm:$0xf] %v1355_v47  ;;  %v945_v53 = vmax.f32 %v929_v42, 0.0  ;;  %v1071_v55 = vmul.f32 %v7224_v40, %v9109_v17  ;;  %v914_v61 = vmul.f32 %v7206_v45, %v9109_v17  ;;  %v1086_v4 = vadd.f32 %v9114_v18, %v1070_v54  ;;  %v1360_v26 = vld [vmem:[#allocation2 + $0xb0] sm:$0xf]  ;;  %s8669_s13 = sshll.u32 %s8751_s11, 4  ;;  %s8670_s13 = int_to_ptr.vmem [resolvable:$false] %s8669_s13 }
  0xc0   : > { %v7648_v58 = vpack.c.bf16 %v1101_v48, %v1101_v48  ;;  %v1209_v59 = vshrl.u32 %v7647_v49, 16  ;;  %v1212_v60 = vshll.u32 %v7647_v49, 16  ;;  %v960_v2 = vpack.c.bf16 %v944_v52, %v944_v52  ;;  %v8364_v28 = vld [vmem:[#allocation2 + $0x48] ss:$8 sps:$4 sm:$0xff]   ;;  %v1366_v36 = vld [vmem:[#allocation2 + $0xb8] sm:$0xf]  ;;  %p8667_p3 = pnand %p8666_p10, %p8953_p5  ;;  %p8672_p12 = scmp.lt.s32.totalorder %s10723_s16, %s8670_s13 }
  0xc1   : > { %v961_v3 = vpack.c.bf16 %v945_v53, %v945_v53  ;;  %v1087_v5 = vadd.f32 %v9114_v18, %v1071_v55  ;;  %v915_v8 = vmul.f32 %v7207_v50, %v9109_v17  ;;  %v930_v9 = vadd.f32 %v9114_v18, %v914_v61  ;;  %v1026_v38 = vld [vmem:[#allocation2 + $0x1b8] sm:$0x1]  ;;  %v1029_v54 = vld [vmem:[#allocation2 + $0x1c0] sm:$0x1]  ;;  %v1032_v55 = vld [vmem:[#allocation2 + $0x1c8] sm:$0x1] }
  0xc2   : > { %v1072_v10 = vmul.f32 %v7225_v51, %v9109_v17  ;;  %v1073_v12 = vmul.f32 %v7226_v56, %v9109_v17  ;;  %976 = vst.msk [vmem:[#allocation2 + $0x68] sm:$0xf] %vm374_vm0, %v960_v2  ;;  %v917_v15 = vmul.f32 %v7209_v57, %v9109_v17  ;;  %v1074_v16 = vmul.f32 %v7227_v62, %v9109_v17  ;;  %v8365_v45 = vld [vmem:[#allocation2 + $0x58] ss:$8 sps:$4 sm:$0xff]   ;;  %p8668_p7 = pneg %p8667_p3 }
  0xc3   : > { %v8362_v13 = vld [vmem:[#allocation2 + $0x90] ss:$8 sps:$4 sm:$0xff]   ;;  %977 = vst.msk [vmem:[#allocation2 + $0x70] sm:$0xf] %vm374_vm0, %v961_v3  ;;  %v1075_v19 = vmul.f32 %v7228_v63, %v9109_v17  ;;  %v918_v20 = vmul.f32 %v7210_v0, %v9109_v17  ;;  %v9217_v21 = vrot.slane %v1209_v59, 7  ;;  %v1217_v22 = vshrl.u32 %v7648_v58, 16 }
  0xc4   : > { %v1220_v25 = vshll.u32 %v7648_v58, 16  ;;  %v1102_v27 = vmax.f32 %v1086_v4, 0.0  ;;  %2104 = vrot.lane.b32.xlu0 %v8362_v13, %s8750_s15  ;;  %v1103_v29 = vmax.f32 %v1087_v5, 0.0  ;;  %v931_v30 = vadd.f32 %v9114_v18, %v915_v8  ;;  %v1372_v56 = vld [vmem:[#allocation2 + $0xc0] sm:$0xf] }
  0xc5   : > { %v946_v31 = vmax.f32 %v930_v9, 0.0  ;;  %v1088_v32 = vadd.f32 %v9114_v18, %v1072_v10  ;;  %v1214_v35 = vor.u32 %v1212_v60, %v9217_v21  ;;  %v1089_v39 = vadd.f32 %v9114_v18, %v1073_v12  ;;  %v1378_v0 = vld [vmem:[#allocation2 + $0xc8] sm:$0xf]  ;;  %v7229_v3 = vld [vmem:[%s9005_s24 + $0x1a0] sm:$0xff] }
  0xc6   : > { %v8363_v34 = vld [vmem:[#allocation2 + $0xa0] ss:$8 sps:$4 sm:$0xff]   ;;  %v7649_v37 = vpack.c.bf16 %v1102_v27, %v1102_v27  ;;  %v933_v40 = vadd.f32 %v9114_v18, %v917_v15  ;;  %v9226_v41 = vrot.slane %v1217_v22, 7  ;;  %v7650_v42 = vpack.c.bf16 %v1103_v29, %v1103_v29 }
  0xc7   : > { %v947_v43 = vmax.f32 %v931_v30, 0.0  ;;  %v962_v44 = vpack.c.bf16 %v946_v31, %v946_v31  ;;  %2106 = vrot.lane.b32.xlu1 %v8363_v34, %s8750_s15  ;;  %v1361_v46 = vsel %vm9158_vm5, %v1214_v35, %v1360_v26  ;;  %v1024_v49 = vsel %vm9024_vm3, 0, %v1023_v14  ;;  %v8386_v4 = vld [vmem:[#allocation9 + $0x40] sm:$0xff]   ;;  %v7230_v31 = vld [vmem:[%s9005_s24 + $0x1a8] sm:$0xff] }
  0xc8   : > { %v1225_v47 = vshrl.u32 %v7649_v37, 16  ;;  %v1228_v48 = vshll.u32 %v7649_v37, 16  ;;  %1716 = vrot.lane.b32.xlu0 %v8364_v28, %s8750_s15  ;;  %v1222_v50 = vor.u32 %v1220_v25, %v9226_v41  ;;  %1362 = vst [vmem:[#allocation2 + $0xb0] sm:$0xf] %v1361_v46  ;;  %v1233_v51 = vshrl.u32 %v7650_v42, 16  ;;  %7677 = vmatprep.subr.bf16.mxu0 %v8386_v4  ;;  %v8387_v26 = vld [vmem:[#allocation9] sm:$0xff]  }
  0xc9   : > { %v1236_v52 = vshll.u32 %v7650_v42, 16  ;;  %v963_v53 = vpack.c.bf16 %v947_v43, %v947_v43  ;;  %978 = vst.msk [vmem:[#allocation2 + $0x78] sm:$0xf] %vm374_vm0, %v962_v44  ;;  %1025 = vst [vmem:[#allocation2 + $0x1b0] sm:$0x1] %v1024_v49  ;;  %v1090_v57 = vadd.f32 %v9114_v18, %v1074_v16  ;;  %v1091_v58 = vadd.f32 %v9114_v18, %v1075_v19  ;;  %v7231_v4 = vld [vmem:[%s9005_s24 + $0x1b0] sm:$0xff] }
  0xca   : > { %v919_v59 = vmul.f32 %v7211_v33, %v9109_v17  ;;  %v9240_v60 = vadd.f32 %v9114_v18, %v918_v20  ;;  %v1367_v61 = vsel %vm9158_vm5, %v1222_v50, %v1366_v36  ;;  %v9244_v62 = vrot.slane %v1225_v47, 7  ;;  %v8367_v5 = vld [vmem:[#allocation2 + $0x68] ss:$8 sps:$4 sm:$0xff]   ;;  %v7213_v33 = vld [vmem:[%s9005_s24 + $0x160] sm:$0xff]  ;;  %7678 = vmatpush3.bf16.msra.mxu0 %v8387_v26 }
  0xcb   : > { %v9246_v63 = vrot.slane %v1233_v51, 7  ;;  %979 = vst.msk [vmem:[#allocation2 + $0x80] sm:$0xf] %vm374_vm0, %v963_v53  ;;  %v1027_v2 = vsel %vm9024_vm3, 0, %v1026_v38  ;;  %1718 = vrot.lane.b32.xlu1 %v8365_v45, %s8750_s15  ;;  %1368 = vst [vmem:[#allocation2 + $0xb8] sm:$0xf] %v1367_v61  ;;  %v1076_v37 = vmul.f32 %v7229_v3, %v9109_v17  ;;  %v1077_v49 = vmul.f32 %v7230_v31, %v9109_v17 }
  0xcc   : > { %1028 = vst [vmem:[#allocation2 + $0x1b8] sm:$0x1] %v1027_v2  ;;  %v1104_v8 = vmax.f32 %v1088_v32, 0.0  ;;  %v1105_v9 = vmax.f32 %v1089_v39, 0.0  ;;  %v949_v10 = vmax.f32 %v933_v40, 0.0  ;;  %v1030_v12 = vsel %vm9024_vm3, 0, %v1029_v54 }
  0xcd   : > { %v1230_v13 = vor.u32 %v1228_v48, %v9244_v62  ;;  %v1238_v14 = vor.u32 %v1236_v52, %v9246_v63  ;;  %1031 = vst [vmem:[#allocation2 + $0x1c0] sm:$0x1] %v1030_v12  ;;  %v1033_v15 = vsel %vm9024_vm3, 0, %v1032_v55  ;;  %v1106_v16 = vmax.f32 %v1090_v57, 0.0  ;;  %v7212_v32 = vld [vmem:[%s9005_s24 + $0x158] sm:$0xff] }
  0xce   : > { %v7651_v19 = vpack.c.bf16 %v1104_v8, %v1104_v8  ;;  %v7652_v20 = vpack.c.bf16 %v1105_v9, %v1105_v9  ;;  %v965_v22 = vpack.c.bf16 %v949_v10, %v949_v10  ;;  %1034 = vst [vmem:[#allocation2 + $0x1c8] sm:$0x1] %v1033_v15  ;;  %v1107_v25 = vmax.f32 %v1091_v58, 0.0  ;;  %v1035_v44 = vld [vmem:[#allocation2 + $0x1d0] sm:$0x1] }
  0xcf   : > { %v1373_v27 = vsel %vm9158_vm5, %v1230_v13, %v1372_v56  ;;  %v1379_v28 = vsel %vm9158_vm5, %v1238_v14, %v1378_v0  ;;  %v7653_v29 = vpack.c.bf16 %v1106_v16, %v1106_v16  ;;  %v935_v30 = vadd.f32 %v9114_v18, %v919_v59  ;;  %1720 = vrot.lane.b32.xlu1 %v8367_v5, %s8750_s15  ;;  %v1038_v45 = vld [vmem:[#allocation2 + $0x1d8] sm:$0x1]  ;;  %v1041_v2 = vld [vmem:[#allocation2 + $0x1e0] sm:$0x1]  ;;  %v1044_v3 = vld [vmem:[#allocation2 + $0x1e8] sm:$0x1] }
  0xd0   : > { %1374 = vst [vmem:[#allocation2 + $0xc0] sm:$0xf] %v1373_v27  ;;  %1380 = vst [vmem:[#allocation2 + $0xc8] sm:$0xf] %v1379_v28  ;;  %v1241_v34 = vshrl.u32 %v7651_v19, 16  ;;  %v1244_v35 = vshll.u32 %v7651_v19, 16  ;;  %v7654_v36 = vpack.c.bf16 %v1107_v25, %v1107_v25  ;;  %v1092_v50 = vadd.f32 %v9114_v18, %v1076_v37 }
  0xd1   : > { %981 = vst.msk [vmem:[#allocation2 + $0x170] sm:$0xf] %vm374_vm0, %v965_v22  ;;  %v1249_v38 = vshrl.u32 %v7652_v20, 16  ;;  %v1252_v39 = vshll.u32 %v7652_v20, 16  ;;  %v1384_v40 = vld [vmem:[#allocation2 + $0x1b0] sm:$0xf]  ;;  %v920_v54 = vmul.f32 %v7212_v32, %v9109_v17  ;;  %v921_v55 = vmul.f32 %v7213_v33, %v9109_v17 }
  0xd2   : > { %v1257_v42 = vshrl.u32 %v7653_v29, 16  ;;  %v1260_v43 = vshll.u32 %v7653_v29, 16  ;;  %v8369_v46 = vld [vmem:[#allocation2 + $0x78] ss:$8 sps:$4 sm:$0xff]   ;;  %v9270_v47 = vrot.slane %v1241_v34, 7  ;;  %v1265_v48 = vshrl.u32 %v7654_v36, 16 }
  0xd3   : > { %v8366_v51 = vld [vmem:[#allocation2 + $0xb0] ss:$8 sps:$4 sm:$0xff]   ;;  %v9274_v52 = vrot.slane %v1249_v38, 7  ;;  %1722 = vrot.lane.b32.xlu1 %v8369_v46, %s8750_s15  ;;  %v1268_v59 = vshll.u32 %v7654_v36, 16  ;;  %v1093_v0 = vadd.f32 %v9114_v18, %v1077_v49  ;;  %v950_v10 = vmax.f32 %v9240_v60, 0.0  ;;  %v7214_v20 = vld [vmem:[%s9005_s24 + $0x168] sm:$0xff] }
  0xd4   : > { %v9276_v53 = vrot.slane %v1257_v42, 7  ;;  %v1246_v56 = vor.u32 %v1244_v35, %v9270_v47  ;;  %v1390_v57 = vld [vmem:[#allocation2 + $0x1b8] sm:$0xf]  ;;  %v9282_v58 = vrot.slane %v1265_v48, 7  ;;  %v1396_v61 = vld [vmem:[#allocation2 + $0x1c0] sm:$0xf]  ;;  %2108 = vrot.lane.b32.xlu0 %v8366_v51, %s8750_s15  ;;  %v936_v33 = vadd.f32 %v9114_v18, %v920_v54 }
  0xd5   : > { %v1254_v5 = vor.u32 %v1252_v39, %v9274_v52  ;;  %v1402_v9 = vld [vmem:[#allocation2 + $0x1c8] sm:$0xf]  ;;  %v951_v12 = vmax.f32 %v935_v30, 0.0  ;;  %v7232_v13 = vld [vmem:[%s9005_s24 + $0x1b8] sm:$0xff]  ;;  %v1036_v16 = vsel %vm9024_vm3, 0, %v1035_v44  ;;  %v1039_v19 = vsel %vm9024_vm3, 0, %v1038_v45 }
  0xd6   : > { %v1262_v8 = vor.u32 %v1260_v43, %v9276_v53  ;;  %v1385_v14 = vsel %vm9158_vm5, %v1246_v56, %v1384_v40  ;;  %v1270_v15 = vor.u32 %v1268_v59, %v9282_v58  ;;  %v7215_v22 = vld [vmem:[%s9005_s24 + $0x170] sm:$0xff]  ;;  %v966_v27 = vpack.c.bf16 %v950_v10, %v950_v10  ;;  %1037 = vst [vmem:[#allocation2 + $0x1d0] sm:$0x1] %v1036_v16  ;;  %v8388_v43 = vld [vmem:[#allocation9 + $0x48] sm:$0xff]  }
  0xd7   : > { %v8368_v25 = vld [vmem:[#allocation2 + $0xc0] ss:$8 sps:$4 sm:$0xff]   ;;  %1386 = vst [vmem:[#allocation2 + $0x1b0] sm:$0xf] %v1385_v14  ;;  %v1391_v60 = vsel %vm9158_vm5, %v1254_v5, %v1390_v57  ;;  %v967_v28 = vpack.c.bf16 %v951_v12, %v951_v12  ;;  %1040 = vst [vmem:[#allocation2 + $0x1d8] sm:$0x1] %v1039_v19  ;;  %v937_v34 = vadd.f32 %v9114_v18, %v921_v55  ;;  %7679 = vmatprep.subr.bf16.mxu0 %v8388_v43 }
  0xd8   : > { %v1397_v26 = vsel %vm9158_vm5, %v1262_v8, %v1396_v61  ;;  %1392 = vst [vmem:[#allocation2 + $0x1b8] sm:$0xf] %v1391_v60  ;;  %v8371_v29 = vld [vmem:[#allocation2 + $0x168] ss:$8 sps:$4 sm:$0xff]   ;;  %v1403_v30 = vsel %vm9158_vm5, %v1270_v15, %v1402_v9  ;;  %v1108_v31 = vmax.f32 %v1092_v50, 0.0  ;;  %v1109_v32 = vmax.f32 %v1093_v0, 0.0  ;;  %2110 = vrot.lane.b32.xlu0 %v8368_v25, %s8750_s15 }
  0xd9   : > { %1398 = vst [vmem:[#allocation2 + $0x1c0] sm:$0xf] %v1397_v26  ;;  %1404 = vst [vmem:[#allocation2 + $0x1c8] sm:$0xf] %v1403_v30  ;;  %v1042_v35 = vsel %vm9024_vm3, 0, %v1041_v2  ;;  %v1045_v36 = vsel %vm9024_vm3, 0, %v1044_v3  ;;  %v1078_v37 = vmul.f32 %v7231_v4, %v9109_v17  ;;  %1724 = vrot.lane.b32.xlu1 %v8371_v29, %s8750_s15  ;;  %v1079_v42 = vmul.f32 %v7232_v13, %v9109_v17 }
  0xda   : > { %982 = vst.msk [vmem:[#allocation2 + $0x178] sm:$0xf] %vm374_vm0, %v966_v27  ;;  %983 = vst.msk [vmem:[#allocation2 + $0x180] sm:$0xf] %vm374_vm0, %v967_v28  ;;  %v7655_v38 = vpack.c.bf16 %v1108_v31, %v1108_v31  ;;  %v7656_v39 = vpack.c.bf16 %v1109_v32, %v1109_v32  ;;  %v952_v40 = vmax.f32 %v936_v33, 0.0  ;;  %v953_v44 = vmax.f32 %v937_v34, 0.0 }
  0xdb   : > { %1043 = vst [vmem:[#allocation2 + $0x1e0] sm:$0x1] %v1042_v35  ;;  %1046 = vst [vmem:[#allocation2 + $0x1e8] sm:$0x1] %v1045_v36  ;;  %v1094_v45 = vadd.f32 %v9114_v18, %v1078_v37  ;;  %v922_v46 = vmul.f32 %v7214_v20, %v9109_v17  ;;  %v923_v48 = vmul.f32 %v7215_v22, %v9109_v17  ;;  %v8389_v49 = vld [vmem:[#allocation9 + $0x8] sm:$0xff]   ;;  %v8390_v61 = vld [vmem:[#allocation9 + $0x50] sm:$0xff]  }
  0xdc   : > { %v1273_v50 = vshrl.u32 %v7655_v38, 16  ;;  %v1276_v51 = vshll.u32 %v7655_v38, 16  ;;  %v1281_v54 = vshrl.u32 %v7656_v39, 16  ;;  %v1284_v55 = vshll.u32 %v7656_v39, 16  ;;  %7680 = vmatpush3.bf16.msra.mxu0 %v8389_v49  ;;  %v2208_v12 = vld [vmem:[#allocation2 + $0x90] sm:$0xf] }
  0xdd   : > { %v968_v56 = vpack.c.bf16 %v952_v40, %v952_v40  ;;  %v969_v57 = vpack.c.bf16 %v953_v44, %v953_v44  ;;  %v1110_v59 = vmax.f32 %v1094_v45, 0.0  ;;  %v1408_v3 = vld [vmem:[#allocation2 + $0x1d0] sm:$0xf]  ;;  %v1095_v4 = vadd.f32 %v9114_v18, %v1079_v42  ;;  %7681 = vmatprep.subr.bf16.mxu0 %v8390_v61  ;;  %v1339_v26 = vld [vmem:[#allocation2 + $0x94] sm:$0x1]  ;;  %v7208_v45 = vld [vmem:[%s9005_s24 + $0x78] sm:$0xff] }
  0xde   : > { %v9321_v0 = vrot.slane %v1273_v50, 7  ;;  %v9323_v2 = vrot.slane %v1281_v54, 7  ;;  %v938_v9 = vadd.f32 %v9114_v18, %v922_v46  ;;  %v939_v10 = vadd.f32 %v9114_v18, %v923_v48  ;;  %v1414_v19 = vld [vmem:[#allocation2 + $0x1d8] sm:$0xf]  ;;  %v1345_v27 = vld [vmem:[#allocation2 + $0x9c] sm:$0x1] }
  0xdf   : > { %v8370_v5 = vld [vmem:[#allocation2 + $0x1b0] ss:$8 sps:$4 sm:$0xff]   ;;  %984 = vst.msk [vmem:[#allocation2 + $0x188] sm:$0xf] %vm374_vm0, %v968_v56  ;;  %985 = vst.msk [vmem:[#allocation2 + $0x190] sm:$0xf] %vm374_vm0, %v969_v57  ;;  %v7657_v8 = vpack.c.bf16 %v1110_v59, %v1110_v59 }
  0xe0   : > { %v8372_v13 = vld [vmem:[#allocation2 + $0x1c0] ss:$8 sps:$4 sm:$0xff]   ;;  %v1278_v14 = vor.u32 %v1276_v51, %v9321_v0  ;;  %v1286_v15 = vor.u32 %v1284_v55, %v9323_v2  ;;  %2112 = vrot.lane.b32.xlu0 %v8370_v5, %s8750_s15  ;;  %v1111_v25 = vmax.f32 %v1095_v4, 0.0  ;;  %v954_v29 = vmax.f32 %v938_v9, 0.0  ;;  %v2210_v32 = vld [vmem:[#allocation2 + $0x98] sm:$0xf] }
  0xe1   : > { %v8373_v16 = vld [vmem:[#allocation2 + $0x178] ss:$8 sps:$4 sm:$0xff]   ;;  %v1289_v60 = vshrl.u32 %v7657_v8, 16  ;;  %v1292_v28 = vshll.u32 %v7657_v8, 16  ;;  %v955_v30 = vmax.f32 %v939_v10, 0.0  ;;  %v1183_v31 = vrot.slane %v9152_v6, 4 }
  0xe2   : > { %v1409_v20 = vsel %vm9158_vm5, %v1278_v14, %v1408_v3  ;;  %v1415_v22 = vsel %vm9158_vm5, %v1286_v15, %v1414_v19  ;;  %1726 = vrot.lane.b32.xlu1 %v8373_v16, %s8750_s15  ;;  %v7658_v33 = vpack.c.bf16 %v1111_v25, %v1111_v25  ;;  %v1191_v35 = vrot.slane %v9154_v7, 4  ;;  %v8391_v37 = vld [vmem:[#allocation9 + $0x10] sm:$0xff]   ;;  %v1420_v38 = vld [vmem:[#allocation2 + $0x1e0] sm:$0xf]  ;;  %v1351_v43 = vld [vmem:[#allocation2 + $0xa4] sm:$0x1] }
  0xe3   : > { %1410 = vst [vmem:[#allocation2 + $0x1d0] sm:$0xf] %v1409_v20  ;;  %1416 = vst [vmem:[#allocation2 + $0x1d8] sm:$0xf] %v1415_v22  ;;  %v9339_v34 = vrot.slane %v1289_v60, 7  ;;  %v2241_v36 = vshrl.u32 %v2208_v12, 16  ;;  %v970_v39 = vpack.c.bf16 %v954_v29, %v954_v29  ;;  %v971_v40 = vpack.c.bf16 %v955_v30, %v955_v30  ;;  %7682 = vmatpush3.bf16.msra.mxu0 %v8391_v37 }
  0xe4   : > { %2114 = vrot.lane.b32.xlu0 %v8372_v13, %s8750_s15  ;;  %v1340_v42 = vsel %vm9024_vm3, %v1183_v31, %v1339_v26  ;;  %vm1781_vm6 = vsmask.f32 3328  ;;  %vm1782_vm7 = vsmask.f32 7440  ;;  %v2244_v6 = vshll.u32 %v2208_v12, 16  ;;  %v8392_v46 = vld [vmem:[#allocation9 + $0x58] sm:$0xff]  }
  0xe5   : > { %v9345_v44 = vld [vmem:[#allocation2 + $0xa0] sm:$0xf]  ;;  %v1294_v7 = vor.u32 %v1292_v28, %v9339_v34  ;;  %1341 = vst [vmem:[#allocation2 + $0x94] sm:$0x1] %v1340_v42  ;;  %v1346_v49 = vsel %vm9024_vm3, %v1191_v35, %v1345_v27  ;;  %v1297_v50 = vshrl.u32 %v7658_v33, 16  ;;  %v1300_v51 = vshll.u32 %v7658_v33, 16  ;;  %7683 = vmatprep.subr.bf16.mxu0 %v8392_v46  ;;  %vm9386_vm8 = vmor %vm1781_vm6, %vm1782_vm7 }
  0xe6   : > { %v8375_v48 = vld [vmem:[#allocation2 + $0x188] ss:$8 sps:$4 sm:$0xff]   ;;  %986 = vst.msk [vmem:[#allocation2 + $0x198] sm:$0xf] %vm374_vm0, %v970_v39  ;;  %987 = vst.msk [vmem:[#allocation2 + $0x1a0] sm:$0xf] %vm374_vm0, %v971_v40  ;;  %v916_v20 = vmul.f32 %v7208_v45, %v9109_v17 }
  0xe7   : > { %1347 = vst [vmem:[#allocation2 + $0x9c] sm:$0x1] %v1346_v49  ;;  %v2243_v54 = vrot.slane %v2241_v36, 4  ;;  %v2246_v55 = vrot.slane %v2244_v6, 5  ;;  %v1357_v56 = vld [vmem:[#allocation2 + $0xac] sm:$0x1]  ;;  %1728 = vrot.lane.b32.xlu1 %v8375_v48, %s8750_s15  ;;  %v1421_v57 = vsel %vm9158_vm5, %v1294_v7, %v1420_v38 }
  0xe8   : > { %v2255_v59 = vshrl.u32 %v2210_v32, 16  ;;  %v2258_v61 = vshll.u32 %v2210_v32, 16  ;;  %v1199_v3 = vrot.slane %v9165_v23, 4  ;;  %v2214_v4 = vld [vmem:[#allocation2 + $0xa8] sm:$0xf]  ;;  %v8393_v5 = vld [vmem:[#allocation9 + $0x18] sm:$0xff]   ;;  %v9378_v6 = vadd.f32 %v9114_v18, %v916_v20 }
  0xe9   : > { %v9357_v8 = vrot.slane %v1297_v50, 7  ;;  %1422 = vst [vmem:[#allocation2 + $0x1e0] sm:$0xf] %v1421_v57  ;;  %v1426_v9 = vld [vmem:[#allocation2 + $0x1e8] sm:$0xf]  ;;  %v2247_v10 = vor.u32 %v2246_v55, %v2243_v54  ;;  %v1207_v12 = vrot.slane %v9167_v24, 4  ;;  %7684 = vmatpush3.bf16.msra.mxu0 %v8393_v5 }
  0xea   : > { %v2269_v13 = vshrl.u32 %v9345_v44, 16  ;;  %v7216_v14 = vld [vmem:[%s9005_s24 + $0x178] sm:$0xff]  ;;  %v8394_v15 = vld [vmem:[#allocation9 + $0x60] sm:$0xff]   ;;  %v1352_v19 = vsel %vm9024_vm3, %v1199_v3, %v1351_v43  ;;  %v2257_v25 = vrot.slane %v2255_v59, 4  ;;  %v2260_v60 = vrot.slane %v2258_v61, 5  ;;  %v8396_v32 = vld [vmem:[#allocation9 + $0x68] sm:$0xff]  }
  0xeb   : > { %v8374_v16 = vld [vmem:[#allocation2 + $0x1d0] ss:$8 sps:$4 sm:$0xff]   ;;  %v1302_v23 = vor.u32 %v1300_v51, %v9357_v8  ;;  %v9366_v22 = vrot.slane %v2247_v10, 4  ;;  %1353 = vst [vmem:[#allocation2 + $0xa4] sm:$0x1] %v1352_v19  ;;  %7685 = vmatprep.subr.bf16.mxu0 %v8394_v15  ;;  %v8395_v24 = vld [vmem:[#allocation9 + $0x20] sm:$0xff]   ;;  %v1358_v27 = vsel %vm9024_vm3, %v1207_v12, %v1357_v56  ;;  %v9381_v43 = vmul.f32 %v7216_v14, %v9109_v17 }
  0xec   : > { %v1363_v26 = vld [vmem:[#allocation2 + $0xb4] sm:$0x1]  ;;  %2116 = vrot.lane.b32.xlu0 %v8374_v16, %s8750_s15  ;;  %v2271_v28 = vrot.slane %v2269_v13, 4  ;;  %v2272_v29 = vshll.u32 %v9345_v44, 16  ;;  %v2283_v30 = vshrl.u32 %v2214_v4, 16  ;;  %v2261_v36 = vor.u32 %v2260_v60, %v2257_v25  ;;  %v8397_v57 = vld [vmem:[#allocation9 + $0x28] sm:$0xff]  }
  0xed   : > { %v2216_v31 = vld [vmem:[#allocation2 + $0xb0] sm:$0xf]  ;;  %v1427_v33 = vsel %vm9158_vm5, %v1302_v23, %v1426_v9  ;;  %v2209_v35 = vld [vmem:[#allocation2 + $0x94] sm:$0x1]  ;;  %1359 = vst [vmem:[#allocation2 + $0xac] sm:$0x1] %v1358_v27  ;;  %7686 = vmatpush3.bf16.msra.mxu0 %v8395_v24 }
  0xee   : > { %v2286_v37 = vshll.u32 %v2214_v4, 16  ;;  %v1215_v38 = vrot.slane %v9217_v21, 4  ;;  %v1369_v39 = vld [vmem:[#allocation2 + $0xbc] sm:$0x1]  ;;  %v9375_v40 = vld [vmem:[#allocation2 + $0xb8] sm:$0xf]  ;;  %7687 = vmatprep.subr.bf16.mxu0 %v8396_v32 }
  0xef   : > { %1428 = vst [vmem:[#allocation2 + $0x1e8] sm:$0xf] %v1427_v33  ;;  %v8377_v42 = vld [vmem:[#allocation2 + $0x198] ss:$8 sps:$4 sm:$0xff]   ;;  %v2211_v44 = vld [vmem:[#allocation2 + $0x9c] sm:$0x1] }
  0xf0   : > { %v2250_v45 = vshll.u32 %v2209_v35, 16  ;;  %v2262_v46 = vrot.slane %v2261_v36, 4  ;;  %v2274_v48 = vrot.slane %v2272_v29, 5  ;;  %v2285_v7 = vrot.slane %v2283_v30, 4  ;;  %1730 = vrot.lane.b32.xlu1 %v8377_v42, %s8750_s15  ;;  %v435_v9 = vld [vmem:[%s9005_s24] sm:$0xff] }
  0xf1   : > { %v2264_v18 = vshll.u32 %v2211_v44, 16  ;;  %v2288_v49 = vrot.slane %v2286_v37, 5  ;;  %v1223_v17 = vrot.slane %v9226_v41, 4  ;;  %v1364_v50 = vsel %vm9024_vm3, %v1215_v38, %v1363_v26  ;;  %v1375_v14 = vld [vmem:[#allocation2 + $0xc4] sm:$0x1]  ;;  %7688 = vmatpush3.bf16.msra.mxu0 %v8397_v57  ;;  %v8398_v37 = vld [vmem:[#allocation9 + $0x70] sm:$0xff]  }
  0xf2   : > { %v2252_v51 = vrot.slane %v2250_v45, 5  ;;  %v2275_v54 = vor.u32 %v2274_v48, %v2271_v28  ;;  %1365 = vst [vmem:[#allocation2 + $0xb4] sm:$0x1] %v1364_v50  ;;  %v2297_v55 = vshrl.u32 %v2216_v31, 16  ;;  %v2300_v56 = vshll.u32 %v2216_v31, 16  ;;  %v8400_v45 = vld [vmem:[#allocation9 + $0x30] sm:$0xff]   ;;  %7689 = vmatprep.subr.bf16.mxu0 %v8398_v37 }
  0xf3   : > { %v2266_v59 = vrot.slane %v2264_v18, 5  ;;  %v2213_v61 = vld [vmem:[#allocation2 + $0xa4] sm:$0x1]  ;;  %v2289_v3 = vor.u32 %v2288_v49, %v2285_v7  ;;  %v1370_v4 = vsel %vm9024_vm3, %v1223_v17, %v1369_v39  ;;  %v2311_v5 = vshrl.u32 %v9375_v40, 16  ;;  %v2220_v15 = vld [vmem:[#allocation2 + $0xc0] sm:$0xf] }
  0xf4   : > { %v2253_v41 = vsel %vm9386_vm8, %v9366_v22, %v2252_v51  ;;  %v2276_v10 = vrot.slane %v2275_v54, 4  ;;  %v2278_v12 = vshll.u32 %v2213_v61, 16  ;;  %1371 = vst [vmem:[#allocation2 + $0xbc] sm:$0x1] %v1370_v4  ;;  %v2299_v13 = vrot.slane %v2297_v55, 4 }
  0xf5   : > { %v2267_v16 = vsel %vm9386_vm8, %v2262_v46, %v2266_v59  ;;  %v2215_v19 = vld [vmem:[#allocation2 + $0xac] sm:$0x1]  ;;  %v2290_v20 = vrot.slane %v2289_v3, 4  ;;  %v2302_v23 = vrot.slane %v2300_v56, 5  ;;  %v2313_v25 = vrot.slane %v2311_v5, 4  ;;  %7690 = vmatpush3.bf16.msra.mxu0 %v8400_v45 }
  0xf6   : > { %v1381_v60 = vld [vmem:[#allocation2 + $0xcc] sm:$0x1]  ;;  %v8376_v26 = vld [vmem:[#allocation2 + $0x1e0] ss:$8 sps:$4 sm:$0xff]   ;;  %v8378_v24 = vld [vmem:[#allocation2 + $0x50] ss:$8 sps:$4 sm:$0xff]   ;;  %v7305_v27 = vcombine.low %v2253_v41, %v2267_v16 }
  0xf7   : > { %v2280_v28 = vrot.slane %v2278_v12, 5  ;;  %v2292_v22 = vshll.u32 %v2215_v19, 16  ;;  %v9405_v29 = vld [vmem:[%s10771_s1] ss:$0 sm:$0xff]  ;;  %v2303_v31 = vor.u32 %v2302_v23, %v2299_v13  ;;  %v2314_v32 = vshll.u32 %v9375_v40, 16  ;;  %2118 = vrot.lane.b32.xlu0 %v8376_v26, %s8750_s15 }
  0xf8   : > { %v9408_v30 = vmul.f32 %v9405_v29, %v435_v9  ;;  %v948_v33 = vmax.f32 %v9378_v6, 0.0  ;;  %v1231_v35 = vrot.slane %v9244_v62, 4  ;;  %v2222_v36 = vld [vmem:[#allocation2 + $0xc8] sm:$0xf]  ;;  %2488 = vrot.lane.b32.xlu1 %v7305_v27, %s8750_s15  ;;  %v1239_v42 = vrot.slane %v9246_v63, 4  ;;  %v437_v27 = vld [vmem:[%s9005_s24 + $0x10] sm:$0xff] }
  0xf9   : > { %v2281_v38 = vsel %vm9386_vm8, %v2276_v10, %v2280_v28  ;;  %v2294_v39 = vrot.slane %v2292_v22, 5  ;;  %v2325_v44 = vshrl.u32 %v2220_v15, 16  ;;  %v2217_v46 = vld [vmem:[#allocation2 + $0xb4] sm:$0x1]  ;;  %v2304_v40 = vrot.slane %v2303_v31, 4 }
  0xfa   : > { %v2316_v48 = vrot.slane %v2314_v32, 5  ;;  %v964_v6 = vpack.c.bf16 %v948_v33, %v948_v33  ;;  %v1376_v62 = vsel %vm9024_vm3, %v1231_v35, %v1375_v14  ;;  %v8379_v7 = vld [vmem:[#allocation2 + $0x60] ss:$8 sps:$4 sm:$0xff]   ;;  %v2306_v49 = vshll.u32 %v2217_v46, 16  ;;  %v1387_v50 = vld [vmem:[#allocation2 + $0x1b4] sm:$0x1] }
  0xfb   : > { %v2295_v18 = vsel %vm9386_vm8, %v2290_v20, %v2294_v39  ;;  %1377 = vst [vmem:[#allocation2 + $0xc4] sm:$0x1] %v1376_v62  ;;  %v1382_v17 = vsel %vm9024_vm3, %v1239_v42, %v1381_v60  ;;  %v2327_v63 = vrot.slane %v2325_v44, 4  ;;  %v2219_v54 = vld [vmem:[#allocation2 + $0xbc] sm:$0x1]  ;;  %v2328_v56 = vshll.u32 %v2220_v15, 16  ;;  %2648 = vrot.lane.b32.xlu0 %v8378_v24, %s8750_s15 }
  0xfc   : > { %v7306_v51 = vcombine.low %v2281_v38, %v2295_v18  ;;  %v2317_v55 = vor.u32 %v2316_v48, %v2313_v25  ;;  %980 = vst.msk [vmem:[#allocation2 + $0x88] sm:$0xf] %vm374_vm0, %v964_v6  ;;  %1383 = vst [vmem:[#allocation2 + $0xcc] sm:$0x1] %v1382_v17  ;;  %v2339_v57 = vshrl.u32 %v2222_v36, 16  ;;  %v2308_v61 = vrot.slane %v2306_v49, 5 }
  0xfd   : > { %v1393_v59 = vld [vmem:[#allocation2 + $0x1bc] sm:$0x1]  ;;  %v2320_v3 = vshll.u32 %v2219_v54, 16  ;;  %v2342_v4 = vshll.u32 %v2222_v36, 16  ;;  %v1247_v5 = vrot.slane %v9270_v47, 4  ;;  %v2330_v10 = vrot.slane %v2328_v56, 5 }
  0xfe   : > { %v2224_v9 = vld [vmem:[#allocation2 + $0x1b0] sm:$0xf]  ;;  %2490 = vrot.lane.b32.xlu1 %v7306_v51, %s8750_s15  ;;  %v2318_v41 = vrot.slane %v2317_v55, 4  ;;  %v2341_v12 = vrot.slane %v2339_v57, 4  ;;  %v1255_v13 = vrot.slane %v9274_v52, 4  ;;  %v2309_v15 = vsel %vm9386_vm8, %v2304_v40, %v2308_v61  ;;  %v436_v24 = vld [vmem:[%s9005_s24 + $0x8] sm:$0xff] }
  0xff   : > { %v2226_v14 = vld [vmem:[#allocation2 + $0x1b8] sm:$0xf]  ;;  %v2322_v16 = vrot.slane %v2320_v3, 5  ;;  %v2344_v19 = vrot.slane %v2342_v4, 5  ;;  %v1388_v20 = vsel %vm9024_vm3, %v1247_v5, %v1387_v50  ;;  %v2331_v23 = vor.u32 %v2330_v10, %v2327_v63  ;;  %2650 = vrot.lane.b32.xlu0 %v8379_v7, %s8750_s15  ;;  %v2228_v32 = vld [vmem:[#allocation2 + $0x1c0] sm:$0xf] }
 0x100   : > { %v8380_v47 = vld [vmem:[#allocation2 + $0x70] ss:$8 sps:$4 sm:$0xff]   ;;  %1389 = vst [vmem:[#allocation2 + $0x1b4] sm:$0x1] %v1388_v20  ;;  %v1394_v25 = vsel %vm9024_vm3, %v1255_v13, %v1393_v59  ;;  %v2353_v60 = vshrl.u32 %v2224_v9, 16  ;;  %v2356_v26 = vshll.u32 %v2224_v9, 16  ;;  %v9454_v62 = vmul.f32 %v9405_v29, %v436_v24 }
 0x101   : > { %v2323_v52 = vsel %vm9386_vm8, %v2318_v41, %v2322_v16  ;;  %v2345_v28 = vor.u32 %v2344_v19, %v2341_v12  ;;  %1395 = vst [vmem:[#allocation2 + $0x1bc] sm:$0x1] %v1394_v25  ;;  %v2367_v22 = vshrl.u32 %v2226_v14, 16  ;;  %v2370_v31 = vshll.u32 %v2226_v14, 16  ;;  %v1399_v39 = vld [vmem:[#allocation2 + $0x1c4] sm:$0x1] }
 0x102   : > { %v7307_v33 = vcombine.low %v2309_v15, %v2323_v52  ;;  %v2221_v35 = vld [vmem:[#allocation2 + $0xc4] sm:$0x1]  ;;  %v2332_v36 = vrot.slane %v2331_v23, 4  ;;  %v2355_v37 = vrot.slane %v2353_v60, 4  ;;  %v2358_v38 = vrot.slane %v2356_v26, 5  ;;  %v8402_v44 = vld [vmem:[#allocation9 + $0x78] sm:$0xff]  }
 0x103   : > { %v1405_v42 = vld [vmem:[#allocation2 + $0x1cc] sm:$0x1]  ;;  %v8381_v45 = vld [vmem:[#allocation2 + $0x80] ss:$8 sps:$4 sm:$0xff]   ;;  %v9457_v7 = vmul.f32 %v9405_v29, %v437_v27  ;;  %v2334_v18 = vshll.u32 %v2221_v35, 16  ;;  %v2346_v49 = vrot.slane %v2345_v28, 4  ;;  %7691 = vmatprep.subr.bf16.mxu0 %v8402_v44  ;;  %2652 = vrot.lane.b32.xlu0 %v8380_v47, %s8750_s15 }
 0x104   : > { %v2223_v46 = vld [vmem:[#allocation2 + $0xcc] sm:$0x1]  ;;  %v9443_v40 = vld [vmem:[%s10772_s2] ss:$0 sm:$0xff]  ;;  %2492 = vrot.lane.b32.xlu1 %v7307_v33, %s8750_s15  ;;  %v2359_v63 = vor.u32 %v2358_v38, %v2355_v37  ;;  %v2372_v50 = vrot.slane %v2370_v31, 5  ;;  %v1271_v51 = vrot.slane %v9282_v58, 4 }
 0x105   : > { %v9447_v48 = vadd.f32 %v9443_v40, %v9381_v43  ;;  %v9451_v6 = vadd.f32 %v9443_v40, %v9408_v30  ;;  %v2348_v17 = vshll.u32 %v2223_v46, 16  ;;  %v2369_v43 = vrot.slane %v2367_v22, 4  ;;  %v2230_v54 = vld [vmem:[#allocation2 + $0x1c8] sm:$0xf]  ;;  %v9463_v61 = vld [vmem:[#allocation2 + $0x1d0] sm:$0xf] }
 0x106   : > { %v1263_v30 = vrot.slane %v9276_v53, 4  ;;  %v2336_v55 = vrot.slane %v2334_v18, 5  ;;  %v2360_v57 = vrot.slane %v2359_v63, 4  ;;  %v2381_v59 = vshrl.u32 %v2228_v32, 16  ;;  %v8382_v3 = vld [vmem:[#allocation2 + $0x170] ss:$8 sps:$4 sm:$0xff]  }
 0x107   : > { %v2350_v56 = vrot.slane %v2348_v17, 5  ;;  %v2225_v4 = vld [vmem:[#allocation2 + $0x1b4] sm:$0x1]  ;;  %v2373_v5 = vor.u32 %v2372_v50, %v2369_v43  ;;  %v1406_v41 = vsel %vm9024_vm3, %v1271_v51, %v1405_v42  ;;  %v2384_v10 = vshll.u32 %v2228_v32, 16  ;;  %v1417_v16 = vld [vmem:[#allocation2 + $0x1dc] sm:$0x1]  ;;  %2654 = vrot.lane.b32.xlu0 %v8381_v45, %s8750_s15 }
 0x108   : > { %v1400_v9 = vsel %vm9024_vm3, %v1263_v30, %v1399_v39  ;;  %v1411_v53 = vld [vmem:[#allocation2 + $0x1d4] sm:$0x1]  ;;  %v2337_v58 = vsel %vm9386_vm8, %v2332_v36, %v2336_v55  ;;  %v2227_v13 = vld [vmem:[#allocation2 + $0x1bc] sm:$0x1]  ;;  %v2362_v14 = vshll.u32 %v2225_v4, 16  ;;  %v2383_v15 = vrot.slane %v2381_v59, 4 }
 0x109   : > { %v2351_v12 = vsel %vm9386_vm8, %v2346_v49, %v2350_v56  ;;  %1401 = vst [vmem:[#allocation2 + $0x1c4] sm:$0x1] %v1400_v9  ;;  %1407 = vst [vmem:[#allocation2 + $0x1cc] sm:$0x1] %v1406_v41  ;;  %v2374_v20 = vrot.slane %v2373_v5, 4  ;;  %v2376_v47 = vshll.u32 %v2227_v13, 16  ;;  %v9491_v56 = vadd.f32 %v9443_v40, %v9454_v62 }
 0x10a   : > { %v7308_v19 = vcombine.low %v2337_v58, %v2351_v12  ;;  %v2386_v23 = vrot.slane %v2384_v10, 5  ;;  %v2234_v25 = vld [vmem:[#allocation2 + $0x1d8] sm:$0xf]  ;;  %v2364_v26 = vrot.slane %v2362_v14, 5  ;;  %v2395_v24 = vshrl.u32 %v2230_v54, 16  ;;  %v8405_v35 = vld [vmem:[#allocation9 + $0xc0] sm:$0xff]  }
 0x10b   : > { %v8403_v60 = vld [vmem:[#allocation9 + $0x38] sm:$0xff]   ;;  %v2398_v27 = vshll.u32 %v2230_v54, 16  ;;  %v1279_v52 = vrot.slane %v9321_v0, 4  ;;  %v2378_v28 = vrot.slane %v2376_v47, 5  ;;  %v8383_v22 = vld [vmem:[#allocation2 + $0x180] ss:$8 sps:$4 sm:$0xff]   ;;  %2656 = vrot.lane.b32.xlu0 %v8382_v3, %s8750_s15  ;;  %8181 = vmatprep.subr.bf16.mxu1 %v8405_v35 }
 0x10c   : > { %2494 = vrot.lane.b32.xlu1 %v7308_v19, %s8750_s15  ;;  %v2387_v31 = vor.u32 %v2386_v23, %v2383_v15  ;;  %v1287_v32 = vrot.slane %v9323_v2, 4  ;;  %v2409_v33 = vshrl.u32 %v9463_v61, 16  ;;  %7692 = vmatpush3.bf16.msra.mxu0 %v8403_v60  ;;  %v2365_v36 = vsel %vm9386_vm8, %v2360_v57, %v2364_v26  ;;  %v1423_v17 = vld [vmem:[#allocation2 + $0x1e4] sm:$0x1]  ;;  %v2236_v63 = vld [vmem:[#allocation2 + $0x1e0] sm:$0xf] }
 0x10d   : > { %v2397_v37 = vrot.slane %v2395_v24, 4  ;;  %v2400_v38 = vrot.slane %v2398_v27, 5  ;;  %v1412_v39 = vsel %vm9024_vm3, %v1279_v52, %v1411_v53  ;;  %v2379_v0 = vsel %vm9386_vm8, %v2374_v20, %v2378_v28  ;;  %7741 = vmatprep.subr.bf16.mxu0 %v8405_v35  ;;  %v8384_v30 = vld [vmem:[#allocation2 + $0x190] ss:$8 sps:$4 sm:$0xff]   ;;  %v1429_v55 = vld [vmem:[#allocation2 + $0x1ec] sm:$0x1] }
 0x10e   : > { %v2388_v42 = vrot.slane %v2387_v31, 4  ;;  %1413 = vst [vmem:[#allocation2 + $0x1d4] sm:$0x1] %v1412_v39  ;;  %v1418_v2 = vsel %vm9024_vm3, %v1287_v32, %v1417_v16  ;;  %v2411_v44 = vrot.slane %v2409_v33, 4  ;;  %v7309_v45 = vcombine.low %v2365_v36, %v2379_v0  ;;  %v2238_v41 = vld [vmem:[#allocation2 + $0x1e8] sm:$0xf] }
 0x10f   : > { %v2401_v46 = vor.u32 %v2400_v38, %v2397_v37  ;;  %1419 = vst [vmem:[#allocation2 + $0x1dc] sm:$0x1] %v1418_v2  ;;  %v2412_v18 = vshll.u32 %v9463_v61, 16  ;;  %v2423_v49 = vshrl.u32 %v2234_v25, 16  ;;  %v2426_v51 = vshll.u32 %v2234_v25, 16  ;;  %2658 = vrot.lane.b32.xlu0 %v8383_v22, %s8750_s15  ;;  %v438_v12 = vld [vmem:[%s9005_s24 + $0x18] sm:$0xff] }
 0x110   : > { %v2229_v43 = vld [vmem:[#allocation2 + $0x1c4] sm:$0x1]  ;;  %v2231_v50 = vld [vmem:[#allocation2 + $0x1cc] sm:$0x1]  ;;  %v956_v54 = vmax.f32 %v9447_v48, 0.0  ;;  %v9495_v57 = vadd.f32 %v9443_v40, %v9457_v7  ;;  %2496 = vrot.lane.b32.xlu1 %v7309_v45, %s8750_s15  ;;  %v1295_v62 = vrot.slane %v9339_v34, 4  ;;  %v460_v38 = vmul.f32 %v9405_v29, %v438_v12 }
 0x111   : > { %v2390_v59 = vshll.u32 %v2229_v43, 16  ;;  %v2402_v61 = vrot.slane %v2401_v46, 4  ;;  %v2404_v3 = vshll.u32 %v2231_v50, 16  ;;  %v2414_v4 = vrot.slane %v2412_v18, 5  ;;  %v439_v13 = vld [vmem:[%s9005_s24 + $0x20] sm:$0xff] }
 0x112   : > { %v2425_v48 = vrot.slane %v2423_v49, 4  ;;  %v2428_v5 = vrot.slane %v2426_v51, 5  ;;  %v972_v9 = vpack.c.bf16 %v956_v54, %v956_v54  ;;  %v1303_v58 = vrot.slane %v9357_v8, 4  ;;  %v9512_v25 = vld [vmem:[#allocation9 + $0x80] sm:$0xff]   ;;  %v387_v36 = vld [vmem:[#allocation2 + $0x8] sm:$0x1] }
 0x113   : > { %v2392_v10 = vrot.slane %v2390_v59, 5  ;;  %v2406_v53 = vrot.slane %v2404_v3, 5  ;;  %v2415_v7 = vor.u32 %v2414_v4, %v2411_v44  ;;  %v1424_v15 = vsel %vm9024_vm3, %v1295_v62, %v1423_v17  ;;  %2660 = vrot.lane.b32.xlu0 %v8384_v30, %s8750_s15  ;;  %8189 = vmatpush3.bf16.msra.mxu1 %v9512_v25  ;;  %v379_v35 = vld [vmem:[#allocation2 + $0x4] sm:$0x1]  ;;  %v1749_v49 = vld [vmem:[#allocation2] sm:$0xf] }
 0x114   : > { %v2429_v14 = vor.u32 %v2428_v5, %v2425_v48  ;;  %988 = vst.msk [vmem:[#allocation2 + $0x1a8] sm:$0xf] %vm374_vm0, %v972_v9  ;;  %v2437_v16 = vshrl.u32 %v2236_v63, 16  ;;  %v2440_v19 = vshll.u32 %v2236_v63, 16  ;;  %1425 = vst [vmem:[#allocation2 + $0x1e4] sm:$0x1] %v1424_v15  ;;  %v1430_v8 = vsel %vm9024_vm3, %v1303_v58, %v1429_v55 }
 0x115   : > { %v2393_v20 = vsel %vm9386_vm8, %v2388_v42, %v2392_v10  ;;  %v2407_v34 = vsel %vm9386_vm8, %v2402_v61, %v2406_v53  ;;  %v2233_v47 = vld [vmem:[#allocation2 + $0x1d4] sm:$0x1]  ;;  %v2416_v23 = vrot.slane %v2415_v7, 4  ;;  %1431 = vst [vmem:[#allocation2 + $0x1ec] sm:$0x1] %v1430_v8  ;;  %v2451_v31 = vshrl.u32 %v2238_v41, 16 }
 0x116   : > { %v7310_v60 = vcombine.low %v2393_v20, %v2407_v34  ;;  %v2235_v26 = vld [vmem:[#allocation2 + $0x1dc] sm:$0x1]  ;;  %v2418_v24 = vshll.u32 %v2233_v47, 16  ;;  %v2430_v27 = vrot.slane %v2429_v14, 4  ;;  %v2439_v52 = vrot.slane %v2437_v16, 4 }
 0x117   : > { %v2432_v28 = vshll.u32 %v2235_v26, 16  ;;  %v2442_v22 = vrot.slane %v2440_v19, 5  ;;  %v2454_v32 = vshll.u32 %v2238_v41, 16  ;;  %v495_v37 = vmax.f32 %v9451_v6, 0.0  ;;  %v741_v5 = vld [vmem:[#allocation2 + $0xc] sm:$0x1] }
 0x118   : > { %2498 = vrot.lane.b32.xlu1 %v7310_v60, %s8750_s15  ;;  %v2420_v33 = vrot.slane %v2418_v24, 5  ;;  %v461_v39 = vmul.f32 %v9405_v29, %v439_v13  ;;  %v2453_v2 = vrot.slane %v2451_v31, 4  ;;  %v380_v46 = vsel %vm9024_vm3, 0, %v379_v35  ;;  %v390_v12 = vld [vmem:[#allocation2 + $0x10] sm:$0x1]  ;;  %v9534_v19 = vld [vmem:[#allocation9 + $0xc8] sm:$0xff]  }
 0x119   : > { %v2434_v0 = vrot.slane %v2432_v28, 5  ;;  %v2443_v42 = vor.u32 %v2442_v22, %v2439_v52  ;;  %v2456_v44 = vrot.slane %v2454_v32, 5  ;;  %v388_v18 = vsel %vm9024_vm3, 0, %v387_v36  ;;  %381 = vst [vmem:[#allocation2 + $0x4] sm:$0x1] %v380_v46  ;;  %8182 = vmatprep.subr.bf16.mxu1 %v9534_v19  ;;  %v441_v32 = vld [vmem:[%s9005_s24 + $0x30] sm:$0xff] }
 0x11a   : > { %v2421_v45 = vsel %vm9386_vm8, %v2416_v23, %v2420_v33  ;;  %v7627_v17 = vpack.c.bf16 %v495_v37, %v495_v37  ;;  %389 = vst [vmem:[#allocation2 + $0x8] sm:$0x1] %v388_v18  ;;  %v1785_v30 = vshrl.u32 %v1749_v49, 16  ;;  %v1788_v55 = vshll.u32 %v1749_v49, 16  ;;  %v393_v13 = vld [vmem:[#allocation2 + $0x18] sm:$0x1] }
 0x11b   : > { %v2435_v6 = vsel %vm9386_vm8, %v2430_v27, %v2434_v0  ;;  %v8385_v63 = vld [vmem:[#allocation2 + $0x1a0] ss:$8 sps:$4 sm:$0xff]   ;;  %v2444_v43 = vrot.slane %v2443_v42, 4  ;;  %v2457_v50 = vor.u32 %v2456_v44, %v2453_v2  ;;  %v2237_v54 = vld [vmem:[#allocation2 + $0x1e4] sm:$0x1]  ;;  %v496_v62 = vmax.f32 %v9491_v56, 0.0 }
 0x11c   : > { %v7311_v51 = vcombine.low %v2421_v45, %v2435_v6  ;;  %v576_v59 = vshrl.u32 %v7627_v17, 16  ;;  %v579_v61 = vshll.u32 %v7627_v17, 16  ;;  %2662 = vrot.lane.b32.xlu0 %v8385_v63, %s8750_s15  ;;  %v2239_v3 = vld [vmem:[#allocation2 + $0x1ec] sm:$0x1]  ;;  %v2446_v4 = vshll.u32 %v2237_v54, 16 }
 0x11d   : > { %v2458_v48 = vrot.slane %v2457_v50, 4  ;;  %v1787_v9 = vrot.slane %v1785_v30, 4  ;;  %v2460_v41 = vshll.u32 %v2239_v3, 16  ;;  %v1790_v10 = vrot.slane %v1788_v55, 5  ;;  %v440_v23 = vld [vmem:[%s9005_s24 + $0x28] sm:$0xff] }
 0x11e   : > { %2500 = vrot.lane.b32.xlu1 %v7311_v51, %s8750_s15  ;;  %v578_v53 = vrot.slane %v576_v59, 7  ;;  %v497_v7 = vmax.f32 %v9495_v57, 0.0  ;;  %v2448_v58 = vrot.slane %v2446_v4, 5  ;;  %v7628_v14 = vpack.c.bf16 %v496_v62, %v496_v62  ;;  %v747_v37 = vld [vmem:[#allocation2 + $0x14] sm:$0x1] }
 0x11f   : > { %v482_v15 = vadd.f32 %v9443_v40, %v460_v38  ;;  %v483_v16 = vadd.f32 %v9443_v40, %v461_v39  ;;  %v2462_v20 = vrot.slane %v2460_v41, 5  ;;  %v1791_v56 = vor.u32 %v1790_v10, %v1787_v9  ;;  %v396_v6 = vld [vmem:[#allocation2 + $0x20] sm:$0x1]  ;;  %v399_v63 = vld [vmem:[#allocation2 + $0x28] sm:$0x1] }
 0x120   : > { %v581_v34 = vor.u32 %v579_v61, %v578_v53  ;;  %v582_v47 = vrot.slane %v578_v53, 4  ;;  %v2449_v8 = vsel %vm9386_vm8, %v2444_v43, %v2448_v58  ;;  %v391_v57 = vsel %vm9024_vm3, 0, %v390_v12  ;;  %v1750_v52 = vld [vmem:[#allocation2 + $0x4] sm:$0x1]  ;;  %v753_v50 = vld [vmem:[#allocation2 + $0x1c] sm:$0x1] }
 0x121   : > { %v394_v60 = vsel %vm9024_vm3, 0, %v393_v13  ;;  %v7629_v26 = vpack.c.bf16 %v497_v7, %v497_v7  ;;  %v2463_v24 = vsel %vm9386_vm8, %v2458_v48, %v2462_v20  ;;  %v738_v27 = vld [vmem:[#allocation2 + $0x8] sm:$0xf]  ;;  %v9546_v28 = vrot.slane %v1791_v56, 4  ;;  %392 = vst [vmem:[#allocation2 + $0x10] sm:$0x1] %v391_v57 }
 0x122   : > { %v742_v22 = vsel %vm9024_vm3, %v582_v47, %v741_v5  ;;  %395 = vst [vmem:[#allocation2 + $0x18] sm:$0x1] %v394_v60  ;;  %v584_v31 = vshrl.u32 %v7628_v14, 16  ;;  %v7312_v33 = vcombine.low %v2449_v8, %v2463_v24  ;;  %v1794_v35 = vshll.u32 %v1750_v52, 16  ;;  %v443_v48 = vld [vmem:[%s9005_s24 + $0x100] sm:$0xff]  ;;  %v444_v7 = vld [vmem:[%s9005_s24 + $0x108] sm:$0xff] }
 0x123   : > { %v739_v36 = vsel %vm9158_vm5, %v581_v34, %v738_v27  ;;  %743 = vst [vmem:[#allocation2 + $0xc] sm:$0x1] %v742_v22  ;;  %v587_v38 = vshll.u32 %v7628_v14, 16  ;;  %v592_v0 = vshrl.u32 %v7629_v26, 16  ;;  %v595_v42 = vshll.u32 %v7629_v26, 16  ;;  %v9573_v20 = vld [vmem:[#allocation9 + $0x88] sm:$0xff]  }
 0x124   : > { %740 = vst [vmem:[#allocation2 + $0x8] sm:$0xf] %v739_v36  ;;  %v586_v39 = vrot.slane %v584_v31, 7  ;;  %v498_v2 = vmax.f32 %v482_v15, 0.0  ;;  %2502 = vrot.lane.b32.xlu1 %v7312_v33, %s8750_s15  ;;  %vm1651_vm9 = vcmask 523264   ;;  %v9554_v44 = vrot.slane %v1794_v35, 5  ;;  %8190 = vmatpush3.bf16.msra.mxu1 %v9573_v20 }
 0x125   : > { %v499_v45 = vmax.f32 %v483_v16, 0.0  ;;  %v462_v46 = vmul.f32 %v9405_v29, %v440_v23  ;;  %v594_v17 = vrot.slane %v592_v0, 7  ;;  %v397_v30 = vsel %vm9024_vm3, 0, %v396_v6  ;;  %v759_v62 = vld [vmem:[#allocation2 + $0x24] sm:$0x1]  ;;  %v445_v33 = vld [vmem:[%s9005_s24 + $0x110] sm:$0xff] }
 0x126   : > { %v589_v18 = vor.u32 %v587_v38, %v586_v39  ;;  %v590_v49 = vrot.slane %v586_v39, 4  ;;  %v7630_v43 = vpack.c.bf16 %v498_v2, %v498_v2  ;;  %v400_v51 = vsel %vm9024_vm3, 0, %v399_v63  ;;  %398 = vst [vmem:[#allocation2 + $0x20] sm:$0x1] %v397_v30  ;;  %v765_v15 = vld [vmem:[#allocation2 + $0x2c] sm:$0x1] }
 0x127   : > { %v7631_v54 = vpack.c.bf16 %v499_v45, %v499_v45  ;;  %v463_v55 = vmul.f32 %v9405_v29, %v441_v32  ;;  %v597_v59 = vor.u32 %v595_v42, %v594_v17  ;;  %v598_v61 = vrot.slane %v594_v17, 4  ;;  %401 = vst [vmem:[#allocation2 + $0x28] sm:$0x1] %v400_v51  ;;  %v402_v38 = vld [vmem:[#allocation2 + $0x30] sm:$0x1] }
 0x128   : > { %v748_v3 = vsel %vm9024_vm3, %v590_v49, %v747_v37  ;;  %v600_v4 = vshrl.u32 %v7630_v43, 16  ;;  %v744_v5 = vld [vmem:[#allocation2 + $0x10] sm:$0xf]  ;;  %v603_v41 = vshll.u32 %v7630_v43, 16  ;;  %v484_v53 = vadd.f32 %v9443_v40, %v462_v46  ;;  %v405_v39 = vld [vmem:[#allocation2 + $0x38] sm:$0x1] }
 0x129   : > { %v750_v9 = vld [vmem:[#allocation2 + $0x18] sm:$0xf]  ;;  %749 = vst [vmem:[#allocation2 + $0x14] sm:$0x1] %v748_v3  ;;  %v608_v10 = vshrl.u32 %v7631_v54, 16  ;;  %v745_v12 = vsel %vm9158_vm5, %v589_v18, %v744_v5  ;;  %v754_v14 = vsel %vm9024_vm3, %v598_v61, %v753_v50  ;;  %v1797_v56 = vsel %vm9386_vm8, %v9546_v28, %v9554_v44 }
 0x12a   : > { %v1752_v58 = vld [vmem:[#allocation2 + $0xc] sm:$0x1]  ;;  %v751_v13 = vsel %vm9158_vm5, %v597_v59, %v750_v9  ;;  %v602_v16 = vrot.slane %v600_v4, 7  ;;  %746 = vst [vmem:[#allocation2 + $0x10] sm:$0xf] %v745_v12  ;;  %v485_v8 = vadd.f32 %v9443_v40, %v463_v55  ;;  %v611_v52 = vshll.u32 %v7631_v54, 16 }
 0x12b   : > { %v1751_v34 = vld [vmem:[#allocation2 + $0x8] sm:$0xf]  ;;  %v1808_v47 = vshll.u32 %v1752_v58, 16  ;;  %752 = vst [vmem:[#allocation2 + $0x18] sm:$0xf] %v751_v13  ;;  %v610_v23 = vrot.slane %v608_v10, 7  ;;  %v465_v32 = vmul.f32 %v9405_v29, %v443_v48  ;;  %v466_v0 = vmul.f32 %v9405_v29, %v444_v7 }
 0x12c   : > { %755 = vst [vmem:[#allocation2 + $0x1c] sm:$0x1] %v754_v14  ;;  %v1799_v57 = vshrl.u32 %v1751_v34, 16  ;;  %v1802_v60 = vshll.u32 %v1751_v34, 16  ;;  %v8399_v26 = vld [vmem:[#allocation2] ss:$8 sps:$4 sm:$0xff]   ;;  %v605_v24 = vor.u32 %v603_v41, %v602_v16  ;;  %v467_v48 = vmul.f32 %v9405_v29, %v445_v33 }
 0x12d   : > { %v606_v27 = vrot.slane %v602_v16, 4  ;;  %v614_v22 = vrot.slane %v610_v23, 4  ;;  %v500_v31 = vmax.f32 %v484_v53, 0.0  ;;  %1652 = vst.msk [vmem:[#allocation4] sm:$0xff] %vm1651_vm9, %v8399_v26  ;;  %v756_v42 = vld [vmem:[#allocation2 + $0x20] sm:$0xf]  ;;  %v613_v45 = vor.u32 %v611_v52, %v610_v23 }
 0x12e   : > { %v1801_v35 = vrot.slane %v1799_v57, 4  ;;  %v1804_v36 = vrot.slane %v1802_v60, 5  ;;  %v762_v2 = vld [vmem:[#allocation2 + $0x28] sm:$0xf]  ;;  %v403_v18 = vsel %vm9024_vm3, 0, %v402_v38  ;;  %v406_v49 = vsel %vm9024_vm3, 0, %v405_v39 }
 0x12f   : > { %v760_v37 = vsel %vm9024_vm3, %v606_v27, %v759_v62  ;;  %v766_v46 = vsel %vm9024_vm3, %v614_v22, %v765_v15  ;;  %vm1740_vm10 = vcmask 1048064   ;;  %v1810_v6 = vrot.slane %v1808_v47, 5  ;;  %404 = vst [vmem:[#allocation2 + $0x30] sm:$0x1] %v403_v18  ;;  %407 = vst [vmem:[#allocation2 + $0x38] sm:$0x1] %v406_v49 }
 0x130   : > { %761 = vst [vmem:[#allocation2 + $0x24] sm:$0x1] %v760_v37  ;;  %v1805_v17 = vor.u32 %v1804_v36, %v1801_v35  ;;  %v1754_v63 = vld [vmem:[#allocation2 + $0x14] sm:$0x1]  ;;  %v757_v43 = vsel %vm9158_vm5, %v605_v24, %v756_v42  ;;  %767 = vst [vmem:[#allocation2 + $0x2c] sm:$0x1] %v766_v46  ;;  %v7632_v50 = vpack.c.bf16 %v500_v31, %v500_v31 }
 0x131   : > { %v1822_v30 = vshll.u32 %v1754_v63, 16  ;;  %758 = vst [vmem:[#allocation2 + $0x20] sm:$0xf] %v757_v43  ;;  %v763_v51 = vsel %vm9158_vm5, %v613_v45, %v762_v2  ;;  %v501_v54 = vmax.f32 %v485_v8, 0.0  ;;  %v9598_v55 = vadd.f32 %v9443_v40, %v465_v32  ;;  %v1753_v61 = vld [vmem:[#allocation2 + $0x10] sm:$0xf] }
 0x132   : > { %v1806_v59 = vrot.slane %v1805_v17, 4  ;;  %v1755_v3 = vld [vmem:[#allocation2 + $0x18] sm:$0xf]  ;;  %764 = vst [vmem:[#allocation2 + $0x28] sm:$0xf] %v763_v51  ;;  %v616_v4 = vshrl.u32 %v7632_v50, 16  ;;  %v9602_v5 = vadd.f32 %v9443_v40, %v466_v0  ;;  %v9617_v44 = vadd.f32 %v9443_v40, %v467_v48 }
 0x133   : > { %v1756_v9 = vld [vmem:[#allocation2 + $0x1c] sm:$0x1]  ;;  %v1813_v62 = vshrl.u32 %v1753_v61, 16  ;;  %v1816_v41 = vshll.u32 %v1753_v61, 16  ;;  %v1824_v10 = vrot.slane %v1822_v30, 5  ;;  %v1827_v53 = vshrl.u32 %v1755_v3, 16 }
 0x134   : > { %v1811_v7 = vsel %vm9386_vm8, %v1806_v59, %v1810_v6  ;;  %v1830_v58 = vshll.u32 %v1755_v3, 16  ;;  %v1836_v12 = vshll.u32 %v1756_v9, 16  ;;  %v9606_v13 = vpack.c.bf16 %v501_v54, %v501_v54  ;;  %v8401_v34 = vld [vmem:[#allocation2 + $0x10] ss:$8 sps:$4 sm:$0xff]   ;;  %v771_v32 = vld [vmem:[#allocation2 + $0x34] sm:$0x1] }
 0x135   : > { %v7281_v29 = vcombine.low %v1797_v56, %v1811_v7  ;;  %v1815_v14 = vrot.slane %v1813_v62, 4  ;;  %v1818_v15 = vrot.slane %v1816_v41, 5  ;;  %v1829_v16 = vrot.slane %v1827_v53, 4  ;;  %1653 = vst.msk [vmem:[#allocation4 + $0x28] sm:$0xff] %vm1651_vm9, %v8401_v34  ;;  %v777_v43 = vld [vmem:[#allocation2 + $0x3c] sm:$0x1] }
 0x136   : > { %v1832_v47 = vrot.slane %v1830_v58, 5  ;;  %v1838_v23 = vrot.slane %v1836_v12, 5  ;;  %v618_v57 = vrot.slane %v616_v4, 7  ;;  %v619_v60 = vshll.u32 %v7632_v50, 16  ;;  %v768_v52 = vld [vmem:[#allocation2 + $0x30] sm:$0xf]  ;;  %v2105_v42 = vpop.permute.xlu0 %2104 }
 0x137   : > { %v1758_v8 = vld [vmem:[#allocation2 + $0x24] sm:$0x1]  ;;  %2040 = vst.msk [vmem:[#allocation4 + $0x8] sm:$0xff] %vm1651_vm9, %v7281_v29  ;;  %v1819_v26 = vor.u32 %v1818_v15, %v1815_v14  ;;  %v1760_v24 = vld [vmem:[#allocation2 + $0x2c] sm:$0x1]  ;;  %v624_v28 = vshrl.u32 %v9606_v13, 16 }
 0x138   : > { %v1850_v27 = vshll.u32 %v1758_v8, 16  ;;  %v1833_v56 = vor.u32 %v1832_v47, %v1829_v16  ;;  %v1757_v22 = vld [vmem:[#allocation2 + $0x20] sm:$0xf]  ;;  %v1864_v31 = vshll.u32 %v1760_v24, 16  ;;  %v621_v33 = vor.u32 %v619_v60, %v618_v57  ;;  %2128 = vst.msk [vmem:[#allocation4 + $0x8] sm:$0xff] %vm1740_vm10, %v2105_v42  ;;  %v9630_v3 = vld [vmem:[#allocation9 + $0xd0] sm:$0xff]  }
 0x139   : > { %v622_v35 = vrot.slane %v618_v57, 4  ;;  %v1820_v36 = vrot.slane %v1819_v26, 4  ;;  %v1759_v37 = vld [vmem:[#allocation2 + $0x28] sm:$0xf]  ;;  %v1841_v38 = vshrl.u32 %v1757_v22, 16  ;;  %v1844_v39 = vshll.u32 %v1757_v22, 16  ;;  %v2107_v4 = vpop.permute.xlu1 %2106  ;;  %8183 = vmatprep.subr.bf16.mxu1 %v9630_v3 }
 0x13a   : > { %v9619_v0 = vrot.slane %v1850_v27, 5  ;;  %v1834_v2 = vrot.slane %v1833_v56, 4  ;;  %v1855_v45 = vshrl.u32 %v1759_v37, 16  ;;  %v1858_v46 = vshll.u32 %v1759_v37, 16  ;;  %v8404_v63 = vld [vmem:[#allocation2 + $0x20] ss:$8 sps:$4 sm:$0xff]   ;;  %v1717_v58 = vpop.permute.xlu0 %1716 }
 0x13b   : > { %v9621_v18 = vrot.slane %v1864_v31, 5  ;;  %v1825_v49 = vsel %vm9386_vm8, %v1820_v36, %v1824_v10  ;;  %v1843_v17 = vrot.slane %v1841_v38, 4  ;;  %v1846_v6 = vrot.slane %v1844_v39, 5  ;;  %v383_v61 = vld [vmem:[#allocation2 + $0x124] sm:$0x1]  ;;  %1654 = vst.msk [vmem:[#allocation4 + $0x50] sm:$0xff] %vm1651_vm9, %v8404_v63 }
 0x13c   : > { %v769_v50 = vsel %vm9158_vm5, %v621_v33, %v768_v52  ;;  %v1839_v30 = vsel %vm9386_vm8, %v1834_v2, %v1838_v23  ;;  %v1857_v51 = vrot.slane %v1855_v45, 4  ;;  %v1860_v54 = vrot.slane %v1858_v46, 5  ;;  %v774_v62 = vld [vmem:[#allocation2 + $0x38] sm:$0xf]  ;;  %v411_v53 = vld [vmem:[#allocation2 + $0x128] sm:$0x1] }
 0x13d   : > { %v626_v59 = vrot.slane %v624_v28, 7  ;;  %770 = vst [vmem:[#allocation2 + $0x30] sm:$0xf] %v769_v50  ;;  %v7282_v48 = vcombine.low %v1825_v49, %v1839_v30  ;;  %v1847_v9 = vor.u32 %v1846_v6, %v1843_v17  ;;  %v627_v41 = vshll.u32 %v9606_v13, 16  ;;  %v9636_v7 = vld [vmem:[#allocation9 + $0x90] sm:$0xff]   ;;  %1741 = vst.msk [vmem:[#allocation4] sm:$0xff] %vm1740_vm10, %v1717_v58  ;;  %v1719_v27 = vpop.permute.xlu1 %1718 }
 0x13e   : > { %v772_v10 = vsel %vm9024_vm3, %v622_v35, %v771_v32  ;;  %v1861_v12 = vor.u32 %v1860_v54, %v1857_v51  ;;  %v384_v14 = vsel %vm9024_vm3, 0, %v383_v61  ;;  %v412_v15 = vsel %vm9024_vm3, 0, %v411_v53  ;;  %v1765_v16 = vld [vmem:[#allocation2 + $0x120] sm:$0xf]  ;;  %8191 = vmatpush3.bf16.msra.mxu1 %v9636_v7  ;;  %v414_v26 = vld [vmem:[#allocation2 + $0x130] sm:$0x1] }
 0x13f   : > { %v630_v29 = vrot.slane %v626_v59, 4  ;;  %773 = vst [vmem:[#allocation2 + $0x34] sm:$0x1] %v772_v10  ;;  %2041 = vst.msk [vmem:[#allocation4 + $0x30] sm:$0xff] %vm1651_vm9, %v7282_v48  ;;  %v1848_v13 = vrot.slane %v1847_v9, 4  ;;  %v629_v34 = vor.u32 %v627_v41, %v626_v59  ;;  %v1897_v47 = vshrl.u32 %v1765_v16, 16 }
 0x140   : > { %385 = vst [vmem:[#allocation2 + $0x124] sm:$0x1] %v384_v14  ;;  %413 = vst [vmem:[#allocation2 + $0x128] sm:$0x1] %v412_v15  ;;  %v1900_v23 = vshll.u32 %v1765_v16, 16  ;;  %v1862_v8 = vrot.slane %v1861_v12, 4 }
 0x141   : > { %2129 = vst.msk [vmem:[#allocation4 + $0x30] sm:$0xff] %vm1740_vm10, %v2107_v4  ;;  %v778_v57 = vsel %vm9024_vm3, %v630_v29, %v777_v43  ;;  %v503_v60 = vmax.f32 %v9598_v55, 0.0  ;;  %v417_v24 = vld [vmem:[#allocation2 + $0x138] sm:$0x1]  ;;  %v1853_v52 = vsel %vm9386_vm8, %v1848_v13, %v9619_v0  ;;  %v775_v28 = vsel %vm9158_vm5, %v629_v34, %v774_v62  ;;  %1742 = vst.msk [vmem:[#allocation4 + $0x28] sm:$0xff] %vm1740_vm10, %v1719_v27  ;;  %v2977_v32 = vld [vmem:[#allocation4 + $0x8] sm:$0xff]  ;;  %v1721_v17 = vpop.permute.xlu1 %1720 }
 0x142   : > { %779 = vst [vmem:[#allocation2 + $0x3c] sm:$0x1] %v778_v57  ;;  %v1899_v56 = vrot.slane %v1897_v47, 4  ;;  %v1902_v22 = vrot.slane %v1900_v23, 5  ;;  %v446_v31 = vld [vmem:[%s9005_s24 + $0x118] sm:$0xff]  ;;  %v1867_v55 = vsel %vm9386_vm8, %v1862_v8, %v9621_v18  ;;  %v415_v35 = vsel %vm9024_vm3, 0, %v414_v26  ;;  %3360 = vmatprep.mubr.bf16.mxu0 %v2977_v32 }
 0x143   : > { %776 = vst [vmem:[#allocation2 + $0x38] sm:$0xf] %v775_v28  ;;  %v7635_v33 = vpack.c.bf16 %v503_v60, %v503_v60  ;;  %v418_v36 = vsel %vm9024_vm3, 0, %v417_v24  ;;  %v9664_v37 = vld [vmem:[#allocation9 + $0xd8] sm:$0xff]   ;;  %v7283_v38 = vcombine.low %v1853_v52, %v1867_v55  ;;  %416 = vst [vmem:[#allocation2 + $0x130] sm:$0x1] %v415_v35 }
 0x144   : > { %v1761_v39 = vld [vmem:[#allocation2 + $0x30] sm:$0xf]  ;;  %v1903_v0 = vor.u32 %v1902_v22, %v1899_v56  ;;  %419 = vst [vmem:[#allocation2 + $0x138] sm:$0x1] %v418_v36  ;;  %v504_v42 = vmax.f32 %v9602_v5, 0.0  ;;  %v505_v2 = vmax.f32 %v9617_v44, 0.0  ;;  %8184 = vmatprep.subr.bf16.mxu1 %v9664_v37 }
 0x145   : > { %v1869_v45 = vshrl.u32 %v1761_v39, 16  ;;  %v1872_v46 = vshll.u32 %v1761_v39, 16  ;;  %v640_v18 = vshrl.u32 %v7635_v33, 16  ;;  %v447_v49 = vld [vmem:[%s9005_s24 + $0x120] sm:$0xff]  ;;  %2042 = vst.msk [vmem:[#allocation4 + $0x58] sm:$0xff] %vm1651_vm9, %v7283_v38  ;;  %v643_v63 = vshll.u32 %v7635_v33, 16  ;;  %v1723_v32 = vpop.permute.xlu1 %1722 }
 0x146   : > { %v1762_v6 = vld [vmem:[#allocation2 + $0x34] sm:$0x1]  ;;  %v7636_v43 = vpack.c.bf16 %v504_v42, %v504_v42  ;;  %v9671_v50 = vpack.c.bf16 %v505_v2, %v505_v2  ;;  %v9676_v5 = vld [vmem:[%s10771_s1] ss:$0 sm:$0xff]  ;;  %v9679_v30 = vld [vmem:[#allocation9 + $0x98] sm:$0xff]   ;;  %1743 = vst.msk [vmem:[#allocation4 + $0x50] sm:$0xff] %vm1740_vm10, %v1721_v17  ;;  %v2109_v8 = vpop.permute.xlu0 %2108 }
 0x147   : > { %v468_v44 = vmul.f32 %v9676_v5, %v446_v31  ;;  %v1871_v51 = vrot.slane %v1869_v45, 4  ;;  %v1874_v54 = vrot.slane %v1872_v46, 5  ;;  %v1878_v59 = vshll.u32 %v1762_v6, 16  ;;  %v2976_v61 = vld [vmem:[#allocation4] sm:$0xff]  ;;  %v789_v4 = vld [vmem:[#allocation2 + $0x12c] sm:$0x1]  ;;  %8192 = vmatpush3.bf16.msra.mxu1 %v9679_v30 }
 0x148   : > { %3361 = vmatmul.mubr.bf16.vlgmr.msra.gmra.mrb[0].mxu0 %v2976_v61  ;;  %v786_v48 = vld [vmem:[#allocation2 + $0x128] sm:$0xf]  ;;  %v9682_v9 = vrot.slane %v1903_v0, 4  ;;  %v642_v62 = vrot.slane %v640_v18, 7  ;;  %v2982_v41 = vld [vmem:[#allocation4 + $0x30] sm:$0xff]  ;;  %v648_v10 = vshrl.u32 %v7636_v43, 16  ;;  %v469_v15 = vmul.f32 %v9676_v5, %v447_v49 }
 0x149   : > { %v1764_v53 = vld [vmem:[#allocation2 + $0x3c] sm:$0x1]  ;;  %v1875_v58 = vor.u32 %v1874_v54, %v1871_v51  ;;  %7742 = vmatpush3.bf16.msra.mxu0 %v9512_v25  ;;  %v9686_v12 = vld [vmem:[#allocation2 + $0x124] sm:$0x1]  ;;  %3368 = vmatprep.mubr.bf16.mxu0 %v2982_v41  ;;  %v651_v29 = vshll.u32 %v7636_v43, 16  ;;  %v656_v14 = vshrl.u32 %v9671_v50, 16  ;;  %v490_v23 = vadd.f32 %v9443_v40, %v468_v44 }
 0x14a   : > { %v1763_v16 = vld [vmem:[#allocation2 + $0x38] sm:$0xf]  ;;  %v1892_v13 = vshll.u32 %v1764_v53, 16  ;;  %v645_v34 = vor.u32 %v643_v63, %v642_v62  ;;  %v646_v47 = vrot.slane %v642_v62, 4  ;;  %7743 = vmatprep.subr.bf16.mxu0 %v9534_v19  ;;  %v9694_v25 = vrot.slane %v1878_v59, 5  ;;  %2130 = vst.msk [vmem:[#allocation4 + $0x58] sm:$0xff] %vm1740_vm10, %v2109_v8 }
 0x14b   : > { %v9692_v57 = vrot.slane %v1875_v58, 4  ;;  %v1883_v60 = vshrl.u32 %v1763_v16, 16  ;;  %v1886_v26 = vshll.u32 %v1763_v16, 16  ;;  %v8406_v24 = vld [vmem:[#allocation2 + $0x30] ss:$8 sps:$4 sm:$0xff]   ;;  %v1906_v27 = vshll.u32 %v9686_v12, 16 }
 0x14c   : > { %v787_v52 = vsel %vm9158_vm5, %v645_v34, %v786_v48  ;;  %v790_v19 = vsel %vm9024_vm3, %v646_v47, %v789_v4  ;;  %v792_v28 = vld [vmem:[#allocation2 + $0x130] sm:$0xf]  ;;  %v795_v40 = vld [vmem:[#allocation2 + $0x134] sm:$0x1]  ;;  %v650_v56 = vrot.slane %v648_v10, 7  ;;  %v1894_v55 = vrot.slane %v1892_v13, 5 }
 0x14d   : > { %v1885_v22 = vrot.slane %v1883_v60, 4  ;;  %v1888_v31 = vrot.slane %v1886_v26, 5  ;;  %1655 = vst.msk [vmem:[#allocation4 + $0x78] sm:$0xff] %vm1651_vm9, %v8406_v24  ;;  %788 = vst [vmem:[#allocation2 + $0x128] sm:$0xf] %v787_v52  ;;  %v2981_v35 = vld [vmem:[#allocation4 + $0x28] sm:$0xff]  ;;  %7744 = vmatpush3.bf16.msra.mxu0 %v9573_v20  ;;  %v1881_v20 = vsel %vm9386_vm8, %v9692_v57, %v9694_v25  ;;  %v2111_v26 = vpop.permute.xlu0 %2110 }
 0x14e   : > { %791 = vst [vmem:[#allocation2 + $0x12c] sm:$0x1] %v790_v19  ;;  %v801_v33 = vld [vmem:[#allocation2 + $0x13c] sm:$0x1]  ;;  %v9707_v36 = vld [vmem:[%s10772_s2] ss:$0 sm:$0xff]  ;;  %v653_v39 = vor.u32 %v651_v29, %v650_v56  ;;  %7745 = vmatprep.subr.bf16.mxu0 %v9630_v3 }
 0x14f   : > { %v491_v38 = vadd.f32 %v9707_v36, %v469_v15  ;;  %1744 = vst.msk [vmem:[#allocation4 + $0x78] sm:$0xff] %vm1740_vm10, %v1723_v32  ;;  %v654_v0 = vrot.slane %v650_v56, 4  ;;  %v658_v42 = vrot.slane %v656_v14, 7  ;;  %v659_v2 = vshll.u32 %v9671_v50, 16  ;;  %v420_v45 = vld [vmem:[#allocation2 + $0x140] sm:$0x1] }
 0x150   : > { %v448_v46 = vld [vmem:[%s9005_s24 + $0x128] sm:$0xff]  ;;  %v1889_v18 = vor.u32 %v1888_v31, %v1885_v22  ;;  %v798_v49 = vld [vmem:[#allocation2 + $0x138] sm:$0xf]  ;;  %v421_v17 = vsel %vm9024_vm3, 0, %v420_v45  ;;  %v506_v63 = vmax.f32 %v490_v23, 0.0  ;;  %v449_v43 = vld [vmem:[%s9005_s24 + $0x130] sm:$0xff]  ;;  %v793_v54 = vsel %vm9158_vm5, %v653_v39, %v792_v28  ;;  %3369 = vmatmul.mubr.bf16.gmra.mrb[4].mxu0 %v2981_v35 }
 0x151   : > { %v423_v6 = vld [vmem:[#allocation2 + $0x148] sm:$0x1]  ;;  %v7249_v44 = vld [vmem:[%s9005_s24 + $0xc0] sm:$0xff]  ;;  %v661_v50 = vor.u32 %v659_v2, %v658_v42  ;;  %v662_v51 = vrot.slane %v658_v42, 4  ;;  %v796_v3 = vsel %vm9024_vm3, %v654_v0, %v795_v40  ;;  %422 = vst [vmem:[#allocation2 + $0x140] sm:$0x1] %v421_v17  ;;  %7746 = vmatpush3.bf16.msra.mxu0 %v9636_v7  ;;  %v470_v29 = vmul.f32 %v9676_v5, %v448_v46 }
 0x152   : > { %v7250_v59 = vld [vmem:[%s9005_s24 + $0xc8] sm:$0xff]  ;;  %v8420_v61 = vld [vmem:[#allocation9 + $0xe0] sm:$0xff]   ;;  %v1890_v4 = vrot.slane %v1889_v18, 4  ;;  %794 = vst [vmem:[#allocation2 + $0x130] sm:$0xf] %v793_v54  ;;  %v424_v48 = vsel %vm9024_vm3, 0, %v423_v6  ;;  %v7638_v41 = vpack.c.bf16 %v506_v63, %v506_v63  ;;  %7747 = vmatprep.subr.bf16.mxu0 %v9664_v37  ;;  %v471_v57 = vmul.f32 %v9676_v5, %v449_v43 }
 0x153   : > { %797 = vst [vmem:[#allocation2 + $0x134] sm:$0x1] %v796_v3  ;;  %v507_v62 = vmax.f32 %v491_v38, 0.0  ;;  %v9730_v10 = vld [vmem:[#allocation9 + $0xa0] sm:$0xff]   ;;  %v9732_v53 = vrot.slane %v1906_v27, 5  ;;  %v799_v58 = vsel %vm9158_vm5, %v661_v50, %v798_v49  ;;  %v802_v12 = vsel %vm9024_vm3, %v662_v51, %v801_v33  ;;  %8185 = vmatprep.subr.bf16.mxu1 %v8420_v61  ;;  %v2986_v31 = vld [vmem:[#allocation4 + $0x50] sm:$0xff]  ;;  %v2113_v3 = vpop.permute.xlu0 %2112 }
 0x154   : > { %425 = vst [vmem:[#allocation2 + $0x148] sm:$0x1] %v424_v48  ;;  %v1895_v14 = vsel %vm9386_vm8, %v1890_v4, %v1894_v55  ;;  %800 = vst [vmem:[#allocation2 + $0x138] sm:$0xf] %v799_v58  ;;  %v664_v15 = vshrl.u32 %v7638_v41, 16  ;;  %v667_v16 = vshll.u32 %v7638_v41, 16  ;;  %8193 = vmatpush3.bf16.msra.mxu1 %v9730_v10  ;;  %v1507_v25 = vmul.f32 %v9676_v5, %v7249_v44 }
 0x155   : > { %803 = vst [vmem:[#allocation2 + $0x13c] sm:$0x1] %v802_v12  ;;  %v9741_v7 = vpack.c.bf16 %v507_v62, %v507_v62  ;;  %v426_v13 = vld [vmem:[#allocation2 + $0x150] sm:$0x1]  ;;  %v429_v34 = vld [vmem:[#allocation2 + $0x158] sm:$0x1]  ;;  %v7284_v47 = vcombine.low %v1881_v20, %v1895_v14  ;;  %v1508_v60 = vmul.f32 %v9676_v5, %v7250_v59  ;;  %7748 = vmatpush3.bf16.msra.mxu0 %v9679_v30  ;;  %v1725_v30 = vpop.permute.xlu1 %1724 }
 0x156   : > { %v1767_v23 = vld [vmem:[#allocation2 + $0x128] sm:$0xf]  ;;  %v1768_v8 = vld [vmem:[#allocation2 + $0x12c] sm:$0x1]  ;;  %v9748_v28 = vrot.slane %v664_v15, 7  ;;  %v427_v56 = vsel %vm9024_vm3, 0, %v426_v13  ;;  %7749 = vmatprep.subr.bf16.mxu0 %v8420_v61  ;;  %v1909_v0 = vsel %vm9386_vm8, %v9682_v9, %v9732_v53  ;;  %v492_v45 = vadd.f32 %v9707_v36, %v470_v29 }
 0x157   : > { %v1911_v24 = vshrl.u32 %v1767_v23, 16  ;;  %v1914_v27 = vshll.u32 %v1767_v23, 16  ;;  %v1920_v52 = vshll.u32 %v1768_v8, 16  ;;  %v8408_v19 = vld [vmem:[#allocation2 + $0x120] ss:$8 sps:$4 sm:$0xff]   ;;  %2043 = vst.msk [vmem:[#allocation4 + $0x80] sm:$0xff] %vm1651_vm9, %v7284_v47  ;;  %v9768_v46 = vadd.f32 %v9707_v36, %v471_v57 }
 0x158   : > { %v672_v37 = vshrl.u32 %v9741_v7, 16  ;;  %v675_v40 = vshll.u32 %v9741_v7, 16  ;;  %v430_v22 = vsel %vm9024_vm3, 0, %v429_v34  ;;  %2131 = vst.msk [vmem:[#allocation4 + $0x80] sm:$0xff] %vm1740_vm10, %v2111_v26  ;;  %v804_v35 = vld [vmem:[#allocation2 + $0x140] sm:$0xf]  ;;  %v669_v38 = vor.u32 %v667_v16, %v9748_v28 }
 0x159   : > { %v1913_v55 = vrot.slane %v1911_v24, 4  ;;  %v1916_v32 = vrot.slane %v1914_v27, 5  ;;  %v1922_v33 = vrot.slane %v1920_v52, 5  ;;  %1656 = vst.msk [vmem:[#allocation4 + $0xa0] sm:$0xff] %vm1651_vm9, %v8408_v19  ;;  %428 = vst [vmem:[#allocation2 + $0x150] sm:$0x1] %v427_v56  ;;  %v1523_v50 = vadd.f32 %v9707_v36, %v1507_v25  ;;  %7750 = vmatpush3.bf16.msra.mxu0 %v9730_v10  ;;  %v1727_v16 = vpop.permute.xlu1 %1726  ;;  %v2115_v56 = vpop.permute.xlu0 %2114 }
 0x15a   : > { %431 = vst [vmem:[#allocation2 + $0x158] sm:$0x1] %v430_v22  ;;  %v2987_v39 = vld [vmem:[#allocation4 + $0x58] sm:$0xff]  ;;  %1745 = vst.msk [vmem:[#allocation4 + $0xa0] sm:$0xff] %vm1740_vm10, %v1725_v30  ;;  %v1769_v42 = vld [vmem:[#allocation2 + $0x130] sm:$0xf]  ;;  %v805_v9 = vsel %vm9158_vm5, %v669_v38, %v804_v35  ;;  %v1524_v51 = vadd.f32 %v9707_v36, %v1508_v60 }
 0x15b   : > { %v1770_v2 = vld [vmem:[#allocation2 + $0x134] sm:$0x1]  ;;  %3376 = vmatprep.mubr.bf16.mxu0 %v2987_v39  ;;  %v1917_v20 = vor.u32 %v1916_v32, %v1913_v55  ;;  %v1925_v18 = vshrl.u32 %v1769_v42, 16  ;;  %v1928_v49 = vshll.u32 %v1769_v42, 16  ;;  %v1771_v63 = vld [vmem:[#allocation2 + $0x138] sm:$0xf] }
 0x15c   : > { %v1934_v17 = vshll.u32 %v1770_v2, 16  ;;  %3377 = vmatmul.mubr.bf16.gmra.mrb[8].mxu0 %v2986_v31  ;;  %v7251_v6 = vld [vmem:[%s9005_s24 + $0xd0] sm:$0xff]  ;;  %v1772_v43 = vld [vmem:[#allocation2 + $0x13c] sm:$0x1]  ;;  %v807_v44 = vld [vmem:[#allocation2 + $0x144] sm:$0x1] }
 0x15d   : > { %v9776_v54 = vmul.f32 %v9676_v5, %v7251_v6  ;;  %v1918_v59 = vrot.slane %v1917_v20, 4  ;;  %v1927_v61 = vrot.slane %v1925_v18, 4  ;;  %v1930_v4 = vrot.slane %v1928_v49, 5  ;;  %v8410_v62 = vld [vmem:[#allocation2 + $0x130] ss:$8 sps:$4 sm:$0xff]   ;;  %v9801_v2 = vpop.permute.xlu1 %1728 }
 0x15e   : > { %v9779_v48 = vrot.slane %v1934_v17, 5  ;;  %806 = vst [vmem:[#allocation2 + $0x140] sm:$0xf] %v805_v9  ;;  %v1939_v41 = vshrl.u32 %v1771_v63, 16  ;;  %v1942_v53 = vshll.u32 %v1771_v63, 16  ;;  %v1948_v58 = vshll.u32 %v1772_v43, 16 }
 0x15f   : > { %v813_v12 = vld [vmem:[#allocation2 + $0x14c] sm:$0x1]  ;;  %v670_v29 = vrot.slane %v9748_v28, 4  ;;  %v1923_v14 = vsel %vm9386_vm8, %v1918_v59, %v1922_v33  ;;  %v1931_v15 = vor.u32 %v1930_v4, %v1927_v61  ;;  %1657 = vst.msk [vmem:[#allocation4 + $0xc8] sm:$0xff] %vm1651_vm9, %v8410_v62  ;;  %v674_v10 = vrot.slane %v672_v37, 7  ;;  %v2992_v25 = vld [vmem:[#allocation4 + $0x80] sm:$0xff] }
 0x160   : > { %v508_v13 = vmax.f32 %v492_v45, 0.0  ;;  %v7285_v34 = vcombine.low %v1909_v0, %v1923_v14  ;;  %v1941_v47 = vrot.slane %v1939_v41, 4  ;;  %v1944_v23 = vrot.slane %v1942_v53, 5  ;;  %1746 = vst.msk [vmem:[#allocation4 + $0xc8] sm:$0xff] %vm1740_vm10, %v1727_v16  ;;  %v810_v57 = vld [vmem:[#allocation2 + $0x148] sm:$0xf]  ;;  %3384 = vmatprep.mubr.bf16.mxu0 %v2992_v25 }
 0x161   : > { %v1950_v8 = vrot.slane %v1948_v58, 5  ;;  %v1932_v60 = vrot.slane %v1931_v15, 4  ;;  %v677_v26 = vor.u32 %v675_v40, %v674_v10  ;;  %v678_v24 = vrot.slane %v674_v10, 4  ;;  %v8418_v31 = vld [vmem:[#allocation2 + $0x8] ss:$8 sps:$4 sm:$0xff]   ;;  %v7252_v32 = vld [vmem:[%s9005_s24 + $0xd8] sm:$0xff]  ;;  %v9812_v58 = vpop.permute.xlu0 %2116 }
 0x162   : > { %v808_v27 = vsel %vm9024_vm3, %v670_v29, %v807_v44  ;;  %2044 = vst.msk [vmem:[#allocation4 + $0xa8] sm:$0xff] %vm1651_vm9, %v7285_v34  ;;  %v1945_v52 = vor.u32 %v1944_v23, %v1941_v47  ;;  %v509_v19 = vmax.f32 %v9768_v46, 0.0  ;;  %v7640_v28 = vpack.c.bf16 %v508_v13, %v508_v13  ;;  %v816_v45 = vld [vmem:[#allocation2 + $0x150] sm:$0xf]  ;;  %2584 = vst.msk [vmem:[#allocation4 + $0x18] sm:$0xff] %vm1651_vm9, %v8418_v31  ;;  %v2991_v18 = vld [vmem:[#allocation4 + $0x78] sm:$0xff]  ;;  %v9821_v23 = vpop.permute.xlu1 %1730 }
 0x163   : > { %809 = vst [vmem:[#allocation2 + $0x144] sm:$0x1] %v808_v27  ;;  %v1539_v37 = vmax.f32 %v1523_v50, 0.0  ;;  %2132 = vst.msk [vmem:[#allocation4 + $0xa8] sm:$0xff] %vm1740_vm10, %v2113_v3  ;;  %v1937_v7 = vsel %vm9386_vm8, %v1932_v60, %v9779_v48  ;;  %v811_v40 = vsel %vm9158_vm5, %v677_v26, %v810_v57  ;;  %v814_v22 = vsel %vm9024_vm3, %v678_v24, %v813_v12  ;;  %v819_v17 = vld [vmem:[#allocation2 + $0x154] sm:$0x1] }
 0x164   : > { %v1540_v55 = vmax.f32 %v1524_v51, 0.0  ;;  %v1946_v33 = vrot.slane %v1945_v52, 4  ;;  %812 = vst [vmem:[#allocation2 + $0x148] sm:$0xf] %v811_v40  ;;  %815 = vst [vmem:[#allocation2 + $0x14c] sm:$0x1] %v814_v22  ;;  %v7641_v35 = vpack.c.bf16 %v509_v19, %v509_v19  ;;  %3385 = vmatmul.mubr.bf16.gmra.mrb[12].mxu0 %v2991_v18  ;;  %v1510_v3 = vmul.f32 %v9676_v5, %v7252_v32 }
 0x165   : > { %v1773_v30 = vld [vmem:[#allocation2 + $0x140] sm:$0xf]  ;;  %v680_v38 = vshrl.u32 %v7640_v28, 16  ;;  %v1555_v39 = vpack.c.bf16 %v1539_v37, %v1539_v37  ;;  %v683_v46 = vshll.u32 %v7640_v28, 16  ;;  %v8424_v44 = vld [vmem:[#allocation9 + $0xe8] sm:$0xff]   ;;  %v1525_v53 = vadd.f32 %v9707_v36, %v9776_v54 }
 0x166   : > { %v1953_v0 = vshrl.u32 %v1773_v30, 16  ;;  %v1956_v42 = vshll.u32 %v1773_v30, 16  ;;  %v1556_v20 = vpack.c.bf16 %v1540_v55, %v1540_v55  ;;  %v1951_v49 = vsel %vm9386_vm8, %v1946_v33, %v1950_v8  ;;  %v822_v59 = vld [vmem:[#allocation2 + $0x158] sm:$0xf]  ;;  %v825_v61 = vld [vmem:[#allocation2 + $0x15c] sm:$0x1]  ;;  %8186 = vmatprep.subr.bf16.mxu1 %v8424_v44  ;;  %7751 = vmatprep.subr.bf16.mxu0 %v8424_v44 }
 0x167   : > { %v682_v6 = vrot.slane %v680_v38, 7  ;;  %v688_v63 = vshrl.u32 %v7641_v35, 16  ;;  %v691_v43 = vshll.u32 %v7641_v35, 16  ;;  %1571 = vst.msk [vmem:[#allocation2 + $0xd8] sm:$0xf] %vm374_vm0, %v1555_v39  ;;  %v7286_v9 = vcombine.low %v1937_v7, %v1951_v49  ;;  %v8425_v37 = vld [vmem:[#allocation9 + $0xa8] sm:$0xff]  }
 0x168   : > { %v1955_v50 = vrot.slane %v1953_v0, 4  ;;  %v1958_v51 = vrot.slane %v1956_v42, 5  ;;  %1572 = vst.msk [vmem:[#allocation2 + $0xe0] sm:$0xf] %vm374_vm0, %v1556_v20  ;;  %v8422_v41 = vld [vmem:[#allocation2 + $0x18] ss:$8 sps:$4 sm:$0xff]   ;;  %v1526_v14 = vadd.f32 %v9707_v36, %v1510_v3  ;;  %8194 = vmatpush3.bf16.msra.mxu1 %v8425_v37  ;;  %7752 = vmatpush3.bf16.msra.mxu0 %v8425_v37 }
 0x169   : > { %v685_v4 = vor.u32 %v683_v46, %v682_v6  ;;  %v686_v48 = vrot.slane %v682_v6, 4  ;;  %v690_v62 = vrot.slane %v688_v63, 7  ;;  %2045 = vst.msk [vmem:[#allocation4 + $0xd0] sm:$0xff] %vm1651_vm9, %v7286_v9  ;;  %2585 = vst.msk [vmem:[#allocation4 + $0x40] sm:$0xff] %vm1651_vm9, %v8422_v41  ;;  %v1541_v8 = vmax.f32 %v1525_v53, 0.0  ;;  %v7253_v22 = vld [vmem:[%s9005_s24 + $0xe0] sm:$0xff]  ;;  %v9829_v31 = vpop.permute.xlu0 %2118 }
 0x16a   : > { %v1774_v12 = vld [vmem:[#allocation2 + $0x144] sm:$0x1]  ;;  %v1959_v29 = vor.u32 %v1958_v51, %v1955_v50  ;;  %2133 = vst.msk [vmem:[#allocation4 + $0xd0] sm:$0xff] %vm1740_vm10, %v2115_v56  ;;  %v1542_v19 = vmax.f32 %v1526_v14, 0.0  ;;  %v1511_v33 = vmul.f32 %v9676_v5, %v7253_v22  ;;  %v8426_v38 = vld [vmem:[#allocation2 + $0x28] ss:$8 sps:$4 sm:$0xff]   ;;  %v2489_v0 = vpop.permute.xlu1 %2488 }
 0x16b   : > { %v1962_v15 = vshll.u32 %v1774_v12, 16  ;;  %v693_v16 = vor.u32 %v691_v43, %v690_v62  ;;  %v694_v10 = vrot.slane %v690_v62, 4  ;;  %v817_v13 = vsel %vm9158_vm5, %v685_v4, %v816_v45  ;;  %v1775_v54 = vld [vmem:[#allocation2 + $0x148] sm:$0xf]  ;;  %v1776_v34 = vld [vmem:[#allocation2 + $0x14c] sm:$0x1] }
 0x16c   : > { %818 = vst [vmem:[#allocation2 + $0x150] sm:$0xf] %v817_v13  ;;  %v820_v47 = vsel %vm9024_vm3, %v686_v48, %v819_v17  ;;  %v1960_v57 = vrot.slane %v1959_v29, 4  ;;  %v1967_v25 = vshrl.u32 %v1775_v54, 16  ;;  %v1970_v60 = vshll.u32 %v1775_v54, 16  ;;  %v7254_v39 = vld [vmem:[%s9005_s24 + $0xe8] sm:$0xff] }
 0x16d   : > { %v1976_v26 = vshll.u32 %v1776_v34, 16  ;;  %821 = vst [vmem:[#allocation2 + $0x154] sm:$0x1] %v820_v47  ;;  %v8412_v24 = vld [vmem:[#allocation2 + $0x140] ss:$8 sps:$4 sm:$0xff]   ;;  %v823_v27 = vsel %vm9158_vm5, %v693_v16, %v822_v59  ;;  %v826_v52 = vsel %vm9024_vm3, %v694_v10, %v825_v61  ;;  %v1557_v28 = vpack.c.bf16 %v1541_v8, %v1541_v8  ;;  %v8428_v46 = vld [vmem:[#allocation9 + $0xf0] sm:$0xff]   ;;  %v2649_v43 = vpop.permute.xlu0 %2648 }
 0x16e   : > { %v1964_v56 = vrot.slane %v1962_v15, 5  ;;  %v1969_v7 = vrot.slane %v1967_v25, 4  ;;  %v1972_v40 = vrot.slane %v1970_v60, 5  ;;  %824 = vst [vmem:[#allocation2 + $0x158] sm:$0xf] %v823_v27  ;;  %1658 = vst.msk [vmem:[#allocation4 + $0xf0] sm:$0xff] %vm1651_vm9, %v8412_v24  ;;  %v1558_v32 = vpack.c.bf16 %v1542_v19, %v1542_v19  ;;  %8187 = vmatprep.subr.bf16.mxu1 %v8428_v46  ;;  %7753 = vmatprep.subr.bf16.mxu0 %v8428_v46 }
 0x16f   : > { %827 = vst [vmem:[#allocation2 + $0x15c] sm:$0x1] %v826_v52  ;;  %v8419_v55 = vld [vmem:[#allocation2 + $0xd8] ss:$8 sps:$4 sm:$0xff]   ;;  %1573 = vst.msk [vmem:[#allocation2 + $0xe8] sm:$0xf] %vm374_vm0, %v1557_v28  ;;  %v1512_v42 = vmul.f32 %v9676_v5, %v7254_v39  ;;  %v1527_v45 = vadd.f32 %v9707_v36, %v1511_v33 }
 0x170   : > { %v1973_v30 = vor.u32 %v1972_v40, %v1969_v7  ;;  %v1978_v35 = vrot.slane %v1976_v26, 5  ;;  %1747 = vst.msk [vmem:[#allocation4 + $0xf0] sm:$0xff] %vm1740_vm10, %v9801_v2  ;;  %v1965_v20 = vsel %vm9386_vm8, %v1960_v57, %v1964_v56  ;;  %v8429_v2 = vld [vmem:[#allocation9 + $0xb0] sm:$0xff]   ;;  %v2997_v50 = vld [vmem:[#allocation4 + $0xa8] sm:$0xff]  ;;  %2672 = vst.msk [vmem:[#allocation4 + $0x18] sm:$0xff] %vm1740_vm10, %v2649_v43  ;;  %v2491_v28 = vpop.permute.xlu1 %2490  ;;  %vm3691_vm11 = vcmask 1040384  }
 0x171   : > { %2200 = vst.msk [vmem:[#allocation4 + $0x10] sm:$0xff] %vm1651_vm9, %v8419_v55  ;;  %2586 = vst.msk [vmem:[#allocation4 + $0x68] sm:$0xff] %vm1651_vm9, %v8426_v38  ;;  %v1528_v44 = vadd.f32 %v9707_v36, %v1512_v42  ;;  %v1543_v9 = vmax.f32 %v1527_v45, 0.0  ;;  %8195 = vmatpush3.bf16.msra.mxu1 %v8429_v2  ;;  %3392 = vmatprep.mubr.bf16.mxu0 %v2997_v50  ;;  %v2996_v59 = vld [vmem:[#allocation4 + $0xa0] sm:$0xff]  ;;  %v2651_v13 = vpop.permute.xlu0 %2650  ;;  %v8430_v34 = vld [vmem:[#allocation9 + $0xf8] sm:$0xff]   ;;  %vm4544_vm14 = vcmask 1042432  }
 0x172   : > { %1574 = vst.msk [vmem:[#allocation2 + $0xf0] sm:$0xf] %vm374_vm0, %v1558_v32  ;;  %v1974_v18 = vrot.slane %v1973_v30, 4  ;;  %3393 = vmatmul.mubr.bf16.gmra.mrb[16].mxu0 %v2996_v59  ;;  %v8431_v25 = vld [vmem:[#allocation9 + $0xb8] sm:$0xff]   ;;  %8188 = vmatprep.subr.bf16.mxu1 %v8430_v34  ;;  %v7255_v7 = vld [vmem:[%s9005_s24 + $0xf0] sm:$0xff]  ;;  %v3001_v30 = vld [vmem:[#allocation4 + $0xc8] sm:$0xff] }
 0x173   : > { %v1777_v49 = vld [vmem:[#allocation2 + $0x150] sm:$0xf]  ;;  %2512 = vst.msk [vmem:[#allocation4 + $0x10] sm:$0xff] %vm1740_vm10, %v2489_v0  ;;  %v1559_v53 = vpack.c.bf16 %v1543_v9, %v1543_v9  ;;  %7754 = vmatpush3.bf16.msra.mxu0 %v8429_v2  ;;  %v1544_v54 = vmax.f32 %v1528_v44, 0.0  ;;  %2673 = vst.msk [vmem:[#allocation4 + $0x40] sm:$0xff] %vm1740_vm10, %v2651_v13  ;;  %v442_v27 = vld [vmem:[%s9005_s24 + $0x38] sm:$0xff]  ;;  %v1513_v32 = vmul.f32 %v9676_v5, %v7255_v7 }
 0x174   : > { %v1778_v17 = vld [vmem:[#allocation2 + $0x154] sm:$0x1]  ;;  %v1981_v6 = vshrl.u32 %v1777_v49, 16  ;;  %v1984_v63 = vshll.u32 %v1777_v49, 16  ;;  %v1979_v51 = vsel %vm9386_vm8, %v1974_v18, %v1978_v35  ;;  %7755 = vmatprep.subr.bf16.mxu0 %v8430_v34  ;;  %v464_v19 = vmul.f32 %v9676_v5, %v442_v27  ;;  %v7256_v55 = vld [vmem:[%s9005_s24 + $0xf8] sm:$0xff]  ;;  %v7257_v45 = vld [vmem:[%s9005_s24 + $0x1c0] sm:$0xff] }
 0x175   : > { %v1990_v3 = vshll.u32 %v1778_v17, 16  ;;  %v7287_v61 = vcombine.low %v1965_v20, %v1979_v51  ;;  %v1779_v4 = vld [vmem:[#allocation2 + $0x158] sm:$0xf]  ;;  %1575 = vst.msk [vmem:[#allocation2 + $0xf8] sm:$0xf] %vm374_vm0, %v1559_v53  ;;  %v1560_v24 = vpack.c.bf16 %v1544_v54, %v1544_v54  ;;  %8196 = vmatpush3.bf16.msra.mxu1 %v8431_v25  ;;  %v2653_v37 = vpop.permute.xlu0 %2652  ;;  %v3002_v33 = vld [vmem:[#allocation4 + $0xd0] sm:$0xff]  ;;  %v1514_v35 = vmul.f32 %v9676_v5, %v7256_v55  ;;  %vm10014_vm12 = vmand %vm3691_vm11, %vm377_vm2 }
 0x176   : > { %v1780_v48 = vld [vmem:[#allocation2 + $0x15c] sm:$0x1]  ;;  %v1983_v62 = vrot.slane %v1981_v6, 4  ;;  %v1986_v41 = vrot.slane %v1984_v63, 5  ;;  %v1995_v29 = vshrl.u32 %v1779_v4, 16  ;;  %v1998_v14 = vshll.u32 %v1779_v4, 16  ;;  %3400 = vmatprep.mubr.bf16.mxu0 %v3002_v33  ;;  %vm10021_vm13 = vmand %vm3691_vm11, %vm736_vm4 }
 0x177   : > { %v1992_v12 = vrot.slane %v1990_v3, 5  ;;  %v2004_v15 = vshll.u32 %v1780_v48, 16  ;;  %2046 = vst.msk [vmem:[#allocation4 + $0xf8] sm:$0xff] %vm1651_vm9, %v7287_v61  ;;  %v8415_v10 = vld [vmem:[#allocation2 + $0x150] ss:$8 sps:$4 sm:$0xff]   ;;  %7756 = vmatpush3.bf16.msra.mxu0 %v8431_v25  ;;  %v486_v22 = vadd.f32 %v9707_v36, %v464_v19  ;;  %v1529_v42 = vadd.f32 %v9707_v36, %v1513_v32  ;;  %v7258_v46 = vld [vmem:[%s9005_s24 + $0x1c8] sm:$0xff] }
 0x178   : > { %v1987_v16 = vor.u32 %v1986_v41, %v1983_v62  ;;  %2134 = vst.msk [vmem:[#allocation4 + $0xf8] sm:$0xff] %vm1740_vm10, %v9812_v58  ;;  %v1997_v47 = vrot.slane %v1995_v29, 4  ;;  %v2000_v8 = vrot.slane %v1998_v14, 5  ;;  %v408_v58 = vld [vmem:[#allocation2 + $0x40] sm:$0x1]  ;;  %2674 = vst.msk [vmem:[#allocation4 + $0x68] sm:$0xff] %vm1740_vm10, %v2653_v37  ;;  %v1530_v49 = vadd.f32 %v9707_v36, %v1514_v35  ;;  %v2493_v62 = vpop.permute.xlu1 %2492 }
 0x179   : > { %v2006_v57 = vrot.slane %v2004_v15, 5  ;;  %1659 = vst.msk [vmem:[#allocation4 + $0x118] sm:$0xff] %vm1651_vm9, %v8415_v10  ;;  %v8423_v26 = vld [vmem:[#allocation2 + $0xe8] ss:$8 sps:$4 sm:$0xff]   ;;  %v409_v56 = vsel %vm9024_vm3, 0, %v408_v58  ;;  %v502_v0 = vmax.f32 %v486_v22, 0.0  ;;  %v9876_v18 = vpop.permute.xlu0 %2654  ;;  %v1515_v2 = vmul.f32 %v9676_v5, %v7257_v45 }
 0x17a   : > { %v1988_v60 = vrot.slane %v1987_v16, 4  ;;  %v2001_v52 = vor.u32 %v2000_v8, %v1997_v47  ;;  %1748 = vst.msk [vmem:[#allocation4 + $0x118] sm:$0xff] %vm1740_vm10, %v9821_v23  ;;  %410 = vst [vmem:[#allocation2 + $0x40] sm:$0x1] %v409_v56  ;;  %v8434_v38 = vld [vmem:[#allocation2 + $0x128] ss:$8 sps:$4 sm:$0xff]   ;;  %3401 = vmatmul.mubr.bf16.gmra.mrb[20].mxu0 %v3001_v30  ;;  %v1516_v17 = vmul.f32 %v9676_v5, %v7258_v46 }
 0x17b   : > { %2201 = vst.msk [vmem:[#allocation4 + $0x38] sm:$0xff] %vm1651_vm9, %v8423_v26  ;;  %2588 = vst.msk [vmem:[#allocation4 + $0xb8] sm:$0xff] %vm1651_vm9, %v8434_v38  ;;  %v7634_v63 = vpack.c.bf16 %v502_v0, %v502_v0  ;;  %v1545_v43 = vmax.f32 %v1529_v42, 0.0  ;;  %v8436_v44 = vld [vmem:[#allocation2 + $0x138] ss:$8 sps:$4 sm:$0xff]   ;;  %v7259_v9 = vld [vmem:[%s9005_s24 + $0x1d0] sm:$0xff]  ;;  %v1531_v51 = vadd.f32 %v9707_v36, %v1515_v2 }
 0x17c   : > { %1576 = vst.msk [vmem:[#allocation2 + $0x100] sm:$0xf] %vm374_vm0, %v1560_v24  ;;  %v1993_v40 = vsel %vm9386_vm8, %v1988_v60, %v1992_v12  ;;  %v2002_v23 = vrot.slane %v2001_v52, 4  ;;  %v1546_v50 = vmax.f32 %v1530_v49, 0.0  ;;  %v1532_v3 = vadd.f32 %v9707_v36, %v1516_v17  ;;  %v3006_v59 = vld [vmem:[#allocation4 + $0xf0] sm:$0xff]  ;;  %v7260_v61 = vld [vmem:[%s9005_s24 + $0x1d8] sm:$0xff] }
 0x17d   : > { %2513 = vst.msk [vmem:[#allocation4 + $0x38] sm:$0xff] %vm1740_vm10, %v2491_v28  ;;  %v1517_v4 = vmul.f32 %v9676_v5, %v7259_v9  ;;  %v632_v41 = vshrl.u32 %v7634_v63, 16  ;;  %v635_v53 = vshll.u32 %v7634_v63, 16  ;;  %v1561_v12 = vpack.c.bf16 %v1545_v43, %v1545_v43  ;;  %v783_v15 = vld [vmem:[#allocation2 + $0x44] sm:$0x1]  ;;  %v2657_v13 = vpop.permute.xlu0 %2656  ;;  %v7262_v60 = vld [vmem:[%s9005_s24 + $0x1e8] sm:$0xff] }
 0x17e   : > { %v2007_v39 = vsel %vm9386_vm8, %v2002_v23, %v2006_v57  ;;  %2589 = vst.msk [vmem:[#allocation4 + $0xe0] sm:$0xff] %vm1651_vm9, %v8436_v44  ;;  %v1518_v29 = vmul.f32 %v9676_v5, %v7260_v61  ;;  %v1562_v16 = vpack.c.bf16 %v1546_v50, %v1546_v50  ;;  %v1547_v54 = vmax.f32 %v1531_v51, 0.0  ;;  %v7261_v47 = vld [vmem:[%s9005_s24 + $0x1e0] sm:$0xff]  ;;  %v8438_v25 = vld [vmem:[#allocation2 + $0x148] ss:$8 sps:$4 sm:$0xff]   ;;  %v450_v33 = vld [vmem:[%s9005_s24 + $0x138] sm:$0xff]  ;;  %v2495_v38 = vpop.permute.xlu1 %2494 }
 0x17f   : > { %v7288_v20 = vcombine.low %v1993_v40, %v2007_v39  ;;  %v3007_v6 = vld [vmem:[#allocation4 + $0xf8] sm:$0xff]  ;;  %v2989_v10 = vld [vmem:[#allocation4 + $0x68] sm:$0xff]  ;;  %v1548_v34 = vmax.f32 %v1532_v3, 0.0  ;;  %v634_v8 = vrot.slane %v632_v41, 7  ;;  %1577 = vst.msk [vmem:[#allocation2 + $0x108] sm:$0xf] %vm374_vm0, %v1561_v12  ;;  %v1519_v26 = vmul.f32 %v9676_v5, %v7261_v47 }
 0x180   : > { %3408 = vmatprep.mubr.bf16.mxu0 %v3007_v6  ;;  %3473 = vmatprep.mubr.bf16.mxu1 %v2989_v10  ;;  %2676 = vst.msk [vmem:[#allocation4 + $0xb8] sm:$0xff] %vm1740_vm10, %v2657_v13  ;;  %v1534_v57 = vadd.f32 %v9707_v36, %v1518_v29  ;;  %v1563_v24 = vpack.c.bf16 %v1547_v54, %v1547_v54  ;;  %v9905_v7 = vld [vmem:[#allocation9 + $0x100] sm:$0xff]   ;;  %v7264_v49 = vld [vmem:[%s9005_s24 + $0x1f8] sm:$0xff]  ;;  %v8442_v47 = vld [vmem:[#allocation9 + $0x108] sm:$0xff]   ;;  %vm4545_vm15 = vcmask 1046532  }
 0x181   : > { %2047 = vst.msk [vmem:[#allocation4 + $0x120] sm:$0xff] %vm1651_vm9, %v7288_v20  ;;  %v780_v14 = vld [vmem:[#allocation2 + $0x40] sm:$0xf]  ;;  %v1564_v27 = vpack.c.bf16 %v1548_v34, %v1548_v34  ;;  %v1520_v58 = vmul.f32 %v9676_v5, %v7262_v60  ;;  %v637_v19 = vor.u32 %v635_v53, %v634_v8  ;;  %v638_v28 = vrot.slane %v634_v8, 4  ;;  %2590 = vst.msk [vmem:[#allocation4 + $0x108] sm:$0xff] %vm1651_vm9, %v8438_v25  ;;  %v2659_v23 = vpop.permute.xlu0 %2658  ;;  %v7263_v20 = vld [vmem:[%s9005_s24 + $0x1f0] sm:$0xff] }
 0x182   : > { %2135 = vst.msk [vmem:[#allocation4 + $0x120] sm:$0xff] %vm1740_vm10, %v9829_v31  ;;  %v1533_v31 = vadd.f32 %v9707_v36, %v1517_v4  ;;  %3409 = vmatmul.mubr.bf16.gmra.mrb[24].mxu0 %v3006_v59  ;;  %v1550_v37 = vmax.f32 %v1534_v57, 0.0  ;;  %v1535_v56 = vadd.f32 %v9707_v36, %v1519_v26  ;;  %v432_v40 = vld [vmem:[#allocation2 + $0x160] sm:$0x1]  ;;  %2677 = vst.msk [vmem:[#allocation4 + $0xe0] sm:$0xff] %vm1740_vm10, %v2659_v23  ;;  %8101 = vmatprep.subr.bf16.mxu0 %v9905_v7  ;;  %v3011_v43 = vld [vmem:[#allocation4 + $0x118] sm:$0xff]  ;;  %v2497_v59 = vpop.permute.xlu1 %2496 }
 0x183   : > { %v8427_v48 = vld [vmem:[#allocation2 + $0xf8] ss:$8 sps:$4 sm:$0xff]   ;;  %1578 = vst.msk [vmem:[#allocation2 + $0x110] sm:$0xf] %vm374_vm0, %v1562_v16  ;;  %1579 = vst.msk [vmem:[#allocation2 + $0x1f8] sm:$0xf] %vm374_vm0, %v1563_v24  ;;  %v1536_v55 = vadd.f32 %v9707_v36, %v1520_v58  ;;  %v781_v30 = vsel %vm9158_vm5, %v637_v19, %v780_v14  ;;  %v784_v35 = vsel %vm9024_vm3, %v638_v28, %v783_v15 }
 0x184   : > { %2202 = vst.msk [vmem:[#allocation4 + $0x60] sm:$0xff] %vm1651_vm9, %v8427_v48  ;;  %v1549_v52 = vmax.f32 %v1533_v31, 0.0  ;;  %v433_v32 = vsel %vm9024_vm3, 0, %v432_v40  ;;  %v1566_v39 = vpack.c.bf16 %v1550_v37, %v1550_v37  ;;  %v1551_v0 = vmax.f32 %v1535_v56, 0.0  ;;  %782 = vst [vmem:[#allocation2 + $0x40] sm:$0xf] %v781_v30 }
 0x185   : > { %2514 = vst.msk [vmem:[#allocation4 + $0x60] sm:$0xff] %vm1740_vm10, %v2493_v62  ;;  %434 = vst [vmem:[#allocation2 + $0x160] sm:$0x1] %v433_v32  ;;  %v1552_v45 = vmax.f32 %v1536_v55, 0.0  ;;  %v472_v46 = vmul.f32 %v9676_v5, %v450_v33  ;;  %v8550_v17 = vld [vmem:[%s10771_s1] ss:$0 sm:$0xff]  ;;  %v2661_v44 = vpop.permute.xlu0 %2660 }
 0x186   : > { %1580 = vst.msk [vmem:[#allocation2 + $0x200] sm:$0xf] %vm374_vm0, %v1564_v27  ;;  %v1565_v22 = vpack.c.bf16 %v1549_v52, %v1549_v52  ;;  %785 = vst [vmem:[#allocation2 + $0x44] sm:$0x1] %v784_v35  ;;  %v1567_v2 = vpack.c.bf16 %v1551_v0, %v1551_v0  ;;  %v1521_v6 = vmul.f32 %v8550_v17, %v7263_v20  ;;  %v2979_v50 = vld [vmem:[#allocation4 + $0x18] sm:$0xff]  ;;  %v2978_v15 = vld [vmem:[#allocation4 + $0x10] sm:$0xff] }
 0x187   : > { %1582 = vst.msk [vmem:[#allocation2 + $0x210] sm:$0xf] %vm374_vm0, %v1566_v39  ;;  %v1522_v63 = vmul.f32 %v8550_v17, %v7264_v49  ;;  %v1568_v9 = vpack.c.bf16 %v1552_v45, %v1552_v45  ;;  %v494_v51 = vadd.f32 %v9707_v36, %v472_v46  ;;  %v831_v31 = vld [vmem:[#allocation2 + $0x164] sm:$0x1]  ;;  %v2680_v8 = vld [vmem:[#allocation2 + $0x8] sm:$0xf]  ;;  %vm10181_vm1 = vmor %vm4544_vm14, %vm4545_vm15 }
 0x188   : > { %1581 = vst.msk [vmem:[#allocation2 + $0x208] sm:$0xf] %vm374_vm0, %v1565_v22  ;;  %1583 = vst.msk [vmem:[#allocation2 + $0x218] sm:$0xf] %vm374_vm0, %v1567_v2  ;;  %v1537_v61 = vadd.f32 %v9707_v36, %v1521_v6  ;;  %v2681_v57 = vld [vmem:[#allocation2 + $0xc] sm:$0x1] }
 0x189   : > { %v3012_v42 = vld [vmem:[#allocation4 + $0x120] sm:$0xff]  ;;  %2678 = vst.msk [vmem:[#allocation4 + $0x108] sm:$0xff] %vm1740_vm10, %v2661_v44  ;;  %v1538_v4 = vadd.f32 %v9707_v36, %v1522_v63  ;;  %v510_v48 = vmax.f32 %v494_v51, 0.0  ;;  %v2682_v25 = vld [vmem:[#allocation2 + $0x10] sm:$0xf]  ;;  %v2713_v58 = vshrl.u32 %v2680_v8, 16 }
 0x18a   : > { %3416 = vmatprep.mubr.bf16.mxu0 %v3012_v42  ;;  %v8433_v3 = vld [vmem:[#allocation2 + $0x108] ss:$8 sps:$4 sm:$0xff]   ;;  %1584 = vst.msk [vmem:[#allocation2 + $0x220] sm:$0xf] %vm374_vm0, %v1568_v9  ;;  %v1553_v53 = vmax.f32 %v1537_v61, 0.0  ;;  %v2499_v14 = vpop.permute.xlu1 %2498  ;;  %v2984_v26 = vld [vmem:[#allocation4 + $0x40] sm:$0xff] }
 0x18b   : > { %2203 = vst.msk [vmem:[#allocation4 + $0x88] sm:$0xff] %vm1651_vm9, %v8433_v3  ;;  %3417 = vmatmul.mubr.bf16.gmra.mrb[28].mxu0 %v3011_v43  ;;  %v7642_v41 = vpack.c.bf16 %v510_v48, %v510_v48  ;;  %v1554_v12 = vmax.f32 %v1538_v4, 0.0  ;;  %v8432_v29 = vld [vmem:[#allocation2 + $0x38] ss:$8 sps:$4 sm:$0xff]   ;;  %v2683_v24 = vld [vmem:[#allocation2 + $0x14] sm:$0x1] }
 0x18c   : > { %v2988_v5 = vld [vmem:[#allocation4 + $0x60] sm:$0xff]  ;;  %2515 = vst.msk [vmem:[#allocation4 + $0x88] sm:$0xff] %vm1740_vm10, %v2495_v38  ;;  %3457 = vmatprep.mubr.bf16.mxu0 %v2979_v50  ;;  %v1569_v13 = vpack.c.bf16 %v1553_v53, %v1553_v53  ;;  %v2716_v19 = vshll.u32 %v2680_v8, 16  ;;  %v2722_v56 = vshll.u32 %v2681_v57, 16  ;;  %v2727_v40 = vshrl.u32 %v2682_v25, 16  ;;  %v9945_v23 = vld [vmem:[#allocation9 + $0x110] sm:$0xff]  }
 0x18d   : > { %3474 = vmatmul.mubr.bf16.vlgmr.msra.gmra.mrb[0].mxu1 %v2988_v5  ;;  %v8435_v62 = vld [vmem:[#allocation2 + $0x1f8] ss:$8 sps:$4 sm:$0xff]   ;;  %v696_v16 = vshrl.u32 %v7642_v41, 16  ;;  %v699_v10 = vshll.u32 %v7642_v41, 16  ;;  %v1570_v54 = vpack.c.bf16 %v1554_v12, %v1554_v12  ;;  %2587 = vst.msk [vmem:[#allocation4 + $0x90] sm:$0xff] %vm1651_vm9, %v8432_v29  ;;  %v2715_v22 = vrot.slane %v2713_v58, 4 }
 0x18e   : > { %2204 = vst.msk [vmem:[#allocation4 + $0xb0] sm:$0xff] %vm1651_vm9, %v8435_v62  ;;  %v828_v34 = vld [vmem:[#allocation2 + $0x160] sm:$0xf]  ;;  %v2718_v55 = vrot.slane %v2716_v19, 5  ;;  %v2730_v32 = vshll.u32 %v2682_v25, 16  ;;  %v2736_v33 = vshll.u32 %v2683_v24, 16  ;;  %v2663_v8 = vpop.permute.xlu0 %2662 }
 0x18f   : > { %2516 = vst.msk [vmem:[#allocation4 + $0xb0] sm:$0xff] %vm1740_vm10, %v2497_v59  ;;  %v8437_v36 = vld [vmem:[#allocation2 + $0x208] ss:$8 sps:$4 sm:$0xff]   ;;  %2675 = vst.msk [vmem:[#allocation4 + $0x90] sm:$0xff] %vm1740_vm10, %v9876_v18  ;;  %v698_v60 = vrot.slane %v696_v16, 7  ;;  %v2724_v38 = vrot.slane %v2722_v56, 5 }
 0x190   : > { %2205 = vst.msk [vmem:[#allocation4 + $0xd8] sm:$0xff] %vm1651_vm9, %v8437_v36  ;;  %v2501_v52 = vpop.permute.xlu1 %2500  ;;  %v2684_v18 = vld [vmem:[#allocation2 + $0x18] sm:$0xf]  ;;  %v2729_v39 = vrot.slane %v2727_v40, 4  ;;  %v2685_v0 = vld [vmem:[#allocation2 + $0x1c] sm:$0x1]  ;;  %v2719_v20 = vor.u32 %v2718_v55, %v2715_v22 }
 0x191   : > { %1585 = vst.msk [vmem:[#allocation2 + $0x228] sm:$0xf] %vm374_vm0, %v1569_v13  ;;  %1586 = vst.msk [vmem:[#allocation2 + $0x230] sm:$0xf] %vm374_vm0, %v1570_v54  ;;  %v8439_v27 = vld [vmem:[#allocation2 + $0x218] ss:$8 sps:$4 sm:$0xff]   ;;  %v701_v28 = vor.u32 %v699_v10, %v698_v60 }
 0x192   : > { %2517 = vst.msk [vmem:[#allocation4 + $0xd8] sm:$0xff] %vm1740_vm10, %v2499_v14  ;;  %v702_v37 = vrot.slane %v698_v60, 4  ;;  %v2686_v42 = vld [vmem:[#allocation2 + $0x20] sm:$0xf]  ;;  %v2999_v46 = vld [vmem:[#allocation4 + $0xb8] sm:$0xff]  ;;  %v2732_v49 = vrot.slane %v2730_v32, 5 }
 0x193   : > { %2206 = vst.msk [vmem:[#allocation4 + $0x100] sm:$0xff] %vm1651_vm9, %v8439_v27  ;;  %3458 = vmatmul.mubr.bf16.vlgmr.msra.gmra.mrb[32].mxu0 %v2978_v15  ;;  %v829_v30 = vsel %vm9158_vm5, %v701_v28, %v828_v34  ;;  %v2993_v45 = vld [vmem:[#allocation4 + $0x88] sm:$0xff]  ;;  %v2738_v2 = vrot.slane %v2736_v33, 5  ;;  %v2741_v17 = vshrl.u32 %v2684_v18, 16  ;;  %v2744_v11 = vshll.u32 %v2684_v18, 16  ;;  %v2983_v5 = vld [vmem:[#allocation4 + $0x38] sm:$0xff] }
 0x194   : > { %2518 = vst.msk [vmem:[#allocation4 + $0x100] sm:$0xff] %vm1740_vm10, %v2501_v52  ;;  %8102 = vmatpush3.bf16.msra.mxu0 %v9905_v7  ;;  %v832_v35 = vsel %vm9024_vm3, %v702_v37, %v831_v31  ;;  %3465 = vmatprep.mubr.bf16.mxu0 %v2984_v26  ;;  %830 = vst [vmem:[#allocation2 + $0x160] sm:$0xf] %v829_v30  ;;  %v2687_v7 = vld [vmem:[#allocation2 + $0x24] sm:$0x1]  ;;  %v2750_v6 = vshll.u32 %v2685_v0, 16  ;;  %v2733_v50 = vor.u32 %v2732_v49, %v2729_v39 }
 0x195   : > { %833 = vst [vmem:[#allocation2 + $0x164] sm:$0x1] %v832_v35  ;;  %8103 = vmatprep.subr.bf16.mxu0 %v8442_v47  ;;  %v2755_v63 = vshrl.u32 %v2686_v42, 16  ;;  %v2758_v1 = vshll.u32 %v2686_v42, 16  ;;  %v2688_v43 = vld [vmem:[#allocation2 + $0x28] sm:$0xf] }
 0x196   : > { %v2994_v44 = vld [vmem:[#allocation4 + $0x90] sm:$0xff]  ;;  %v2720_v9 = vrot.slane %v2719_v20, 4  ;;  %v2503_v3 = vpop.permute.xlu1 %2502  ;;  %v2743_v59 = vrot.slane %v2741_v17, 4  ;;  %v2746_v61 = vrot.slane %v2744_v11, 5  ;;  %v8445_v4 = vld [vmem:[#allocation9 + $0x118] sm:$0xff]   ;;  %v2734_v62 = vrot.slane %v2733_v50, 4 }
 0x197   : > { %3481 = vmatprep.mubr.bf16.mxu1 %v2994_v44  ;;  %v2757_v41 = vrot.slane %v2755_v63, 4  ;;  %v2760_v53 = vrot.slane %v2758_v1, 5  ;;  %v2689_v12 = vld [vmem:[#allocation2 + $0x2c] sm:$0x1]  ;;  %v2752_v14 = vrot.slane %v2750_v6, 5  ;;  %v2764_v36 = vshll.u32 %v2687_v7, 16 }
 0x198   : > { %v8443_v51 = vld [vmem:[#allocation2 + $0x228] ss:$8 sps:$4 sm:$0xff]   ;;  %8104 = vmatpush3.bf16.msra.mxu0 %v8442_v47  ;;  %3482 = vmatmul.mubr.bf16.gmra.mrb[4].mxu1 %v2993_v45  ;;  %v2725_v48 = vsel %vm9386_vm8, %v2720_v9, %v2724_v38  ;;  %v2747_v29 = vor.u32 %v2746_v61, %v2743_v59  ;;  %v2769_v16 = vshrl.u32 %v2688_v43, 16  ;;  %v2739_v10 = vsel %vm9386_vm8, %v2734_v62, %v2738_v2  ;;  %v2691_v54 = vld [vmem:[#allocation2 + $0x34] sm:$0x1]  ;;  %v3004_v24 = vld [vmem:[#allocation4 + $0xe0] sm:$0xff] }
 0x199   : > { %8105 = vmatprep.subr.bf16.mxu0 %v9945_v23  ;;  %3489 = vmatprep.mubr.bf16.mxu1 %v2999_v46  ;;  %2207 = vst.msk [vmem:[#allocation4 + $0x128] sm:$0xff] %vm1651_vm9, %v8443_v51  ;;  %v2690_v15 = vld [vmem:[#allocation2 + $0x30] sm:$0xf]  ;;  %v2761_v13 = vor.u32 %v2760_v53, %v2757_v41  ;;  %v2772_v34 = vshll.u32 %v2688_v43, 16  ;;  %v2778_v31 = vshll.u32 %v2689_v12, 16  ;;  %v7329_v25 = vcombine.low %v2725_v48, %v2739_v10 }
 0x19a   : > { %2519 = vst.msk [vmem:[#allocation4 + $0x128] sm:$0xff] %vm1740_vm10, %v2503_v3  ;;  %v2692_v47 = vld [vmem:[#allocation2 + $0x38] sm:$0xf]  ;;  %v2748_v60 = vrot.slane %v2747_v29, 4  ;;  %v2766_v26 = vrot.slane %v2764_v36, 5  ;;  %v2771_v52 = vrot.slane %v2769_v16, 4 }
 0x19b   : > { %3466 = vmatmul.mubr.bf16.gmra.mrb[36].mxu0 %v2983_v5  ;;  %v8441_v57 = vld [vmem:[#allocation2 + $0x158] ss:$8 sps:$4 sm:$0xff]   ;;  %v2762_v27 = vrot.slane %v2761_v13, 4  ;;  %v2774_v58 = vrot.slane %v2772_v34, 5  ;;  %v2780_v19 = vrot.slane %v2778_v31, 5  ;;  %v2998_v28 = vld [vmem:[#allocation4 + $0xb0] sm:$0xff] }
 0x19c   : > { %8106 = vmatpush3.bf16.msra.mxu0 %v9945_v23  ;;  %2591 = vst.msk [vmem:[#allocation4 + $0x130] sm:$0xff] %vm1651_vm9, %v8441_v57  ;;  %2968 = vst.msk [vmem:[#allocation4 + $0x20] sm:$0xff] %vm1651_vm9, %v7329_v25  ;;  %v2753_v37 = vsel %vm9386_vm8, %v2748_v60, %v2752_v14  ;;  %v2783_v56 = vshrl.u32 %v2690_v15, 16  ;;  %v2786_v40 = vshll.u32 %v2690_v15, 16  ;;  %v2792_v18 = vshll.u32 %v2691_v54, 16  ;;  %v3009_v13 = vld [vmem:[#allocation4 + $0x108] sm:$0xff] }
 0x19d   : > { %8107 = vmatprep.subr.bf16.mxu0 %v8445_v4  ;;  %v2693_v23 = vld [vmem:[#allocation2 + $0x3c] sm:$0x1]  ;;  %2679 = vst.msk [vmem:[#allocation4 + $0x130] sm:$0xff] %vm1740_vm10, %v2663_v8  ;;  %v2767_v22 = vsel %vm9386_vm8, %v2762_v27, %v2766_v26  ;;  %v2775_v55 = vor.u32 %v2774_v58, %v2771_v52  ;;  %v2694_v32 = vld [vmem:[#allocation2 + $0x40] sm:$0xf]  ;;  %v2797_v30 = vshrl.u32 %v2692_v47, 16 }
 0x19e   : > { %v2695_v33 = vld [vmem:[#allocation2 + $0x44] sm:$0x1]  ;;  %v2800_v35 = vshll.u32 %v2692_v47, 16  ;;  %v7330_v38 = vcombine.low %v2753_v37, %v2767_v22  ;;  %v2785_v39 = vrot.slane %v2783_v56, 4  ;;  %v2788_v0 = vrot.slane %v2786_v40, 5 }
 0x19f   : > { %v2794_v42 = vrot.slane %v2792_v18, 5  ;;  %v2696_v45 = vld [vmem:[#allocation2 + $0x128] sm:$0xf]  ;;  %v2776_v46 = vrot.slane %v2775_v55, 4  ;;  %v2799_v20 = vrot.slane %v2797_v30, 4  ;;  %v2806_v2 = vshll.u32 %v2693_v23, 16 }
 0x1a0   : > { %8108 = vmatpush3.bf16.msra.mxu0 %v8445_v4  ;;  %3490 = vmatmul.mubr.bf16.gmra.mrb[8].mxu1 %v2998_v28  ;;  %v2802_v49 = vrot.slane %v2800_v35, 5  ;;  %2969 = vst.msk [vmem:[#allocation4 + $0x48] sm:$0xff] %vm1651_vm9, %v7330_v38  ;;  %v2789_v7 = vor.u32 %v2788_v0, %v2785_v39  ;;  %v2811_v17 = vshrl.u32 %v2694_v32, 16  ;;  %v2814_v11 = vshll.u32 %v2694_v32, 16  ;;  %v2697_v63 = vld [vmem:[#allocation2 + $0x12c] sm:$0x1] }
 0x1a1   : > { %3497 = vmatprep.mubr.bf16.mxu1 %v3004_v24  ;;  %v2820_v6 = vshll.u32 %v2695_v33, 16  ;;  %v2781_v1 = vsel %vm9386_vm8, %v2776_v46, %v2780_v19  ;;  %v2808_v44 = vrot.slane %v2806_v2, 5  ;;  %v2698_v9 = vld [vmem:[#allocation2 + $0x130] sm:$0xf]  ;;  %v2825_v50 = vshrl.u32 %v2696_v45, 16  ;;  %v3003_v4 = vld [vmem:[#allocation4 + $0xd8] sm:$0xff] }
 0x1a2   : > { %v2803_v43 = vor.u32 %v2802_v49, %v2799_v20  ;;  %v2790_v51 = vrot.slane %v2789_v7, 4  ;;  %v2813_v3 = vrot.slane %v2811_v17, 4  ;;  %v2816_v5 = vrot.slane %v2814_v11, 5  ;;  %v2699_v61 = vld [vmem:[#allocation2 + $0x134] sm:$0x1]  ;;  %v3008_v17 = vld [vmem:[#allocation4 + $0x100] sm:$0xff] }
 0x1a3   : > { %v2822_v59 = vrot.slane %v2820_v6, 5  ;;  %v2980_v48 = vld [vmem:[#allocation4 + $0x20] sm:$0xff]  ;;  %v2827_v41 = vrot.slane %v2825_v50, 4  ;;  %v2828_v53 = vshll.u32 %v2696_v45, 16  ;;  %v2834_v12 = vshll.u32 %v2697_v63, 16 }
 0x1a4   : > { %v2804_v62 = vrot.slane %v2803_v43, 4  ;;  %8109 = vmatprep.mubr.msk.bf16.mxu0 %vm1651_vm9, %v2980_v48  ;;  %v2795_v29 = vsel %vm9386_vm8, %v2790_v51, %v2794_v42  ;;  %v2817_v14 = vor.u32 %v2816_v5, %v2813_v3  ;;  %v2839_v36 = vshrl.u32 %v2698_v9, 16  ;;  %v2700_v16 = vld [vmem:[#allocation2 + $0x138] sm:$0xf]  ;;  %v2701_v10 = vld [vmem:[#allocation2 + $0x13c] sm:$0x1] }
 0x1a5   : > { %v2842_v15 = vshll.u32 %v2698_v9, 16  ;;  %v7331_v54 = vcombine.low %v2781_v1, %v2795_v29  ;;  %v2830_v31 = vrot.slane %v2828_v53, 5  ;;  %v2836_v47 = vrot.slane %v2834_v12, 5  ;;  %v2702_v8 = vld [vmem:[#allocation2 + $0x140] sm:$0xf] }
 0x1a6   : > { %v2809_v34 = vsel %vm9386_vm8, %v2804_v62, %v2808_v44  ;;  %v2818_v57 = vrot.slane %v2817_v14, 4  ;;  %v2841_v25 = vrot.slane %v2839_v36, 4  ;;  %v2848_v26 = vshll.u32 %v2699_v61, 16  ;;  %v2703_v52 = vld [vmem:[#allocation2 + $0x144] sm:$0x1]  ;;  %v3014_v44 = vld [vmem:[#allocation4 + $0x130] sm:$0xff] }
 0x1a7   : > { %v2844_v60 = vrot.slane %v2842_v15, 5  ;;  %v2985_v24 = vld [vmem:[#allocation4 + $0x48] sm:$0xff]  ;;  %2970 = vst.msk [vmem:[#allocation4 + $0x70] sm:$0xff] %vm1651_vm9, %v7331_v54  ;;  %v2831_v27 = vor.u32 %v2830_v31, %v2827_v41  ;;  %v2853_v58 = vshrl.u32 %v2700_v16, 16  ;;  %v2856_v19 = vshll.u32 %v2700_v16, 16 }
 0x1a8   : > { %3498 = vmatmul.mubr.bf16.gmra.mrb[12].mxu1 %v3003_v4  ;;  %v2862_v28 = vshll.u32 %v2701_v10, 16  ;;  %8110 = vmatmul.mubr.msk.bf16.vlgmr.msra.gmra.mrb[40].mxu0 %vm1651_vm9, %v2985_v24  ;;  %v2823_v37 = vsel %vm9386_vm8, %v2818_v57, %v2822_v59  ;;  %v2850_v40 = vrot.slane %v2848_v26, 5  ;;  %v2867_v18 = vshrl.u32 %v2702_v8, 16  ;;  %v2704_v23 = vld [vmem:[#allocation2 + $0x148] sm:$0xf] }
 0x1a9   : > { %3505 = vmatprep.mubr.bf16.mxu1 %v3009_v13  ;;  %v2845_v56 = vor.u32 %v2844_v60, %v2841_v25  ;;  %v2705_v22 = vld [vmem:[#allocation2 + $0x14c] sm:$0x1]  ;;  %v7332_v55 = vcombine.low %v2809_v34, %v2823_v37  ;;  %v2832_v32 = vrot.slane %v2831_v27, 4  ;;  %v2855_v33 = vrot.slane %v2853_v58, 4  ;;  %v2706_v35 = vld [vmem:[#allocation2 + $0x150] sm:$0xf] }
 0x1aa   : > { %v2858_v30 = vrot.slane %v2856_v19, 5  ;;  %v2864_v39 = vrot.slane %v2862_v28, 5  ;;  %v2869_v0 = vrot.slane %v2867_v18, 4  ;;  %v2870_v42 = vshll.u32 %v2702_v8, 16  ;;  %v2707_v45 = vld [vmem:[#allocation2 + $0x154] sm:$0x1] }
 0x1ab   : > { %v2846_v38 = vrot.slane %v2845_v56, 4  ;;  %v2708_v46 = vld [vmem:[#allocation2 + $0x158] sm:$0xf]  ;;  %2971 = vst.msk [vmem:[#allocation4 + $0x98] sm:$0xff] %vm1651_vm9, %v7332_v55  ;;  %v2837_v20 = vsel %vm9386_vm8, %v2832_v32, %v2836_v47  ;;  %v2876_v2 = vshll.u32 %v2703_v52, 16  ;;  %v2881_v7 = vshrl.u32 %v2704_v23, 16 }
 0x1ac   : > { %v2859_v49 = vor.u32 %v2858_v30, %v2855_v33  ;;  %v2872_v6 = vrot.slane %v2870_v42, 5  ;;  %v2884_v63 = vshll.u32 %v2704_v23, 16  ;;  %v2890_v1 = vshll.u32 %v2705_v22, 16  ;;  %v2709_v43 = vld [vmem:[#allocation2 + $0x15c] sm:$0x1]  ;;  %v3013_v47 = vld [vmem:[#allocation4 + $0x128] sm:$0xff] }
 0x1ad   : > { %v2851_v11 = vsel %vm9386_vm8, %v2846_v38, %v2850_v40  ;;  %v2878_v51 = vrot.slane %v2876_v2, 5  ;;  %v2883_v3 = vrot.slane %v2881_v7, 4  ;;  %v2710_v5 = vld [vmem:[#allocation2 + $0x160] sm:$0xf]  ;;  %v2895_v62 = vshrl.u32 %v2706_v35, 16  ;;  %v8448_v2 = vld [vmem:[#allocation12 + $0x10] sm:$0xff]  }
 0x1ae   : > { %v7333_v9 = vcombine.low %v2837_v20, %v2851_v11  ;;  %v2860_v50 = vrot.slane %v2859_v49, 4  ;;  %v2990_v59 = vld [vmem:[#allocation4 + $0x70] sm:$0xff]  ;;  %v2873_v61 = vor.u32 %v2872_v6, %v2869_v0  ;;  %v2886_v4 = vrot.slane %v2884_v63, 5  ;;  %v2711_v29 = vld [vmem:[#allocation2 + $0x164] sm:$0x1]  ;;  %v8447_v49 = vld [vmem:[#allocation12 + $0x8] sm:$0xff]  }
 0x1af   : > { %v2892_v48 = vrot.slane %v2890_v1, 5  ;;  %8113 = vmatprep.mubr.msk.bf16.mxu0 %vm1651_vm9, %v2990_v59  ;;  %v2898_v53 = vshll.u32 %v2706_v35, 16  ;;  %v2904_v12 = vshll.u32 %v2707_v45, 16  ;;  %v2909_v14 = vshrl.u32 %v2708_v46, 16  ;;  %v8446_v35 = vld [vmem:[#allocation12] sm:$0xff]   ;;  %v8449_v7 = vld [vmem:[#allocation12 + $0x18] sm:$0xff]  }
 0x1b0   : > { %3506 = vmatmul.mubr.bf16.gmra.mrb[16].mxu1 %v3008_v17  ;;  %2972 = vst.msk [vmem:[#allocation4 + $0xc0] sm:$0xff] %vm1651_vm9, %v7333_v9  ;;  %v2865_v41 = vsel %vm9386_vm8, %v2860_v50, %v2864_v39  ;;  %v2874_v36 = vrot.slane %v2873_v61, 4  ;;  %v2887_v15 = vor.u32 %v2886_v4, %v2883_v3  ;;  %v2897_v16 = vrot.slane %v2895_v62, 4  ;;  %8125 = vmatprep.subr.bf16.mxu1 %v8446_v35  ;;  %v7519_v17 = vld [vmem:[%s9005_s24 + $0xc0] sm:$0xff]  ;;  %v7520_v11 = vld [vmem:[%s9005_s24 + $0xc8] sm:$0xff]  ;;  %v7521_v63 = vld [vmem:[%s9005_s24 + $0xd0] sm:$0xff] }
 0x1b1   : > { %3513 = vmatprep.mubr.bf16.mxu1 %v3014_v44  ;;  %v2912_v10 = vshll.u32 %v2708_v46, 16  ;;  %v2900_v13 = vrot.slane %v2898_v53, 5  ;;  %v2906_v54 = vrot.slane %v2904_v12, 5  ;;  %v2911_v34 = vrot.slane %v2909_v14, 4  ;;  %8126 = vmatpush3.bf16.msra.mxu1 %v8446_v35  ;;  %v7522_v1 = vld [vmem:[%s9005_s24 + $0xd8] sm:$0xff]  ;;  %v8451_v9 = vld [vmem:[#allocation11 + $0x80] sm:$0xff]  }
 0x1b2   : > { %v2918_v31 = vshll.u32 %v2709_v43, 16  ;;  %v2995_v8 = vld [vmem:[#allocation4 + $0x98] sm:$0xff]  ;;  %v2879_v57 = vsel %vm9386_vm8, %v2874_v36, %v2878_v51  ;;  %v2888_v25 = vrot.slane %v2887_v15, 4  ;;  %v2923_v26 = vshrl.u32 %v2710_v5, 16  ;;  %8127 = vmatprep.subr.bf16.mxu1 %v8447_v49  ;;  %v8450_v43 = vld [vmem:[#allocation11 + $0xc0] sm:$0xff]   ;;  %v8452_v12 = vld [vmem:[#allocation11 + $0xc8] sm:$0xff]  }
 0x1b3   : > { %v2914_v60 = vrot.slane %v2912_v10, 5  ;;  %8114 = vmatmul.mubr.msk.bf16.gmra.mrb[44].mxu0 %vm1651_vm9, %v2995_v8  ;;  %v7334_v24 = vcombine.low %v2865_v41, %v2879_v57  ;;  %v2901_v27 = vor.u32 %v2900_v13, %v2897_v16  ;;  %v2926_v58 = vshll.u32 %v2710_v5, 16  ;;  %v3699_v51 = vld [vmem:[#allocation3 + $0x18] sm:$0x1]  ;;  %v3748_v3 = vld [vmem:[#allocation3 + $0x1c] sm:$0x1] }
 0x1b4   : > { %v2920_v52 = vrot.slane %v2918_v31, 5  ;;  %v2925_v28 = vrot.slane %v2923_v26, 4  ;;  %v2932_v37 = vshll.u32 %v2711_v29, 16  ;;  %v2893_v56 = vsel %vm9386_vm8, %v2888_v25, %v2892_v48  ;;  %v3693_v61 = vld [vmem:[#allocation3 + $0x8] sm:$0x1]  ;;  %v8454_v8 = vld [vmem:[#allocation11 + $0x40] sm:$0xff]  }
 0x1b5   : > { %v2915_v19 = vor.u32 %v2914_v60, %v2911_v34  ;;  %2973 = vst.msk [vmem:[#allocation4 + $0xe8] sm:$0xff] %vm1651_vm9, %v7334_v24  ;;  %v2902_v40 = vrot.slane %v2901_v27, 4  ;;  %v2928_v18 = vrot.slane %v2926_v58, 5  ;;  %8128 = vmatpush3.bf16.msra.mxu1 %v8447_v49  ;;  %v5956_v6 = vpack.c.bf16 %v7520_v11, %v7519_v17  ;;  %v3742_v4 = vld [vmem:[#allocation3 + $0xc] sm:$0x1]  ;;  %v8455_v57 = vld [vmem:[#allocation11 + $0xd0] sm:$0xff]   ;;  %7829 = vmatprep.subr.bf16.mxu0 %v8454_v8 }
 0x1b6   : > { %v2934_v55 = vrot.slane %v2932_v37, 5  ;;  %8129 = vmatprep.subr.bf16.mxu1 %v8448_v2  ;;  %v5957_v44 = vpack.c.bf16 %v7522_v1, %v7521_v63  ;;  %v3700_v5 = vsel %vm10014_vm12, 0, %v3699_v51  ;;  %v3749_v48 = vsel %vm10021_vm13, 0, %v3748_v3  ;;  %v3702_v53 = vld [vmem:[#allocation3 + $0x20] sm:$0x1]  ;;  %v8453_v15 = vld [vmem:[#allocation11 + $0x88] sm:$0xff]  }
 0x1b7   : > { %v3000_v23 = vld [vmem:[#allocation4 + $0xc0] sm:$0xff]  ;;  %v2916_v22 = vrot.slane %v2915_v19, 4  ;;  %v2907_v32 = vsel %vm9386_vm8, %v2902_v40, %v2906_v54  ;;  %v2929_v33 = vor.u32 %v2928_v18, %v2925_v28  ;;  %3701 = vst [vmem:[#allocation3 + $0x18] sm:$0x1] %v3700_v5  ;;  %v3694_v62 = vsel %vm10014_vm12, 0, %v3693_v61  ;;  %v7524_v34 = vld [vmem:[%s9005_s24 + $0xe8] sm:$0xff] }
 0x1b8   : > { %3514 = vmatmul.mubr.bf16.gmra.mrb[20].mxu1 %v3013_v47  ;;  %8117 = vmatprep.mubr.msk.bf16.mxu0 %vm1651_vm9, %v3000_v23  ;;  %v7335_v30 = vcombine.low %v2893_v56, %v2907_v32  ;;  %v3743_v41 = vsel %vm10021_vm13, 0, %v3742_v4  ;;  %3750 = vst [vmem:[#allocation3 + $0x1c] sm:$0x1] %v3749_v48  ;;  %3695 = vst [vmem:[#allocation3 + $0x8] sm:$0x1] %v3694_v62  ;;  %v3703_v29 = vsel %vm10014_vm12, 0, %v3702_v53 }
 0x1b9   : > { %v2921_v38 = vsel %vm9386_vm8, %v2916_v22, %v2920_v52  ;;  %v2930_v39 = vrot.slane %v2929_v33, 4  ;;  %8130 = vmatpush3.bf16.msra.mxu1 %v8448_v2  ;;  %8133 = vmatprep.mubr.msk.bf16.mxu1 %vm1651_vm9, %v5956_v6  ;;  %3744 = vst [vmem:[#allocation3 + $0xc] sm:$0x1] %v3743_v41  ;;  %v3751_v14 = vld [vmem:[#allocation3 + $0x24] sm:$0x1]  ;;  %v7525_v24 = vld [vmem:[%s9005_s24 + $0xf0] sm:$0xff] }
 0x1ba   : > { %2974 = vst.msk [vmem:[#allocation4 + $0x110] sm:$0xff] %vm1651_vm9, %v7335_v30  ;;  %8131 = vmatprep.subr.bf16.mxu1 %v8449_v7  ;;  %v3696_v36 = vld [vmem:[#allocation3 + $0x10] sm:$0x1]  ;;  %3704 = vst [vmem:[#allocation3 + $0x20] sm:$0x1] %v3703_v29  ;;  %v3752_v16 = vsel %vm10021_vm13, 0, %v3751_v14 }
 0x1bb   : > { %v2935_v0 = vsel %vm9386_vm8, %v2930_v39, %v2934_v55  ;;  %v3697_v10 = vsel %vm10014_vm12, 0, %v3696_v36  ;;  %v3745_v13 = vld [vmem:[#allocation3 + $0x14] sm:$0x1]  ;;  %v7523_v54 = vld [vmem:[%s9005_s24 + $0xe0] sm:$0xff]  ;;  %3753 = vst [vmem:[#allocation3 + $0x24] sm:$0x1] %v3752_v16 }
 0x1bc   : > { %v3005_v42 = vld [vmem:[#allocation4 + $0xe8] sm:$0xff]  ;;  %v7336_v45 = vcombine.low %v2921_v38, %v2935_v0  ;;  %3698 = vst [vmem:[#allocation3 + $0x10] sm:$0x1] %v3697_v10  ;;  %v3746_v31 = vsel %vm10021_vm13, 0, %v3745_v13  ;;  %v5958_v47 = vpack.c.bf16 %v7524_v34, %v7523_v54  ;;  %v3711_v25 = vld [vmem:[#allocation3 + $0x38] sm:$0x1] }
 0x1bd   : > { %8118 = vmatmul.mubr.msk.bf16.gmra.mrb[48].mxu0 %vm1651_vm9, %v3005_v42  ;;  %8132 = vmatpush3.bf16.msra.mxu1 %v8449_v7  ;;  %3747 = vst [vmem:[#allocation3 + $0x14] sm:$0x1] %v3746_v31  ;;  %v3712_v60 = vsel %vm10014_vm12, 0, %v3711_v25  ;;  %v3760_v26 = vld [vmem:[#allocation3 + $0x3c] sm:$0x1]  ;;  %v8456_v19 = vld [vmem:[#allocation11] sm:$0xff]  }
 0x1be   : > { %2975 = vst.msk [vmem:[#allocation4 + $0x138] sm:$0xff] %vm1651_vm9, %v7336_v45  ;;  %7893 = vmatprep.subr.bf16.mxu1 %v8450_v43  ;;  %v7526_v27 = vld [vmem:[%s9005_s24 + $0xf8] sm:$0xff]  ;;  %3713 = vst [vmem:[#allocation3 + $0x38] sm:$0x1] %v3712_v60  ;;  %v3761_v52 = vsel %vm10021_vm13, 0, %v3760_v26  ;;  %v8457_v28 = vld [vmem:[#allocation11 + $0x90] sm:$0xff]   ;;  %7830 = vmatpush3.bf16.msra.mxu0 %v8456_v19 }
 0x1bf   : > { %v5959_v58 = vpack.c.bf16 %v7526_v27, %v7525_v24  ;;  %v8458_v37 = vld [vmem:[#allocation11 + $0x48] sm:$0xff]   ;;  %3762 = vst [vmem:[#allocation3 + $0x3c] sm:$0x1] %v3761_v52  ;;  %v8459_v56 = vld [vmem:[#allocation11 + $0xd8] sm:$0xff]   ;;  %v7527_v55 = vld [vmem:[%s9005_s24 + $0x1c0] sm:$0xff]  ;;  %vm4014_vm0 = vcmask 1043456  }
 0x1c0   : > { %8134 = vmatmul.mubr.msk.bf16.vlgmr.msra.gmra.mrb[24].mxu1 %vm1651_vm9, %v5957_v44  ;;  %v8460_v18 = vld [vmem:[#allocation11 + $0x8] sm:$0xff]   ;;  %7831 = vmatprep.subr.bf16.mxu0 %v8458_v37  ;;  %v8461_v22 = vld [vmem:[#allocation11 + $0x98] sm:$0xff]   ;;  %v8462_v39 = vld [vmem:[#allocation11 + $0x50] sm:$0xff]  }
 0x1c1   : > { %v3010_v46 = vld [vmem:[#allocation4 + $0x110] sm:$0xff]  ;;  %7894 = vmatpush3.bf16.msra.mxu1 %v8451_v9  ;;  %8137 = vmatprep.mubr.msk.bf16.mxu1 %vm1651_vm9, %v5958_v47  ;;  %v7528_v30 = vld [vmem:[%s9005_s24 + $0x1c8] sm:$0xff]  ;;  %v3714_v49 = vld [vmem:[#allocation3 + $0x40] sm:$0x1] }
 0x1c2   : > { %8121 = vmatprep.mubr.msk.bf16.mxu0 %vm1651_vm9, %v3010_v46  ;;  %7895 = vmatprep.subr.bf16.mxu1 %v8452_v12  ;;  %v5960_v38 = vpack.c.bf16 %v7528_v30, %v7527_v55  ;;  %v3705_v42 = vld [vmem:[#allocation3 + $0x28] sm:$0x1]  ;;  %v3754_v45 = vld [vmem:[#allocation3 + $0x2c] sm:$0x1]  ;;  %v3715_v2 = vsel %vm10014_vm12, 0, %v3714_v49  ;;  %v8463_v17 = vld [vmem:[#allocation11 + $0xe0] sm:$0xff]  }
 0x1c3   : > { %7832 = vmatpush3.bf16.msra.mxu0 %v8460_v18  ;;  %v3706_v46 = vsel %vm10014_vm12, 0, %v3705_v42  ;;  %v3763_v7 = vld [vmem:[#allocation3 + $0x44] sm:$0x1]  ;;  %3716 = vst [vmem:[#allocation3 + $0x40] sm:$0x1] %v3715_v2  ;;  %v7529_v1 = vld [vmem:[%s9005_s24 + $0x1d0] sm:$0xff]  ;;  %vm10233_vm2 = vmand %vm4014_vm0, %vm736_vm4 }
 0x1c4   : > { %3707 = vst [vmem:[#allocation3 + $0x28] sm:$0x1] %v3706_v46  ;;  %7833 = vmatprep.subr.bf16.mxu0 %v8462_v39  ;;  %v3764_v11 = vsel %vm10021_vm13, 0, %v3763_v7  ;;  %v3708_v6 = vld [vmem:[#allocation3 + $0x30] sm:$0x1]  ;;  %v7530_v51 = vld [vmem:[%s9005_s24 + $0x1d8] sm:$0xff] }
 0x1c5   : > { %v3015_v20 = vld [vmem:[#allocation4 + $0x138] sm:$0xff]  ;;  %7896 = vmatpush3.bf16.msra.mxu1 %v8453_v15  ;;  %v3757_v63 = vld [vmem:[#allocation3 + $0x34] sm:$0x1]  ;;  %3765 = vst [vmem:[#allocation3 + $0x44] sm:$0x1] %v3764_v11  ;;  %v3709_v44 = vsel %vm10014_vm12, 0, %v3708_v6  ;;  %v5961_v62 = vpack.c.bf16 %v7530_v51, %v7529_v1 }
 0x1c6   : > { %8122 = vmatmul.mubr.msk.bf16.gmra.mrb[52].mxu0 %vm1651_vm9, %v3015_v20  ;;  %7897 = vmatprep.subr.bf16.mxu1 %v8455_v57  ;;  %v3755_v20 = vsel %vm10021_vm13, 0, %v3754_v45  ;;  %v3758_v9 = vsel %vm10021_vm13, 0, %v3757_v63  ;;  %v8464_v3 = vld [vmem:[#allocation11 + $0x10] sm:$0xff]   ;;  %v8465_v5 = vld [vmem:[#allocation11 + $0xa0] sm:$0xff]   ;;  %3710 = vst [vmem:[#allocation3 + $0x30] sm:$0x1] %v3709_v44 }
 0x1c7   : > { %3756 = vst [vmem:[#allocation3 + $0x2c] sm:$0x1] %v3755_v20  ;;  %3759 = vst [vmem:[#allocation3 + $0x34] sm:$0x1] %v3758_v9  ;;  %v3723_v4 = vld [vmem:[#allocation3 + $0x68] sm:$0x1]  ;;  %7834 = vmatpush3.bf16.msra.mxu0 %v8464_v3 }
 0x1c8   : > { %8138 = vmatmul.mubr.msk.bf16.gmra.mrb[28].mxu1 %vm1651_vm9, %v5959_v58  ;;  %v3772_v48 = vld [vmem:[#allocation3 + $0x6c] sm:$0x1]  ;;  %v8466_v41 = vld [vmem:[#allocation11 + $0x58] sm:$0xff]   ;;  %v3724_v29 = vsel %vm10014_vm12, 0, %v3723_v4  ;;  %v7531_v34 = vld [vmem:[%s9005_s24 + $0x1e0] sm:$0xff] }
 0x1c9   : > { %7898 = vmatpush3.bf16.msra.mxu1 %v8457_v28  ;;  %8141 = vmatprep.mubr.msk.bf16.mxu1 %vm1651_vm9, %v5960_v38  ;;  %v3773_v14 = vsel %vm10021_vm13, 0, %v3772_v48  ;;  %v8467_v36 = vld [vmem:[#allocation11 + $0xe8] sm:$0xff]   ;;  %v8468_v15 = vld [vmem:[#allocation11 + $0x18] sm:$0xff]   ;;  %3725 = vst [vmem:[#allocation3 + $0x68] sm:$0x1] %v3724_v29  ;;  %v8470_v27 = vld [vmem:[#allocation11 + $0x60] sm:$0xff]  }
 0x1ca   : > { %7899 = vmatprep.subr.bf16.mxu1 %v8459_v56  ;;  %v8469_v16 = vld [vmem:[#allocation11 + $0xa8] sm:$0xff]   ;;  %3774 = vst [vmem:[#allocation3 + $0x6c] sm:$0x1] %v3773_v14  ;;  %v3717_v13 = vld [vmem:[#allocation3 + $0x58] sm:$0x1]  ;;  %7835 = vmatprep.subr.bf16.mxu0 %v8466_v41  ;;  %v7533_v18 = vld [vmem:[%s9005_s24 + $0x1f0] sm:$0xff] }
 0x1cb   : > { %v3766_v54 = vld [vmem:[#allocation3 + $0x5c] sm:$0x1]  ;;  %v3718_v47 = vsel %vm10014_vm12, 0, %v3717_v13  ;;  %v3726_v57 = vld [vmem:[#allocation3 + $0x70] sm:$0x1]  ;;  %7836 = vmatpush3.bf16.msra.mxu0 %v8468_v15  ;;  %v7532_v24 = vld [vmem:[%s9005_s24 + $0x1e8] sm:$0xff] }
 0x1cc   : > { %v3767_v8 = vsel %vm10021_vm13, 0, %v3766_v54  ;;  %v3775_v25 = vld [vmem:[#allocation3 + $0x74] sm:$0x1]  ;;  %3719 = vst [vmem:[#allocation3 + $0x58] sm:$0x1] %v3718_v47  ;;  %v3727_v60 = vsel %vm10014_vm12, 0, %v3726_v57  ;;  %v5962_v19 = vpack.c.bf16 %v7532_v24, %v7531_v34  ;;  %7837 = vmatprep.subr.bf16.mxu0 %v8470_v27 }
 0x1cd   : > { %7900 = vmatpush3.bf16.msra.mxu1 %v8461_v22  ;;  %3768 = vst [vmem:[#allocation3 + $0x5c] sm:$0x1] %v3767_v8  ;;  %v3776_v26 = vsel %vm10021_vm13, 0, %v3775_v25  ;;  %3728 = vst [vmem:[#allocation3 + $0x70] sm:$0x1] %v3727_v60  ;;  %v8473_v38 = vld [vmem:[#allocation11 + $0xb0] sm:$0xff]  }
 0x1ce   : > { %7901 = vmatprep.subr.bf16.mxu1 %v8463_v17  ;;  %3777 = vst [vmem:[#allocation3 + $0x74] sm:$0x1] %v3776_v26  ;;  %v3720_v52 = vld [vmem:[#allocation3 + $0x60] sm:$0x1]  ;;  %v3769_v58 = vld [vmem:[#allocation3 + $0x64] sm:$0x1] }
 0x1cf   : > { %v3721_v28 = vsel %vm10014_vm12, 0, %v3720_v52  ;;  %v3770_v37 = vsel %vm10021_vm13, 0, %v3769_v58  ;;  %v3735_v45 = vld [vmem:[#allocation3 + $0x88] sm:$0x1]  ;;  %v3784_v46 = vld [vmem:[#allocation3 + $0x8c] sm:$0x1] }
 0x1d0   : > { %8142 = vmatmul.mubr.msk.bf16.gmra.mrb[32].mxu1 %vm1651_vm9, %v5961_v62  ;;  %3722 = vst [vmem:[#allocation3 + $0x60] sm:$0x1] %v3721_v28  ;;  %3771 = vst [vmem:[#allocation3 + $0x64] sm:$0x1] %v3770_v37  ;;  %v3736_v20 = vsel %vm10014_vm12, 0, %v3735_v45  ;;  %v3785_v49 = vsel %vm10021_vm13, 0, %v3784_v46 }
 0x1d1   : > { %7902 = vmatpush3.bf16.msra.mxu1 %v8465_v5  ;;  %8145 = vmatprep.mubr.msk.bf16.mxu1 %vm1651_vm9, %v5962_v19  ;;  %3737 = vst [vmem:[#allocation3 + $0x88] sm:$0x1] %v3736_v20  ;;  %3786 = vst [vmem:[#allocation3 + $0x8c] sm:$0x1] %v3785_v49  ;;  %v3729_v2 = vld [vmem:[#allocation3 + $0x78] sm:$0x1] }
 0x1d2   : > { %7903 = vmatprep.subr.bf16.mxu1 %v8467_v36  ;;  %v3778_v7 = vld [vmem:[#allocation3 + $0x7c] sm:$0x1]  ;;  %v3730_v11 = vsel %vm10014_vm12, 0, %v3729_v2  ;;  %v3738_v63 = vld [vmem:[#allocation3 + $0x90] sm:$0x1]  ;;  %v8476_v14 = vld [vmem:[#allocation11 + $0x28] sm:$0xff]  }
 0x1d3   : > { %v3779_v6 = vsel %vm10021_vm13, 0, %v3778_v7  ;;  %3731 = vst [vmem:[#allocation3 + $0x78] sm:$0x1] %v3730_v11  ;;  %v3787_v44 = vld [vmem:[#allocation3 + $0x94] sm:$0x1]  ;;  %v8475_v29 = vld [vmem:[#allocation11 + $0xf8] sm:$0xff]  }
 0x1d4   : > { %3780 = vst [vmem:[#allocation3 + $0x7c] sm:$0x1] %v3779_v6  ;;  %v3788_v3 = vsel %vm10021_vm13, 0, %v3787_v44  ;;  %v3732_v4 = vld [vmem:[#allocation3 + $0x80] sm:$0x1]  ;;  %v8477_v36 = vld [vmem:[#allocation11 + $0xb8] sm:$0xff]  }
 0x1d5   : > { %7904 = vmatpush3.bf16.msra.mxu1 %v8469_v16  ;;  %3789 = vst [vmem:[#allocation3 + $0x94] sm:$0x1] %v3788_v3  ;;  %v3781_v48 = vld [vmem:[#allocation3 + $0x84] sm:$0x1]  ;;  %v3733_v62 = vsel %vm10014_vm12, 0, %v3732_v4  ;;  %v8478_v15 = vld [vmem:[#allocation11 + $0x70] sm:$0xff]  }
 0x1d6   : > { %v3782_v41 = vsel %vm10021_vm13, 0, %v3781_v48  ;;  %3734 = vst [vmem:[#allocation3 + $0x80] sm:$0x1] %v3733_v62  ;;  %v8480_v16 = vld [vmem:[#allocation11 + $0x1c0] sm:$0xff]   ;;  %v8484_v13 = vld [vmem:[#allocation11 + $0x78] sm:$0xff]  }
 0x1d7   : > { %3783 = vst [vmem:[#allocation3 + $0x84] sm:$0x1] %v3782_v41  ;;  %v8485_v54 = vld [vmem:[#allocation11 + $0x38] sm:$0xff]   ;;  %v8498_v19 = vld [vmem:[#allocation11 + $0x140] sm:$0xff]  }
 0x21b   : > { %v7693_v40 = vpop.f32.mrb[0].mxu0 }
 0x21c   : > { %v7694_v23 = vpop.f32.mrb[1].mxu0 }
 0x21d   : > { %v10050_v32 = vadd.f32 %v7694_v23, %v7693_v40  ;;  %v7696_v33 = vpop.f32.mrb[2].mxu0  ;;  %v8471_v40 = vld [vmem:[#allocation11 + $0xf0] sm:$0xff]   ;;  %v7534_v23 = vld [vmem:[%s9005_s24 + $0x1f8] sm:$0xff]  ;;  %s8671_s24 = scalar_lea.vmem %s8670_s13, 4096 }
 0x21e   : > { %v7697_v35 = vpop.f32.mrb[3].mxu0  ;;  %v5963_v55 = vpack.c.bf16 %v7534_v23, %v7533_v18  ;;  %7905 = vmatprep.subr.bf16.mxu1 %v8471_v40  ;;  %p8673_p1 = scmp.lt.s32.totalorder %s8671_s24, %s8665_s19 }
 0x21f   : > { %v10053_v0 = vadd.f32 %v7697_v35, %v7696_v33  ;;  %v8472_v33 = vld [vmem:[#allocation11 + $0x20] sm:$0xff]   ;;  %7906 = vmatpush3.bf16.msra.mxu1 %v8473_v38 }
 0x220   : > { %8146 = vmatmul.mubr.msk.bf16.gmra.mrb[36].mxu1 %vm1651_vm9, %v5963_v55  ;;  %7838 = vmatpush3.bf16.msra.mxu0 %v8472_v33  ;;  %p8674_p2 = por %p8673_p1, %p8672_p12 }
 0x221   : > { %7907 = vmatprep.subr.bf16.mxu1 %v8475_v29 }
 0x222   : > { %p8675_p4 = pnand %p8674_p2, %p8668_p7 }
 0x223   : > { %v7699_v43 = vpop.f32.mrb[4].mxu0  ;;  %7908 = vmatpush3.bf16.msra.mxu1 %v8477_v36 }
 0x224   : > { %v7700_v61 = vpop.f32.mrb[5].mxu0  ;;  %8021 = vmatprep.subr.bf16.mxu1 %v8480_v16  ;;  %v4184_v16 = vld [vmem:[#allocation3] sm:$0xf] }
 0x225   : > { %v10070_v53 = vadd.f32 %v7700_v61, %v7699_v43  ;;  %v7702_v12 = vpop.f32.mrb[6].mxu0  ;;  %v3739_v43 = vsel %vm10014_vm12, 0, %v3738_v63 }
 0x226   : > { %v7703_v10 = vpop.f32.mrb[7].mxu0  ;;  %3740 = vst [vmem:[#allocation3 + $0x90] sm:$0x1] %v3739_v43 }
 0x227   : > { %v10078_v31 = vadd.f32 %v7703_v10, %v7702_v12  ;;  %v8474_v12 = vld [vmem:[#allocation11 + $0x68] sm:$0xff]   ;;  %v8481_v10 = vld [vmem:[#allocation11 + $0x30] sm:$0xff]  }
 0x228   : > { %7839 = vmatprep.subr.bf16.mxu0 %v8474_v12 }
 0x229   : > { %7840 = vmatpush3.bf16.msra.mxu0 %v8476_v14 }
 0x22a   : > { %7841 = vmatprep.subr.bf16.mxu0 %v8478_v15 }
 0x22d   : > { %7842 = vmatpush3.bf16.msra.mxu0 %v8481_v10 }
 0x22e   : > { %7843 = vmatprep.subr.bf16.mxu0 %v8484_v13 }
 0x22f   : > { %v7705_v56 = vpop.f32.mrb[8].mxu0 }
 0x230   : > { %v7706_v22 = vpop.f32.mrb[9].mxu0 }
 0x231   : > { %v10096_v30 = vadd.f32 %v7706_v22, %v7705_v56  ;;  %v7708_v35 = vpop.f32.mrb[10].mxu0  ;;  %7844 = vmatpush3.bf16.msra.mxu0 %v8485_v54  ;;  %v4200_v54 = vld [vmem:[#allocation3 + $0x50] sm:$0xf] }
 0x232   : > { %v7709_v39 = vpop.f32.mrb[11].mxu0  ;;  %7957 = vmatprep.subr.bf16.mxu0 %v8498_v19 }
 0x233   : > { %v10099_v42 = vadd.f32 %v7709_v39, %v7708_v35 }
 0x237   : > { %v7711_v17 = vpop.f32.mrb[12].mxu0 }
 0x238   : > { %v7712_v1 = vpop.f32.mrb[13].mxu0 }
 0x239   : > { %v10111_v9 = vadd.f32 %v7712_v1, %v7711_v17  ;;  %v7714_v51 = vpop.f32.mrb[14].mxu0 }
 0x23a   : > { %v7715_v5 = vpop.f32.mrb[15].mxu0 }
 0x23b   : > { %v10115_v61 = vadd.f32 %v7715_v5, %v7714_v51 }
 0x245   : > { %v7717_v59 = vpop.f32.mrb[16].mxu0 }
 0x246   : > { %v7718_v34 = vpop.f32.mrb[17].mxu0 }
 0x247   : > { %v10121_v47 = vadd.f32 %v7718_v34, %v7717_v59  ;;  %v7720_v8 = vpop.f32.mrb[18].mxu0  ;;  %v4217_v59 = vshrl.u32 %v4184_v16, 16  ;;  %v4220_v34 = vshll.u32 %v4184_v16, 16 }
 0x248   : > { %v7721_v57 = vpop.f32.mrb[19].mxu0 }
 0x249   : > { %v10123_v25 = vadd.f32 %v7721_v57, %v7720_v8 }
 0x24d   : > { %v7723_v60 = vpop.f32.mrb[20].mxu0 }
 0x24e   : > { %v7724_v26 = vpop.f32.mrb[21].mxu0 }
 0x24f   : > { %v10125_v24 = vadd.f32 %v7724_v26, %v7723_v60  ;;  %v7726_v27 = vpop.f32.mrb[22].mxu0  ;;  %v4329_v26 = vshrl.u32 %v4200_v54, 16 }
 0x250   : > { %v7727_v52 = vpop.f32.mrb[23].mxu0 }
 0x251   : > { %v10127_v58 = vadd.f32 %v7727_v52, %v7726_v27  ;;  %v4332_v27 = vshll.u32 %v4200_v54, 16 }
 0x255   : > { %v7729_v28 = vpop.f32.mrb[24].mxu0 }
 0x256   : > { %v7730_v37 = vpop.f32.mrb[25].mxu0 }
 0x257   : > { %v10129_v56 = vadd.f32 %v7730_v37, %v7729_v28  ;;  %v7732_v40 = vpop.f32.mrb[26].mxu0  ;;  %v4185_v28 = vld [vmem:[#allocation3 + $0x4] sm:$0x1]  ;;  %v4219_v37 = vrot.slane %v4217_v59, 4 }
 0x258   : > { %v7733_v18 = vpop.f32.mrb[27].mxu0 }
 0x259   : > { %v10131_v23 = vadd.f32 %v7733_v18, %v7732_v40  ;;  %v4222_v40 = vrot.slane %v4220_v34, 5 }
 0x25e   : > { %v7735_v33 = vpop.f32.mrb[28].mxu0 }
 0x25f   : > { %v7736_v39 = vpop.f32.mrb[29].mxu0 }
 0x260   : > { %v7769_v22 = vpop.f32.mrb[0].mxu1  ;;  %v10133_v46 = vadd.f32 %v7736_v39, %v7735_v33  ;;  %v7738_v20 = vpop.f32.mrb[30].mxu0  ;;  %v4480_v33 = vld [vmem:[#allocation3] sm:$0xe]  ;;  %v4481_v39 = vld [vmem:[#allocation3 + $0x4] sm:$0x1] }
 0x261   : > { %v7770_v55 = vpop.f32.mrb[1].mxu1  ;;  %v7739_v2 = vpop.f32.mrb[31].mxu0 }
 0x262   : > { %v7771_v35 = vadd.f32 %v7770_v55, %v7769_v22  ;;  %v7772_v38 = vpop.f32.mrb[2].mxu1  ;;  %v10138_v17 = vadd.f32 %v7739_v2, %v7738_v20  ;;  %v4334_v22 = vrot.slane %v4332_v27, 5 }
 0x263   : > { %v7773_v45 = vpop.f32.mrb[3].mxu1 }
 0x264   : > { %v7774_v49 = vadd.f32 %v7773_v45, %v7772_v38  ;;  %v10136_v7 = vadd.f32 %v7771_v35, %v10096_v30  ;;  %v4201_v35 = vld [vmem:[#allocation3 + $0x54] sm:$0x1]  ;;  %v10164_v38 = vld [vmem:[%s10774_s4] ss:$0 sm:$0xff]  ;;  %v4223_v45 = vor.u32 %v4222_v40, %v4219_v37 }
 0x266   : > { %v10141_v11 = vadd.f32 %v7774_v49, %v10099_v42  ;;  %v7757_v6 = vpop.f32.mrb[32].mxu0  ;;  %v4496_v49 = vld [vmem:[#allocation3 + $0x50] sm:$0xe] }
 0x267   : > { %v7758_v63 = vpop.f32.mrb[33].mxu0 }
 0x268   : > { %v7759_v1 = vadd.f32 %v7758_v63, %v7757_v6  ;;  %v7760_v43 = vpop.f32.mrb[34].mxu0  ;;  %v7415_v63 = vrot.slane %v4480_v33, 9 }
 0x269   : > { %v7761_v44 = vpop.f32.mrb[35].mxu0 }
 0x26a   : > { %v7762_v51 = vadd.f32 %v7761_v44, %v7760_v43  ;;  %v3460_v3 = vadd.f32 %v7759_v1, %v10050_v32  ;;  %v4338_v1 = vshll.u32 %v4201_v35, 16 }
 0x26b   : > { %v7775_v5 = vpop.f32.mrb[4].mxu1 }
 0x26c   : > { %v10145_v4 = vadd.f32 %v7762_v51, %v10053_v0  ;;  %v7776_v48 = vpop.f32.mrb[5].mxu1 }
 0x26d   : > { %v7777_v30 = vadd.f32 %v7776_v48, %v7775_v5  ;;  %v7778_v62 = vpop.f32.mrb[6].mxu1  ;;  %v10169_v5 = vld [vmem:[%s10775_s5] ss:$0 sm:$0xff] }
 0x26e   : > { %v7763_v41 = vpop.f32.mrb[36].mxu0  ;;  %v7779_v12 = vpop.f32.mrb[7].mxu1 }
 0x26f   : > { %v7764_v29 = vpop.f32.mrb[37].mxu0  ;;  %v7780_v42 = vadd.f32 %v7779_v12, %v7778_v62  ;;  %v10148_v15 = vadd.f32 %v7777_v30, %v10111_v9  ;;  %v4549_v30 = vrot.slane %v4481_v39, 5  ;;  %v10214_v39 = vld [vmem:[#allocation3 + $0x4c] sm:$0x1] }
 0x270   : > { %v7765_v14 = vadd.f32 %v7764_v29, %v7763_v41  ;;  %v7766_v36 = vpop.f32.mrb[38].mxu0 }
 0x271   : > { %v7767_v10 = vpop.f32.mrb[39].mxu0  ;;  %v10152_v0 = vadd.f32 %v7780_v42, %v10115_v61  ;;  %v4331_v61 = vrot.slane %v4329_v26, 4  ;;  %v10173_v42 = vrot.slane %v4223_v45, 4  ;;  %v5274_v26 = vld [vmem:[#allocation3 + $0x48] sm:$0xf] }
 0x272   : > { %v7768_v13 = vadd.f32 %v7767_v10, %v7766_v36  ;;  %v3468_v32 = vadd.f32 %v7765_v14, %v10070_v53  ;;  %v7423_v14 = vrot.slane %v4496_v49, 9 }
 0x273   : > { %v7781_v8 = vpop.f32.mrb[8].mxu1 }
 0x274   : > { %v3471_v57 = vadd.f32 %v7768_v13, %v10078_v31  ;;  %v7782_v60 = vpop.f32.mrb[9].mxu1  ;;  %v4226_v31 = vshll.u32 %v4185_v28, 16  ;;  %v5394_v28 = vshll.u32 %v5274_v26, 16 }
 0x275   : > { %v7783_v52 = vadd.f32 %v7782_v60, %v7781_v8  ;;  %v7784_v9 = vpop.f32.mrb[10].mxu1  ;;  %v10189_v60 = vrot.slane %v4338_v1, 5 }
 0x276   : > { %v7785_v19 = vpop.f32.mrb[11].mxu1  ;;  %v10171_v62 = vrot.slane %v4226_v31, 5  ;;  %v10216_v45 = vrot.slane %v5394_v28, 5 }
 0x277   : > { %v7786_v18 = vadd.f32 %v7785_v19, %v7784_v9  ;;  %v10156_v53 = vadd.f32 %v7783_v52, %v10121_v47  ;;  %v4497_v47 = vld [vmem:[#allocation3 + $0x54] sm:$0x1]  ;;  %v5391_v52 = vshrl.u32 %v5274_v26, 16 }
 0x278   : > { %v4581_v36 = vrot.slane %v4497_v47, 5 }
 0x279   : > { %v10159_v55 = vadd.f32 %v7786_v18, %v10123_v25  ;;  %v4335_v25 = vor.u32 %v4334_v22, %v4331_v61  ;;  %v10207_v61 = vrot.slane %v5391_v52, 4 }
 0x27a   : > { %v10212_v35 = vsel %vm10181_vm1, %v7423_v14, %v4581_v36 }
 0x27b   : > { %v7787_v20 = vpop.f32.mrb[12].mxu1  ;;  %v8111_v6 = vpop.f32.mrb[40].mxu0  ;;  %v10187_v8 = vrot.slane %v4335_v25, 4 }
 0x27c   : > { %v7788_v2 = vpop.f32.mrb[13].mxu1  ;;  %v3565_v51 = vadd.f32 %v8111_v6, %v3468_v32  ;;  %v3556_v48 = vpop.f32.mrb[41].mxu0 }
 0x27d   : > { %v7789_v43 = vadd.f32 %v7788_v2, %v7787_v20  ;;  %v7790_v44 = vpop.f32.mrb[14].mxu1  ;;  %v3557_v12 = vadd.f32 %v3556_v48, %v3460_v3  ;;  %v8112_v29 = vpop.f32.mrb[42].mxu0  ;;  %v4341_v6 = vsel %vm9386_vm8, %v10187_v8, %v10189_v60 }
 0x27e   : > { %v7791_v41 = vpop.f32.mrb[15].mxu1  ;;  %v3628_v10 = vmul.f32 %v10164_v38, %v3565_v51  ;;  %v3568_v13 = vadd.f32 %v8112_v29, %v3471_v57  ;;  %v3559_v32 = vpop.f32.mrb[43].mxu0  ;;  %v4028_v29 = vld [vmem:[#allocation3 + $0x18] sm:$0xf] }
 0x27f   : > { %v7792_v16 = vadd.f32 %v7791_v41, %v7790_v44  ;;  %v10177_v54 = vadd.f32 %v7789_v43, %v10125_v24  ;;  %v3626_v3 = vmul.f32 %v10164_v38, %v3557_v12  ;;  %v3560_v34 = vadd.f32 %v3559_v32, %v10145_v4 }
 0x280   : > { %v3651_v57 = vadd.f32 %v10169_v5, %v3628_v10  ;;  %v3629_v24 = vmul.f32 %v10164_v38, %v3568_v13  ;;  %v10200_v4 = vsel %vm10181_vm1, %v7415_v63, %v4549_v30  ;;  %v5397_v43 = vor.u32 %v10216_v45, %v10207_v61 }
 0x281   : > { %v10194_v27 = vadd.f32 %v7792_v16, %v10127_v58  ;;  %v3649_v9 = vadd.f32 %v10169_v5, %v3626_v3  ;;  %v3627_v19 = vmul.f32 %v10164_v38, %v3560_v34  ;;  %v4229_v58 = vsel %vm9386_vm8, %v10173_v42, %v10171_v62  ;;  %v4031_v3 = vld [vmem:[#allocation3 + $0x1c] sm:$0x1] }
 0x282   : > { %v3667_v40 = vmax.f32 %v3651_v57, 0.0  ;;  %v3652_v18 = vadd.f32 %v10169_v5, %v3629_v24  ;;  %v5400_v44 = vshll.u32 %v10214_v39, 16 }
 0x283   : > { %v7793_v37 = vpop.f32.mrb[16].mxu1  ;;  %v3665_v33 = vmax.f32 %v3649_v9, 0.0  ;;  %v3650_v31 = vadd.f32 %v10169_v5, %v3627_v19  ;;  %v4016_v19 = vld [vmem:[#allocation3 + $0x8] sm:$0xf] }
 0x284   : > { %v7794_v22 = vpop.f32.mrb[17].mxu1  ;;  %v7661_v47 = vpack.c.bf16 %v3667_v40, %v3667_v40  ;;  %v3668_v2 = vmax.f32 %v3652_v18, 0.0 }
 0x285   : > { %v10218_v20 = vadd.f32 %v7794_v22, %v7793_v37  ;;  %v7796_v49 = vpop.f32.mrb[18].mxu1  ;;  %v7659_v25 = vpack.c.bf16 %v3665_v33, %v3665_v33  ;;  %v3666_v1 = vmax.f32 %v3650_v31, 0.0  ;;  %v4019_v31 = vld [vmem:[#allocation3 + $0xc] sm:$0x1] }
 0x286   : > { %v7797_v63 = vpop.f32.mrb[19].mxu1  ;;  %v3871_v48 = vshrl.u32 %v7661_v47, 16  ;;  %v3874_v30 = vshll.u32 %v7661_v47, 16  ;;  %v7662_v41 = vpack.c.bf16 %v3668_v2, %v3668_v2  ;;  %v8115_v12 = vpop.f32.mrb[44].mxu0 }
 0x287   : > { %v10227_v51 = vadd.f32 %v7797_v63, %v7796_v49  ;;  %v3855_v14 = vshrl.u32 %v7659_v25, 16  ;;  %v3858_v36 = vshll.u32 %v7659_v25, 16  ;;  %v7660_v16 = vpack.c.bf16 %v3666_v1, %v3666_v1  ;;  %v3572_v13 = vpop.f32.mrb[45].mxu0  ;;  %v4034_v25 = vld [vmem:[#allocation3 + $0x20] sm:$0xf] }
 0x288   : > { %v3581_v10 = vadd.f32 %v8115_v12, %v10148_v15  ;;  %v3873_v32 = vrot.slane %v3871_v48, 7  ;;  %v3879_v34 = vshrl.u32 %v7662_v41, 16  ;;  %v3882_v26 = vshll.u32 %v7662_v41, 16  ;;  %v8116_v24 = vpop.f32.mrb[46].mxu0 }
 0x289   : > { %v3573_v57 = vadd.f32 %v3572_v13, %v10136_v7  ;;  %v3857_v9 = vrot.slane %v3855_v14, 7  ;;  %v3863_v28 = vshrl.u32 %v7660_v16, 16  ;;  %v3866_v37 = vshll.u32 %v7660_v16, 16  ;;  %v3575_v40 = vpop.f32.mrb[47].mxu0  ;;  %v4022_v13 = vld [vmem:[#allocation3 + $0x10] sm:$0xf] }
 0x28a   : > { %v3632_v15 = vmul.f32 %v10164_v38, %v3581_v10  ;;  %v3876_v22 = vor.u32 %v3874_v30, %v3873_v32  ;;  %v3877_v33 = vrot.slane %v3873_v32, 4  ;;  %v3881_v49 = vrot.slane %v3879_v34, 7  ;;  %v4037_v10 = vld [vmem:[#allocation3 + $0x24] sm:$0x1] }
 0x28b   : > { %v7799_v18 = vpop.f32.mrb[20].mxu1  ;;  %v3630_v7 = vmul.f32 %v10164_v38, %v3573_v57  ;;  %v3860_v2 = vor.u32 %v3858_v36, %v3857_v9  ;;  %v3861_v63 = vrot.slane %v3857_v9, 4  ;;  %v3865_v1 = vrot.slane %v3863_v28, 7  ;;  %v4025_v28 = vld [vmem:[#allocation3 + $0x14] sm:$0x1] }
 0x28c   : > { %v7800_v47 = vpop.f32.mrb[21].mxu1  ;;  %v3655_v48 = vadd.f32 %v10169_v5, %v3632_v15  ;;  %v4029_v14 = vsel %vm10233_vm2, %v3876_v22, %v4028_v29  ;;  %v4032_v30 = vsel %vm10014_vm12, %v3877_v33, %v4031_v3  ;;  %v3884_v16 = vor.u32 %v3882_v26, %v3881_v49 }
 0x28d   : > { %v7801_v41 = vadd.f32 %v7800_v47, %v7799_v18  ;;  %v7802_v12 = vpop.f32.mrb[22].mxu1  ;;  %4030 = vst [vmem:[#allocation3 + $0x18] sm:$0xf] %v4029_v14  ;;  %4033 = vst [vmem:[#allocation3 + $0x1c] sm:$0x1] %v4032_v30  ;;  %v4017_v36 = vsel %vm10233_vm2, %v3860_v2, %v4016_v19  ;;  %v4020_v34 = vsel %vm10014_vm12, %v3861_v63, %v4019_v31  ;;  %v3885_v57 = vrot.slane %v3881_v49, 4 }
 0x28e   : > { %v7803_v32 = vpop.f32.mrb[23].mxu1  ;;  %v3868_v9 = vor.u32 %v3866_v37, %v3865_v1  ;;  %4018 = vst [vmem:[#allocation3 + $0x8] sm:$0xf] %v4017_v36  ;;  %4021 = vst [vmem:[#allocation3 + $0xc] sm:$0x1] %v4020_v34  ;;  %v4035_v29 = vsel %vm10233_vm2, %v3884_v16, %v4034_v25  ;;  %v3869_v3 = vrot.slane %v3865_v1, 4  ;;  %v3653_v22 = vadd.f32 %v10169_v5, %v3630_v7 }
 0x28f   : > { %v10248_v15 = vadd.f32 %v7803_v32, %v7802_v12  ;;  %v3671_v26 = vmax.f32 %v3655_v48, 0.0  ;;  %4036 = vst [vmem:[#allocation3 + $0x20] sm:$0xf] %v4035_v29  ;;  %v4038_v18 = vsel %vm10014_vm12, %v3885_v57, %v4037_v10  ;;  %v3584_v37 = vadd.f32 %v8116_v24, %v10152_v0  ;;  %v4040_v29 = vld [vmem:[#allocation3 + $0x28] sm:$0xf] }
 0x290   : > { %v4023_v19 = vsel %vm10233_vm2, %v3868_v9, %v4022_v13  ;;  %4039 = vst [vmem:[#allocation3 + $0x24] sm:$0x1] %v4038_v18  ;;  %v4026_v33 = vsel %vm10014_vm12, %v3869_v3, %v4025_v28  ;;  %v3576_v49 = vadd.f32 %v3575_v40, %v10141_v11  ;;  %v8119_v47 = vpop.f32.mrb[48].mxu0  ;;  %v10262_v2 = vadd.f32 %v7801_v41, %v10133_v46  ;;  %v4052_v46 = vld [vmem:[#allocation3 + $0x38] sm:$0xf] }
 0x291   : > { %4024 = vst [vmem:[#allocation3 + $0x10] sm:$0xf] %v4023_v19  ;;  %v7665_v31 = vpack.c.bf16 %v3671_v26, %v3671_v26  ;;  %4027 = vst [vmem:[#allocation3 + $0x14] sm:$0x1] %v4026_v33  ;;  %v3669_v63 = vmax.f32 %v3653_v22, 0.0  ;;  %v3633_v25 = vmul.f32 %v10164_v38, %v3584_v37  ;;  %v3597_v7 = vadd.f32 %v8119_v47, %v10177_v54  ;;  %v3588_v1 = vpop.f32.mrb[49].mxu0 }
 0x292   : > { %v10268_v0 = vadd.f32 %v10218_v20, %v10129_v56  ;;  %v3631_v12 = vmul.f32 %v10164_v38, %v3576_v49  ;;  %v3589_v11 = vadd.f32 %v3588_v1, %v10156_v53  ;;  %v8120_v40 = vpop.f32.mrb[50].mxu0  ;;  %v4055_v13 = vld [vmem:[#allocation3 + $0x3c] sm:$0x1] }
 0x293   : > { %v3903_v24 = vshrl.u32 %v7665_v31, 16  ;;  %v3906_v48 = vshll.u32 %v7665_v31, 16  ;;  %v7663_v41 = vpack.c.bf16 %v3669_v63, %v3669_v63  ;;  %v3656_v14 = vadd.f32 %v10169_v5, %v3633_v25  ;;  %v3591_v16 = vpop.f32.mrb[51].mxu0  ;;  %v4043_v31 = vld [vmem:[#allocation3 + $0x2c] sm:$0x1] }
 0x294   : > { %v3636_v30 = vmul.f32 %v10164_v38, %v3597_v7  ;;  %v3600_v54 = vadd.f32 %v8120_v40, %v10194_v27  ;;  %v3654_v56 = vadd.f32 %v10169_v5, %v3631_v12  ;;  %v3634_v20 = vmul.f32 %v10164_v38, %v3589_v11  ;;  %v4061_v12 = vld [vmem:[#allocation3 + $0x44] sm:$0x1] }
 0x295   : > { %v3905_v10 = vrot.slane %v3903_v24, 7  ;;  %v3592_v32 = vadd.f32 %v3591_v16, %v10159_v55  ;;  %v3887_v36 = vshrl.u32 %v7663_v41, 16  ;;  %v3890_v53 = vshll.u32 %v7663_v41, 16 }
 0x296   : > { %v3672_v34 = vmax.f32 %v3656_v14, 0.0  ;;  %v3659_v57 = vadd.f32 %v10169_v5, %v3636_v30  ;;  %v3670_v3 = vmax.f32 %v3654_v56, 0.0  ;;  %v3657_v27 = vadd.f32 %v10169_v5, %v3634_v20 }
 0x297   : > { %v3908_v9 = vor.u32 %v3906_v48, %v3905_v10  ;;  %v3909_v28 = vrot.slane %v3905_v10, 4  ;;  %v3889_v26 = vrot.slane %v3887_v36, 7  ;;  %v3637_v22 = vmul.f32 %v10164_v38, %v3600_v54  ;;  %v4058_v48 = vld [vmem:[#allocation3 + $0x40] sm:$0xf]  ;;  %v4046_v10 = vld [vmem:[#allocation3 + $0x30] sm:$0xf] }
 0x298   : > { %v7666_v18 = vpack.c.bf16 %v3672_v34, %v3672_v34  ;;  %v3675_v19 = vmax.f32 %v3659_v57, 0.0  ;;  %v8479_v37 = vld [vmem:[#allocation3 + $0x8] ss:$8 sps:$4 sm:$0xff]   ;;  %v7664_v49 = vpack.c.bf16 %v3670_v3, %v3670_v3  ;;  %v3673_v47 = vmax.f32 %v3657_v27, 0.0  ;;  %v4049_v3 = vld [vmem:[#allocation3 + $0x34] sm:$0x1] }
 0x299   : > { %v4053_v55 = vsel %vm10233_vm2, %v3908_v9, %v4052_v46  ;;  %v4056_v33 = vsel %vm10014_vm12, %v3909_v28, %v4055_v13  ;;  %v3892_v63 = vor.u32 %v3890_v53, %v3889_v26  ;;  %v3893_v25 = vrot.slane %v3889_v26, 4  ;;  %v8123_v24 = vpop.f32.mrb[52].mxu0  ;;  %6678 = vmatprep.mubr.bf16.mxu1 %v8479_v37 }
 0x29a   : > { %4054 = vst [vmem:[#allocation3 + $0x38] sm:$0xf] %v4053_v55  ;;  %4057 = vst [vmem:[#allocation3 + $0x3c] sm:$0x1] %v4056_v33  ;;  %v3911_v7 = vshrl.u32 %v7666_v18, 16  ;;  %v3914_v1 = vshll.u32 %v7666_v18, 16  ;;  %v7669_v41 = vpack.c.bf16 %v3675_v19, %v3675_v19  ;;  %v7667_v46 = vpack.c.bf16 %v3673_v47, %v3673_v47 }
 0x29b   : > { %v3895_v11 = vshrl.u32 %v7664_v49, 16  ;;  %v3898_v40 = vshll.u32 %v7664_v49, 16  ;;  %v3604_v14 = vpop.f32.mrb[53].mxu0  ;;  %v4041_v30 = vsel %vm10233_vm2, %v3892_v63, %v4040_v29  ;;  %v4044_v54 = vsel %vm10014_vm12, %v3893_v25, %v4043_v31  ;;  %v4076_v33 = vld [vmem:[#allocation3 + $0x68] sm:$0xf] }
 0x29c   : > { %v3913_v16 = vrot.slane %v3911_v7, 7  ;;  %v3660_v13 = vadd.f32 %v10169_v5, %v3637_v22  ;;  %v10290_v56 = vpop.f32.mrb[54].mxu0  ;;  %4042 = vst [vmem:[#allocation3 + $0x28] sm:$0xf] %v4041_v30  ;;  %4045 = vst [vmem:[#allocation3 + $0x2c] sm:$0x1] %v4044_v54  ;;  %v3635_v47 = vmul.f32 %v10164_v38, %v3592_v32 }
 0x29d   : > { %v3897_v20 = vrot.slane %v3895_v11, 7  ;;  %v3935_v36 = vshrl.u32 %v7669_v41, 16  ;;  %v3938_v53 = vshll.u32 %v7669_v41, 16  ;;  %v3919_v34 = vshrl.u32 %v7667_v46, 16  ;;  %v3607_v57 = vpop.f32.mrb[55].mxu0 }
 0x29e   : > { %v3916_v9 = vor.u32 %v3914_v1, %v3913_v16  ;;  %v3917_v28 = vrot.slane %v3913_v16, 4  ;;  %v3922_v29 = vshll.u32 %v7667_v46, 16  ;;  %v3676_v27 = vmax.f32 %v3660_v13, 0.0  ;;  %v4079_v31 = vld [vmem:[#allocation3 + $0x6c] sm:$0x1] }
 0x29f   : > { %v3900_v26 = vor.u32 %v3898_v40, %v3897_v20  ;;  %v3901_v18 = vrot.slane %v3897_v20, 4  ;;  %v3937_v19 = vrot.slane %v3935_v36, 7  ;;  %v3921_v37 = vrot.slane %v3919_v34, 7  ;;  %v4064_v11 = vld [vmem:[#allocation3 + $0x58] sm:$0xf] }
 0x2a0   : > { %v4059_v22 = vsel %vm10233_vm2, %v3916_v9, %v4058_v48  ;;  %v4062_v55 = vsel %vm10014_vm12, %v3917_v28, %v4061_v12  ;;  %v7670_v49 = vpack.c.bf16 %v3676_v27, %v3676_v27  ;;  %v4067_v48 = vld [vmem:[#allocation3 + $0x5c] sm:$0x1]  ;;  %v3658_v54 = vadd.f32 %v10169_v5, %v3635_v47  ;;  %v4085_v9 = vld [vmem:[#allocation3 + $0x74] sm:$0x1] }
 0x2a1   : > { %4060 = vst [vmem:[#allocation3 + $0x40] sm:$0xf] %v4059_v22  ;;  %4063 = vst [vmem:[#allocation3 + $0x44] sm:$0x1] %v4062_v55  ;;  %v4047_v63 = vsel %vm10233_vm2, %v3900_v26, %v4046_v10  ;;  %v4050_v25 = vsel %vm10014_vm12, %v3901_v18, %v4049_v3  ;;  %v3940_v7 = vor.u32 %v3938_v53, %v3937_v19  ;;  %v3941_v1 = vrot.slane %v3937_v19, 4 }
 0x2a2   : > { %4048 = vst [vmem:[#allocation3 + $0x30] sm:$0xf] %v4047_v63  ;;  %4051 = vst [vmem:[#allocation3 + $0x34] sm:$0x1] %v4050_v25  ;;  %v3924_v12 = vor.u32 %v3922_v29, %v3921_v37  ;;  %v3925_v40 = vrot.slane %v3921_v37, 4  ;;  %v3943_v41 = vshrl.u32 %v7670_v49, 16  ;;  %v3613_v16 = vadd.f32 %v8123_v24, %v10262_v2 }
 0x2a3   : > { %v3946_v46 = vshll.u32 %v7670_v49, 16  ;;  %v4077_v32 = vsel %vm10233_vm2, %v3940_v7, %v4076_v33  ;;  %v4080_v30 = vsel %vm10014_vm12, %v3941_v1, %v4079_v31  ;;  %v4482_v10 = vld [vmem:[#allocation3 + $0x8] sm:$0xe]  ;;  %v4082_v53 = vld [vmem:[#allocation3 + $0x70] sm:$0xf]  ;;  %v3605_v34 = vadd.f32 %v3604_v14, %v10268_v0  ;;  %v8482_v25 = vld [vmem:[#allocation11 + $0x180] sm:$0xff]  }
 0x2a4   : > { %4078 = vst [vmem:[#allocation3 + $0x68] sm:$0xf] %v4077_v32  ;;  %4081 = vst [vmem:[#allocation3 + $0x6c] sm:$0x1] %v4080_v30  ;;  %v4065_v13 = vsel %vm10233_vm2, %v3924_v12, %v4064_v11  ;;  %v4068_v20 = vsel %vm10014_vm12, %v3925_v40, %v4067_v48  ;;  %v3945_v36 = vrot.slane %v3943_v41, 7  ;;  %v3674_v28 = vmax.f32 %v3658_v54, 0.0 }
 0x2a5   : > { %4066 = vst [vmem:[#allocation3 + $0x58] sm:$0xf] %v4065_v13  ;;  %4069 = vst [vmem:[#allocation3 + $0x5c] sm:$0x1] %v4068_v20  ;;  %v3640_v3 = vmul.f32 %v10164_v38, %v3613_v16  ;;  %v3519_v2 = vadd.f32 %v10248_v15, %v10138_v17  ;;  %v3511_v24 = vadd.f32 %v10227_v51, %v10131_v23  ;;  %v4483_v29 = vld [vmem:[#allocation3 + $0xc] sm:$0x1] }
 0x2a6   : > { %v3948_v27 = vor.u32 %v3946_v46, %v3945_v36  ;;  %v3949_v26 = vrot.slane %v3945_v36, 4  ;;  %v3638_v18 = vmul.f32 %v10164_v38, %v3605_v34  ;;  %v7416_v19 = vrot.slane %v4482_v10, 9  ;;  %v4186_v55 = vld [vmem:[#allocation3 + $0x8] sm:$0xf]  ;;  %v4070_v11 = vld [vmem:[#allocation3 + $0x60] sm:$0xf] }
 0x2a7   : > { %v7668_v37 = vpack.c.bf16 %v3674_v28, %v3674_v28  ;;  %v3663_v0 = vadd.f32 %v10169_v5, %v3640_v3  ;;  %v3616_v14 = vadd.f32 %v10290_v56, %v3519_v2  ;;  %v3608_v22 = vadd.f32 %v3607_v57, %v3511_v24  ;;  %v8487_v41 = vld [vmem:[#allocation11 + $0x1c8] sm:$0xff]   ;;  %v4073_v46 = vld [vmem:[#allocation3 + $0x64] sm:$0x1]  ;;  %v8483_v54 = vld [vmem:[#allocation3 + $0x18] ss:$8 sps:$4 sm:$0xff]  }
 0x2a8   : > { %v4083_v33 = vsel %vm10233_vm2, %v3948_v27, %v4082_v53  ;;  %v4086_v17 = vsel %vm10014_vm12, %v3949_v26, %v4085_v9  ;;  %v3661_v23 = vadd.f32 %v10169_v5, %v3638_v18  ;;  %v4553_v51 = vrot.slane %v4483_v29, 5  ;;  %v4187_v53 = vld [vmem:[#allocation3 + $0xc] sm:$0x1]  ;;  %v4100_v9 = vld [vmem:[#allocation3 + $0x88] sm:$0xf] }
 0x2a9   : > { %4084 = vst [vmem:[#allocation3 + $0x70] sm:$0xf] %v4083_v33  ;;  %4087 = vst [vmem:[#allocation3 + $0x74] sm:$0x1] %v4086_v17  ;;  %v3927_v15 = vshrl.u32 %v7668_v37, 16  ;;  %v3930_v31 = vshll.u32 %v7668_v37, 16  ;;  %v3641_v47 = vmul.f32 %v10164_v38, %v3616_v14  ;;  %v3639_v56 = vmul.f32 %v10164_v38, %v3608_v22 }
 0x2aa   : > { %v3679_v49 = vmax.f32 %v3663_v0, 0.0  ;;  %v3677_v63 = vmax.f32 %v3661_v23, 0.0  ;;  %v4554_v57 = vsel %vm10181_vm1, %v7416_v19, %v4553_v51  ;;  %v4231_v7 = vshrl.u32 %v4186_v55, 16  ;;  %v8488_v34 = vld [vmem:[#allocation11 + $0x188] sm:$0xff]   ;;  %v10332_v29 = vld [vmem:[#allocation3 + $0x10] sm:$0xf] }
 0x2ab   : > { %v3929_v1 = vrot.slane %v3927_v15, 7  ;;  %v3664_v12 = vadd.f32 %v10169_v5, %v3641_v47  ;;  %v7431_v40 = vcombine.low %v10200_v4, %v4554_v57  ;;  %v3662_v30 = vadd.f32 %v10169_v5, %v3639_v56  ;;  %v4103_v28 = vld [vmem:[#allocation3 + $0x8c] sm:$0x1]  ;;  %v4088_v18 = vld [vmem:[#allocation3 + $0x78] sm:$0xf]  ;;  %v8491_v37 = vld [vmem:[#allocation11 + $0x1d0] sm:$0xff]  }
 0x2ac   : > { %v7673_v48 = vpack.c.bf16 %v3679_v49, %v3679_v49  ;;  %v7671_v32 = vpack.c.bf16 %v3677_v63, %v3677_v63  ;;  %v4233_v16 = vrot.slane %v4231_v7, 4  ;;  %v4234_v38 = vshll.u32 %v4186_v55, 16  ;;  %v4091_v14 = vld [vmem:[#allocation3 + $0x7c] sm:$0x1]  ;;  %v8492_v17 = vld [vmem:[#allocation11 + $0x190] sm:$0xff]  }
 0x2ad   : > { %v3932_v10 = vor.u32 %v3930_v31, %v3929_v1  ;;  %v3933_v13 = vrot.slane %v3929_v1, 4  ;;  %6679 = vmatmul.mubr.bf16.vlgmr.msra.gmra.mrb[40].mxu1 %v7431_v40  ;;  %v3680_v4 = vmax.f32 %v3664_v12, 0.0  ;;  %v3678_v24 = vmax.f32 %v3662_v30, 0.0  ;;  %v8495_v57 = vld [vmem:[#allocation11 + $0x1d8] sm:$0xff]   ;;  %v4106_v1 = vld [vmem:[#allocation3 + $0x90] sm:$0xf] }
 0x2ae   : > { %v3967_v20 = vshrl.u32 %v7673_v48, 16  ;;  %v3970_v36 = vshll.u32 %v7673_v48, 16  ;;  %v3951_v3 = vshrl.u32 %v7671_v32, 16  ;;  %v3954_v2 = vshll.u32 %v7671_v32, 16  ;;  %8022 = vmatpush3.bf16.msra.mxu1 %v8482_v25  ;;  %6686 = vmatprep.mubr.bf16.mxu1 %v8483_v54  ;;  %v4189_v40 = vld [vmem:[#allocation3 + $0x14] sm:$0x1] }
 0x2af   : > { %v4071_v5 = vsel %vm10233_vm2, %v3932_v10, %v4070_v11  ;;  %v4074_v27 = vsel %vm10014_vm12, %v3933_v13, %v4073_v46  ;;  %v4236_v19 = vrot.slane %v4234_v38, 5  ;;  %8023 = vmatprep.subr.bf16.mxu1 %v8487_v41  ;;  %v7674_v22 = vpack.c.bf16 %v3680_v4, %v3680_v4  ;;  %v4109_v11 = vld [vmem:[#allocation3 + $0x94] sm:$0x1]  ;;  %v10343_v41 = vld [vmem:[#allocation3 + $0x18] sm:$0xf] }
 0x2b0   : > { %v3969_v26 = vrot.slane %v3967_v20, 7  ;;  %4072 = vst [vmem:[#allocation3 + $0x60] sm:$0xf] %v4071_v5  ;;  %4075 = vst [vmem:[#allocation3 + $0x64] sm:$0x1] %v4074_v27  ;;  %v3953_v0 = vrot.slane %v3951_v3, 7  ;;  %v7672_v55 = vpack.c.bf16 %v3678_v24, %v3678_v24 }
 0x2b1   : > { %v4240_v33 = vshll.u32 %v4187_v53, 16  ;;  %v4237_v15 = vor.u32 %v4236_v19, %v4233_v16  ;;  %v4245_v31 = vshrl.u32 %v10332_v29, 16  ;;  %v3975_v63 = vshrl.u32 %v7674_v22, 16  ;;  %v4094_v54 = vld [vmem:[#allocation3 + $0x80] sm:$0xf]  ;;  %v8496_v10 = vld [vmem:[#allocation11 + $0x198] sm:$0xff]  }
 0x2b2   : > { %v3972_v23 = vor.u32 %v3970_v36, %v3969_v26  ;;  %v3973_v51 = vrot.slane %v3969_v26, 4  ;;  %v3956_v49 = vor.u32 %v3954_v2, %v3953_v0  ;;  %v3957_v47 = vrot.slane %v3953_v0, 4  ;;  %8024 = vmatpush3.bf16.msra.mxu1 %v8488_v34  ;;  %v4097_v16 = vld [vmem:[#allocation3 + $0x84] sm:$0x1]  ;;  %v4191_v36 = vld [vmem:[#allocation3 + $0x1c] sm:$0x1] }
 0x2b3   : > { %v3978_v56 = vshll.u32 %v7674_v22, 16  ;;  %v3959_v48 = vshrl.u32 %v7672_v55, 16  ;;  %v3962_v12 = vshll.u32 %v7672_v55, 16  ;;  %8025 = vmatprep.subr.bf16.mxu1 %v8491_v37  ;;  %v3977_v30 = vrot.slane %v3975_v63, 7  ;;  %v4486_v5 = vld [vmem:[#allocation3 + $0x18] sm:$0xe] }
 0x2b4   : > { %v4101_v25 = vsel %vm10233_vm2, %v3972_v23, %v4100_v9  ;;  %v4104_v7 = vsel %vm10014_vm12, %v3973_v51, %v4103_v28  ;;  %v4089_v46 = vsel %vm10233_vm2, %v3956_v49, %v4088_v18  ;;  %v4092_v32 = vsel %vm10014_vm12, %v3957_v47, %v4091_v14  ;;  %v4484_v9 = vld [vmem:[#allocation3 + $0x10] sm:$0xe]  ;;  %v4485_v28 = vld [vmem:[#allocation3 + $0x14] sm:$0x1]  ;;  %v4487_v27 = vld [vmem:[#allocation3 + $0x1c] sm:$0x1] }
 0x2b5   : > { %4102 = vst [vmem:[#allocation3 + $0x88] sm:$0xf] %v4101_v25  ;;  %4105 = vst [vmem:[#allocation3 + $0x8c] sm:$0x1] %v4104_v7  ;;  %v4238_v38 = vrot.slane %v4237_v15, 4  ;;  %v3961_v13 = vrot.slane %v3959_v48, 7  ;;  %v3980_v3 = vor.u32 %v3978_v56, %v3977_v30 }
 0x2b6   : > { %4090 = vst [vmem:[#allocation3 + $0x78] sm:$0xf] %v4089_v46  ;;  %4093 = vst [vmem:[#allocation3 + $0x7c] sm:$0x1] %v4092_v32  ;;  %v4242_v20 = vrot.slane %v4240_v33, 5  ;;  %v4247_v53 = vrot.slane %v4245_v31, 4  ;;  %8026 = vmatpush3.bf16.msra.mxu1 %v8492_v17 }
 0x2b7   : > { %v4248_v34 = vshll.u32 %v10332_v29, 16  ;;  %v3981_v2 = vrot.slane %v3977_v30, 4  ;;  %v4254_v4 = vshll.u32 %v4189_v40, 16  ;;  %v4259_v24 = vshrl.u32 %v10343_v41, 16  ;;  %v8499_v26 = vld [vmem:[#allocation11 + $0x100] sm:$0xff]   ;;  %8027 = vmatprep.subr.bf16.mxu1 %v8495_v57  ;;  %v8504_v31 = vld [vmem:[#allocation11 + $0x148] sm:$0xff]  }
 0x2b8   : > { %v8501_v18 = vld [vmem:[#allocation11 + $0x1e0] sm:$0xff]   ;;  %v3964_v19 = vor.u32 %v3962_v12, %v3961_v13  ;;  %v3965_v37 = vrot.slane %v3961_v13, 4  ;;  %v4243_v0 = vsel %vm9386_vm8, %v4238_v38, %v4242_v20  ;;  %v4107_v55 = vsel %vm10233_vm2, %v3980_v3, %v4106_v1  ;;  %v4194_v57 = vld [vmem:[#allocation3 + $0x28] sm:$0xf]  ;;  %v4195_v1 = vld [vmem:[#allocation3 + $0x2c] sm:$0x1] }
 0x2b9   : > { %v8486_v14 = vld [vmem:[#allocation3] ss:$8 sps:$4 sm:$0xff]   ;;  %v4250_v22 = vrot.slane %v4248_v34, 5  ;;  %v4110_v33 = vsel %vm10014_vm12, %v3981_v2, %v4109_v11  ;;  %v7407_v17 = vcombine.low %v4229_v58, %v4243_v0  ;;  %v10362_v23 = vrot.slane %v4254_v4, 5  ;;  %v4193_v51 = vld [vmem:[#allocation3 + $0x24] sm:$0x1] }
 0x2ba   : > { %v4192_v29 = vld [vmem:[#allocation3 + $0x20] sm:$0xf]  ;;  %4108 = vst [vmem:[#allocation3 + $0x90] sm:$0xf] %v4107_v55  ;;  %4111 = vst [vmem:[#allocation3 + $0x94] sm:$0x1] %v4110_v33  ;;  %v4095_v49 = vsel %vm10233_vm2, %v3964_v19, %v4094_v54  ;;  %v4098_v47 = vsel %vm10014_vm12, %v3965_v37, %v4097_v16  ;;  %8028 = vmatpush3.bf16.msra.mxu1 %v8496_v10 }
 0x2bb   : > { %v8502_v15 = vld [vmem:[#allocation11 + $0x1a0] sm:$0xff]   ;;  %v4251_v63 = vor.u32 %v4250_v22, %v4247_v53  ;;  %v4261_v56 = vrot.slane %v4259_v24, 4  ;;  %v8507_v25 = vld [vmem:[#allocation11 + $0x1e8] sm:$0xff]   ;;  %4096 = vst [vmem:[#allocation3 + $0x80] sm:$0xf] %v4095_v49  ;;  %6581 = vmatprep.mubr.bf16.mxu0 %v7407_v17  ;;  %v4262_v62 = vshll.u32 %v10343_v41, 16  ;;  %8029 = vmatprep.subr.bf16.mxu1 %v8501_v18 }
 0x2bc   : > { %4099 = vst [vmem:[#allocation3 + $0x84] sm:$0x1] %v4098_v47  ;;  %v4268_v42 = vshll.u32 %v4191_v36, 16  ;;  %v7417_v58 = vrot.slane %v4484_v9, 9  ;;  %v4557_v7 = vrot.slane %v4485_v28, 5  ;;  %v8505_v11 = vld [vmem:[#allocation11 + $0x108] sm:$0xff]   ;;  %6582 = vmatmul.mubr.bf16.vlgmr.msra.gmra.mrb[56].mxu0 %v8486_v14 }
 0x2bd   : > { %v4252_v52 = vrot.slane %v4251_v63, 4  ;;  %v7418_v48 = vrot.slane %v4486_v5, 9  ;;  %v4561_v50 = vrot.slane %v4487_v27, 5  ;;  %v4273_v12 = vshrl.u32 %v4192_v29, 16  ;;  %v4488_v40 = vld [vmem:[#allocation3 + $0x20] sm:$0xe]  ;;  %7958 = vmatpush3.bf16.msra.mxu0 %v8499_v26 }
 0x2be   : > { %v4264_v46 = vrot.slane %v4262_v62, 5  ;;  %v4270_v32 = vrot.slane %v4268_v42, 5  ;;  %v4558_v30 = vsel %vm10181_vm1, %v7417_v58, %v4557_v7  ;;  %v4276_v54 = vshll.u32 %v4192_v29, 16  ;;  %v4489_v41 = vld [vmem:[#allocation3 + $0x24] sm:$0x1]  ;;  %v8508_v16 = vld [vmem:[#allocation11 + $0x1a8] sm:$0xff]   ;;  %7959 = vmatprep.subr.bf16.mxu0 %v8504_v31  ;;  %8030 = vmatpush3.bf16.msra.mxu1 %v8502_v15 }
 0x2bf   : > { %v8510_v38 = vld [vmem:[#allocation11 + $0x150] sm:$0xff]   ;;  %v4257_v10 = vsel %vm9386_vm8, %v4252_v52, %v10362_v23  ;;  %v4562_v13 = vsel %vm10181_vm1, %v7418_v48, %v4561_v50  ;;  %v4275_v20 = vrot.slane %v4273_v12, 4  ;;  %v4282_v36 = vshll.u32 %v4193_v51, 16  ;;  %v4490_v53 = vld [vmem:[#allocation3 + $0x28] sm:$0xe]  ;;  %8031 = vmatprep.subr.bf16.mxu1 %v8507_v25  ;;  %v8516_v23 = vld [vmem:[#allocation11 + $0x158] sm:$0xff]  }
 0x2c0   : > { %v4491_v34 = vld [vmem:[#allocation3 + $0x2c] sm:$0x1]  ;;  %v8513_v9 = vld [vmem:[#allocation11 + $0x1f0] sm:$0xff]   ;;  %v4265_v28 = vor.u32 %v4264_v46, %v4261_v56  ;;  %v7432_v3 = vcombine.low %v4558_v30, %v4562_v13  ;;  %v4278_v4 = vrot.slane %v4276_v54, 5  ;;  %v4287_v24 = vshrl.u32 %v4194_v57, 16  ;;  %v8517_v58 = vld [vmem:[#allocation11 + $0x118] sm:$0xff]  }
 0x2c1   : > { %v8489_v2 = vld [vmem:[#allocation3 + $0x28] ss:$8 sps:$4 sm:$0xff]   ;;  %v10376_v26 = vrot.slane %v4282_v36, 5  ;;  %v4290_v18 = vshll.u32 %v4194_v57, 16  ;;  %v4296_v19 = vshll.u32 %v4195_v1, 16  ;;  %v7419_v37 = vrot.slane %v4488_v40, 9  ;;  %7960 = vmatpush3.bf16.msra.mxu0 %v8505_v11 }
 0x2c2   : > { %v4196_v5 = vld [vmem:[#allocation3 + $0x30] sm:$0xf]  ;;  %v4197_v0 = vld [vmem:[#allocation3 + $0x34] sm:$0x1]  ;;  %v4266_v14 = vrot.slane %v4265_v28, 4  ;;  %6687 = vmatmul.mubr.bf16.gmra.mrb[44].mxu1 %v7432_v3  ;;  %v4279_v22 = vor.u32 %v4278_v4, %v4275_v20  ;;  %v4289_v29 = vrot.slane %v4287_v24, 4  ;;  %7961 = vmatprep.subr.bf16.mxu0 %v8510_v38 }
 0x2c3   : > { %v8511_v27 = vld [vmem:[#allocation11 + $0x110] sm:$0xff]   ;;  %v4565_v55 = vrot.slane %v4489_v41, 5  ;;  %v4198_v33 = vld [vmem:[#allocation3 + $0x38] sm:$0xf]  ;;  %6694 = vmatprep.mubr.bf16.mxu1 %v8489_v2  ;;  %v4292_v51 = vrot.slane %v4290_v18, 5  ;;  %v4298_v15 = vrot.slane %v4296_v19, 5  ;;  %8032 = vmatpush3.bf16.msra.mxu1 %v8508_v16 }
 0x2c4   : > { %v8514_v17 = vld [vmem:[#allocation11 + $0x1b0] sm:$0xff]   ;;  %v7420_v31 = vrot.slane %v4490_v53, 9  ;;  %v4569_v49 = vrot.slane %v4491_v34, 5  ;;  %v4199_v47 = vld [vmem:[#allocation3 + $0x3c] sm:$0x1]  ;;  %v4271_v63 = vsel %vm9386_vm8, %v4266_v14, %v4270_v32  ;;  %v4280_v57 = vrot.slane %v4279_v22, 4  ;;  %8033 = vmatprep.subr.bf16.mxu1 %v8513_v9 }
 0x2c5   : > { %v8490_v56 = vld [vmem:[#allocation3 + $0x10] ss:$8 sps:$4 sm:$0xff]   ;;  %v4566_v25 = vsel %vm10181_vm1, %v7419_v37, %v4565_v55  ;;  %v4301_v62 = vshrl.u32 %v4196_v5, 16  ;;  %v7408_v7 = vcombine.low %v4257_v10, %v4271_v63  ;;  %v4293_v1 = vor.u32 %v4292_v51, %v4289_v29  ;;  %v4493_v48 = vld [vmem:[#allocation3 + $0x34] sm:$0x1]  ;;  %v8519_v50 = vld [vmem:[#allocation11 + $0x160] sm:$0xff]   ;;  %7962 = vmatpush3.bf16.msra.mxu0 %v8511_v27 }
 0x2c6   : > { %v4492_v42 = vld [vmem:[#allocation3 + $0x30] sm:$0xe]  ;;  %v4570_v11 = vsel %vm10181_vm1, %v7420_v31, %v4569_v49  ;;  %v4304_v52 = vshll.u32 %v4196_v5, 16  ;;  %v8520_v12 = vld [vmem:[#allocation11 + $0x1f8] sm:$0xff]   ;;  %v4285_v40 = vsel %vm9386_vm8, %v4280_v57, %v10376_v26  ;;  %v4310_v30 = vshll.u32 %v4197_v0, 16  ;;  %7963 = vmatprep.subr.bf16.mxu0 %v8516_v23  ;;  %v10387_v34 = vld [vmem:[#allocation11 + $0x200] sm:$0xff]  }
 0x2c7   : > { %v7433_v46 = vcombine.low %v4566_v25, %v4570_v11  ;;  %v4303_v32 = vrot.slane %v4301_v62, 4  ;;  %v4494_v54 = vld [vmem:[#allocation3 + $0x38] sm:$0xe]  ;;  %v4495_v41 = vld [vmem:[#allocation3 + $0x3c] sm:$0x1]  ;;  %6589 = vmatprep.mubr.bf16.mxu0 %v7408_v7  ;;  %v4294_v38 = vrot.slane %v4293_v1, 4  ;;  %8034 = vmatpush3.bf16.msra.mxu1 %v8514_v17 }
 0x2c8   : > { %v8522_v16 = vld [vmem:[#allocation11 + $0x1b8] sm:$0xff]   ;;  %v4306_v13 = vrot.slane %v4304_v52, 5  ;;  %v4315_v20 = vshrl.u32 %v4198_v33, 16  ;;  %v4318_v36 = vshll.u32 %v4198_v33, 16  ;;  %6590 = vmatmul.mubr.bf16.gmra.mrb[60].mxu0 %v8490_v56  ;;  %v4312_v9 = vrot.slane %v4310_v30, 5  ;;  %8035 = vmatprep.subr.bf16.mxu1 %v8520_v12  ;;  %v8521_v55 = vld [vmem:[#allocation11 + $0x120] sm:$0xff]  }
 0x2c9   : > { %v8493_v10 = vld [vmem:[#allocation3 + $0x38] ss:$8 sps:$4 sm:$0xff]   ;;  %v4324_v28 = vshll.u32 %v4199_v47, 16  ;;  %v7421_v3 = vrot.slane %v4492_v42, 9  ;;  %v4573_v2 = vrot.slane %v4493_v48, 5  ;;  %v4299_v24 = vsel %vm9386_vm8, %v4294_v38, %v4298_v15  ;;  %7964 = vmatpush3.bf16.msra.mxu0 %v8517_v58  ;;  %v8523_v31 = vld [vmem:[#allocation11 + $0x168] sm:$0xff]  }
 0x2ca   : > { %v4202_v53 = vld [vmem:[#allocation3 + $0x58] sm:$0xf]  ;;  %v4203_v4 = vld [vmem:[#allocation3 + $0x5c] sm:$0x1]  ;;  %v4307_v5 = vor.u32 %v4306_v13, %v4303_v32  ;;  %v4317_v27 = vrot.slane %v4315_v20, 4  ;;  %v4320_v26 = vrot.slane %v4318_v36, 5  ;;  %v7409_v37 = vcombine.low %v4285_v40, %v4299_v24  ;;  %6695 = vmatmul.mubr.bf16.gmra.mrb[48].mxu1 %v7433_v46  ;;  %7965 = vmatprep.subr.bf16.mxu0 %v8519_v50 }
 0x2cb   : > { %v4498_v18 = vld [vmem:[#allocation3 + $0x58] sm:$0xe]  ;;  %v4499_v19 = vld [vmem:[#allocation3 + $0x5c] sm:$0x1]  ;;  %v4326_v0 = vrot.slane %v4324_v28, 5  ;;  %v4574_v14 = vsel %vm10181_vm1, %v7421_v3, %v4573_v2  ;;  %v7422_v22 = vrot.slane %v4494_v54, 9  ;;  %6702 = vmatprep.mubr.bf16.mxu1 %v8493_v10  ;;  %8036 = vmatpush3.bf16.msra.mxu1 %v8522_v16 }
 0x2cc   : > { %v4204_v29 = vld [vmem:[#allocation3 + $0x60] sm:$0xf]  ;;  %v4308_v33 = vrot.slane %v4307_v5, 4  ;;  %v4321_v17 = vor.u32 %v4320_v26, %v4317_v27  ;;  %v4577_v23 = vrot.slane %v4495_v41, 5  ;;  %v4343_v51 = vshrl.u32 %v4202_v53, 16  ;;  %6597 = vmatprep.mubr.bf16.mxu0 %v7409_v37  ;;  %v8524_v1 = vld [vmem:[#allocation11 + $0x128] sm:$0xff]   ;;  %8149 = vmatprep.subr.bf16.mxu1 %v10387_v34 }
 0x2cd   : > { %v4205_v15 = vld [vmem:[#allocation3 + $0x64] sm:$0x1]  ;;  %v8494_v49 = vld [vmem:[#allocation3 + $0x20] ss:$8 sps:$4 sm:$0xff]   ;;  %v4346_v47 = vshll.u32 %v4202_v53, 16  ;;  %v4352_v63 = vshll.u32 %v4203_v4, 16  ;;  %7966 = vmatpush3.bf16.msra.mxu0 %v8521_v55 }
 0x2ce   : > { %v7424_v56 = vrot.slane %v4498_v18, 9  ;;  %v4585_v57 = vrot.slane %v4499_v19, 5  ;;  %v4313_v25 = vsel %vm9386_vm8, %v4308_v33, %v4312_v9  ;;  %v4322_v62 = vrot.slane %v4321_v17, 4  ;;  %v4206_v7 = vld [vmem:[#allocation3 + $0x68] sm:$0xf]  ;;  %v8526_v40 = vld [vmem:[#allocation11 + $0x170] sm:$0xff]   ;;  %7967 = vmatprep.subr.bf16.mxu0 %v8523_v31 }
 0x2cf   : > { %v4578_v42 = vsel %vm10181_vm1, %v7422_v22, %v4577_v23  ;;  %v4345_v58 = vrot.slane %v4343_v51, 4  ;;  %v4348_v52 = vrot.slane %v4346_v47, 5  ;;  %v4354_v48 = vrot.slane %v4352_v63, 5  ;;  %v4207_v12 = vld [vmem:[#allocation3 + $0x6c] sm:$0x1]  ;;  %v8528_v55 = vld [vmem:[#allocation11 + $0x130] sm:$0xff]  }
 0x2d0   : > { %v7434_v11 = vcombine.low %v4574_v14, %v4578_v42  ;;  %v10400_v50 = vsel %vm10181_vm1, %v7424_v56, %v4585_v57  ;;  %v4327_v46 = vsel %vm9386_vm8, %v4322_v62, %v4326_v0  ;;  %v8497_v32 = vld [vmem:[#allocation3 + $0x58] ss:$8 sps:$4 sm:$0xff]   ;;  %v4357_v54 = vshrl.u32 %v4204_v29, 16  ;;  %v4501_v38 = vld [vmem:[#allocation3 + $0x64] sm:$0x1]  ;;  %6598 = vmatmul.mubr.bf16.gmra.mrb[64].mxu0 %v8494_v49 }
 0x2d1   : > { %v7435_v30 = vcombine.low %v10212_v35, %v10400_v50  ;;  %v4360_v41 = vshll.u32 %v4204_v29, 16  ;;  %v4500_v16 = vld [vmem:[#allocation3 + $0x60] sm:$0xe]  ;;  %v7410_v10 = vcombine.low %v4313_v25, %v4327_v46  ;;  %v4349_v13 = vor.u32 %v4348_v52, %v4345_v58  ;;  %v4502_v53 = vld [vmem:[#allocation3 + $0x68] sm:$0xe]  ;;  %7968 = vmatpush3.bf16.msra.mxu0 %v8524_v1  ;;  %v8530_v49 = vld [vmem:[#allocation11 + $0x178] sm:$0xff]  }
 0x2d2   : > { %v4366_v20 = vshll.u32 %v4205_v15, 16  ;;  %v4371_v36 = vshrl.u32 %v4206_v7, 16  ;;  %v4503_v9 = vld [vmem:[#allocation3 + $0x6c] sm:$0x1]  ;;  %v4359_v28 = vrot.slane %v4357_v54, 4  ;;  %v4374_v2 = vshll.u32 %v4206_v7, 16  ;;  %6703 = vmatmul.mubr.bf16.gmra.mrb[52].mxu1 %v7434_v11  ;;  %7969 = vmatprep.subr.bf16.mxu0 %v8526_v40 }
 0x2d3   : > { %v4362_v3 = vrot.slane %v4360_v41, 5  ;;  %v4380_v4 = vshll.u32 %v4207_v12, 16  ;;  %v4208_v24 = vld [vmem:[#allocation3 + $0x70] sm:$0xf]  ;;  %6605 = vmatprep.mubr.bf16.mxu0 %v7410_v10  ;;  %v4350_v5 = vrot.slane %v4349_v13, 4  ;;  %v7425_v18 = vrot.slane %v4500_v16, 9  ;;  %6710 = vmatprep.mubr.bf16.mxu1 %v8497_v32 }
 0x2d4   : > { %v4368_v27 = vrot.slane %v4366_v20, 5  ;;  %v4373_v26 = vrot.slane %v4371_v36, 4  ;;  %v4209_v19 = vld [vmem:[#allocation3 + $0x74] sm:$0x1]  ;;  %v4376_v0 = vrot.slane %v4374_v2, 5  ;;  %v4589_v22 = vrot.slane %v4501_v38, 5 }
 0x2d5   : > { %v4363_v37 = vor.u32 %v4362_v3, %v4359_v28  ;;  %v4382_v14 = vrot.slane %v4380_v4, 5  ;;  %v4210_v29 = vld [vmem:[#allocation3 + $0x78] sm:$0xf]  ;;  %v4355_v17 = vsel %vm9386_vm8, %v4350_v5, %v4354_v48  ;;  %v7426_v23 = vrot.slane %v4502_v53, 9  ;;  %v4211_v15 = vld [vmem:[#allocation3 + $0x7c] sm:$0x1]  ;;  %7970 = vmatpush3.bf16.msra.mxu0 %v8528_v55 }
 0x2d6   : > { %v8500_v33 = vld [vmem:[#allocation3 + $0x30] ss:$8 sps:$4 sm:$0xff]   ;;  %v4593_v51 = vrot.slane %v4503_v9, 5  ;;  %v4385_v31 = vshrl.u32 %v4208_v24, 16  ;;  %v7411_v47 = vcombine.low %v4341_v6, %v4355_v17  ;;  %v4377_v56 = vor.u32 %v4376_v0, %v4373_v26  ;;  %v4505_v62 = vld [vmem:[#allocation3 + $0x74] sm:$0x1]  ;;  %7971 = vmatprep.subr.bf16.mxu0 %v8530_v49 }
 0x2d7   : > { %v4364_v63 = vrot.slane %v4363_v37, 4  ;;  %v10415_v57 = vsel %vm10181_vm1, %v7425_v18, %v4589_v22  ;;  %v4504_v25 = vld [vmem:[#allocation3 + $0x70] sm:$0xe]  ;;  %v4388_v7 = vshll.u32 %v4208_v24, 16  ;;  %v4394_v1 = vshll.u32 %v4209_v19, 16  ;;  %v8531_v48 = vld [vmem:[#allocation11 + $0x138] sm:$0xff]  }
 0x2d8   : > { %v10419_v42 = vsel %vm10181_vm1, %v7426_v23, %v4593_v51  ;;  %v4387_v58 = vrot.slane %v4385_v31, 4  ;;  %v4506_v11 = vld [vmem:[#allocation3 + $0x78] sm:$0xe]  ;;  %v4507_v52 = vld [vmem:[#allocation3 + $0x7c] sm:$0x1]  ;;  %v4378_v6 = vrot.slane %v4377_v56, 4  ;;  %6606 = vmatmul.mubr.bf16.gmra.mrb[68].mxu0 %v8500_v33 }
 0x2d9   : > { %v8503_v8 = vld [vmem:[#allocation3 + $0x68] ss:$8 sps:$4 sm:$0xff]   ;;  %v4369_v60 = vsel %vm9386_vm8, %v4364_v63, %v4368_v27  ;;  %v7436_v12 = vcombine.low %v10415_v57, %v10419_v42  ;;  %v4399_v40 = vshrl.u32 %v4210_v29, 16  ;;  %v4212_v46 = vld [vmem:[#allocation3 + $0x80] sm:$0xf]  ;;  %v4390_v32 = vrot.slane %v4388_v7, 5  ;;  %6613 = vmatprep.mubr.bf16.mxu0 %v7411_v47  ;;  %7972 = vmatpush3.bf16.msra.mxu0 %v8531_v48 }
 0x2da   : > { %v4396_v54 = vrot.slane %v4394_v1, 5  ;;  %v4402_v41 = vshll.u32 %v4210_v29, 16  ;;  %v4408_v16 = vshll.u32 %v4211_v15, 16  ;;  %v4383_v38 = vsel %vm9386_vm8, %v4378_v6, %v4382_v14  ;;  %v4213_v36 = vld [vmem:[#allocation3 + $0x84] sm:$0x1]  ;;  %6711 = vmatmul.mubr.bf16.gmra.mrb[56].mxu1 %v7435_v30 }
 0x2db   : > { %v4401_v10 = vrot.slane %v4399_v40, 4  ;;  %v7427_v13 = vrot.slane %v4504_v25, 9  ;;  %v4597_v20 = vrot.slane %v4505_v62, 5  ;;  %v7412_v53 = vcombine.low %v4369_v60, %v4383_v38  ;;  %v4214_v2 = vld [vmem:[#allocation3 + $0x88] sm:$0xf]  ;;  %6718 = vmatprep.mubr.bf16.mxu1 %v8503_v8 }
 0x2dc   : > { %v4391_v9 = vor.u32 %v4390_v32, %v4387_v58  ;;  %v4404_v28 = vrot.slane %v4402_v41, 5  ;;  %v4410_v3 = vrot.slane %v4408_v16, 5  ;;  %v4215_v4 = vld [vmem:[#allocation3 + $0x8c] sm:$0x1]  ;;  %v7428_v5 = vrot.slane %v4506_v11, 9 }
 0x2dd   : > { %v10432_v24 = vsel %vm10181_vm1, %v7427_v13, %v4597_v20  ;;  %v4601_v27 = vrot.slane %v4507_v52, 5  ;;  %v4413_v26 = vshrl.u32 %v4212_v46, 16  ;;  %v4508_v18 = vld [vmem:[#allocation3 + $0x80] sm:$0xe]  ;;  %v4509_v19 = vld [vmem:[#allocation3 + $0x84] sm:$0x1] }
 0x2de   : > { %v8506_v37 = vld [vmem:[#allocation3 + $0x50] ss:$8 sps:$4 sm:$0xff]   ;;  %v4392_v35 = vrot.slane %v4391_v9, 4  ;;  %v4405_v50 = vor.u32 %v4404_v28, %v4401_v10  ;;  %v4416_v30 = vshll.u32 %v4212_v46, 16  ;;  %v4422_v0 = vshll.u32 %v4213_v36, 16 }
 0x2df   : > { %v4510_v14 = vld [vmem:[#allocation3 + $0x88] sm:$0xe]  ;;  %v10436_v22 = vsel %vm10181_vm1, %v7428_v5, %v4601_v27  ;;  %v4415_v29 = vrot.slane %v4413_v26, 4  ;;  %v4427_v55 = vshrl.u32 %v4214_v2, 16  ;;  %v4430_v33 = vshll.u32 %v4214_v2, 16 }
 0x2e0   : > { %v4397_v17 = vsel %vm9386_vm8, %v4392_v35, %v4396_v54  ;;  %v4406_v23 = vrot.slane %v4405_v50, 4  ;;  %v7437_v51 = vcombine.low %v10432_v24, %v10436_v22  ;;  %v4418_v15 = vrot.slane %v4416_v30, 5  ;;  %v4511_v31 = vld [vmem:[#allocation3 + $0x8c] sm:$0x1]  ;;  %v5260_v25 = vld [vmem:[#allocation3 + $0x10] sm:$0xf]  ;;  %6614 = vmatmul.mubr.bf16.gmra.mrb[72].mxu0 %v8506_v37 }
 0x2e1   : > { %v4424_v49 = vrot.slane %v4422_v0, 5  ;;  %v4429_v47 = vrot.slane %v4427_v55, 4  ;;  %v4432_v63 = vrot.slane %v4430_v33, 5  ;;  %v4436_v56 = vshll.u32 %v4215_v4, 16  ;;  %v5261_v11 = vld [vmem:[#allocation3 + $0x14] sm:$0x1]  ;;  %6621 = vmatprep.mubr.bf16.mxu0 %v7412_v53 }
 0x2e2   : > { %v4411_v62 = vsel %vm9386_vm8, %v4406_v23, %v4410_v3  ;;  %v4419_v58 = vor.u32 %v4418_v15, %v4415_v29  ;;  %v7429_v7 = vrot.slane %v4508_v18, 9  ;;  %v4605_v1 = vrot.slane %v4509_v19, 5  ;;  %v5262_v52 = vld [vmem:[#allocation3 + $0x18] sm:$0xf]  ;;  %v5263_v46 = vld [vmem:[#allocation3 + $0x1c] sm:$0x1]  ;;  %6719 = vmatmul.mubr.bf16.gmra.mrb[60].mxu1 %v7436_v12 }
 0x2e3   : > { %v8509_v48 = vld [vmem:[#allocation3 + $0x78] ss:$8 sps:$4 sm:$0xff]   ;;  %v7413_v8 = vcombine.low %v4397_v17, %v4411_v62  ;;  %v4433_v60 = vor.u32 %v4432_v63, %v4429_v47  ;;  %v4438_v6 = vrot.slane %v4436_v56, 5  ;;  %v7430_v40 = vrot.slane %v4510_v14, 9  ;;  %v5019_v38 = vld [vmem:[#allocation3 + $0x8] sm:$0xe] }
 0x2e4   : > { %v4420_v32 = vrot.slane %v4419_v58, 4  ;;  %v10449_v54 = vsel %vm10181_vm1, %v7429_v7, %v4605_v1  ;;  %v4609_v41 = vrot.slane %v4511_v31, 5  ;;  %v5293_v16 = vshrl.u32 %v5260_v25, 16  ;;  %6726 = vmatprep.mubr.bf16.mxu1 %v8509_v48  ;;  %v5020_v53 = vld [vmem:[#allocation3 + $0xc] sm:$0x1] }
 0x2e5   : > { %v4434_v10 = vrot.slane %v4433_v60, 4  ;;  %v5296_v13 = vshll.u32 %v5260_v25, 16  ;;  %v5302_v20 = vshll.u32 %v5261_v11, 16  ;;  %v5307_v36 = vshrl.u32 %v5262_v52, 16  ;;  %v8512_v9 = vld [vmem:[#allocation3 + $0x60] ss:$8 sps:$4 sm:$0xff]  }
 0x2e6   : > { %v4425_v28 = vsel %vm9386_vm8, %v4420_v32, %v4424_v49  ;;  %v10455_v57 = vsel %vm10181_vm1, %v7430_v40, %v4609_v41  ;;  %v5295_v42 = vrot.slane %v5293_v16, 4  ;;  %v5310_v12 = vshll.u32 %v5262_v52, 16  ;;  %v5021_v3 = vld [vmem:[#allocation3 + $0x10] sm:$0xe]  ;;  %v5022_v2 = vld [vmem:[#allocation3 + $0x14] sm:$0x1] }
 0x2e7   : > { %v4439_v4 = vsel %vm9386_vm8, %v4434_v10, %v4438_v6  ;;  %v7438_v5 = vcombine.low %v10449_v54, %v10455_v57  ;;  %v5298_v27 = vrot.slane %v5296_v13, 5  ;;  %v5304_v26 = vrot.slane %v5302_v20, 5  ;;  %v5264_v18 = vld [vmem:[#allocation3 + $0x20] sm:$0xf]  ;;  %v5265_v19 = vld [vmem:[#allocation3 + $0x24] sm:$0x1] }
 0x2e8   : > { %v7414_v37 = vcombine.low %v4425_v28, %v4439_v4  ;;  %v5309_v35 = vrot.slane %v5307_v36, 4  ;;  %v5312_v50 = vrot.slane %v5310_v12, 5  ;;  %v5316_v30 = vshll.u32 %v5263_v46, 16  ;;  %v5266_v0 = vld [vmem:[#allocation3 + $0x28] sm:$0xf]  ;;  %6622 = vmatmul.mubr.bf16.gmra.mrb[76].mxu0 %v8512_v9 }
 0x2e9   : > { %v8515_v14 = vld [vmem:[#allocation3 + $0x88] ss:$8 sps:$4 sm:$0xff]   ;;  %v5299_v29 = vor.u32 %v5298_v27, %v5295_v42  ;;  %v7455_v55 = vrot.slane %v5019_v38, 9  ;;  %v5085_v33 = vrot.slane %v5020_v53, 5  ;;  %v7456_v17 = vrot.slane %v5021_v3, 9  ;;  %6629 = vmatprep.mubr.bf16.mxu0 %v7413_v8 }
 0x2ea   : > { %v5313_v23 = vor.u32 %v5312_v50, %v5309_v35  ;;  %v5318_v15 = vrot.slane %v5316_v30, 5  ;;  %v5089_v31 = vrot.slane %v5022_v2, 5  ;;  %v5321_v49 = vshrl.u32 %v5264_v18, 16  ;;  %v5267_v56 = vld [vmem:[#allocation3 + $0x2c] sm:$0x1]  ;;  %6727 = vmatmul.mubr.bf16.gmra.mrb[64].mxu1 %v7437_v51 }
 0x2eb   : > { %v5300_v47 = vrot.slane %v5299_v29, 4  ;;  %v10463_v63 = vsel %vm10181_vm1, %v7455_v55, %v5085_v33  ;;  %v5324_v25 = vshll.u32 %v5264_v18, 16  ;;  %v5330_v62 = vshll.u32 %v5265_v19, 16  ;;  %v4723_v52 = vld [vmem:[#allocation3 + $0x8] sm:$0xf]  ;;  %6734 = vmatprep.mubr.bf16.mxu1 %v8515_v14 }
 0x2ec   : > { %v5314_v58 = vrot.slane %v5313_v23, 4  ;;  %v10470_v7 = vsel %vm10181_vm1, %v7456_v17, %v5089_v31  ;;  %v5323_v1 = vrot.slane %v5321_v49, 4  ;;  %v5335_v11 = vshrl.u32 %v5266_v0, 16  ;;  %v4724_v40 = vld [vmem:[#allocation3 + $0xc] sm:$0x1] }
 0x2ed   : > { %v5305_v48 = vsel %vm9386_vm8, %v5300_v47, %v5304_v26  ;;  %v7471_v8 = vcombine.low %v10463_v63, %v10470_v7  ;;  %v5326_v60 = vrot.slane %v5324_v25, 5  ;;  %v5332_v6 = vrot.slane %v5330_v62, 5  ;;  %v4725_v24 = vld [vmem:[#allocation3 + $0x10] sm:$0xf]  ;;  %v4726_v16 = vld [vmem:[#allocation3 + $0x14] sm:$0x1] }
 0x2ee   : > { %v8518_v22 = vld [vmem:[#allocation3 + $0x70] ss:$8 sps:$4 sm:$0xff]   ;;  %v5319_v51 = vsel %vm9386_vm8, %v5314_v58, %v5318_v15  ;;  %v5337_v46 = vrot.slane %v5335_v11, 4  ;;  %v5338_v32 = vshll.u32 %v5266_v0, 16  ;;  %v5344_v41 = vshll.u32 %v5267_v56, 16 }
 0x2ef   : > { %v7487_v38 = vcombine.low %v5305_v48, %v5319_v51  ;;  %v5327_v10 = vor.u32 %v5326_v60, %v5323_v1  ;;  %v4756_v13 = vshrl.u32 %v4723_v52, 16  ;;  %v4759_v20 = vshll.u32 %v4723_v52, 16  ;;  %v5023_v36 = vld [vmem:[#allocation3 + $0x18] sm:$0xe]  ;;  %v5024_v53 = vld [vmem:[#allocation3 + $0x1c] sm:$0x1] }
 0x2f0   : > { %v5340_v9 = vrot.slane %v5338_v32, 5  ;;  %v5346_v28 = vrot.slane %v5344_v41, 5  ;;  %v4765_v42 = vshll.u32 %v4724_v40, 16  ;;  %v4770_v12 = vshrl.u32 %v4725_v24, 16  ;;  %v5025_v3 = vld [vmem:[#allocation3 + $0x20] sm:$0xe]  ;;  %6630 = vmatmul.mubr.bf16.gmra.mrb[80].mxu0 %v8518_v22 }
 0x2f1   : > { %v5328_v2 = vrot.slane %v5327_v10, 4  ;;  %v4758_v4 = vrot.slane %v4756_v13, 4  ;;  %v4761_v27 = vrot.slane %v4759_v20, 5  ;;  %v4773_v26 = vshll.u32 %v4725_v24, 16  ;;  %v5026_v18 = vld [vmem:[#allocation3 + $0x24] sm:$0x1]  ;;  %6637 = vmatprep.mubr.bf16.mxu0 %v7414_v37 }
 0x2f2   : > { %v5341_v19 = vor.u32 %v5340_v9, %v5337_v46  ;;  %v4767_v35 = vrot.slane %v4765_v42, 5  ;;  %v4772_v50 = vrot.slane %v4770_v12, 4  ;;  %v4779_v30 = vshll.u32 %v4726_v16, 16  ;;  %v5268_v0 = vld [vmem:[#allocation3 + $0x30] sm:$0xf]  ;;  %6735 = vmatmul.mubr.bf16.gmra.mrb[68].mxu1 %v7438_v5  ;;  %v8532_v10 = vld [vmem:[#allocation11 + $0x208] sm:$0xff]  }
 0x2f3   : > { %v5333_v14 = vsel %vm9386_vm8, %v5328_v2, %v5332_v6  ;;  %v4762_v29 = vor.u32 %v4761_v27, %v4758_v4  ;;  %v4775_v55 = vrot.slane %v4773_v26, 5  ;;  %v7457_v33 = vrot.slane %v5023_v36, 9  ;;  %v5269_v17 = vld [vmem:[#allocation3 + $0x34] sm:$0x1]  ;;  %v5270_v47 = vld [vmem:[#allocation3 + $0x38] sm:$0xf]  ;;  %6872 = vmatprep.mubr.bf16.mxu1 %v7487_v38 }
 0x2f4   : > { %v5342_v23 = vrot.slane %v5341_v19, 4  ;;  %v4781_v15 = vrot.slane %v4779_v30, 5  ;;  %v5093_v31 = vrot.slane %v5024_v53, 5  ;;  %v7458_v49 = vrot.slane %v5025_v3, 9  ;;  %v8525_v58 = vld [vmem:[#allocation3 + $0x80] ss:$8 sps:$4 sm:$0xff]  }
 0x2f5   : > { %v4763_v56 = vrot.slane %v4762_v29, 4  ;;  %v4776_v25 = vor.u32 %v4775_v55, %v4772_v50  ;;  %v5097_v37 = vrot.slane %v5026_v18, 5  ;;  %v5349_v62 = vshrl.u32 %v5268_v0, 16  ;;  %v5271_v54 = vld [vmem:[#allocation3 + $0x3c] sm:$0x1] }
 0x2f6   : > { %v5347_v1 = vsel %vm9386_vm8, %v5342_v23, %v5346_v28  ;;  %v10487_v11 = vsel %vm10181_vm1, %v7457_v33, %v5093_v31  ;;  %v5352_v57 = vshll.u32 %v5268_v0, 16  ;;  %v5358_v5 = vshll.u32 %v5269_v17, 16  ;;  %v4727_v40 = vld [vmem:[#allocation3 + $0x18] sm:$0xf]  ;;  %v4728_v24 = vld [vmem:[#allocation3 + $0x1c] sm:$0x1] }
 0x2f7   : > { %v7488_v52 = vcombine.low %v5333_v14, %v5347_v1  ;;  %v4768_v48 = vsel %vm9386_vm8, %v4763_v56, %v4767_v35  ;;  %v4777_v60 = vrot.slane %v4776_v25, 4  ;;  %v10493_v6 = vsel %vm10181_vm1, %v7458_v49, %v5097_v37  ;;  %v8529_v22 = vld [vmem:[#allocation3 + $0x10] ss:$8 sps:$4 sm:$0xff]   ;;  %v4729_v16 = vld [vmem:[#allocation3 + $0x20] sm:$0xf] }
 0x2f8   : > { %v7472_v51 = vcombine.low %v10487_v11, %v10493_v6  ;;  %v5351_v46 = vrot.slane %v5349_v62, 4  ;;  %v5354_v32 = vrot.slane %v5352_v57, 5  ;;  %v5360_v41 = vrot.slane %v5358_v5, 5  ;;  %v4730_v53 = vld [vmem:[#allocation3 + $0x24] sm:$0x1]  ;;  %6638 = vmatmul.mubr.bf16.gmra.mrb[84].mxu0 %v8525_v58 }
 0x2f9   : > { %v4782_v38 = vsel %vm9386_vm8, %v4777_v60, %v4781_v15  ;;  %v5363_v13 = vshrl.u32 %v5270_v47, 16  ;;  %v5366_v20 = vshll.u32 %v5270_v47, 16  ;;  %v5372_v36 = vshll.u32 %v5271_v54, 16  ;;  %v5027_v3 = vld [vmem:[#allocation3 + $0x28] sm:$0xe]  ;;  %6775 = vmatprep.mubr.bf16.mxu0 %v7471_v8  ;;  %v8534_v15 = vld [vmem:[#allocation11 + $0x210] sm:$0xff]  }
 0x2fa   : > { %v7447_v9 = vcombine.low %v4768_v48, %v4782_v38  ;;  %v5355_v28 = vor.u32 %v5354_v32, %v5351_v46  ;;  %v4784_v42 = vshrl.u32 %v4727_v40, 16  ;;  %v4787_v12 = vshll.u32 %v4727_v40, 16  ;;  %v5028_v2 = vld [vmem:[#allocation3 + $0x2c] sm:$0x1]  ;;  %v5029_v19 = vld [vmem:[#allocation3 + $0x30] sm:$0xe]  ;;  %6873 = vmatmul.mubr.bf16.vlgmr.msra.gmra.mrb[72].mxu1 %v8529_v22 }
 0x2fb   : > { %v5365_v4 = vrot.slane %v5363_v13, 4  ;;  %v5368_v27 = vrot.slane %v5366_v20, 5  ;;  %v5374_v26 = vrot.slane %v5372_v36, 5  ;;  %v4793_v18 = vshll.u32 %v4728_v24, 16  ;;  %v5030_v14 = vld [vmem:[#allocation3 + $0x34] sm:$0x1]  ;;  %8150 = vmatpush3.bf16.msra.mxu1 %v10387_v34  ;;  %6880 = vmatprep.mubr.bf16.mxu1 %v7488_v52 }
 0x2fc   : > { %v5356_v35 = vrot.slane %v5355_v28, 4  ;;  %v4786_v50 = vrot.slane %v4784_v42, 4  ;;  %v4789_v30 = vrot.slane %v4787_v12, 5  ;;  %v4798_v0 = vshrl.u32 %v4729_v16, 16  ;;  %v5272_v63 = vld [vmem:[#allocation3 + $0x40] sm:$0xf]  ;;  %8151 = vmatprep.subr.bf16.mxu1 %v8532_v10 }
 0x2fd   : > { %v5369_v29 = vor.u32 %v5368_v27, %v5365_v4  ;;  %v4795_v55 = vrot.slane %v4793_v18, 5  ;;  %v4801_v33 = vshll.u32 %v4729_v16, 16  ;;  %v4807_v17 = vshll.u32 %v4730_v53, 16  ;;  %v5273_v58 = vld [vmem:[#allocation3 + $0x44] sm:$0x1]  ;;  %v8536_v16 = vld [vmem:[#allocation11 + $0x218] sm:$0xff]  }
 0x2fe   : > { %v5361_v7 = vsel %vm9386_vm8, %v5356_v35, %v5360_v41  ;;  %v4790_v8 = vor.u32 %v4789_v30, %v4786_v50  ;;  %v4800_v23 = vrot.slane %v4798_v0, 4  ;;  %v7459_v31 = vrot.slane %v5027_v3, 9  ;;  %v8533_v54 = vld [vmem:[#allocation3 + $0x20] ss:$8 sps:$4 sm:$0xff]   ;;  %v4732_v32 = vld [vmem:[#allocation3 + $0x2c] sm:$0x1] }
 0x2ff   : > { %v5370_v49 = vrot.slane %v5369_v29, 4  ;;  %v4803_v47 = vrot.slane %v4801_v33, 5  ;;  %v4809_v56 = vrot.slane %v4807_v17, 5  ;;  %v5101_v25 = vrot.slane %v5028_v2, 5  ;;  %8152 = vmatpush3.bf16.msra.mxu1 %v8532_v10  ;;  %v4731_v60 = vld [vmem:[#allocation3 + $0x28] sm:$0xf] }
 0x300   : > { %v4791_v37 = vrot.slane %v4790_v8, 4  ;;  %v7460_v34 = vrot.slane %v5029_v19, 9  ;;  %v5105_v62 = vrot.slane %v5030_v14, 5  ;;  %v5377_v1 = vshrl.u32 %v5272_v63, 16  ;;  %6776 = vmatmul.mubr.bf16.vlgmr.msra.gmra.mrb[88].mxu0 %v7447_v9  ;;  %8153 = vmatprep.subr.bf16.mxu1 %v8534_v15  ;;  %v4733_v41 = vld [vmem:[#allocation3 + $0x30] sm:$0xf] }
 0x301   : > { %v5375_v57 = vsel %vm9386_vm8, %v5370_v49, %v5374_v26  ;;  %v4804_v5 = vor.u32 %v4803_v47, %v4800_v23  ;;  %v10509_v52 = vsel %vm10181_vm1, %v7459_v31, %v5101_v25  ;;  %v5380_v48 = vshll.u32 %v5272_v63, 16  ;;  %6783 = vmatprep.mubr.bf16.mxu0 %v7472_v51  ;;  %v4734_v36 = vld [vmem:[#allocation3 + $0x34] sm:$0x1]  ;;  %v5031_v12 = vld [vmem:[#allocation3 + $0x38] sm:$0xe]  ;;  %v8538_v3 = vld [vmem:[#allocation11 + $0x220] sm:$0xff]  }
 0x302   : > { %v7489_v40 = vcombine.low %v5361_v7, %v5375_v57  ;;  %v4796_v24 = vsel %vm9386_vm8, %v4791_v37, %v4795_v55  ;;  %v5106_v22 = vsel %vm10181_vm1, %v7460_v34, %v5105_v62  ;;  %v5379_v46 = vrot.slane %v5377_v1, 4  ;;  %6881 = vmatmul.mubr.bf16.gmra.mrb[76].mxu1 %v8533_v54  ;;  %v5032_v4 = vld [vmem:[#allocation3 + $0x3c] sm:$0x1]  ;;  %v5033_v27 = vld [vmem:[#allocation3 + $0x40] sm:$0xe]  ;;  %v8540_v23 = vld [vmem:[#allocation11 + $0x228] sm:$0xff]  }
 0x303   : > { %v4805_v38 = vrot.slane %v4804_v5, 4  ;;  %v7473_v10 = vcombine.low %v10509_v52, %v5106_v22  ;;  %v5382_v13 = vrot.slane %v5380_v48, 5  ;;  %v5386_v20 = vshll.u32 %v5273_v58, 16  ;;  %8154 = vmatpush3.bf16.msra.mxu1 %v8534_v15  ;;  %v5277_v30 = vld [vmem:[#allocation3 + $0x64] sm:$0x1] }
 0x304   : > { %v5398_v53 = vrot.slane %v5397_v43, 4  ;;  %v5402_v9 = vrot.slane %v5400_v44, 5  ;;  %v4812_v28 = vshrl.u32 %v4731_v60, 16  ;;  %v4815_v42 = vshll.u32 %v4731_v60, 16  ;;  %6888 = vmatprep.mubr.bf16.mxu1 %v7489_v40  ;;  %8155 = vmatprep.subr.bf16.mxu1 %v8536_v16  ;;  %v5034_v43 = vld [vmem:[#allocation3 + $0x44] sm:$0x1] }
 0x305   : > { %v4810_v11 = vsel %vm9386_vm8, %v4805_v38, %v4809_v56  ;;  %v5383_v6 = vor.u32 %v5382_v13, %v5379_v46  ;;  %v5388_v51 = vrot.slane %v5386_v20, 5  ;;  %v4821_v2 = vshll.u32 %v4732_v32, 16  ;;  %v5276_v44 = vld [vmem:[#allocation3 + $0x60] sm:$0xf]  ;;  %v5278_v0 = vld [vmem:[#allocation3 + $0x68] sm:$0xf] }
 0x306   : > { %v7448_v26 = vcombine.low %v4796_v24, %v4810_v11  ;;  %v5403_v61 = vsel %vm9386_vm8, %v5398_v53, %v5402_v9  ;;  %v4814_v39 = vrot.slane %v4812_v28, 4  ;;  %v4817_v45 = vrot.slane %v4815_v42, 5  ;;  %v8535_v15 = vld [vmem:[#allocation3 + $0x30] ss:$8 sps:$4 sm:$0xff]   ;;  %v5279_v25 = vld [vmem:[#allocation3 + $0x6c] sm:$0x1] }
 0x307   : > { %v5384_v18 = vrot.slane %v5383_v6, 4  ;;  %v4823_v19 = vrot.slane %v4821_v2, 5  ;;  %v4826_v35 = vshrl.u32 %v4733_v41, 16  ;;  %v4829_v50 = vshll.u32 %v4733_v41, 16  ;;  %8156 = vmatpush3.bf16.msra.mxu1 %v8536_v16  ;;  %v4735_v1 = vld [vmem:[#allocation3 + $0x38] sm:$0xf] }
 0x308   : > { %v4818_v14 = vor.u32 %v4817_v45, %v4814_v39  ;;  %v4835_v29 = vshll.u32 %v4734_v36, 16  ;;  %v7461_v55 = vrot.slane %v5031_v12, 9  ;;  %v5109_v33 = vrot.slane %v5032_v4, 5  ;;  %6784 = vmatmul.mubr.bf16.gmra.mrb[92].mxu0 %v7448_v26  ;;  %8157 = vmatprep.subr.bf16.mxu1 %v8538_v3  ;;  %v4736_v48 = vld [vmem:[#allocation3 + $0x3c] sm:$0x1]  ;;  %v8542_v13 = vld [vmem:[#allocation11 + $0x230] sm:$0xff]  }
 0x309   : > { %v5389_v17 = vsel %vm9386_vm8, %v5384_v18, %v5388_v51  ;;  %v4828_v63 = vrot.slane %v4826_v35, 4  ;;  %v4831_v7 = vrot.slane %v4829_v50, 5  ;;  %v7462_v8 = vrot.slane %v5033_v27, 9  ;;  %6791 = vmatprep.mubr.bf16.mxu0 %v7473_v10  ;;  %v4737_v46 = vld [vmem:[#allocation3 + $0x40] sm:$0xf]  ;;  %v8544_v27 = vld [vmem:[#allocation11 + $0x238] sm:$0xff]  }
 0x30a   : > { %v7490_v31 = vcombine.low %v5389_v17, %v5403_v61  ;;  %v4819_v49 = vrot.slane %v4818_v14, 4  ;;  %v4837_v47 = vrot.slane %v4835_v29, 5  ;;  %v5110_v56 = vsel %vm10181_vm1, %v7461_v55, %v5109_v33  ;;  %6889 = vmatmul.mubr.bf16.gmra.mrb[80].mxu1 %v8535_v15  ;;  %v4738_v10 = vld [vmem:[#allocation3 + $0x44] sm:$0x1]  ;;  %v5035_v28 = vld [vmem:[#allocation3 + $0x58] sm:$0xe] }
 0x30b   : > { %v4832_v37 = vor.u32 %v4831_v7, %v4828_v63  ;;  %v5113_v34 = vrot.slane %v5034_v43, 5  ;;  %v5405_v62 = vshrl.u32 %v5276_v44, 16  ;;  %v5408_v58 = vshll.u32 %v5276_v44, 16  ;;  %8158 = vmatpush3.bf16.msra.mxu1 %v8538_v3  ;;  %v5036_v42 = vld [vmem:[#allocation3 + $0x5c] sm:$0x1] }
 0x30c   : > { %v4824_v54 = vsel %vm9386_vm8, %v4819_v49, %v4823_v19  ;;  %v5414_v57 = vshll.u32 %v5277_v30, 16  ;;  %v5419_v5 = vshrl.u32 %v5278_v0, 16  ;;  %v5422_v52 = vshll.u32 %v5278_v0, 16  ;;  %6896 = vmatprep.mubr.bf16.mxu1 %v7490_v31  ;;  %8159 = vmatprep.subr.bf16.mxu1 %v8540_v23  ;;  %v8537_v11 = vld [vmem:[#allocation3 + $0x40] ss:$8 sps:$4 sm:$0xff]  }
 0x30d   : > { %v4833_v60 = vrot.slane %v4832_v37, 4  ;;  %v5114_v40 = vsel %vm10181_vm1, %v7462_v8, %v5113_v34  ;;  %v5407_v24 = vrot.slane %v5405_v62, 4  ;;  %v5410_v22 = vrot.slane %v5408_v58, 5  ;;  %v5037_v2 = vld [vmem:[#allocation3 + $0x60] sm:$0xe] }
 0x30e   : > { %v7474_v32 = vcombine.low %v5110_v56, %v5114_v40  ;;  %v5416_v41 = vrot.slane %v5414_v57, 5  ;;  %v5421_v16 = vrot.slane %v5419_v5, 4  ;;  %v5424_v38 = vrot.slane %v5422_v52, 5  ;;  %v5038_v4 = vld [vmem:[#allocation3 + $0x64] sm:$0x1] }
 0x30f   : > { %v4838_v20 = vsel %vm9386_vm8, %v4833_v60, %v4837_v47  ;;  %v5411_v36 = vor.u32 %v5410_v22, %v5407_v24  ;;  %v5428_v53 = vshll.u32 %v5279_v25, 16  ;;  %v4840_v9 = vshrl.u32 %v4735_v1, 16  ;;  %v5280_v43 = vld [vmem:[#allocation3 + $0x70] sm:$0xf]  ;;  %8160 = vmatpush3.bf16.msra.mxu1 %v8540_v23  ;;  %v5281_v50 = vld [vmem:[#allocation3 + $0x74] sm:$0x1] }
 0x310   : > { %v7449_v12 = vcombine.low %v4824_v54, %v4838_v20  ;;  %v5425_v6 = vor.u32 %v5424_v38, %v5421_v16  ;;  %v4843_v51 = vshll.u32 %v4735_v1, 16  ;;  %v4849_v3 = vshll.u32 %v4736_v48, 16  ;;  %8161 = vmatprep.subr.bf16.mxu1 %v8542_v13  ;;  %v5282_v55 = vld [vmem:[#allocation3 + $0x78] sm:$0xf]  ;;  %v5283_v25 = vld [vmem:[#allocation3 + $0x7c] sm:$0x1] }
 0x311   : > { %v5412_v26 = vrot.slane %v5411_v36, 4  ;;  %v5430_v61 = vrot.slane %v5428_v53, 5  ;;  %v4842_v39 = vrot.slane %v4840_v9, 4  ;;  %v4854_v45 = vshrl.u32 %v4737_v46, 16  ;;  %v4739_v54 = vld [vmem:[#allocation3 + $0x58] sm:$0xf] }
 0x312   : > { %6792 = vmatmul.mubr.bf16.gmra.mrb[96].mxu0 %v7449_v12  ;;  %v5426_v44 = vrot.slane %v5425_v6, 4  ;;  %v4845_v18 = vrot.slane %v4843_v51, 5  ;;  %v4851_v19 = vrot.slane %v4849_v3, 5  ;;  %v4857_v35 = vshll.u32 %v4737_v46, 16  ;;  %6897 = vmatmul.mubr.bf16.gmra.mrb[84].mxu1 %v8537_v11  ;;  %v8539_v48 = vld [vmem:[#allocation3 + $0x60] ss:$8 sps:$4 sm:$0xff]  }
 0x313   : > { %6799 = vmatprep.mubr.bf16.mxu0 %v7474_v32  ;;  %v5417_v30 = vsel %vm9386_vm8, %v5412_v26, %v5416_v41  ;;  %v4856_v0 = vrot.slane %v4854_v45, 4  ;;  %v4863_v14 = vshll.u32 %v4738_v10, 16  ;;  %v7463_v29 = vrot.slane %v5035_v28, 9  ;;  %8162 = vmatpush3.bf16.msra.mxu1 %v8542_v13  ;;  %v4740_v40 = vld [vmem:[#allocation3 + $0x5c] sm:$0x1] }
 0x314   : > { %v5431_v33 = vsel %vm9386_vm8, %v5426_v44, %v5430_v61  ;;  %v4846_v17 = vor.u32 %v4845_v18, %v4842_v39  ;;  %v4859_v63 = vrot.slane %v4857_v35, 5  ;;  %v5117_v7 = vrot.slane %v5036_v42, 5  ;;  %8163 = vmatprep.subr.bf16.mxu1 %v8544_v27  ;;  %v4741_v24 = vld [vmem:[#allocation3 + $0x60] sm:$0xf]  ;;  %v4742_v16 = vld [vmem:[#allocation3 + $0x64] sm:$0x1] }
 0x315   : > { %v7491_v8 = vcombine.low %v5417_v30, %v5431_v33  ;;  %v4865_v23 = vrot.slane %v4863_v14, 5  ;;  %v7464_v15 = vrot.slane %v5037_v2, 9  ;;  %v5121_v31 = vrot.slane %v5038_v4, 5  ;;  %v5039_v36 = vld [vmem:[#allocation3 + $0x68] sm:$0xe] }
 0x316   : > { %v4847_v49 = vrot.slane %v4846_v17, 4  ;;  %v4860_v47 = vor.u32 %v4859_v63, %v4856_v0  ;;  %v5118_v56 = vsel %vm10181_vm1, %v7463_v29, %v5117_v7  ;;  %v5433_v37 = vshrl.u32 %v5280_v43, 16  ;;  %v5040_v12 = vld [vmem:[#allocation3 + $0x6c] sm:$0x1]  ;;  %v5041_v11 = vld [vmem:[#allocation3 + $0x70] sm:$0xe] }
 0x317   : > { %6904 = vmatprep.mubr.bf16.mxu1 %v7491_v8  ;;  %v5122_v34 = vsel %vm10181_vm1, %v7464_v15, %v5121_v31  ;;  %v5436_v62 = vshll.u32 %v5280_v43, 16  ;;  %v5442_v58 = vshll.u32 %v5281_v50, 16  ;;  %v5447_v1 = vshrl.u32 %v5282_v55, 16  ;;  %8164 = vmatpush3.bf16.msra.mxu1 %v8544_v27  ;;  %v5042_v4 = vld [vmem:[#allocation3 + $0x74] sm:$0x1] }
 0x318   : > { %v4852_v57 = vsel %vm9386_vm8, %v4847_v49, %v4851_v19  ;;  %v4861_v5 = vrot.slane %v4860_v47, 4  ;;  %v7475_v52 = vcombine.low %v5118_v56, %v5122_v34  ;;  %v5435_v60 = vrot.slane %v5433_v37, 4  ;;  %v5284_v45 = vld [vmem:[#allocation3 + $0x80] sm:$0xf]  ;;  %v5285_v35 = vld [vmem:[#allocation3 + $0x84] sm:$0x1] }
 0x319   : > { %v5438_v22 = vrot.slane %v5436_v62, 5  ;;  %v5444_v46 = vrot.slane %v5442_v58, 5  ;;  %v5449_v32 = vrot.slane %v5447_v1, 4  ;;  %v5450_v41 = vshll.u32 %v5282_v55, 16  ;;  %v5287_v15 = vld [vmem:[#allocation3 + $0x8c] sm:$0x1] }
 0x31a   : > { %v4866_v38 = vsel %vm9386_vm8, %v4861_v5, %v4865_v23  ;;  %v5456_v10 = vshll.u32 %v5283_v25, 16  ;;  %v4868_v13 = vshrl.u32 %v4739_v54, 16  ;;  %v4871_v20 = vshll.u32 %v4739_v54, 16  ;;  %6905 = vmatmul.mubr.bf16.gmra.mrb[88].mxu1 %v8539_v48  ;;  %v5286_v23 = vld [vmem:[#allocation3 + $0x88] sm:$0xf] }
 0x31b   : > { %v7450_v53 = vcombine.low %v4852_v57, %v4866_v38  ;;  %v5439_v9 = vor.u32 %v5438_v22, %v5435_v60  ;;  %v5452_v28 = vrot.slane %v5450_v41, 5  ;;  %v4877_v42 = vshll.u32 %v4740_v40, 16  ;;  %v8541_v25 = vld [vmem:[#allocation3 + $0x70] ss:$8 sps:$4 sm:$0xff]   ;;  %v4743_v34 = vld [vmem:[#allocation3 + $0x68] sm:$0xf] }
 0x31c   : > { %v5458_v6 = vrot.slane %v5456_v10, 5  ;;  %v4870_v51 = vrot.slane %v4868_v13, 4  ;;  %v4873_v3 = vrot.slane %v4871_v20, 5  ;;  %v4882_v2 = vshrl.u32 %v4741_v24, 16  ;;  %v4744_v57 = vld [vmem:[#allocation3 + $0x6c] sm:$0x1] }
 0x31d   : > { %6800 = vmatmul.mubr.bf16.gmra.mrb[100].mxu0 %v7450_v53  ;;  %v5440_v27 = vrot.slane %v5439_v9, 4  ;;  %v5453_v26 = vor.u32 %v5452_v28, %v5449_v32  ;;  %v4879_v61 = vrot.slane %v4877_v42, 5  ;;  %v4885_v39 = vshll.u32 %v4741_v24, 16  ;;  %v4745_v40 = vld [vmem:[#allocation3 + $0x70] sm:$0xf] }
 0x31e   : > { %6807 = vmatprep.mubr.bf16.mxu0 %v7475_v52  ;;  %v4874_v43 = vor.u32 %v4873_v3, %v4870_v51  ;;  %v4884_v44 = vrot.slane %v4882_v2, 4  ;;  %v4891_v18 = vshll.u32 %v4742_v16, 16  ;;  %v7465_v19 = vrot.slane %v5039_v36, 9  ;;  %v5043_v20 = vld [vmem:[#allocation3 + $0x78] sm:$0xe] }
 0x31f   : > { %v5445_v50 = vsel %vm9386_vm8, %v5440_v27, %v5444_v46  ;;  %v5454_v30 = vrot.slane %v5453_v26, 4  ;;  %v4887_v0 = vrot.slane %v4885_v39, 5  ;;  %v5125_v14 = vrot.slane %v5040_v12, 5  ;;  %v4746_v46 = vld [vmem:[#allocation3 + $0x74] sm:$0x1] }
 0x320   : > { %v4875_v29 = vrot.slane %v4874_v43, 4  ;;  %v4893_v55 = vrot.slane %v4891_v18, 5  ;;  %v7466_v33 = vrot.slane %v5041_v11, 9  ;;  %v5129_v17 = vrot.slane %v5042_v4, 5  ;;  %v5044_v36 = vld [vmem:[#allocation3 + $0x7c] sm:$0x1] }
 0x321   : > { %v5459_v63 = vsel %vm9386_vm8, %v5454_v30, %v5458_v6  ;;  %v4888_v7 = vor.u32 %v4887_v0, %v4884_v44  ;;  %v5126_v8 = vsel %vm10181_vm1, %v7465_v19, %v5125_v14  ;;  %v5461_v31 = vshrl.u32 %v5284_v45, 16  ;;  %v5045_v12 = vld [vmem:[#allocation3 + $0x80] sm:$0xe]  ;;  %v5046_v2 = vld [vmem:[#allocation3 + $0x84] sm:$0x1] }
 0x322   : > { %v7492_v49 = vcombine.low %v5445_v50, %v5459_v63  ;;  %v4880_v47 = vsel %vm9386_vm8, %v4875_v29, %v4879_v61  ;;  %v5130_v56 = vsel %vm10181_vm1, %v7466_v33, %v5129_v17  ;;  %v5464_v37 = vshll.u32 %v5284_v45, 16  ;;  %v5288_v39 = vld [vmem:[#allocation3 + $0x90] sm:$0xf]  ;;  %v5289_v19 = vld [vmem:[#allocation3 + $0x94] sm:$0x1] }
 0x323   : > { %v4889_v62 = vrot.slane %v4888_v7, 4  ;;  %v7476_v58 = vcombine.low %v5126_v8, %v5130_v56  ;;  %v5463_v1 = vrot.slane %v5461_v31, 4  ;;  %v5470_v54 = vshll.u32 %v5285_v35, 16  ;;  %v8543_v33 = vld [vmem:[#allocation3 + $0x80] ss:$8 sps:$4 sm:$0xff]  }
 0x324   : > { %6912 = vmatprep.mubr.bf16.mxu1 %v7492_v49  ;;  %v5466_v5 = vrot.slane %v5464_v37, 5  ;;  %v5475_v52 = vshrl.u32 %v5286_v23, 16  ;;  %v5478_v48 = vshll.u32 %v5286_v23, 16  ;;  %v5484_v60 = vshll.u32 %v5287_v15, 16  ;;  %v5290_v17 = vld [vmem:[#allocation3 + $0x98] sm:$0xf] }
 0x325   : > { %v4894_v24 = vsel %vm9386_vm8, %v4889_v62, %v4893_v55  ;;  %6913 = vmatmul.mubr.bf16.gmra.mrb[92].mxu1 %v8541_v25  ;;  %v5472_v22 = vrot.slane %v5470_v54, 5  ;;  %v4896_v32 = vshrl.u32 %v4743_v34, 16  ;;  %v4899_v41 = vshll.u32 %v4743_v34, 16  ;;  %v5291_v63 = vld [vmem:[#allocation3 + $0x9c] sm:$0x1] }
 0x326   : > { %v7451_v16 = vcombine.low %v4880_v47, %v4894_v24  ;;  %v5467_v38 = vor.u32 %v5466_v5, %v5463_v1  ;;  %v5477_v10 = vrot.slane %v5475_v52, 4  ;;  %v5480_v13 = vrot.slane %v5478_v48, 5  ;;  %v4747_v49 = vld [vmem:[#allocation3 + $0x78] sm:$0xf]  ;;  %v4748_v47 = vld [vmem:[#allocation3 + $0x7c] sm:$0x1] }
 0x327   : > { %v5486_v53 = vrot.slane %v5484_v60, 5  ;;  %v4898_v9 = vrot.slane %v4896_v32, 4  ;;  %v4901_v28 = vrot.slane %v4899_v41, 5  ;;  %v4905_v42 = vshll.u32 %v4744_v57, 16  ;;  %v4749_v62 = vld [vmem:[#allocation3 + $0x80] sm:$0xf] }
 0x328   : > { %6808 = vmatmul.mubr.bf16.gmra.mrb[104].mxu0 %v7451_v16  ;;  %v5468_v11 = vrot.slane %v5467_v38, 4  ;;  %v5481_v6 = vor.u32 %v5480_v13, %v5477_v10  ;;  %v4910_v51 = vshrl.u32 %v4745_v40, 16  ;;  %v4913_v3 = vshll.u32 %v4745_v40, 16  ;;  %v4750_v5 = vld [vmem:[#allocation3 + $0x84] sm:$0x1] }
 0x329   : > { %6815 = vmatprep.mubr.bf16.mxu0 %v7476_v58  ;;  %v4902_v4 = vor.u32 %v4901_v28, %v4898_v9  ;;  %v4907_v27 = vrot.slane %v4905_v42, 5  ;;  %v4919_v26 = vshll.u32 %v4746_v46, 16  ;;  %v7467_v61 = vrot.slane %v5043_v20, 9  ;;  %v5047_v24 = vld [vmem:[#allocation3 + $0x88] sm:$0xe] }
 0x32a   : > { %v5473_v45 = vsel %vm9386_vm8, %v5468_v11, %v5472_v22  ;;  %v5482_v43 = vrot.slane %v5481_v6, 4  ;;  %v4912_v44 = vrot.slane %v4910_v51, 4  ;;  %v4915_v18 = vrot.slane %v4913_v3, 5  ;;  %v5048_v16 = vld [vmem:[#allocation3 + $0x8c] sm:$0x1] }
 0x32b   : > { %v4903_v35 = vrot.slane %v4902_v4, 4  ;;  %v4921_v50 = vrot.slane %v4919_v26, 5  ;;  %v5133_v30 = vrot.slane %v5044_v36, 5  ;;  %v7468_v0 = vrot.slane %v5045_v12, 9  ;;  %v5049_v38 = vld [vmem:[#allocation3 + $0x90] sm:$0xe] }
 0x32c   : > { %v5487_v14 = vsel %vm9386_vm8, %v5482_v43, %v5486_v53  ;;  %v4916_v29 = vor.u32 %v4915_v18, %v4912_v44  ;;  %v5137_v55 = vrot.slane %v5046_v2, 5  ;;  %v5489_v7 = vshrl.u32 %v5288_v39, 16  ;;  %v5050_v53 = vld [vmem:[#allocation3 + $0x94] sm:$0x1]  ;;  %v5556_v9 = vld [vmem:[#allocation3 + $0x10] sm:$0xe] }
 0x32d   : > { %v7493_v8 = vcombine.low %v5473_v45, %v5487_v14  ;;  %v4908_v23 = vsel %vm9386_vm8, %v4903_v35, %v4907_v27  ;;  %v5134_v15 = vsel %vm10181_vm1, %v7467_v61, %v5133_v30  ;;  %v5492_v31 = vshll.u32 %v5288_v39, 16  ;;  %v5557_v6 = vld [vmem:[#allocation3 + $0x14] sm:$0x1]  ;;  %v5558_v4 = vld [vmem:[#allocation3 + $0x18] sm:$0xe] }
 0x32e   : > { %v4917_v56 = vrot.slane %v4916_v29, 4  ;;  %v5138_v25 = vsel %vm10181_vm1, %v7468_v0, %v5137_v55  ;;  %v5491_v37 = vrot.slane %v5489_v7, 4  ;;  %v5498_v34 = vshll.u32 %v5289_v19, 16  ;;  %v5559_v45 = vld [vmem:[#allocation3 + $0x1c] sm:$0x1] }
 0x32f   : > { %6920 = vmatprep.mubr.bf16.mxu1 %v7493_v8  ;;  %v7477_v58 = vcombine.low %v5134_v15, %v5138_v25  ;;  %v5494_v1 = vrot.slane %v5492_v31, 5  ;;  %v5503_v54 = vshrl.u32 %v5290_v17, 16  ;;  %v5506_v57 = vshll.u32 %v5290_v17, 16  ;;  %v4751_v35 = vld [vmem:[#allocation3 + $0x88] sm:$0xf] }
 0x330   : > { %v4922_v52 = vsel %vm9386_vm8, %v4917_v56, %v4921_v50  ;;  %6921 = vmatmul.mubr.bf16.gmra.mrb[96].mxu1 %v8543_v33  ;;  %v5500_v48 = vrot.slane %v5498_v34, 5  ;;  %v5512_v60 = vshll.u32 %v5291_v63, 16  ;;  %v4924_v40 = vshrl.u32 %v4747_v49, 16  ;;  %v8545_v14 = vld [vmem:[#allocation3 + $0x90] ss:$8 sps:$4 sm:$0xff]  }
 0x331   : > { %v7452_v22 = vcombine.low %v4908_v23, %v4922_v52  ;;  %v5495_v46 = vor.u32 %v5494_v1, %v5491_v37  ;;  %v5505_v32 = vrot.slane %v5503_v54, 4  ;;  %v5508_v41 = vrot.slane %v5506_v57, 5  ;;  %v4752_v55 = vld [vmem:[#allocation3 + $0x8c] sm:$0x1]  ;;  %v4753_v33 = vld [vmem:[#allocation3 + $0x90] sm:$0xf] }
 0x332   : > { %v5514_v10 = vrot.slane %v5512_v60, 5  ;;  %v4926_v13 = vrot.slane %v4924_v40, 4  ;;  %v4927_v20 = vshll.u32 %v4747_v49, 16  ;;  %v4933_v36 = vshll.u32 %v4748_v47, 16  ;;  %v4754_v23 = vld [vmem:[#allocation3 + $0x94] sm:$0x1] }
 0x333   : > { %6816 = vmatmul.mubr.bf16.gmra.mrb[108].mxu0 %v7452_v22  ;;  %v5496_v28 = vrot.slane %v5495_v46, 4  ;;  %v5509_v42 = vor.u32 %v5508_v41, %v5505_v32  ;;  %v4938_v12 = vshrl.u32 %v4749_v62, 16  ;;  %v4941_v11 = vshll.u32 %v4749_v62, 16  ;;  %v5560_v56 = vld [vmem:[#allocation3 + $0x20] sm:$0xe] }
 0x334   : > { %6823 = vmatprep.mubr.bf16.mxu0 %v7477_v58  ;;  %v4929_v51 = vrot.slane %v4927_v20, 5  ;;  %v4947_v3 = vshll.u32 %v4750_v5, 16  ;;  %v7469_v2 = vrot.slane %v5047_v24, 9  ;;  %v4935_v44 = vrot.slane %v4933_v36, 5  ;;  %v5561_v58 = vld [vmem:[#allocation3 + $0x24] sm:$0x1] }
 0x335   : > { %v5501_v27 = vsel %vm9386_vm8, %v5496_v28, %v5500_v48  ;;  %v5510_v26 = vrot.slane %v5509_v42, 4  ;;  %v4940_v61 = vrot.slane %v4938_v12, 4  ;;  %v4943_v39 = vrot.slane %v4941_v11, 5  ;;  %v5562_v1 = vld [vmem:[#allocation3 + $0x28] sm:$0xe] }
 0x336   : > { %v4930_v43 = vor.u32 %v4929_v51, %v4926_v13  ;;  %v5141_v18 = vrot.slane %v5048_v16, 5  ;;  %v7470_v19 = vrot.slane %v5049_v38, 9  ;;  %v5145_v0 = vrot.slane %v5050_v53, 5  ;;  %v5563_v48 = vld [vmem:[#allocation3 + $0x2c] sm:$0x1] }
 0x337   : > { %v5515_v50 = vsel %vm9386_vm8, %v5510_v26, %v5514_v10  ;;  %v4944_v30 = vor.u32 %v4943_v39, %v4940_v61  ;;  %v7495_v29 = vrot.slane %v5556_v9, 9  ;;  %v4949_v7 = vrot.slane %v4947_v3, 5  ;;  %v5564_v60 = vld [vmem:[#allocation3 + $0x30] sm:$0xe]  ;;  %v5565_v32 = vld [vmem:[#allocation3 + $0x34] sm:$0x1] }
 0x338   : > { %v7494_v17 = vcombine.low %v5501_v27, %v5515_v50  ;;  %v4931_v63 = vrot.slane %v4930_v43, 4  ;;  %v5622_v8 = vrot.slane %v5557_v6, 5  ;;  %v5142_v31 = vsel %vm10181_vm1, %v7469_v2, %v5141_v18  ;;  %v5566_v41 = vld [vmem:[#allocation3 + $0x38] sm:$0xe]  ;;  %v5567_v20 = vld [vmem:[#allocation3 + $0x3c] sm:$0x1] }
 0x339   : > { %v4945_v15 = vrot.slane %v4944_v30, 4  ;;  %v7496_v49 = vrot.slane %v5558_v4, 9  ;;  %v5626_v47 = vrot.slane %v5559_v45, 5  ;;  %v5146_v37 = vsel %vm10181_vm1, %v7470_v19, %v5145_v0  ;;  %v5568_v42 = vld [vmem:[#allocation3 + $0x40] sm:$0xe] }
 0x33a   : > { %6928 = vmatprep.mubr.bf16.mxu1 %v7494_v17  ;;  %v4936_v25 = vsel %vm9386_vm8, %v4931_v63, %v4935_v44  ;;  %v5623_v34 = vsel %vm10181_vm1, %v7495_v29, %v5622_v8  ;;  %v4952_v62 = vshrl.u32 %v4751_v35, 16  ;;  %v4955_v5 = vshll.u32 %v4751_v35, 16  ;;  %v5569_v3 = vld [vmem:[#allocation3 + $0x44] sm:$0x1]  ;;  %v5570_v61 = vld [vmem:[#allocation3 + $0x48] sm:$0xe] }
 0x33b   : > { %v4950_v54 = vsel %vm9386_vm8, %v4945_v15, %v4949_v7  ;;  %6929 = vmatmul.mubr.bf16.gmra.mrb[100].mxu1 %v8545_v14  ;;  %v5627_v57 = vsel %vm10181_vm1, %v7496_v49, %v5626_v47  ;;  %v4961_v52 = vshll.u32 %v4752_v55, 16  ;;  %v4966_v46 = vshrl.u32 %v4753_v33, 16  ;;  %v5571_v18 = vld [vmem:[#allocation3 + $0x4c] sm:$0x1]  ;;  %v5572_v19 = vld [vmem:[#allocation3 + $0x60] sm:$0xe] }
 0x33c   : > { %v7453_v40 = vcombine.low %v4936_v25, %v4950_v54  ;;  %v7511_v24 = vcombine.low %v5623_v34, %v5627_v57  ;;  %v4954_v22 = vrot.slane %v4952_v62, 4  ;;  %v7478_v16 = vcombine.low %v5142_v31, %v5146_v37  ;;  %v5573_v14 = vld [vmem:[#allocation3 + $0x64] sm:$0x1]  ;;  %v5574_v29 = vld [vmem:[#allocation3 + $0x68] sm:$0xe] }
 0x33d   : > { %v4957_v38 = vrot.slane %v4955_v5, 5  ;;  %v4969_v10 = vshll.u32 %v4753_v33, 16  ;;  %v4975_v13 = vshll.u32 %v4754_v23, 16  ;;  %v4968_v36 = vrot.slane %v4966_v46, 4  ;;  %v5575_v7 = vld [vmem:[#allocation3 + $0x6c] sm:$0x1] }
 0x33e   : > { %6824 = vmatmul.mubr.bf16.gmra.mrb[112].mxu0 %v7453_v40  ;;  %8165 = vmatprep.mubr.bf16.mxu1 %v7511_v24  ;;  %v7497_v53 = vrot.slane %v5560_v56, 9  ;;  %v5630_v9 = vrot.slane %v5561_v58, 5  ;;  %v7498_v28 = vrot.slane %v5562_v1, 9  ;;  %v4963_v11 = vrot.slane %v4961_v52, 5  ;;  %v5578_v1 = vld [vmem:[#allocation3 + $0x78] sm:$0xe] }
 0x33f   : > { %6831 = vmatprep.mubr.bf16.mxu0 %v7478_v16  ;;  %v4958_v12 = vor.u32 %v4957_v38, %v4954_v22  ;;  %v4971_v6 = vrot.slane %v4969_v10, 5  ;;  %v5634_v51 = vrot.slane %v5563_v48, 5  ;;  %v7499_v4 = vrot.slane %v5564_v60, 9  ;;  %v5579_v54 = vld [vmem:[#allocation3 + $0x7c] sm:$0x1] }
 0x340   : > { %v5631_v2 = vsel %vm10181_vm1, %v7497_v53, %v5630_v9  ;;  %v5638_v27 = vrot.slane %v5565_v32, 5  ;;  %v7500_v26 = vrot.slane %v5566_v41, 9  ;;  %v5642_v44 = vrot.slane %v5567_v20, 5  ;;  %v5580_v57 = vld [vmem:[#allocation3 + $0x80] sm:$0xe] }
 0x341   : > { %v4959_v39 = vrot.slane %v4958_v12, 4  ;;  %v4972_v45 = vor.u32 %v4971_v6, %v4968_v36  ;;  %v5635_v43 = vsel %vm10181_vm1, %v7498_v28, %v5634_v51  ;;  %v4977_v35 = vrot.slane %v4975_v13, 5  ;;  %v5581_v21 = vld [vmem:[#allocation3 + $0x84] sm:$0x1]  ;;  %v5576_v48 = vld [vmem:[#allocation3 + $0x70] sm:$0xe] }
 0x342   : > { %v7512_v50 = vcombine.low %v5631_v2, %v5635_v43  ;;  %v5639_v30 = vsel %vm10181_vm1, %v7499_v4, %v5638_v27  ;;  %v7501_v0 = vrot.slane %v5568_v42, 9  ;;  %v5643_v33 = vsel %vm10181_vm1, %v7500_v26, %v5642_v44  ;;  %v5577_v60 = vld [vmem:[#allocation3 + $0x74] sm:$0x1]  ;;  %v5582_v46 = vld [vmem:[#allocation3 + $0x88] sm:$0xe] }
 0x343   : > { %v4973_v55 = vrot.slane %v4972_v45, 4  ;;  %v5646_v17 = vrot.slane %v5569_v3, 5  ;;  %v7502_v63 = vrot.slane %v5570_v61, 9  ;;  %v7513_v8 = vcombine.low %v5639_v30, %v5643_v33  ;;  %v5583_v32 = vld [vmem:[#allocation3 + $0x8c] sm:$0x1] }
 0x344   : > { %8166 = vmatmul.mubr.bf16.vlgmr.msra.gmra.mrb[24].mxu1 %v7512_v50  ;;  %v5650_v23 = vrot.slane %v5571_v18, 5  ;;  %v7503_v15 = vrot.slane %v5572_v19, 9  ;;  %v4964_v31 = vsel %vm9386_vm8, %v4959_v39, %v4963_v11  ;;  %v5654_v47 = vrot.slane %v5573_v14, 5  ;;  %v5584_v53 = vld [vmem:[#allocation3 + $0x90] sm:$0xe] }
 0x345   : > { %v4978_v49 = vsel %vm9386_vm8, %v4973_v55, %v4977_v35  ;;  %8169 = vmatprep.mubr.bf16.mxu1 %v7513_v8  ;;  %v7504_v25 = vrot.slane %v5574_v29, 9  ;;  %v5658_v37 = vrot.slane %v5575_v7, 5  ;;  %v5647_v34 = vsel %vm10181_vm1, %v7501_v0, %v5646_v17  ;;  %v5585_v28 = vld [vmem:[#allocation3 + $0x94] sm:$0x1]  ;;  %v5586_v42 = vld [vmem:[#allocation3 + $0x98] sm:$0xe] }
 0x346   : > { %v7454_v56 = vcombine.low %v4964_v31, %v4978_v49  ;;  %v5651_v62 = vsel %vm10181_vm1, %v7502_v63, %v5650_v23  ;;  %v5655_v58 = vsel %vm10181_vm1, %v7503_v15, %v5654_v47  ;;  %v7506_v24 = vrot.slane %v5578_v1, 9  ;;  %v5587_v12 = vld [vmem:[#allocation3 + $0x9c] sm:$0x1] }
 0x347   : > { %v7514_v5 = vcombine.low %v5647_v34, %v5651_v62  ;;  %v5659_v52 = vsel %vm10181_vm1, %v7504_v25, %v5658_v37  ;;  %v5666_v22 = vrot.slane %v5579_v54, 5  ;;  %v7507_v41 = vrot.slane %v5580_v57, 9 }
 0x348   : > { %6832 = vmatmul.mubr.bf16.gmra.mrb[116].mxu0 %v7454_v56  ;;  %v7515_v40 = vcombine.low %v5655_v58, %v5659_v52  ;;  %v5670_v16 = vrot.slane %v5581_v21, 5  ;;  %v7505_v38 = vrot.slane %v5576_v48, 9  ;;  %v5662_v10 = vrot.slane %v5577_v60, 5 }
 0x349   : > { %v7508_v13 = vrot.slane %v5582_v46, 9  ;;  %v5674_v20 = vrot.slane %v5583_v32, 5  ;;  %v5667_v36 = vsel %vm10181_vm1, %v7506_v24, %v5666_v22  ;;  %v7509_v3 = vrot.slane %v5584_v53, 9 }
 0x34a   : > { %v5671_v9 = vsel %vm10181_vm1, %v7507_v41, %v5670_v16  ;;  %v5663_v11 = vsel %vm10181_vm1, %v7505_v38, %v5662_v10  ;;  %v5678_v4 = vrot.slane %v5585_v28, 5  ;;  %v7510_v27 = vrot.slane %v5586_v42, 9 }
 0x34b   : > { %v7516_v6 = vcombine.low %v5663_v11, %v5667_v36  ;;  %v5675_v51 = vsel %vm10181_vm1, %v7508_v13, %v5674_v20  ;;  %v5682_v26 = vrot.slane %v5587_v12, 5 }
 0x34c   : > { %8170 = vmatmul.mubr.bf16.gmra.mrb[28].mxu1 %v7514_v5  ;;  %v7517_v2 = vcombine.low %v5671_v9, %v5675_v51  ;;  %v5679_v61 = vsel %vm10181_vm1, %v7509_v3, %v5678_v4 }
 0x34d   : > { %8173 = vmatprep.mubr.bf16.mxu1 %v7515_v40  ;;  %v5683_v39 = vsel %vm10181_vm1, %v7510_v27, %v5682_v26 }
 0x34e   : > { %v7518_v45 = vcombine.low %v5679_v61, %v5683_v39 }
 0x354   : > { %8174 = vmatmul.mubr.bf16.gmra.mrb[32].mxu1 %v7516_v6 }
 0x355   : > { %8177 = vmatprep.mubr.bf16.mxu1 %v7517_v2 }
 0x35c   : > { %8178 = vmatmul.mubr.bf16.gmra.mrb[36].mxu1 %v7518_v45 }
 0x380   : > { %v7909_v43 = vpop.f32.mrb[40].mxu1 }
 0x381   : > { %v7910_v44 = vpop.f32.mrb[41].mxu1 }
 0x382   : > { %v7911_v18 = vadd.f32 %v7910_v44, %v7909_v43  ;;  %v7912_v19 = vpop.f32.mrb[42].mxu1 }
 0x383   : > { %v7913_v35 = vpop.f32.mrb[43].mxu1 }
 0x384   : > { %v7914_v50 = vadd.f32 %v7913_v35, %v7912_v19 }
 0x38f   : > { %v7845_v30 = vpop.f32.mrb[56].mxu0 }
 0x390   : > { %v7846_v0 = vpop.f32.mrb[57].mxu0 }
 0x391   : > { %v7847_v14 = vadd.f32 %v7846_v0, %v7845_v30  ;;  %v7848_v29 = vpop.f32.mrb[58].mxu0 }
 0x392   : > { %v7849_v55 = vpop.f32.mrb[59].mxu0 }
 0x393   : > { %v10622_v33 = vadd.f32 %v7911_v18, %v7847_v14  ;;  %v7850_v17 = vadd.f32 %v7849_v55, %v7848_v29 }
 0x395   : > { %v7915_v63 = vpop.f32.mrb[44].mxu1  ;;  %v10624_v59 = vadd.f32 %v7914_v50, %v7850_v17 }
 0x396   : > { %v7916_v7 = vpop.f32.mrb[45].mxu1 }
 0x397   : > { %v7917_v8 = vadd.f32 %v7916_v7, %v7915_v63  ;;  %v7918_v23 = vpop.f32.mrb[46].mxu1 }
 0x398   : > { %v7919_v15 = vpop.f32.mrb[47].mxu1 }
 0x399   : > { %v7920_v31 = vadd.f32 %v7919_v15, %v7918_v23 }
 0x39b   : > { %v7851_v49 = vpop.f32.mrb[60].mxu0 }
 0x39c   : > { %v7852_v47 = vpop.f32.mrb[61].mxu0 }
 0x39d   : > { %v7853_v56 = vadd.f32 %v7852_v47, %v7851_v49  ;;  %v7921_v25 = vpop.f32.mrb[48].mxu1  ;;  %v7854_v37 = vpop.f32.mrb[62].mxu0 }
 0x39e   : > { %v7922_v34 = vpop.f32.mrb[49].mxu1  ;;  %v7855_v62 = vpop.f32.mrb[63].mxu0 }
 0x39f   : > { %v10626_v58 = vadd.f32 %v7917_v8, %v7853_v56  ;;  %v7923_v1 = vadd.f32 %v7922_v34, %v7921_v25  ;;  %v7856_v54 = vadd.f32 %v7855_v62, %v7854_v37  ;;  %v7924_v57 = vpop.f32.mrb[50].mxu1 }
 0x3a0   : > { %v7925_v21 = vpop.f32.mrb[51].mxu1 }
 0x3a1   : > { %v10628_v5 = vadd.f32 %v7920_v31, %v7856_v54  ;;  %v7926_v52 = vadd.f32 %v7925_v21, %v7924_v57 }
 0x3a3   : > { %v7857_v48 = vpop.f32.mrb[64].mxu0 }
 0x3a4   : > { %v7858_v60 = vpop.f32.mrb[65].mxu0 }
 0x3a5   : > { %v7859_v40 = vadd.f32 %v7858_v60, %v7857_v48  ;;  %v7927_v24 = vpop.f32.mrb[52].mxu1  ;;  %v7860_v22 = vpop.f32.mrb[66].mxu0 }
 0x3a6   : > { %v7928_v46 = vpop.f32.mrb[53].mxu1  ;;  %v7861_v32 = vpop.f32.mrb[67].mxu0 }
 0x3a7   : > { %v10630_v41 = vadd.f32 %v7923_v1, %v7859_v40  ;;  %v7929_v16 = vadd.f32 %v7928_v46, %v7927_v24  ;;  %v7862_v38 = vadd.f32 %v7861_v32, %v7860_v22  ;;  %v7930_v10 = vpop.f32.mrb[54].mxu1 }
 0x3a8   : > { %v7931_v13 = vpop.f32.mrb[55].mxu1 }
 0x3a9   : > { %v10632_v20 = vadd.f32 %v7926_v52, %v7862_v38  ;;  %v7932_v36 = vadd.f32 %v7931_v13, %v7930_v10 }
 0x3ab   : > { %v7863_v53 = vpop.f32.mrb[68].mxu0 }
 0x3ac   : > { %v7864_v9 = vpop.f32.mrb[69].mxu0 }
 0x3ad   : > { %v7865_v28 = vadd.f32 %v7864_v9, %v7863_v53  ;;  %v7933_v42 = vpop.f32.mrb[56].mxu1  ;;  %v7866_v12 = vpop.f32.mrb[70].mxu0 }
 0x3ae   : > { %v7934_v11 = vpop.f32.mrb[57].mxu1  ;;  %v7867_v6 = vpop.f32.mrb[71].mxu0 }
 0x3af   : > { %v10634_v51 = vadd.f32 %v7929_v16, %v7865_v28  ;;  %v7935_v3 = vadd.f32 %v7934_v11, %v7933_v42  ;;  %v7868_v2 = vadd.f32 %v7867_v6, %v7866_v12  ;;  %v7936_v4 = vpop.f32.mrb[58].mxu1 }
 0x3b0   : > { %v7937_v27 = vpop.f32.mrb[59].mxu1 }
 0x3b1   : > { %v10636_v26 = vadd.f32 %v7932_v36, %v7868_v2  ;;  %v7938_v61 = vadd.f32 %v7937_v27, %v7936_v4 }
 0x3b3   : > { %v7869_v39 = vpop.f32.mrb[72].mxu0 }
 0x3b4   : > { %v7870_v45 = vpop.f32.mrb[73].mxu0 }
 0x3b5   : > { %v7871_v43 = vadd.f32 %v7870_v45, %v7869_v39  ;;  %v7939_v44 = vpop.f32.mrb[60].mxu1  ;;  %v7872_v18 = vpop.f32.mrb[74].mxu0 }
 0x3b6   : > { %v7940_v19 = vpop.f32.mrb[61].mxu1  ;;  %v7873_v35 = vpop.f32.mrb[75].mxu0 }
 0x3b7   : > { %v10638_v50 = vadd.f32 %v7935_v3, %v7871_v43  ;;  %v7941_v30 = vadd.f32 %v7940_v19, %v7939_v44  ;;  %v7874_v0 = vadd.f32 %v7873_v35, %v7872_v18  ;;  %v7942_v14 = vpop.f32.mrb[62].mxu1 }
 0x3b8   : > { %v7943_v29 = vpop.f32.mrb[63].mxu1 }
 0x3b9   : > { %v10640_v55 = vadd.f32 %v7938_v61, %v7874_v0  ;;  %v7944_v17 = vadd.f32 %v7943_v29, %v7942_v14 }
 0x3bb   : > { %v7875_v63 = vpop.f32.mrb[76].mxu0 }
 0x3bc   : > { %v7876_v7 = vpop.f32.mrb[77].mxu0 }
 0x3bd   : > { %v7877_v8 = vadd.f32 %v7876_v7, %v7875_v63  ;;  %v7945_v23 = vpop.f32.mrb[64].mxu1  ;;  %v7878_v15 = vpop.f32.mrb[78].mxu0 }
 0x3be   : > { %v7946_v31 = vpop.f32.mrb[65].mxu1  ;;  %v7879_v49 = vpop.f32.mrb[79].mxu0 }
 0x3bf   : > { %v10642_v47 = vadd.f32 %v7941_v30, %v7877_v8  ;;  %v7947_v56 = vadd.f32 %v7946_v31, %v7945_v23  ;;  %v7880_v25 = vadd.f32 %v7879_v49, %v7878_v15  ;;  %v7948_v37 = vpop.f32.mrb[66].mxu1 }
 0x3c0   : > { %v7949_v34 = vpop.f32.mrb[67].mxu1 }
 0x3c1   : > { %v10644_v62 = vadd.f32 %v7944_v17, %v7880_v25  ;;  %v7950_v1 = vadd.f32 %v7949_v34, %v7948_v37 }
 0x3c3   : > { %v7881_v54 = vpop.f32.mrb[80].mxu0 }
 0x3c4   : > { %v7882_v57 = vpop.f32.mrb[81].mxu0 }
 0x3c5   : > { %v7883_v21 = vadd.f32 %v7882_v57, %v7881_v54  ;;  %v7951_v52 = vpop.f32.mrb[68].mxu1  ;;  %v7884_v48 = vpop.f32.mrb[82].mxu0 }
 0x3c6   : > { %v7952_v60 = vpop.f32.mrb[69].mxu1  ;;  %v7885_v40 = vpop.f32.mrb[83].mxu0 }
 0x3c7   : > { %v10646_v24 = vadd.f32 %v7947_v56, %v7883_v21  ;;  %v7953_v22 = vadd.f32 %v7952_v60, %v7951_v52  ;;  %v7886_v46 = vadd.f32 %v7885_v40, %v7884_v48  ;;  %v7954_v32 = vpop.f32.mrb[70].mxu1 }
 0x3c8   : > { %v7955_v16 = vpop.f32.mrb[71].mxu1 }
 0x3c9   : > { %v10648_v38 = vadd.f32 %v7950_v1, %v7886_v46  ;;  %v7956_v10 = vadd.f32 %v7955_v16, %v7954_v32 }
 0x3cb   : > { %v7887_v13 = vpop.f32.mrb[84].mxu0 }
 0x3cc   : > { %v7888_v36 = vpop.f32.mrb[85].mxu0 }
 0x3cd   : > { %v7889_v53 = vadd.f32 %v7888_v36, %v7887_v13  ;;  %v8037_v9 = vpop.f32.mrb[72].mxu1  ;;  %v7890_v28 = vpop.f32.mrb[86].mxu0 }
 0x3ce   : > { %v8038_v42 = vpop.f32.mrb[73].mxu1  ;;  %v7891_v12 = vpop.f32.mrb[87].mxu0 }
 0x3cf   : > { %v10650_v11 = vadd.f32 %v7953_v22, %v7889_v53  ;;  %v8039_v6 = vadd.f32 %v8038_v42, %v8037_v9  ;;  %v7892_v3 = vadd.f32 %v7891_v12, %v7890_v28  ;;  %v8040_v2 = vpop.f32.mrb[74].mxu1 }
 0x3d0   : > { %v8041_v4 = vpop.f32.mrb[75].mxu1 }
 0x3d1   : > { %v10652_v27 = vadd.f32 %v7956_v10, %v7892_v3  ;;  %v8042_v61 = vadd.f32 %v8041_v4, %v8040_v2 }
 0x3d3   : > { %v7973_v39 = vpop.f32.mrb[88].mxu0 }
 0x3d4   : > { %v7974_v45 = vpop.f32.mrb[89].mxu0 }
 0x3d5   : > { %v7975_v43 = vadd.f32 %v7974_v45, %v7973_v39  ;;  %v8043_v44 = vpop.f32.mrb[76].mxu1  ;;  %v7976_v18 = vpop.f32.mrb[90].mxu0 }
 0x3d6   : > { %v8044_v19 = vpop.f32.mrb[77].mxu1  ;;  %v7977_v35 = vpop.f32.mrb[91].mxu0 }
 0x3d7   : > { %v8202_v30 = vadd.f32 %v10622_v33, %v7975_v43  ;;  %v8045_v0 = vadd.f32 %v8044_v19, %v8043_v44  ;;  %v7978_v14 = vadd.f32 %v7977_v35, %v7976_v18  ;;  %v8046_v29 = vpop.f32.mrb[78].mxu1 }
 0x3d8   : > { %v8047_v17 = vpop.f32.mrb[79].mxu1 }
 0x3d9   : > { %v8210_v63 = vadd.f32 %v10624_v59, %v7978_v14  ;;  %v8048_v7 = vadd.f32 %v8047_v17, %v8046_v29  ;;  %v10656_v8 = vadd.f32 %v8202_v30, %v8039_v6 }
 0x3db   : > { %v7979_v23 = vpop.f32.mrb[92].mxu0  ;;  %v10658_v15 = vadd.f32 %v8210_v63, %v8042_v61 }
 0x3dc   : > { %v7980_v31 = vpop.f32.mrb[93].mxu0 }
 0x3dd   : > { %v7981_v49 = vadd.f32 %v7980_v31, %v7979_v23  ;;  %v8049_v56 = vpop.f32.mrb[80].mxu1  ;;  %v7982_v25 = vpop.f32.mrb[94].mxu0 }
 0x3de   : > { %v8050_v37 = vpop.f32.mrb[81].mxu1  ;;  %v7983_v34 = vpop.f32.mrb[95].mxu0 }
 0x3df   : > { %v8198_v33 = vadd.f32 %v10626_v58, %v7981_v49  ;;  %v8051_v1 = vadd.f32 %v8050_v37, %v8049_v56  ;;  %v7984_v54 = vadd.f32 %v7983_v34, %v7982_v25  ;;  %v8052_v57 = vpop.f32.mrb[82].mxu1 }
 0x3e0   : > { %v8053_v21 = vpop.f32.mrb[83].mxu1 }
 0x3e1   : > { %v8206_v59 = vadd.f32 %v10628_v5, %v7984_v54  ;;  %v8054_v52 = vadd.f32 %v8053_v21, %v8052_v57  ;;  %v10662_v48 = vadd.f32 %v8198_v33, %v8045_v0 }
 0x3e3   : > { %v10664_v40 = vadd.f32 %v8206_v59, %v8048_v7 }
 0x3e5   : > { %v7985_v60 = vpop.f32.mrb[96].mxu0  ;;  %v8055_v32 = vpop.f32.mrb[84].mxu1 }
 0x3e6   : > { %v7986_v22 = vpop.f32.mrb[97].mxu0  ;;  %v8056_v10 = vpop.f32.mrb[85].mxu1 }
 0x3e7   : > { %v7987_v46 = vadd.f32 %v7986_v22, %v7985_v60  ;;  %v7988_v16 = vpop.f32.mrb[98].mxu0  ;;  %v8057_v36 = vadd.f32 %v8056_v10, %v8055_v32  ;;  %v8058_v9 = vpop.f32.mrb[86].mxu1 }
 0x3e8   : > { %v7989_v13 = vpop.f32.mrb[99].mxu0  ;;  %v8059_v28 = vpop.f32.mrb[87].mxu1 }
 0x3e9   : > { %v8218_v58 = vadd.f32 %v10630_v41, %v7987_v46  ;;  %v7990_v53 = vadd.f32 %v7989_v13, %v7988_v16  ;;  %v8060_v42 = vadd.f32 %v8059_v28, %v8058_v9 }
 0x3eb   : > { %v8226_v5 = vadd.f32 %v10632_v20, %v7990_v53  ;;  %v10668_v12 = vadd.f32 %v8218_v58, %v8051_v1 }
 0x3ed   : > { %v10670_v6 = vadd.f32 %v8226_v5, %v8054_v52  ;;  %v8061_v3 = vpop.f32.mrb[88].mxu1 }
 0x3ee   : > { %v8062_v4 = vpop.f32.mrb[89].mxu1 }
 0x3ef   : > { %v8063_v39 = vadd.f32 %v8062_v4, %v8061_v3  ;;  %v8064_v45 = vpop.f32.mrb[90].mxu1 }
 0x3f0   : > { %v7991_v2 = vpop.f32.mrb[100].mxu0  ;;  %v8065_v41 = vpop.f32.mrb[91].mxu1 }
 0x3f1   : > { %v7992_v61 = vpop.f32.mrb[101].mxu0  ;;  %v8066_v19 = vadd.f32 %v8065_v41, %v8064_v45 }
 0x3f2   : > { %v7993_v43 = vadd.f32 %v7992_v61, %v7991_v2  ;;  %v7994_v44 = vpop.f32.mrb[102].mxu0 }
 0x3f3   : > { %v7995_v18 = vpop.f32.mrb[103].mxu0 }
 0x3f4   : > { %v8214_v35 = vadd.f32 %v10634_v51, %v7993_v43  ;;  %v7996_v30 = vadd.f32 %v7995_v18, %v7994_v44 }
 0x3f6   : > { %v8222_v20 = vadd.f32 %v10636_v26, %v7996_v30  ;;  %v10674_v0 = vadd.f32 %v8214_v35, %v8057_v36 }
 0x3f8   : > { %v8067_v14 = vpop.f32.mrb[92].mxu1  ;;  %v10676_v29 = vadd.f32 %v8222_v20, %v8060_v42 }
 0x3f9   : > { %v8068_v17 = vpop.f32.mrb[93].mxu1 }
 0x3fa   : > { %v8069_v63 = vadd.f32 %v8068_v17, %v8067_v14  ;;  %v8070_v7 = vpop.f32.mrb[94].mxu1 }
 0x3fb   : > { %v7997_v23 = vpop.f32.mrb[104].mxu0  ;;  %v8071_v31 = vpop.f32.mrb[95].mxu1 }
 0x3fc   : > { %v7998_v49 = vpop.f32.mrb[105].mxu0  ;;  %v8072_v56 = vadd.f32 %v8071_v31, %v8070_v7 }
 0x3fd   : > { %v7999_v25 = vadd.f32 %v7998_v49, %v7997_v23  ;;  %v8000_v37 = vpop.f32.mrb[106].mxu0 }
 0x3fe   : > { %v8001_v34 = vpop.f32.mrb[107].mxu0 }
 0x3ff   : > { %v8234_v51 = vadd.f32 %v10638_v50, %v7999_v25  ;;  %v8002_v33 = vadd.f32 %v8001_v34, %v8000_v37 }
 0x401   : > { %v8242_v26 = vadd.f32 %v10640_v55, %v8002_v33  ;;  %v10680_v1 = vadd.f32 %v8234_v51, %v8063_v39 }
 0x403   : > { %v8073_v54 = vpop.f32.mrb[96].mxu1  ;;  %v10682_v57 = vadd.f32 %v8242_v26, %v8066_v19 }
 0x404   : > { %v8074_v21 = vpop.f32.mrb[97].mxu1 }
 0x405   : > { %v8075_v59 = vadd.f32 %v8074_v21, %v8073_v54  ;;  %v8076_v52 = vpop.f32.mrb[98].mxu1 }
 0x406   : > { %v8003_v60 = vpop.f32.mrb[108].mxu0  ;;  %v8077_v22 = vpop.f32.mrb[99].mxu1 }
 0x407   : > { %v8004_v46 = vpop.f32.mrb[109].mxu0  ;;  %v8078_v32 = vadd.f32 %v8077_v22, %v8076_v52 }
 0x408   : > { %v8005_v16 = vadd.f32 %v8004_v46, %v8003_v60  ;;  %v8006_v10 = vpop.f32.mrb[110].mxu0 }
 0x409   : > { %v8007_v13 = vpop.f32.mrb[111].mxu0 }
 0x40a   : > { %v8230_v50 = vadd.f32 %v10642_v47, %v8005_v16  ;;  %v8008_v58 = vadd.f32 %v8007_v13, %v8006_v10 }
 0x40c   : > { %v8238_v55 = vadd.f32 %v10644_v62, %v8008_v58  ;;  %v8231_v36 = vadd.f32 %v8230_v50, %v8069_v63 }
 0x40e   : > { %v8079_v53 = vpop.f32.mrb[100].mxu1  ;;  %v8239_v9 = vadd.f32 %v8238_v55, %v8072_v56 }
 0x40f   : > { %v8080_v28 = vpop.f32.mrb[101].mxu1 }
 0x410   : > { %v8081_v5 = vadd.f32 %v8080_v28, %v8079_v53  ;;  %v8082_v42 = vpop.f32.mrb[102].mxu1 }
 0x411   : > { %v8009_v3 = vpop.f32.mrb[112].mxu0  ;;  %v8083_v2 = vpop.f32.mrb[103].mxu1 }
 0x412   : > { %v8010_v4 = vpop.f32.mrb[113].mxu0  ;;  %v8084_v61 = vadd.f32 %v8083_v2, %v8082_v42 }
 0x413   : > { %v8011_v39 = vadd.f32 %v8010_v4, %v8009_v3  ;;  %v8012_v45 = vpop.f32.mrb[114].mxu0 }
 0x414   : > { %v8013_v43 = vpop.f32.mrb[115].mxu0 }
 0x415   : > { %v8250_v47 = vadd.f32 %v10646_v24, %v8011_v39  ;;  %v8014_v44 = vadd.f32 %v8013_v43, %v8012_v45 }
 0x417   : > { %v8258_v41 = vadd.f32 %v10648_v38, %v8014_v44  ;;  %v8167_v62 = vpop.f32.mrb[24].mxu1  ;;  %v8251_v18 = vadd.f32 %v8250_v47, %v8075_v59 }
 0x418   : > { %v8200_v19 = vadd.f32 %v10662_v48, %v8167_v62  ;;  %v6971_v35 = vpop.f32.mrb[25].mxu1 }
 0x419   : > { %v8204_v30 = vadd.f32 %v10656_v8, %v6971_v35  ;;  %v8168_v20 = vpop.f32.mrb[26].mxu1  ;;  %v8259_v14 = vadd.f32 %v8258_v41, %v8078_v32 }
 0x41a   : > { %7036 = vst [vmem:[%s10691_s21 + $0x10] sm:$0xff] %v8200_v19  ;;  %v8208_v24 = vadd.f32 %v10664_v40, %v8168_v20  ;;  %v6974_v17 = vpop.f32.mrb[27].mxu1 }
 0x41b   : > { %v8015_v38 = vpop.f32.mrb[116].mxu0  ;;  %7034 = vst [vmem:[%s10691_s21] sm:$0xff] %v8204_v30  ;;  %v8212_v63 = vadd.f32 %v10658_v15, %v6974_v17 }
 0x41c   : > { %v8016_v48 = vpop.f32.mrb[117].mxu0  ;;  %7037 = vst [vmem:[%s10691_s21 + $0x18] sm:$0xff] %v8208_v24 }
 0x41d   : > { %v8017_v8 = vadd.f32 %v8016_v48, %v8015_v38  ;;  %v8018_v7 = vpop.f32.mrb[118].mxu0  ;;  %7035 = vst [vmem:[%s10691_s21 + $0x8] sm:$0xff] %v8212_v63 }
 0x41e   : > { %v8019_v23 = vpop.f32.mrb[119].mxu0 }
 0x41f   : > { %v8246_v31 = vadd.f32 %v10650_v11, %v8017_v8  ;;  %v8020_v49 = vadd.f32 %v8019_v23, %v8018_v7  ;;  %v8171_v56 = vpop.f32.mrb[28].mxu1 }
 0x420   : > { %v8216_v40 = vadd.f32 %v10674_v0, %v8171_v56  ;;  %v6987_v25 = vpop.f32.mrb[29].mxu1 }
 0x421   : > { %v8254_v37 = vadd.f32 %v10652_v27, %v8020_v49  ;;  %v8220_v15 = vadd.f32 %v10668_v12, %v6987_v25  ;;  %v8172_v34 = vpop.f32.mrb[30].mxu1  ;;  %v8247_v51 = vadd.f32 %v8246_v31, %v8081_v5 }
 0x422   : > { %7040 = vst [vmem:[%s10691_s21 + $0x30] sm:$0xff] %v8216_v40  ;;  %v8224_v33 = vadd.f32 %v10676_v29, %v8172_v34  ;;  %v6990_v26 = vpop.f32.mrb[31].mxu1 }
 0x423   : > { %7038 = vst [vmem:[%s10691_s21 + $0x20] sm:$0xff] %v8220_v15  ;;  %v8228_v11 = vadd.f32 %v10670_v6, %v6990_v26  ;;  %v8255_v54 = vadd.f32 %v8254_v37, %v8084_v61 }
 0x424   : > { %7041 = vst [vmem:[%s10691_s21 + $0x38] sm:$0xff] %v8224_v33 }
 0x425   : > { %7039 = vst [vmem:[%s10691_s21 + $0x28] sm:$0xff] %v8228_v11 }
 0x427   : > { %v8175_v27 = vpop.f32.mrb[32].mxu1 }
 0x428   : > { %v8232_v12 = vadd.f32 %v8231_v36, %v8175_v27  ;;  %v7003_v0 = vpop.f32.mrb[33].mxu1 }
 0x429   : > { %v8236_v21 = vadd.f32 %v10680_v1, %v7003_v0  ;;  %v8176_v59 = vpop.f32.mrb[34].mxu1 }
 0x42a   : > { %7044 = vst [vmem:[%s10691_s21 + $0x50] sm:$0xff] %v8232_v12  ;;  %v8240_v29 = vadd.f32 %v8239_v9, %v8176_v59  ;;  %v7006_v52 = vpop.f32.mrb[35].mxu1 }
 0x42b   : > { %7042 = vst [vmem:[%s10691_s21 + $0x40] sm:$0xff] %v8236_v21  ;;  %v8244_v60 = vadd.f32 %v10682_v57, %v7006_v52 }
 0x42c   : > { %7045 = vst [vmem:[%s10691_s21 + $0x58] sm:$0xff] %v8240_v29 }
 0x42d   : > { %7043 = vst [vmem:[%s10691_s21 + $0x48] sm:$0xff] %v8244_v60 }
 0x42f   : > { %v8179_v6 = vpop.f32.mrb[36].mxu1 }
 0x430   : > { %v8248_v22 = vadd.f32 %v8247_v51, %v8179_v6  ;;  %v7019_v1 = vpop.f32.mrb[37].mxu1 }
 0x431   : > { %v8252_v46 = vadd.f32 %v8251_v18, %v7019_v1  ;;  %v8180_v32 = vpop.f32.mrb[38].mxu1 }
 0x432   : > { %7048 = vst [vmem:[%s10691_s21 + $0x70] sm:$0xff] %v8248_v22  ;;  %v8256_v16 = vadd.f32 %v8255_v54, %v8180_v32  ;;  %v7022_v10 = vpop.f32.mrb[39].mxu1 }
 0x433   : > { %7046 = vst [vmem:[%s10691_s21 + $0x60] sm:$0xff] %v8252_v46  ;;  %v8260_v57 = vadd.f32 %v8259_v14, %v7022_v10 }
 0x434   : > { %7049 = vst [vmem:[%s10691_s21 + $0x78] sm:$0xff] %v8256_v16 }
 0x435   : > { %7047 = vst [vmem:[%s10691_s21 + $0x68] sm:$0xff] %v8260_v57 }
 0x436   : > { %8678 = shalt.err (!%p8675_p4)
}
 0x437   : > { %s8679_s10 = scalar_lea.hbm %s10721_s20, 2048  ;;  %s8683_s18 = scalar_lea.hbm %s10778_s8, 4096 }
 0x438   : > { %p8680_p9 = scmp.ne.s32.totalorder %s10721_s20, %s8679_s10  ;;  %p8684_p8 = scmp.lt.u32.totalorder %s10721_s20, %s10778_s8 }
 0x439   : > { %p8685_p13 = scmp.lt.u32.totalorder %s8683_s18, %s8679_s10  ;;  %p8687_p10 = scmp.lt.u32.totalorder %s8679_s10, %s10721_s20 }
 0x43a   : > { %p8681_p0 = pnand %p8680_p9, %p8953_p5 }
 0x43b   : > { %p8686_p6 = por %p8685_p13, %p8684_p8 }
 0x43c   : > { %p8682_p11 = pneg %p8681_p0 }
 0x43d   : > { %p8688_p3 = por %p8687_p10, %p8686_p6 }
 0x43f   : > { %p8689_p7 = pnand %p8688_p3, %p8682_p11 }
 0x441   : > { %8692 = shalt.err (!%p8689_p7)
}
 0x442   : > { %s8752_s27 = smov 128   ;;  %s8753_s12 = smov 8  }
 0x443   : > { %8291 = dma.vmem_to_hbm [thread:$0]  (%p8953_p5), %s10723_s16, 2048, %s10721_s20, %s7051_s9, %s8752_s27, %s8752_s27, %s8753_s12  }
 0x444 PF: > { %s10814_s19 = sld [smem:[#allocation19_spill]]  ;;  %s10815_s11 = sld [smem:[#allocation20_spill]] }
 0x445   : > { %p10817_p1 = scmp.ge.s32.totalorder %s8739_s30, 2 }
 0x44a   : > { %s7080_s13 = sand.u32 1, %s10814_s19   ;;  %p10816_p12 = scmp.ne.s32.totalorder %s10815_s11, 0 }
 0x44b   : > { %s7081_s24 = scalar_lea.sflag [#allocation8], %s7080_s13 }
 0x44c   : > { %p8308_p2 = pnand %p10817_p1, %p10816_p12 }
 0x44e   : > { %8722 = dma.done.wait (!%p8308_p2), %s7081_s24, 2048  }
 0x44f   : > { %8724 = vsyncadd (!%p8308_p2), %s7081_s24, 4294965248  ;;  %p23_p4 = scmp.ge.s32.totalorder %s8939_s26, 4   ;;  %s10818_s27 = smov %s8731_s28 }
 0x450   : > { %s10819_s28 = smov %s8735_s29  ;;  %s10820_s29 = smov %s8949_s22 }
 0x451   : > { %s10821_s30 = smov %s8939_s26  ;;  %25 = sbr.rel (!%p23_p4) target bundleno = 7 (0x7), region = 122 }
 0x458   :  { %7086 = vsyncpa [#allocation7], 1 }
 0x459   :  { %7088 = vsyncpa [#allocation7 + $0x1], 1 }
 0x45a   :  { %7089 = vsyncpa [#allocation10], 1 }
 0x45b   :  { %7090 = vsyncpa [#allocation13], 1 }
 0x45c   :  { %7091 = vsyncpa [#allocation8], 1 }
 0x45d   :  { %7093 = vsyncpa [#allocation8 + $0x1], 1 }

</bundles_post_ra>
